<compile_context>
chip_gen: v5e
topology: v5e:2x2
jax: 0.10.0
libtpu: 0.0.40
codegen_flags: <defaults>
</compile_context>

<pallas_src>
import math

import numpy as np
import jax
import jax.numpy as jnp
from jax.experimental import pallas as pl
from jax.experimental.pallas import tpu as pltpu

# ----------------------------- model config (small) -----------------------------
IMG_SIZE = (32, 32)      # -> 2x2 feature map after the /16 conv patch embedding
VIT_EMB = 32
D_MODEL = 32
DIM_FF = 64
NHEAD = 2                # LeViT stages use nhead*2 = 4 heads, dim_key = dim_value = 64
NUM_DEC_LAYERS = 1
MAX_OUTPUT_LEN = 6       # module adds +2 internally for the positional encoder
NUM_CLASSES = 11
BATCH = 2
SY = 6

LANE = 128               # lane-dense padded feature width of every inter-kernel activation
NEG_INF = -1e30
EPS = 1e-5
LEAKY_SLOPE = 0.05       # slope used by the original module's bottleneck LeakyReLU


def _num_tensorcores():
    """2 only on chips with two TensorCores (v7x); v5e/v6e keep a single program."""
    try:
        kind = jax.devices()[0].device_kind.lower()
    except Exception:
        return 1
    return 2 if "v7" in kind else 1


_NUM_TC = _num_tensorcores()


# ----------------------------- in-kernel helpers ---------------------------------
def _layernorm(t, g, b, n_true, eps=EPS):
    # padded lanes of t are zero, so sums over all lanes == sums over the n_true real lanes
    mu = jnp.sum(t, axis=-1, keepdims=True) / n_true
    ex2 = jnp.sum(t * t, axis=-1, keepdims=True) / n_true
    var = jnp.maximum(ex2 - mu * mu, 0.0)
    return (t - mu) * jax.lax.rsqrt(var + eps) * g + b


def _batchnorm_rows(t, g, b, m_rows, eps=EPS):
    # training-mode BatchNorm2d: per-channel stats over the m_rows (batch * spatial) rows
    mu = jnp.sum(t, axis=0, keepdims=True) / m_rows
    ex2 = jnp.sum(t * t, axis=0, keepdims=True) / m_rows
    var = jnp.maximum(ex2 - mu * mu, 0.0)
    return (t - mu) * jax.lax.rsqrt(var + eps) * g + b


def _hardswish(t):
    return t * jnp.clip(t + 3.0, 0.0, 6.0) * (1.0 / 6.0)


def _merged_attention(q, k, v, bias, scale, *, batch, heads, nq, nk, dh, dv):
    """softmax(q k^T * scale + bias) v with all (batch, head) blocks stacked along sublanes.

    q:(batch*nq, heads*dh)  k:(batch*nk, heads*dh)  v:(batch*nk, heads*dv)
    bias:(batch*heads*nq, batch*heads*nk) additive, -1e30 outside each (b,h) block.
    Returns (batch*nq, heads*dv).  Two MXU pushes total instead of 2*batch*heads.
    """
    def stack(t, n, d):
        return jnp.concatenate(
            [t[b * n:(b + 1) * n, h * d:(h + 1) * d]
             for b in range(batch) for h in range(heads)], axis=0)

    qs = stack(q, nq, dh).astype(jnp.bfloat16)
    ks = stack(k, nk, dh).astype(jnp.bfloat16)
    vs = stack(v, nk, dv).astype(jnp.bfloat16)
    s = jax.lax.dot_general(qs, ks, (((1,), (1,)), ((), ())),
                            preferred_element_type=jnp.float32)
    s = s * scale + bias
    m = jnp.max(s, axis=-1, keepdims=True)
    p = jnp.exp(s - m)
    denom = jnp.sum(p, axis=-1, keepdims=True)
    p = p * pl.reciprocal(denom, approx=True)
    o = jnp.dot(p.astype(jnp.bfloat16), vs, preferred_element_type=jnp.float32)
    rows = []
    for b in range(batch):
        rows.append(jnp.concatenate(
            [o[(b * heads + h) * nq:(b * heads + h + 1) * nq, :]
             for h in range(heads)], axis=1))
    return jnp.concatenate(rows, axis=0)


# ----------------------------- fused matmul kernel -------------------------------
def fused_matmul(a, w, b, *, act=None, residual=None, ln=None, ln_n=None, eps=EPS):
    """out = LayerNorm(act(a @ w + b) + residual)   (each epilogue optional).

    `w` is a prepped bf16 (K, N) matrix with N a multiple of 128 (zero-padded columns);
    `b`, ln params are (1, N).  a is f32 (M, K); activations are cast to bf16 in-kernel,
    accumulation / epilogue math are f32.  LN uses the ln_n true features (padded lanes are 0).
    """
    M, K = a.shape
    K2, N = w.shape
    assert K == K2 and N % LANE == 0, (a.shape, w.shape)
    has_res = residual is not None
    has_ln = ln is not None

    # Generation-gated row split: only when two TensorCores exist (v7x) and the halves align.
    if _NUM_TC >= 2 and M >= 16 and M % 2 == 0 and (M // 2) % 8 == 0:
        tm = M // 2
    else:
        tm = M
    grid = (M // tm,)

    in_specs = [pl.BlockSpec((tm, K), lambda i: (i, 0)),
                pl.BlockSpec((K, N), lambda i: (0, 0)),
                pl.BlockSpec((1, N), lambda i: (0, 0))]
    args = [a, w, b]
    if has_res:
        in_specs.append(pl.BlockSpec((tm, N), lambda i: (i, 0)))
        args.append(residual)
    if has_ln:
        in_specs.append(pl.BlockSpec((1, N), lambda i: (0, 0)))
        in_specs.append(pl.BlockSpec((1, N), lambda i: (0, 0)))
        args.append(ln[0])
        args.append(ln[1])

    def kernel(a_ref, w_ref, b_ref, *rest):
        o_ref = rest[-1]
        idx = 0
        if has_res:
            r_ref = rest[idx]
            idx += 1
        if has_ln:
            g_ref, beta_ref = rest[idx], rest[idx + 1]
        acc = jnp.dot(a_ref[...].astype(jnp.bfloat16), w_ref[...],
                      preferred_element_type=jnp.float32)
        acc = acc + b_ref[...]
        if act == "leaky_relu":
            acc = jnp.where(acc >= 0.0, acc, LEAKY_SLOPE * acc)
        if has_res:
            acc = acc + r_ref[...]
        if has_ln:
            acc = _layernorm(acc, g_ref[...], beta_ref[...], ln_n, eps)
        o_ref[...] = acc

    return pl.pallas_call(
        kernel,
        out_shape=jax.ShapeDtypeStruct((M, N), jnp.float32),
        grid_spec=pltpu.PrefetchScalarGridSpec(
            num_scalar_prefetch=0, grid=grid,
            in_specs=in_specs,
            out_specs=pl.BlockSpec((tm, N), lambda i: (i, 0))),
        compiler_params=pltpu.CompilerParams(dimension_semantics=("parallel",)),
    )(*args)


# ----------------------------- LeViT layer kernel --------------------------------
def levit_layer(x, lp, cfg, B, fmap_h, fmap_w):
    """One whole LeViT layer (attention block + FF block) as a single pallas_call.

    x: (B*fmap_h*fmap_w, 128) f32 with true channels in lanes [0, 32).
    Returns ((B*hq*wq, 128), hq, wq).
    """
    heads = cfg["heads"]
    d_key = cfg["dim_key"]
    d_val = cfg["dim_value"]
    downsample = cfg["downsample"]
    attn_res = cfg["attn_residual"]
    ik = heads * d_key
    iv = heads * d_val
    M = B * fmap_h * fmap_w
    if downsample:
        hq, wq = -(-fmap_h // 2), -(-fmap_w // 2)
        q_rows = [b * fmap_h * fmap_w + i * 2 * fmap_w + j * 2
                  for b in range(B) for i in range(hq) for j in range(wq)]
    else:
        hq, wq = fmap_h, fmap_w
        q_rows = None
    Mq = B * hq * wq
    Nq = hq * wq
    Nk = fmap_h * fmap_w
    scale = d_key ** -0.5
    Cp = x.shape[1]

    def kernel(x_ref, wq_ref, gq_ref, bq_ref, wkv_ref, gkv_ref, bkv_ref, pb_ref,
               wo_ref, bo_ref, go_ref, bob_ref, w1_ref, g1_ref, b1_ref,
               w2_ref, b2_ref, o_ref):
        x_f = x_ref[...]
        if downsample:
            xq = jnp.concatenate([x_f[r:r + 1, :] for r in q_rows], axis=0)
        else:
            xq = x_f
        # q / kv 1x1 convs (no bias) + training-mode BatchNorm, fused
        q = _batchnorm_rows(
            jnp.dot(xq.astype(jnp.bfloat16), wq_ref[...],
                    preferred_element_type=jnp.float32),
            gq_ref[...], bq_ref[...], Mq)
        kv = _batchnorm_rows(
            jnp.dot(x_f.astype(jnp.bfloat16), wkv_ref[...],
                    preferred_element_type=jnp.float32),
            gkv_ref[...], bkv_ref[...], M)
        k = kv[:, :ik]
        v = kv[:, ik:]
        # merged-head attention with LeViT positional bias (dots*scale + pos/scale)
        att = _merged_attention(q, k, v, pb_ref[...], scale,
                                batch=B, heads=heads, nq=Nq, nk=Nk, dh=d_key, dv=d_val)
        att = _hardswish(att)
        out = jnp.dot(att.astype(jnp.bfloat16), wo_ref[...],
                      preferred_element_type=jnp.float32) + bo_ref[...]
        out = _batchnorm_rows(out, go_ref[...], bob_ref[...], Mq)
        if attn_res:
            out = out + x_f
        # feed-forward block: conv1 + BN + hardswish + conv2 + bias + residual
        h = _batchnorm_rows(
            jnp.dot(out.astype(jnp.bfloat16), w1_ref[...],
                    preferred_element_type=jnp.float32),
            g1_ref[...], b1_ref[...], Mq)
        h = _hardswish(h)
        y = jnp.dot(h.astype(jnp.bfloat16), w2_ref[...],
                    preferred_element_type=jnp.float32) + b2_ref[...]
        o_ref[...] = out + y

    out = pl.pallas_call(
        kernel,
        out_shape=jax.ShapeDtypeStruct((Mq, Cp), jnp.float32),
    )(x, lp["wq"], lp["gq"], lp["bq"], lp["wkv"], lp["gkv"], lp["bkv"], lp["pos_bias"],
      lp["wo"], lp["bo"], lp["go"], lp["bob"], lp["w1"], lp["g1"], lp["b1"],
      lp["w2"], lp["b2"])
    return out, hq, wq


# ----------------------------- decoder layer kernels ------------------------------
def decoder_layer(x, mem, dp, *, B, Sy, Sx, E, nhead, eps=EPS):
    """PyTorch nn.TransformerDecoderLayer (post-norm, gelu) in two pallas_calls.

    Call 1: self-attn (fused QKV) + out-proj + residual + LN1, cross-attn (fused KV) +
    out-proj + residual + LN2, and lin1.  Exact erf GELU in plain JAX.  Call 2 (fused_matmul):
    lin2 + residual + LN3.  x: (B*Sy, 128), mem: (B*Sx, 128); both padded-lane layouts.
    """
    dh = E // nhead
    scale = 1.0 / math.sqrt(dh)
    Ep = x.shape[1]
    FFp = dp["w_l1"].shape[1]

    def kernel(x_ref, m_ref, wqkv_ref, bqkv_ref, wso_ref, bso_ref, g1_ref, be1_ref,
               smask_ref, wcq_ref, bcq_ref, wckv_ref, bckv_ref, wco_ref, bco_ref,
               g2_ref, be2_ref, cmask_ref, wl1_ref, bl1_ref, x2_ref, h_ref):
        x_f = x_ref[...]
        # ---- self attention ----
        qkv = jnp.dot(x_f.astype(jnp.bfloat16), wqkv_ref[...],
                      preferred_element_type=jnp.float32) + bqkv_ref[...]
        q = qkv[:, :E]
        k = qkv[:, E:2 * E]
        v = qkv[:, 2 * E:3 * E]
        sa = _merged_attention(q, k, v, smask_ref[...], scale,
                               batch=B, heads=nhead, nq=Sy, nk=Sy, dh=dh, dv=dh)
        t = jnp.dot(sa.astype(jnp.bfloat16), wso_ref[...],
                    preferred_element_type=jnp.float32) + bso_ref[...] + x_f
        x1 = _layernorm(t, g1_ref[...], be1_ref[...], E, eps)
        # ---- cross attention ----
        m_f = m_ref[...]
        cq = jnp.dot(x1.astype(jnp.bfloat16), wcq_ref[...],
                     preferred_element_type=jnp.float32) + bcq_ref[...]
        ckv = jnp.dot(m_f.astype(jnp.bfloat16), wckv_ref[...],
                      preferred_element_type=jnp.float32) + bckv_ref[...]
        ck = ckv[:, :E]
        cv = ckv[:, E:]
        ca = _merged_attention(cq, ck, cv, cmask_ref[...], scale,
                               batch=B, heads=nhead, nq=Sy, nk=Sx, dh=dh, dv=dh)
        t = jnp.dot(ca.astype(jnp.bfloat16), wco_ref[...],
                    preferred_element_type=jnp.float32) + bco_ref[...] + x1
        x2 = _layernorm(t, g2_ref[...], be2_ref[...], E, eps)
        # ---- feed forward: lin1 ----
        h = jnp.dot(x2.astype(jnp.bfloat16), wl1_ref[...],
                    preferred_element_type=jnp.float32) + bl1_ref[...]
        x2_ref[...] = x2
        h_ref[...] = h

    x2, h = pl.pallas_call(
        kernel,
        out_shape=(jax.ShapeDtypeStruct((B * Sy, Ep), jnp.float32),
                   jax.ShapeDtypeStruct((B * Sy, FFp), jnp.float32)),
    )(x, mem, dp["w_qkv"], dp["b_qkv"], dp["w_so"], dp["b_so"], dp["n1_g"], dp["n1_b"],
      dp["self_mask"], dp["w_cq"], dp["b_cq"], dp["w_ckv"], dp["b_ckv"],
      dp["w_co"], dp["b_co"], dp["n2_g"], dp["n2_b"], dp["cross_mask"],
      dp["w_l1"], dp["b_l1"])

    # TODO(synk): exact (erf) GELU kept in plain JAX (not fused in-kernel).
    g = jax.nn.gelu(h, approximate=False)
    return fused_matmul(g, dp["w_l2"], dp["b_l2"], residual=x2,
                        ln=(dp["n3_g"], dp["n3_b"]), ln_n=E)


# ----------------------------- plain-JAX glue (NHWC) ------------------------------
def im2col_3x3_s2(x, extra=None):
    """3x3 stride-2 pad-1 im2col in NHWC; returns lane-ordered (kh, kw, c) patches."""
    B, H, W, C = x.shape
    k, s, p = 3, 2, 1
    xp = jnp.pad(x, ((0, 0), (p, p), (p, p), (0, 0)))
    Ho = (H + 2 * p - k) // s + 1
    Wo = (W + 2 * p - k) // s + 1
    cols = [xp[:, kh:kh + s * Ho:s, kw:kw + s * Wo:s, :]
            for kh in range(k) for kw in range(k)]
    if extra is not None:
        cols.append(extra)
    patches = jnp.concatenate(cols, axis=-1)
    return patches.reshape(B * Ho * Wo, patches.shape[-1]), Ho, Wo


def conv_stem(pp, x):
    """Conv patch embedding (/16) + 1x1 stride-16 residual conv, all outputs 128-lane padded."""
    B = x.shape[0]
    p1, h, w = im2col_3x3_s2(x)
    y = fused_matmul(p1, pp["c1_w"], pp["c1_b"]).reshape(B, h, w, LANE)
    p2, h, w = im2col_3x3_s2(y)
    y = fused_matmul(p2, pp["c2_w"], pp["c2_b"]).reshape(B, h, w, LANE)
    p3, h, w = im2col_3x3_s2(y)
    y = fused_matmul(p3, pp["c3_w"], pp["c3_b"]).reshape(B, h, w, LANE)
    res = x[:, ::16, ::16, :]                 # residual 1x1 stride-16 conv input
    p4, h, w = im2col_3x3_s2(y, extra=res)    # conv4 and residual conv fused along K
    y = fused_matmul(p4, pp["c4_w"], pp["c4_b"])
    return y, h, w


def encode(prep, cfg, x_img):
    if x_img.shape[1] == 1:
        x_img = jnp.tile(x_img, (1, 3, 1, 1))
    x = jnp.transpose(x_img, (0, 2, 3, 1))            # NCHW -> NHWC, once
    B = x.shape[0]
    y, fh, fw = conv_stem(prep["patch"], x)            # (B*fh*fw, 128)
    for lp, lcfg in zip(prep["backbone"], cfg["backbone_cfg"]):
        y, fh, fw = levit_layer(y, lp, lcfg, B, fh, fw)
    # pooling 'b c h w -> b (h w) c' is free in the flattened NHWC layout;
    # bottleneck Linear + LeakyReLU + LayerNorm fused in one kernel
    mem = fused_matmul(y, prep["bottleneck_w"], prep["bottleneck_b"],
                       act="leaky_relu", ln=(prep["norm_g"], prep["norm_b"]), ln_n=D_MODEL)
    return mem, fh * fw                                # (B*Sx, 128), Sx


def decode(prep, cfg, y_tokens, mem, Sx):
    B, Sy = y_tokens.shape
    x = prep["target_embedding"][y_tokens]            # already scaled by sqrt(d_model)
    x = x + prep["pe"][None, :Sy, :]                   # PositionalEncoding1D (dropout=identity)
    x = x.reshape(B * Sy, -1)
    for dp in prep["dec_layers"]:
        x = decoder_layer(x, mem, dp, B=B, Sy=Sy, Sx=Sx, E=D_MODEL, nhead=cfg["nhead"])
    logits = fused_matmul(x, prep["fc_w"], prep["fc_b"])[:, :NUM_CLASSES]
    return logits.reshape(B, Sy, NUM_CLASSES)


def vit_transformer_forward(prep, cfg, x_img, y_tokens):
    mem, Sx = encode(prep, cfg, x_img)
    logits = decode(prep, cfg, y_tokens, mem, Sx)      # (B, Sy, num_classes)
    return jnp.transpose(logits, (0, 2, 1))            # (B, num_classes, Sy)


# ----------------------------- deterministic init --------------------------------
class KeyGen:
    def __init__(self, seed=1):
        self._key = jax.random.PRNGKey(seed)

    def __call__(self):
        self._key, sub = jax.random.split(self._key)
        return sub


def compute_pos_indices(fmap_h, fmap_w, downsample):
    step = 2 if downsample else 1
    qh = np.arange(0, fmap_h, step)
    qw = np.arange(0, fmap_w, step)
    kh = np.arange(fmap_h)
    kw = np.arange(fmap_w)
    q_pos = np.stack(np.meshgrid(qh, qw, indexing="ij"), axis=-1).reshape(-1, 2)
    k_pos = np.stack(np.meshgrid(kh, kw, indexing="ij"), axis=-1).reshape(-1, 2)
    rel = np.abs(q_pos[:, None, :] - k_pos[None, :, :])
    return jnp.asarray(rel[..., 0] * fmap_w + rel[..., 1], dtype=jnp.int32)


def make_pe(d_model, max_len):
    pe = np.zeros((max_len, d_model), np.float32)
    position = np.arange(0, max_len, dtype=np.float32)[:, None]
    div_term = np.exp(np.arange(0, d_model, 2).astype(np.float32)
                      * (-math.log(10000.0) / d_model))
    pe[:, 0::2] = np.sin(position * div_term)
    pe[:, 1::2] = np.cos(position * div_term)
    return jnp.asarray(pe[:, None, :])                 # (max_len, 1, d_model)


def init_model(img_size, vit_emb, d_model, dim_feedforward, nhead,
               num_decoder_layers, max_output_len, num_classes):
    kg = KeyGen(1)

    def rnd(shape, scale=0.05):
        return scale * jax.random.normal(kg(), shape, jnp.float32)

    def ones(shape):
        return jnp.ones(shape, jnp.float32)

    def zeros(shape):
        return jnp.zeros(shape, jnp.float32)

    dim_key, dim_value = 64, 64
    heads = nhead * 2
    stages = 2
    dims = (vit_emb,) * stages

    def init_attn(dim, dim_out, fmap_h, fmap_w, downsample):
        ik, iv = dim_key * heads, dim_value * heads
        return {
            "q_w": rnd((ik, dim, 1, 1)), "q_bn_g": ones((ik,)), "q_bn_b": zeros((ik,)),
            "k_w": rnd((ik, dim, 1, 1)), "k_bn_g": ones((ik,)), "k_bn_b": zeros((ik,)),
            "v_w": rnd((iv, dim, 1, 1)), "v_bn_g": ones((iv,)), "v_bn_b": zeros((iv,)),
            "out_w": rnd((dim_out, iv, 1, 1)), "out_b": zeros((dim_out,)),
            "out_bn_g": ones((dim_out,)), "out_bn_b": zeros((dim_out,)),
            "pos_emb": rnd((fmap_h * fmap_w, heads)),
            "pos_indices": compute_pos_indices(fmap_h, fmap_w, downsample),
        }

    def init_ff(dim, mult):
        hid = dim * mult
        return {"w1": rnd((hid, dim, 1, 1)), "bn_g": ones((hid,)), "bn_b": zeros((hid,)),
                "w2": rnd((dim, hid, 1, 1)), "b2": zeros((dim,))}

    def init_block(dim, dim_out, fmap_h, fmap_w, mlp_mult, downsample):
        p = {"layers": [{"attn": init_attn(dim, dim_out, fmap_h, fmap_w, downsample),
                         "ff": init_ff(dim_out, mlp_mult)}]}
        c = {"heads": heads, "dim_key": dim_key, "dim_value": dim_value,
             "downsample": downsample,
             "attn_residual": (not downsample) and dim == dim_out}
        return p, c

    fmap_h, fmap_w = img_size[0] // 16, img_size[1] // 16
    backbone_p, backbone_cfg = [], []
    for ind in range(stages):
        is_last = ind == stages - 1
        p, c = init_block(dims[ind], dims[ind], fmap_h, fmap_w, 4, False)
        backbone_p.append(p)
        backbone_cfg.append(c)
        if not is_last:
            p, c = init_block(dims[ind], dims[ind + 1], fmap_h, fmap_w, 2, True)
            backbone_p.append(p)
            backbone_cfg.append(c)
            fmap_h, fmap_w = math.ceil(fmap_h / 2), math.ceil(fmap_w / 2)

    def init_dec_layer():
        return {
            "self_attn": {"in_w": rnd((3 * d_model, d_model)), "in_b": zeros((3 * d_model,)),
                          "out_w": rnd((d_model, d_model)), "out_b": zeros((d_model,))},
            "cross_attn": {"in_w": rnd((3 * d_model, d_model)), "in_b": zeros((3 * d_model,)),
                           "out_w": rnd((d_model, d_model)), "out_b": zeros((d_model,))},
            "lin1_w": rnd((dim_feedforward, d_model)), "lin1_b": zeros((dim_feedforward,)),
            "lin2_w": rnd((d_model, dim_feedforward)), "lin2_b": zeros((d_model,)),
            "n1_g": ones((d_model,)), "n1_b": zeros((d_model,)),
            "n2_g": ones((d_model,)), "n2_b": zeros((d_model,)),
            "n3_g": ones((d_model,)), "n3_b": zeros((d_model,)),
        }

    params = {
        "patch": {"c1_w": rnd((32, 3, 3, 3)), "c1_b": zeros((32,)),
                  "c2_w": rnd((64, 32, 3, 3)), "c2_b": zeros((64,)),
                  "c3_w": rnd((128, 64, 3, 3)), "c3_b": zeros((128,)),
                  "c4_w": rnd((dims[0], 128, 3, 3)), "c4_b": zeros((dims[0],)),
                  "res_w": rnd((dims[0], 3, 1, 1)), "res_b": zeros((dims[0],))},
        "backbone": backbone_p,
        "bottleneck_w": rnd((d_model, vit_emb)), "bottleneck_b": zeros((d_model,)),
        "norm_g": ones((d_model,)), "norm_b": zeros((d_model,)),
        "target_embedding": rnd((num_classes, d_model), scale=0.1),
        "pe": make_pe(d_model, max_output_len + 2),
        "dec_layers": [init_dec_layer() for _ in range(num_decoder_layers)],
        "fc_w": rnd((num_classes, d_model), scale=0.1), "fc_b": zeros((num_classes,)),
    }
    cfgs = {"backbone": backbone_cfg, "nhead": nhead}
    return params, cfgs


# ----------------------------- weight / mask prep (outside jit) -------------------
def _pad_cols(a, n):
    a = np.asarray(a, np.float32)
    if a.shape[-1] < n:
        a = np.pad(a, [(0, 0)] * (a.ndim - 1) + [(0, n - a.shape[-1])])
    return a


def _pad_rows(a, n):
    a = np.asarray(a, np.float32)
    if a.shape[0] < n:
        a = np.pad(a, [(0, n - a.shape[0])] + [(0, 0)] * (a.ndim - 1))
    return a


def _w(a):
    return jnp.asarray(a, jnp.bfloat16)      # MXU matmul operand


def _v(a):
    return jnp.asarray(np.asarray(a, np.float32).reshape(1, -1), jnp.float32)


def _conv3x3_mat(w, cin_pad):
    w_np = np.asarray(w, np.float32)                   # (Cout, Cin, 3, 3)
    cin = w_np.shape[1]
    w_np = np.transpose(w_np, (2, 3, 1, 0))            # (kh, kw, Cin, Cout)
    if cin_pad > cin:
        w_np = np.pad(w_np, ((0, 0), (0, 0), (0, cin_pad - cin), (0, 0)))
    return w_np.reshape(-1, w_np.shape[-1])            # (kh*kw*cin_pad, Cout)


def _merged_attn_mask(batch, heads, nq, nk, causal):
    r = np.arange(batch * heads * nq)[:, None]
    c = np.arange(batch * heads * nk)[None, :]
    ok = (r // nq) == (c // nk)
    if causal:
        ok = ok & ((c % nk) <= (r % nq))
    return jnp.asarray(np.where(ok, 0.0, NEG_INF).astype(np.float32))


def _merged_pos_bias(pos_emb, pos_indices, heads, scale, batch):
    pe = np.asarray(pos_emb, np.float32)               # (L, heads)
    idx = np.asarray(pos_indices)                      # (Nq, Nk)
    pb = np.transpose(pe[idx], (2, 0, 1)) / scale      # (heads, Nq, Nk); matches dots*scale+pos/scale
    nq, nk = idx.shape
    full = np.full((batch * heads * nq, batch * heads * nk), NEG_INF, np.float32)
    for b in range(batch):
        for h in range(heads):
            r0 = (b * heads + h) * nq
            c0 = (b * heads + h) * nk
            full[r0:r0 + nq, c0:c0 + nk] = pb[h]
    return jnp.asarray(full)


def prepare_params(params, cfgs, batch, sy, img_size):
    """Pre-transpose / zero-pad / fuse all weights into kernel-ready bf16 operands."""
    d_model = params["bottleneck_w"].shape[0]
    nhead = cfgs["nhead"]
    E = d_model

    # ---- conv patch embedding ----
    pt = params["patch"]
    c4_mat = _conv3x3_mat(pt["c4_w"], LANE)                                   # (1152, 32)
    res_mat = np.asarray(pt["res_w"], np.float32).reshape(pt["res_w"].shape[0], -1).T  # (3, 32)
    patch = {
        "c1_w": _w(_pad_cols(_conv3x3_mat(pt["c1_w"], pt["c1_w"].shape[1]), LANE)),
        "c1_b": _v(_pad_cols(pt["c1_b"], LANE)),
        "c2_w": _w(_pad_cols(_conv3x3_mat(pt["c2_w"], LANE), LANE)),
        "c2_b": _v(_pad_cols(pt["c2_b"], LANE)),
        "c3_w": _w(_pad_cols(_conv3x3_mat(pt["c3_w"], LANE), LANE)),
        "c3_b": _v(_pad_cols(pt["c3_b"], LANE)),
        "c4_w": _w(_pad_cols(np.concatenate([c4_mat, res_mat], axis=0), LANE)),
        "c4_b": _v(_pad_cols(np.asarray(pt["c4_b"]) + np.asarray(pt["res_b"]), LANE)),
    }

    # ---- LeViT backbone ----
    backbone, backbone_cfg = [], []
    for blk_p, blk_cfg in zip(params["backbone"], cfgs["backbone"]):
        heads = blk_cfg["heads"]
        d_key, d_val = blk_cfg["dim_key"], blk_cfg["dim_value"]
        ik, iv = heads * d_key, heads * d_val
        scale = d_key ** -0.5
        for layer in blk_p["layers"]:
            ap, fp = layer["attn"], layer["ff"]
            wq = np.asarray(ap["q_w"], np.float32).reshape(ik, -1).T          # (dim, ik)
            wk = np.asarray(ap["k_w"], np.float32).reshape(ik, -1).T
            wv = np.asarray(ap["v_w"], np.float32).reshape(iv, -1).T
            wo = np.asarray(ap["out_w"], np.float32).reshape(-1, iv).T        # (iv, dim_out)
            w1 = np.asarray(fp["w1"], np.float32).reshape(fp["w1"].shape[0], -1).T  # (dim, hid)
            w2 = np.asarray(fp["w2"], np.float32).reshape(fp["w2"].shape[0], -1).T  # (hid, dim)
            backbone.append({
                "wq": _w(_pad_rows(wq, LANE)),
                "gq": _v(ap["q_bn_g"]), "bq": _v(ap["q_bn_b"]),
                "wkv": _w(_pad_rows(np.concatenate([wk, wv], axis=1), LANE)),
                "gkv": _v(np.concatenate([np.asarray(ap["k_bn_g"]),
                                          np.asarray(ap["v_bn_g"])])),
                "bkv": _v(np.concatenate([np.asarray(ap["k_bn_b"]),
                                          np.asarray(ap["v_bn_b"])])),
                "pos_bias": _merged_pos_bias(ap["pos_emb"], ap["pos_indices"],
                                             heads, scale, batch),
                "wo": _w(_pad_cols(wo, LANE)),
                "bo": _v(_pad_cols(ap["out_b"], LANE)),
                "go": _v(_pad_cols(ap["out_bn_g"], LANE)),
                "bob": _v(_pad_cols(ap["out_bn_b"], LANE)),
                "w1": _w(_pad_rows(w1, LANE)),
                "g1": _v(fp["bn_g"]), "b1": _v(fp["bn_b"]),
                "w2": _w(_pad_cols(w2, LANE)),
                "b2": _v(_pad_cols(fp["b2"], LANE)),
            })
            backbone_cfg.append(blk_cfg)

    # memory sequence length after the backbone's downsampling
    fh, fw = img_size[0] // 16, img_size[1] // 16
    for c in cfgs["backbone"]:
        if c["downsample"]:
            fh, fw = math.ceil(fh / 2), math.ceil(fw / 2)
    sx = fh * fw

    # ---- decoder ----
    dec_layers = []
    for dl in params["dec_layers"]:
        sw = np.asarray(dl["self_attn"]["in_w"], np.float32)
        sb = np.asarray(dl["self_attn"]["in_b"], np.float32)
        cw = np.asarray(dl["cross_attn"]["in_w"], np.float32)
        cb = np.asarray(dl["cross_attn"]["in_b"], np.float32)
        dec_layers.append({
            "w_qkv": _w(_pad_rows(sw.T, LANE)),
            "b_qkv": _v(sb),
            "w_so": _w(_pad_cols(np.asarray(dl["self_attn"]["out_w"], np.float32).T, LANE)),
            "b_so": _v(_pad_cols(dl["self_attn"]["out_b"], LANE)),
            "n1_g": _v(_pad_cols(dl["n1_g"], LANE)), "n1_b": _v(_pad_cols(dl["n1_b"], LANE)),
            "self_mask": _merged_attn_mask(batch, nhead, sy, sy, causal=True),
            "w_cq": _w(_pad_rows(cw[:E].T, LANE)),
            "b_cq": _v(cb[:E]),
            "w_ckv": _w(_pad_rows(cw[E:].T, LANE)),
            "b_ckv": _v(cb[E:]),
            "w_co": _w(_pad_cols(np.asarray(dl["cross_attn"]["out_w"], np.float32).T, LANE)),
            "b_co": _v(_pad_cols(dl["cross_attn"]["out_b"], LANE)),
            "n2_g": _v(_pad_cols(dl["n2_g"], LANE)), "n2_b": _v(_pad_cols(dl["n2_b"], LANE)),
            "cross_mask": _merged_attn_mask(batch, nhead, sy, sx, causal=False),
            "w_l1": _w(_pad_cols(_pad_rows(np.asarray(dl["lin1_w"], np.float32).T, LANE), LANE)),
            "b_l1": _v(_pad_cols(dl["lin1_b"], LANE)),
            "w_l2": _w(_pad_cols(_pad_rows(np.asarray(dl["lin2_w"], np.float32).T, LANE), LANE)),
            "b_l2": _v(_pad_cols(dl["lin2_b"], LANE)),
            "n3_g": _v(_pad_cols(dl["n3_g"], LANE)), "n3_b": _v(_pad_cols(dl["n3_b"], LANE)),
        })

    emb = np.asarray(params["target_embedding"], np.float32) * math.sqrt(d_model)
    pe = np.asarray(params["pe"], np.float32)[:, 0, :]
    prep = {
        "patch": patch,
        "backbone": backbone,
        "bottleneck_w": _w(_pad_cols(_pad_rows(np.asarray(params["bottleneck_w"],
                                                          np.float32).T, LANE), LANE)),
        "bottleneck_b": _v(_pad_cols(params["bottleneck_b"], LANE)),
        "norm_g": _v(_pad_cols(params["norm_g"], LANE)),
        "norm_b": _v(_pad_cols(params["norm_b"], LANE)),
        "target_embedding": jnp.asarray(_pad_cols(emb, LANE), jnp.float32),
        "pe": jnp.asarray(_pad_cols(pe, LANE), jnp.float32),
        "dec_layers": dec_layers,
        "fc_w": _w(_pad_cols(_pad_rows(np.asarray(params["fc_w"], np.float32).T, LANE), LANE)),
        "fc_b": _v(_pad_cols(params["fc_b"], LANE)),
    }
    run_cfg = {"backbone_cfg": backbone_cfg, "nhead": nhead}
    return prep, run_cfg


# ----------------------------- main ----------------------------------------------
if __name__ == "__main__":
    params, cfgs = init_model(IMG_SIZE, VIT_EMB, D_MODEL, DIM_FF, NHEAD,
                              NUM_DEC_LAYERS, MAX_OUTPUT_LEN, NUM_CLASSES)
    prep, run_cfg = prepare_params(params, cfgs, BATCH, SY, IMG_SIZE)

    key = jax.random.PRNGKey(0)
    kx, ky = jax.random.split(key)
    x = jax.random.normal(kx, (BATCH, 3) + IMG_SIZE, jnp.float32)
    y = jax.random.randint(ky, (BATCH, SY), 0, NUM_CLASSES, dtype=jnp.int32)

    fwd = jax.jit(lambda p, xi, yi: vit_transformer_forward(p, run_cfg, xi, yi))
    out = jax.block_until_ready(fwd(prep, x, y))

    assert out.shape == (BATCH, NUM_CLASSES, SY), out.shape
    assert bool(jnp.all(jnp.isfinite(out)))
    print("KERNEL_OK")
</pallas_src>

<mosaic_0001>
module attributes {stable_mosaic.version = 11 : i64} {
  func.func @kernel(%arg0: i32, %arg1: memref<512x27xf32, #tpu.memory_space<vmem>>, %arg2: memref<27x128xbf16, #tpu.memory_space<vmem>>, %arg3: memref<1x128xf32, #tpu.memory_space<vmem>>, %arg4: memref<512x128xf32, #tpu.memory_space<vmem>>) attributes {dimension_semantics = [#tpu.dimension_semantics<parallel>], iteration_bounds = array<i64: 1>, scalar_prefetch = 0 : i64, scratch_operands = 0 : i64, tpu.core_type = #tpu.core_type<tc>, window_params = [{transform_indices = @transform_0, window_bounds = array<i64: 512, 27>}, {pipeline_mode = #tpu.pipeline_mode<synchronous>, transform_indices = @transform_1, window_bounds = array<i64: 27, 128>}, {pipeline_mode = #tpu.pipeline_mode<synchronous>, transform_indices = @transform_2, window_bounds = array<i64: 1, 128>}, {transform_indices = @transform_3, window_bounds = array<i64: 512, 128>}]} {
    %c0 = arith.constant 0 : index
    %c0_0 = arith.constant 0 : index
    %0 = vector.load %arg1[%c0, %c0_0] : memref<512x27xf32, #tpu.memory_space<vmem>>, vector<512x27xf32>
    %1 = arith.truncf %0 : vector<512x27xf32> to vector<512x27xbf16>
    %c0_1 = arith.constant 0 : index
    %c0_2 = arith.constant 0 : index
    %2 = vector.load %arg2[%c0_1, %c0_2] : memref<27x128xbf16, #tpu.memory_space<vmem>>, vector<27x128xbf16>
    %cst = arith.constant dense<0.000000e+00> : vector<512x128xf32>
    %3 = tpu.matmul %1, %2, %cst {dimension_numbers = #tpu.dot_dimension_numbers<[1], [0], [0], [1], [0, 0, 1, 1], [], []>} : vector<512x27xbf16>, vector<27x128xbf16>, vector<512x128xf32> -> vector<512x128xf32>
    %c0_3 = arith.constant 0 : index
    %c0_4 = arith.constant 0 : index
    %4 = vector.load %arg3[%c0_3, %c0_4] : memref<1x128xf32, #tpu.memory_space<vmem>>, vector<1x128xf32>
    %5 = vector.broadcast %4 : vector<1x128xf32> to vector<512x128xf32>
    %6 = arith.addf %3, %5 : vector<512x128xf32>
    %c0_5 = arith.constant 0 : index
    %c0_6 = arith.constant 0 : index
    %7 = vector.load %arg4[%c0_5, %c0_6] : memref<512x128xf32, #tpu.memory_space<vmem>>, vector<512x128xf32>
    tpu.vector_store %arg4[%c0_5, %c0_6], %6 {strides = array<i32>} : memref<512x128xf32, #tpu.memory_space<vmem>>, vector<512x128xf32>,
    return
  }
  func.func @transform_0(%arg0: i32) -> (i32, i32) {
    %c0_i32 = arith.constant 0 : i32
    %c0_i32_0 = arith.constant 0 : i32
    return %arg0, %c0_i32 : i32, i32
  }
  func.func @transform_1(%arg0: i32) -> (i32, i32) {
    %c0_i32 = arith.constant 0 : i32
    %c0_i32_0 = arith.constant 0 : i32
    %c0_i32_1 = arith.constant 0 : i32
    return %c0_i32, %c0_i32_0 : i32, i32
  }
  func.func @transform_2(%arg0: i32) -> (i32, i32) {
    %c0_i32 = arith.constant 0 : i32
    %c0_i32_0 = arith.constant 0 : i32
    %c0_i32_1 = arith.constant 0 : i32
    return %c0_i32, %c0_i32_0 : i32, i32
  }
  func.func @transform_3(%arg0: i32) -> (i32, i32) {
    %c0_i32 = arith.constant 0 : i32
    %c0_i32_0 = arith.constant 0 : i32
    return %arg0, %c0_i32 : i32, i32
  }
}

module attributes {stable_mosaic.version = 11 : i64} {
  func.func @kernel(%arg0: i32, %arg1: memref<128x1152xf32, #tpu.memory_space<vmem>>, %arg2: memref<1152x128xbf16, #tpu.memory_space<vmem>>, %arg3: memref<1x128xf32, #tpu.memory_space<vmem>>, %arg4: memref<128x128xf32, #tpu.memory_space<vmem>>) attributes {dimension_semantics = [#tpu.dimension_semantics<parallel>], iteration_bounds = array<i64: 1>, scalar_prefetch = 0 : i64, scratch_operands = 0 : i64, tpu.core_type = #tpu.core_type<tc>, window_params = [{transform_indices = @transform_0, window_bounds = array<i64: 128, 1152>}, {pipeline_mode = #tpu.pipeline_mode<synchronous>, transform_indices = @transform_1, window_bounds = array<i64: 1152, 128>}, {pipeline_mode = #tpu.pipeline_mode<synchronous>, transform_indices = @transform_2, window_bounds = array<i64: 1, 128>}, {transform_indices = @transform_3, window_bounds = array<i64: 128, 128>}]} {
    %c0 = arith.constant 0 : index
    %c0_0 = arith.constant 0 : index
    %0 = vector.load %arg1[%c0, %c0_0] : memref<128x1152xf32, #tpu.memory_space<vmem>>, vector<128x1152xf32>
    %1 = arith.truncf %0 : vector<128x1152xf32> to vector<128x1152xbf16>
    %c0_1 = arith.constant 0 : index
    %c0_2 = arith.constant 0 : index
    %2 = vector.load %arg2[%c0_1, %c0_2] : memref<1152x128xbf16, #tpu.memory_space<vmem>>, vector<1152x128xbf16>
    %cst = arith.constant dense<0.000000e+00> : vector<128x128xf32>
    %3 = tpu.matmul %1, %2, %cst {dimension_numbers = #tpu.dot_dimension_numbers<[1], [0], [0], [1], [0, 0, 1, 1], [], []>} : vector<128x1152xbf16>, vector<1152x128xbf16>, vector<128x128xf32> -> vector<128x128xf32>
    %c0_3 = arith.constant 0 : index
    %c0_4 = arith.constant 0 : index
    %4 = vector.load %arg3[%c0_3, %c0_4] : memref<1x128xf32, #tpu.memory_space<vmem>>, vector<1x128xf32>
    %5 = vector.broadcast %4 : vector<1x128xf32> to vector<128x128xf32>
    %6 = arith.addf %3, %5 : vector<128x128xf32>
    %c0_5 = arith.constant 0 : index
    %c0_6 = arith.constant 0 : index
    %7 = vector.load %arg4[%c0_5, %c0_6] : memref<128x128xf32, #tpu.memory_space<vmem>>, vector<128x128xf32>
    tpu.vector_store %arg4[%c0_5, %c0_6], %6 {strides = array<i32>} : memref<128x128xf32, #tpu.memory_space<vmem>>, vector<128x128xf32>,
    return
  }
  func.func @transform_0(%arg0: i32) -> (i32, i32) {
    %c0_i32 = arith.constant 0 : i32
    %c0_i32_0 = arith.constant 0 : i32
    return %arg0, %c0_i32 : i32, i32
  }
  func.func @transform_1(%arg0: i32) -> (i32, i32) {
    %c0_i32 = arith.constant 0 : i32
    %c0_i32_0 = arith.constant 0 : i32
    %c0_i32_1 = arith.constant 0 : i32
    return %c0_i32, %c0_i32_0 : i32, i32
  }
  func.func @transform_2(%arg0: i32) -> (i32, i32) {
    %c0_i32 = arith.constant 0 : i32
    %c0_i32_0 = arith.constant 0 : i32
    %c0_i32_1 = arith.constant 0 : i32
    return %c0_i32, %c0_i32_0 : i32, i32
  }
  func.func @transform_3(%arg0: i32) -> (i32, i32) {
    %c0_i32 = arith.constant 0 : i32
    %c0_i32_0 = arith.constant 0 : i32
    return %arg0, %c0_i32 : i32, i32
  }
}

module attributes {stable_mosaic.version = 11 : i64} {
  func.func @kernel(%arg0: i32, %arg1: memref<32x1152xf32, #tpu.memory_space<vmem>>, %arg2: memref<1152x128xbf16, #tpu.memory_space<vmem>>, %arg3: memref<1x128xf32, #tpu.memory_space<vmem>>, %arg4: memref<32x128xf32, #tpu.memory_space<vmem>>) attributes {dimension_semantics = [#tpu.dimension_semantics<parallel>], iteration_bounds = array<i64: 1>, scalar_prefetch = 0 : i64, scratch_operands = 0 : i64, tpu.core_type = #tpu.core_type<tc>, window_params = [{transform_indices = @transform_0, window_bounds = array<i64: 32, 1152>}, {pipeline_mode = #tpu.pipeline_mode<synchronous>, transform_indices = @transform_1, window_bounds = array<i64: 1152, 128>}, {pipeline_mode = #tpu.pipeline_mode<synchronous>, transform_indices = @transform_2, window_bounds = array<i64: 1, 128>}, {transform_indices = @transform_3, window_bounds = array<i64: 32, 128>}]} {
    %c0 = arith.constant 0 : index
    %c0_0 = arith.constant 0 : index
    %0 = vector.load %arg1[%c0, %c0_0] : memref<32x1152xf32, #tpu.memory_space<vmem>>, vector<32x1152xf32>
    %1 = arith.truncf %0 : vector<32x1152xf32> to vector<32x1152xbf16>
    %c0_1 = arith.constant 0 : index
    %c0_2 = arith.constant 0 : index
    %2 = vector.load %arg2[%c0_1, %c0_2] : memref<1152x128xbf16, #tpu.memory_space<vmem>>, vector<1152x128xbf16>
    %cst = arith.constant dense<0.000000e+00> : vector<32x128xf32>
    %3 = tpu.matmul %1, %2, %cst {dimension_numbers = #tpu.dot_dimension_numbers<[1], [0], [0], [1], [0, 0, 1, 1], [], []>} : vector<32x1152xbf16>, vector<1152x128xbf16>, vector<32x128xf32> -> vector<32x128xf32>
    %c0_3 = arith.constant 0 : index
    %c0_4 = arith.constant 0 : index
    %4 = vector.load %arg3[%c0_3, %c0_4] : memref<1x128xf32, #tpu.memory_space<vmem>>, vector<1x128xf32>
    %5 = vector.broadcast %4 : vector<1x128xf32> to vector<32x128xf32>
    %6 = arith.addf %3, %5 : vector<32x128xf32>
    %c0_5 = arith.constant 0 : index
    %c0_6 = arith.constant 0 : index
    %7 = vector.load %arg4[%c0_5, %c0_6] : memref<32x128xf32, #tpu.memory_space<vmem>>, vector<32x128xf32>
    tpu.vector_store %arg4[%c0_5, %c0_6], %6 {strides = array<i32>} : memref<32x128xf32, #tpu.memory_space<vmem>>, vector<32x128xf32>,
    return
  }
  func.func @transform_0(%arg0: i32) -> (i32, i32) {
    %c0_i32 = arith.constant 0 : i32
    %c0_i32_0 = arith.constant 0 : i32
    return %arg0, %c0_i32 : i32, i32
  }
  func.func @transform_1(%arg0: i32) -> (i32, i32) {
    %c0_i32 = arith.constant 0 : i32
    %c0_i32_0 = arith.constant 0 : i32
    %c0_i32_1 = arith.constant 0 : i32
    return %c0_i32, %c0_i32_0 : i32, i32
  }
  func.func @transform_2(%arg0: i32) -> (i32, i32) {
    %c0_i32 = arith.constant 0 : i32
    %c0_i32_0 = arith.constant 0 : i32
    %c0_i32_1 = arith.constant 0 : i32
    return %c0_i32, %c0_i32_0 : i32, i32
  }
  func.func @transform_3(%arg0: i32) -> (i32, i32) {
    %c0_i32 = arith.constant 0 : i32
    %c0_i32_0 = arith.constant 0 : i32
    return %arg0, %c0_i32 : i32, i32
  }
}

module attributes {stable_mosaic.version = 11 : i64} {
  func.func @kernel(%arg0: i32, %arg1: memref<8x1155xf32, #tpu.memory_space<vmem>>, %arg2: memref<1155x128xbf16, #tpu.memory_space<vmem>>, %arg3: memref<1x128xf32, #tpu.memory_space<vmem>>, %arg4: memref<8x128xf32, #tpu.memory_space<vmem>>) attributes {dimension_semantics = [#tpu.dimension_semantics<parallel>], iteration_bounds = array<i64: 1>, scalar_prefetch = 0 : i64, scratch_operands = 0 : i64, tpu.core_type = #tpu.core_type<tc>, window_params = [{transform_indices = @transform_0, window_bounds = array<i64: 8, 1155>}, {pipeline_mode = #tpu.pipeline_mode<synchronous>, transform_indices = @transform_1, window_bounds = array<i64: 1155, 128>}, {pipeline_mode = #tpu.pipeline_mode<synchronous>, transform_indices = @transform_2, window_bounds = array<i64: 1, 128>}, {transform_indices = @transform_3, window_bounds = array<i64: 8, 128>}]} {
    %c0 = arith.constant 0 : index
    %c0_0 = arith.constant 0 : index
    %0 = vector.load %arg1[%c0, %c0_0] : memref<8x1155xf32, #tpu.memory_space<vmem>>, vector<8x1155xf32>
    %1 = arith.truncf %0 : vector<8x1155xf32> to vector<8x1155xbf16>
    %c0_1 = arith.constant 0 : index
    %c0_2 = arith.constant 0 : index
    %2 = vector.load %arg2[%c0_1, %c0_2] : memref<1155x128xbf16, #tpu.memory_space<vmem>>, vector<1155x128xbf16>
    %cst = arith.constant dense<0.000000e+00> : vector<8x128xf32>
    %3 = tpu.matmul %1, %2, %cst {dimension_numbers = #tpu.dot_dimension_numbers<[1], [0], [0], [1], [0, 0, 1, 1], [], []>} : vector<8x1155xbf16>, vector<1155x128xbf16>, vector<8x128xf32> -> vector<8x128xf32>
    %c0_3 = arith.constant 0 : index
    %c0_4 = arith.constant 0 : index
    %4 = vector.load %arg3[%c0_3, %c0_4] : memref<1x128xf32, #tpu.memory_space<vmem>>, vector<1x128xf32>
    %5 = vector.broadcast %4 : vector<1x128xf32> to vector<8x128xf32>
    %6 = arith.addf %3, %5 : vector<8x128xf32>
    %c0_5 = arith.constant 0 : index
    %c0_6 = arith.constant 0 : index
    %7 = vector.load %arg4[%c0_5, %c0_6] : memref<8x128xf32, #tpu.memory_space<vmem>>, vector<8x128xf32>
    tpu.vector_store %arg4[%c0_5, %c0_6], %6 {strides = array<i32>} : memref<8x128xf32, #tpu.memory_space<vmem>>, vector<8x128xf32>,
    return
  }
  func.func @transform_0(%arg0: i32) -> (i32, i32) {
    %c0_i32 = arith.constant 0 : i32
    %c0_i32_0 = arith.constant 0 : i32
    return %arg0, %c0_i32 : i32, i32
  }
  func.func @transform_1(%arg0: i32) -> (i32, i32) {
    %c0_i32 = arith.constant 0 : i32
    %c0_i32_0 = arith.constant 0 : i32
    %c0_i32_1 = arith.constant 0 : i32
    return %c0_i32, %c0_i32_0 : i32, i32
  }
  func.func @transform_2(%arg0: i32) -> (i32, i32) {
    %c0_i32 = arith.constant 0 : i32
    %c0_i32_0 = arith.constant 0 : i32
    %c0_i32_1 = arith.constant 0 : i32
    return %c0_i32, %c0_i32_0 : i32, i32
  }
  func.func @transform_3(%arg0: i32) -> (i32, i32) {
    %c0_i32 = arith.constant 0 : i32
    %c0_i32_0 = arith.constant 0 : i32
    return %arg0, %c0_i32 : i32, i32
  }
}

module attributes {stable_mosaic.version = 11 : i64} {
  func.func @kernel(%arg0: memref<2x128xf32, #tpu.memory_space<vmem>>, %arg1: memref<128x256xbf16, #tpu.memory_space<vmem>>, %arg2: memref<1x256xf32, #tpu.memory_space<vmem>>, %arg3: memref<1x256xf32, #tpu.memory_space<vmem>>, %arg4: memref<128x512xbf16, #tpu.memory_space<vmem>>, %arg5: memref<1x512xf32, #tpu.memory_space<vmem>>, %arg6: memref<1x512xf32, #tpu.memory_space<vmem>>, %arg7: memref<8x8xf32, #tpu.memory_space<vmem>>, %arg8: memref<256x128xbf16, #tpu.memory_space<vmem>>, %arg9: memref<1x128xf32, #tpu.memory_space<vmem>>, %arg10: memref<1x128xf32, #tpu.memory_space<vmem>>, %arg11: memref<1x128xf32, #tpu.memory_space<vmem>>, %arg12: memref<128x128xbf16, #tpu.memory_space<vmem>>, %arg13: memref<1x128xf32, #tpu.memory_space<vmem>>, %arg14: memref<1x128xf32, #tpu.memory_space<vmem>>, %arg15: memref<128x128xbf16, #tpu.memory_space<vmem>>, %arg16: memref<1x128xf32, #tpu.memory_space<vmem>>, %arg17: memref<2x128xf32, #tpu.memory_space<vmem>>) attributes {dimension_semantics = [], scalar_prefetch = 0 : i64, scratch_operands = 0 : i64, tpu.core_type = #tpu.core_type<tc>} {
    %c0 = arith.constant 0 : index
    %c0_0 = arith.constant 0 : index
    %0 = vector.load %arg0[%c0, %c0_0] : memref<2x128xf32, #tpu.memory_space<vmem>>, vector<2x128xf32>
    %1 = arith.truncf %0 : vector<2x128xf32> to vector<2x128xbf16>
    %c0_1 = arith.constant 0 : index
    %c0_2 = arith.constant 0 : index
    %2 = vector.load %arg1[%c0_1, %c0_2] : memref<128x256xbf16, #tpu.memory_space<vmem>>, vector<128x256xbf16>
    %cst = arith.constant dense<0.000000e+00> : vector<2x256xf32>
    %3 = tpu.matmul %1, %2, %cst {dimension_numbers = #tpu.dot_dimension_numbers<[1], [0], [0], [1], [0, 0, 1, 1], [], []>} : vector<2x128xbf16>, vector<128x256xbf16>, vector<2x256xf32> -> vector<2x256xf32>
    %c0_3 = arith.constant 0 : index
    %c0_4 = arith.constant 0 : index
    %4 = vector.load %arg2[%c0_3, %c0_4] : memref<1x256xf32, #tpu.memory_space<vmem>>, vector<1x256xf32>
    %c0_5 = arith.constant 0 : index
    %c0_6 = arith.constant 0 : index
    %5 = vector.load %arg3[%c0_5, %c0_6] : memref<1x256xf32, #tpu.memory_space<vmem>>, vector<1x256xf32>
    %cst_7 = arith.constant dense<0.000000e+00> : vector<256xf32>
    %6 = vector.multi_reduction <add>, %3, %cst_7 [0] : vector<2x256xf32> to vector<256xf32>
    %7 = vector.shape_cast %6 : vector<256xf32> to vector<1x256xf32>
    %cst_8 = arith.constant 2.000000e+00 : f32
    %8 = vector.broadcast %cst_8 : f32 to vector<1x256xf32>
    %9 = arith.divf %7, %8 : vector<1x256xf32>
    %10 = arith.mulf %3, %3 : vector<2x256xf32>
    %cst_9 = arith.constant dense<0.000000e+00> : vector<256xf32>
    %11 = vector.multi_reduction <add>, %10, %cst_9 [0] : vector<2x256xf32> to vector<256xf32>
    %12 = vector.shape_cast %11 : vector<256xf32> to vector<1x256xf32>
    %cst_10 = arith.constant 2.000000e+00 : f32
    %13 = vector.broadcast %cst_10 : f32 to vector<1x256xf32>
    %14 = arith.divf %12, %13 : vector<1x256xf32>
    %15 = arith.mulf %9, %9 : vector<1x256xf32>
    %16 = arith.subf %14, %15 : vector<1x256xf32>
    %cst_11 = arith.constant 0.000000e+00 : f32
    %17 = vector.broadcast %cst_11 : f32 to vector<1x256xf32>
    %18 = arith.maximumf %16, %17 : vector<1x256xf32>
    %19 = vector.broadcast %9 : vector<1x256xf32> to vector<2x256xf32>
    %20 = arith.subf %3, %19 : vector<2x256xf32>
    %cst_12 = arith.constant 9.99999974E-6 : f32
    %21 = vector.broadcast %cst_12 : f32 to vector<1x256xf32>
    %22 = arith.addf %18, %21 : vector<1x256xf32>
    %23 = math.rsqrt %22 : vector<1x256xf32>
    %24 = vector.broadcast %23 : vector<1x256xf32> to vector<2x256xf32>
    %25 = arith.mulf %20, %24 : vector<2x256xf32>
    %26 = vector.broadcast %4 : vector<1x256xf32> to vector<2x256xf32>
    %27 = arith.mulf %25, %26 : vector<2x256xf32>
    %28 = vector.broadcast %5 : vector<1x256xf32> to vector<2x256xf32>
    %29 = arith.addf %27, %28 : vector<2x256xf32>
    %30 = arith.truncf %0 : vector<2x128xf32> to vector<2x128xbf16>
    %c0_13 = arith.constant 0 : index
    %c0_14 = arith.constant 0 : index
    %31 = vector.load %arg4[%c0_13, %c0_14] : memref<128x512xbf16, #tpu.memory_space<vmem>>, vector<128x512xbf16>
    %cst_15 = arith.constant dense<0.000000e+00> : vector<2x512xf32>
    %32 = tpu.matmul %30, %31, %cst_15 {dimension_numbers = #tpu.dot_dimension_numbers<[1], [0], [0], [1], [0, 0, 1, 1], [], []>} : vector<2x128xbf16>, vector<128x512xbf16>, vector<2x512xf32> -> vector<2x512xf32>
    %c0_16 = arith.constant 0 : index
    %c0_17 = arith.constant 0 : index
    %33 = vector.load %arg5[%c0_16, %c0_17] : memref<1x512xf32, #tpu.memory_space<vmem>>, vector<1x512xf32>
    %c0_18 = arith.constant 0 : index
    %c0_19 = arith.constant 0 : index
    %34 = vector.load %arg6[%c0_18, %c0_19] : memref<1x512xf32, #tpu.memory_space<vmem>>, vector<1x512xf32>
    %cst_20 = arith.constant dense<0.000000e+00> : vector<512xf32>
    %35 = vector.multi_reduction <add>, %32, %cst_20 [0] : vector<2x512xf32> to vector<512xf32>
    %36 = vector.shape_cast %35 : vector<512xf32> to vector<1x512xf32>
    %cst_21 = arith.constant 2.000000e+00 : f32
    %37 = vector.broadcast %cst_21 : f32 to vector<1x512xf32>
    %38 = arith.divf %36, %37 : vector<1x512xf32>
    %39 = arith.mulf %32, %32 : vector<2x512xf32>
    %cst_22 = arith.constant dense<0.000000e+00> : vector<512xf32>
    %40 = vector.multi_reduction <add>, %39, %cst_22 [0] : vector<2x512xf32> to vector<512xf32>
    %41 = vector.shape_cast %40 : vector<512xf32> to vector<1x512xf32>
    %cst_23 = arith.constant 2.000000e+00 : f32
    %42 = vector.broadcast %cst_23 : f32 to vector<1x512xf32>
    %43 = arith.divf %41, %42 : vector<1x512xf32>
    %44 = arith.mulf %38, %38 : vector<1x512xf32>
    %45 = arith.subf %43, %44 : vector<1x512xf32>
    %cst_24 = arith.constant 0.000000e+00 : f32
    %46 = vector.broadcast %cst_24 : f32 to vector<1x512xf32>
    %47 = arith.maximumf %45, %46 : vector<1x512xf32>
    %48 = vector.broadcast %38 : vector<1x512xf32> to vector<2x512xf32>
    %49 = arith.subf %32, %48 : vector<2x512xf32>
    %cst_25 = arith.constant 9.99999974E-6 : f32
    %50 = vector.broadcast %cst_25 : f32 to vector<1x512xf32>
    %51 = arith.addf %47, %50 : vector<1x512xf32>
    %52 = math.rsqrt %51 : vector<1x512xf32>
    %53 = vector.broadcast %52 : vector<1x512xf32> to vector<2x512xf32>
    %54 = arith.mulf %49, %53 : vector<2x512xf32>
    %55 = vector.broadcast %33 : vector<1x512xf32> to vector<2x512xf32>
    %56 = arith.mulf %54, %55 : vector<2x512xf32>
    %57 = vector.broadcast %34 : vector<1x512xf32> to vector<2x512xf32>
    %58 = arith.addf %56, %57 : vector<2x512xf32>
    %59 = vector.extract_strided_slice %58 {offsets = [0, 0], sizes = [2, 256], strides = [1, 1]} : vector<2x512xf32> to vector<2x256xf32>
    %60 = vector.extract_strided_slice %58 {offsets = [0, 256], sizes = [2, 256], strides = [1, 1]} : vector<2x512xf32> to vector<2x256xf32>
    %c0_26 = arith.constant 0 : index
    %c0_27 = arith.constant 0 : index
    %61 = vector.load %arg7[%c0_26, %c0_27] : memref<8x8xf32, #tpu.memory_space<vmem>>, vector<8x8xf32>
    %62 = vector.extract_strided_slice %29 {offsets = [0, 0], sizes = [1, 64], strides = [1, 1]} : vector<2x256xf32> to vector<1x64xf32>
    %63 = vector.extract_strided_slice %29 {offsets = [0, 64], sizes = [1, 64], strides = [1, 1]} : vector<2x256xf32> to vector<1x64xf32>
    %64 = vector.extract_strided_slice %29 {offsets = [0, 128], sizes = [1, 64], strides = [1, 1]} : vector<2x256xf32> to vector<1x64xf32>
    %65 = vector.extract_strided_slice %29 {offsets = [0, 192], sizes = [1, 64], strides = [1, 1]} : vector<2x256xf32> to vector<1x64xf32>
    %66 = vector.extract_strided_slice %29 {offsets = [1, 0], sizes = [1, 64], strides = [1, 1]} : vector<2x256xf32> to vector<1x64xf32>
    %67 = vector.extract_strided_slice %29 {offsets = [1, 64], sizes = [1, 64], strides = [1, 1]} : vector<2x256xf32> to vector<1x64xf32>
    %68 = vector.extract_strided_slice %29 {offsets = [1, 128], sizes = [1, 64], strides = [1, 1]} : vector<2x256xf32> to vector<1x64xf32>
    %69 = vector.extract_strided_slice %29 {offsets = [1, 192], sizes = [1, 64], strides = [1, 1]} : vector<2x256xf32> to vector<1x64xf32>
    %70 = tpu.concatenate %62, %63, %64, %65, %66, %67, %68, %69 in 0 : vector<1x64xf32>, vector<1x64xf32>, vector<1x64xf32>, vector<1x64xf32>, vector<1x64xf32>, vector<1x64xf32>, vector<1x64xf32>, vector<1x64xf32> -> vector<8x64xf32>
    %71 = arith.truncf %70 : vector<8x64xf32> to vector<8x64xbf16>
    %72 = vector.extract_strided_slice %59 {offsets = [0, 0], sizes = [1, 64], strides = [1, 1]} : vector<2x256xf32> to vector<1x64xf32>
    %73 = vector.extract_strided_slice %59 {offsets = [0, 64], sizes = [1, 64], strides = [1, 1]} : vector<2x256xf32> to vector<1x64xf32>
    %74 = vector.extract_strided_slice %59 {offsets = [0, 128], sizes = [1, 64], strides = [1, 1]} : vector<2x256xf32> to vector<1x64xf32>
    %75 = vector.extract_strided_slice %59 {offsets = [0, 192], sizes = [1, 64], strides = [1, 1]} : vector<2x256xf32> to vector<1x64xf32>
    %76 = vector.extract_strided_slice %59 {offsets = [1, 0], sizes = [1, 64], strides = [1, 1]} : vector<2x256xf32> to vector<1x64xf32>
    %77 = vector.extract_strided_slice %59 {offsets = [1, 64], sizes = [1, 64], strides = [1, 1]} : vector<2x256xf32> to vector<1x64xf32>
    %78 = vector.extract_strided_slice %59 {offsets = [1, 128], sizes = [1, 64], strides = [1, 1]} : vector<2x256xf32> to vector<1x64xf32>
    %79 = vector.extract_strided_slice %59 {offsets = [1, 192], sizes = [1, 64], strides = [1, 1]} : vector<2x256xf32> to vector<1x64xf32>
    %80 = tpu.concatenate %72, %73, %74, %75, %76, %77, %78, %79 in 0 : vector<1x64xf32>, vector<1x64xf32>, vector<1x64xf32>, vector<1x64xf32>, vector<1x64xf32>, vector<1x64xf32>, vector<1x64xf32>, vector<1x64xf32> -> vector<8x64xf32>
    %81 = arith.truncf %80 : vector<8x64xf32> to vector<8x64xbf16>
    %82 = vector.extract_strided_slice %60 {offsets = [0, 0], sizes = [1, 64], strides = [1, 1]} : vector<2x256xf32> to vector<1x64xf32>
    %83 = vector.extract_strided_slice %60 {offsets = [0, 64], sizes = [1, 64], strides = [1, 1]} : vector<2x256xf32> to vector<1x64xf32>
    %84 = vector.extract_strided_slice %60 {offsets = [0, 128], sizes = [1, 64], strides = [1, 1]} : vector<2x256xf32> to vector<1x64xf32>
    %85 = vector.extract_strided_slice %60 {offsets = [0, 192], sizes = [1, 64], strides = [1, 1]} : vector<2x256xf32> to vector<1x64xf32>
    %86 = vector.extract_strided_slice %60 {offsets = [1, 0], sizes = [1, 64], strides = [1, 1]} : vector<2x256xf32> to vector<1x64xf32>
    %87 = vector.extract_strided_slice %60 {offsets = [1, 64], sizes = [1, 64], strides = [1, 1]} : vector<2x256xf32> to vector<1x64xf32>
    %88 = vector.extract_strided_slice %60 {offsets = [1, 128], sizes = [1, 64], strides = [1, 1]} : vector<2x256xf32> to vector<1x64xf32>
    %89 = vector.extract_strided_slice %60 {offsets = [1, 192], sizes = [1, 64], strides = [1, 1]} : vector<2x256xf32> to vector<1x64xf32>
    %90 = tpu.concatenate %82, %83, %84, %85, %86, %87, %88, %89 in 0 : vector<1x64xf32>, vector<1x64xf32>, vector<1x64xf32>, vector<1x64xf32>, vector<1x64xf32>, vector<1x64xf32>, vector<1x64xf32>, vector<1x64xf32> -> vector<8x64xf32>
    %91 = arith.truncf %90 : vector<8x64xf32> to vector<8x64xbf16>
    %cst_28 = arith.constant dense<0.000000e+00> : vector<8x8xf32>
    %92 = tpu.matmul %71, %81, %cst_28 {dimension_numbers = #tpu.dot_dimension_numbers<[1], [1], [0], [0], [0, 0, 1, 0], [], []>} : vector<8x64xbf16>, vector<8x64xbf16>, vector<8x8xf32> -> vector<8x8xf32>
    %cst_29 = arith.constant 1.250000e-01 : f32
    %93 = vector.broadcast %cst_29 : f32 to vector<8x8xf32>
    %94 = arith.mulf %92, %93 : vector<8x8xf32>
    %95 = arith.addf %94, %61 : vector<8x8xf32>
    %cst_30 = arith.constant dense<0xFF800000> : vector<8xf32>
    %96 = vector.multi_reduction <maximumf>, %95, %cst_30 [1] : vector<8x8xf32> to vector<8xf32>
    %97 = vector.shape_cast %96 : vector<8xf32> to vector<8x1xf32>
    %98 = vector.broadcast %97 : vector<8x1xf32> to vector<8x8xf32>
    %99 = arith.subf %95, %98 : vector<8x8xf32>
    %100 = math.exp %99 : vector<8x8xf32>
    %cst_31 = arith.constant dense<0.000000e+00> : vector<8xf32>
    %101 = vector.multi_reduction <add>, %100, %cst_31 [1] : vector<8x8xf32> to vector<8xf32>
    %102 = vector.shape_cast %101 : vector<8xf32> to vector<8x1xf32>
    %103 = tpu.reciprocal %102 {approx = true} : vector<8x1xf32> -> vector<8x1xf32>
    %104 = vector.broadcast %103 : vector<8x1xf32> to vector<8x8xf32>
    %105 = arith.mulf %100, %104 : vector<8x8xf32>
    %106 = arith.truncf %105 : vector<8x8xf32> to vector<8x8xbf16>
    %cst_32 = arith.constant dense<0.000000e+00> : vector<8x64xf32>
    %107 = tpu.matmul %106, %91, %cst_32 {dimension_numbers = #tpu.dot_dimension_numbers<[1], [0], [0], [1], [0, 0, 1, 1], [], []>} : vector<8x8xbf16>, vector<8x64xbf16>, vector<8x64xf32> -> vector<8x64xf32>
    %108 = vector.extract_strided_slice %107 {offsets = [0, 0], sizes = [1, 64], strides = [1, 1]} : vector<8x64xf32> to vector<1x64xf32>
    %109 = vector.extract_strided_slice %107 {offsets = [1, 0], sizes = [1, 64], strides = [1, 1]} : vector<8x64xf32> to vector<1x64xf32>
    %110 = vector.extract_strided_slice %107 {offsets = [2, 0], sizes = [1, 64], strides = [1, 1]} : vector<8x64xf32> to vector<1x64xf32>
    %111 = vector.extract_strided_slice %107 {offsets = [3, 0], sizes = [1, 64], strides = [1, 1]} : vector<8x64xf32> to vector<1x64xf32>
    %112 = tpu.concatenate %108, %109, %110, %111 in 1 : vector<1x64xf32>, vector<1x64xf32>, vector<1x64xf32>, vector<1x64xf32> -> vector<1x256xf32>
    %113 = vector.extract_strided_slice %107 {offsets = [4, 0], sizes = [1, 64], strides = [1, 1]} : vector<8x64xf32> to vector<1x64xf32>
    %114 = vector.extract_strided_slice %107 {offsets = [5, 0], sizes = [1, 64], strides = [1, 1]} : vector<8x64xf32> to vector<1x64xf32>
    %115 = vector.extract_strided_slice %107 {offsets = [6, 0], sizes = [1, 64], strides = [1, 1]} : vector<8x64xf32> to vector<1x64xf32>
    %116 = vector.extract_strided_slice %107 {offsets = [7, 0], sizes = [1, 64], strides = [1, 1]} : vector<8x64xf32> to vector<1x64xf32>
    %117 = tpu.concatenate %113, %114, %115, %116 in 1 : vector<1x64xf32>, vector<1x64xf32>, vector<1x64xf32>, vector<1x64xf32> -> vector<1x256xf32>
    %118 = tpu.concatenate %112, %117 in 0 : vector<1x256xf32>, vector<1x256xf32> -> vector<2x256xf32>
    %cst_33 = arith.constant 3.000000e+00 : f32
    %119 = vector.broadcast %cst_33 : f32 to vector<2x256xf32>
    %120 = arith.addf %118, %119 : vector<2x256xf32>
    %cst_34 = arith.constant 0.000000e+00 : f32
    %cst_35 = arith.constant 6.000000e+00 : f32
    %121 = vector.broadcast %cst_34 : f32 to vector<2x256xf32>
    %122 = arith.maximumf %121, %120 : vector<2x256xf32>
    %123 = vector.broadcast %cst_35 : f32 to vector<2x256xf32>
    %124 = arith.minimumf %123, %122 : vector<2x256xf32>
    %125 = arith.mulf %118, %124 : vector<2x256xf32>
    %cst_36 = arith.constant 0.166666672 : f32
    %126 = vector.broadcast %cst_36 : f32 to vector<2x256xf32>
    %127 = arith.mulf %125, %126 : vector<2x256xf32>
    %128 = arith.truncf %127 : vector<2x256xf32> to vector<2x256xbf16>
    %c0_37 = arith.constant 0 : index
    %c0_38 = arith.constant 0 : index
    %129 = vector.load %arg8[%c0_37, %c0_38] : memref<256x128xbf16, #tpu.memory_space<vmem>>, vector<256x128xbf16>
    %cst_39 = arith.constant dense<0.000000e+00> : vector<2x128xf32>
    %130 = tpu.matmul %128, %129, %cst_39 {dimension_numbers = #tpu.dot_dimension_numbers<[1], [0], [0], [1], [0, 0, 1, 1], [], []>} : vector<2x256xbf16>, vector<256x128xbf16>, vector<2x128xf32> -> vector<2x128xf32>
    %c0_40 = arith.constant 0 : index
    %c0_41 = arith.constant 0 : index
    %131 = vector.load %arg9[%c0_40, %c0_41] : memref<1x128xf32, #tpu.memory_space<vmem>>, vector<1x128xf32>
    %132 = vector.broadcast %131 : vector<1x128xf32> to vector<2x128xf32>
    %133 = arith.addf %130, %132 : vector<2x128xf32>
    %c0_42 = arith.constant 0 : index
    %c0_43 = arith.constant 0 : index
    %134 = vector.load %arg10[%c0_42, %c0_43] : memref<1x128xf32, #tpu.memory_space<vmem>>, vector<1x128xf32>
    %c0_44 = arith.constant 0 : index
    %c0_45 = arith.constant 0 : index
    %135 = vector.load %arg11[%c0_44, %c0_45] : memref<1x128xf32, #tpu.memory_space<vmem>>, vector<1x128xf32>
    %cst_46 = arith.constant dense<0.000000e+00> : vector<128xf32>
    %136 = vector.multi_reduction <add>, %133, %cst_46 [0] : vector<2x128xf32> to vector<128xf32>
    %137 = vector.shape_cast %136 : vector<128xf32> to vector<1x128xf32>
    %cst_47 = arith.constant 2.000000e+00 : f32
    %138 = vector.broadcast %cst_47 : f32 to vector<1x128xf32>
    %139 = arith.divf %137, %138 : vector<1x128xf32>
    %140 = arith.mulf %133, %133 : vector<2x128xf32>
    %cst_48 = arith.constant dense<0.000000e+00> : vector<128xf32>
    %141 = vector.multi_reduction <add>, %140, %cst_48 [0] : vector<2x128xf32> to vector<128xf32>
    %142 = vector.shape_cast %141 : vector<128xf32> to vector<1x128xf32>
    %cst_49 = arith.constant 2.000000e+00 : f32
    %143 = vector.broadcast %cst_49 : f32 to vector<1x128xf32>
    %144 = arith.divf %142, %143 : vector<1x128xf32>
    %145 = arith.mulf %139, %139 : vector<1x128xf32>
    %146 = arith.subf %144, %145 : vector<1x128xf32>
    %cst_50 = arith.constant 0.000000e+00 : f32
    %147 = vector.broadcast %cst_50 : f32 to vector<1x128xf32>
    %148 = arith.maximumf %146, %147 : vector<1x128xf32>
    %149 = vector.broadcast %139 : vector<1x128xf32> to vector<2x128xf32>
    %150 = arith.subf %133, %149 : vector<2x128xf32>
    %cst_51 = arith.constant 9.99999974E-6 : f32
    %151 = vector.broadcast %cst_51 : f32 to vector<1x128xf32>
    %152 = arith.addf %148, %151 : vector<1x128xf32>
    %153 = math.rsqrt %152 : vector<1x128xf32>
    %154 = vector.broadcast %153 : vector<1x128xf32> to vector<2x128xf32>
    %155 = arith.mulf %150, %154 : vector<2x128xf32>
    %156 = vector.broadcast %134 : vector<1x128xf32> to vector<2x128xf32>
    %157 = arith.mulf %155, %156 : vector<2x128xf32>
    %158 = vector.broadcast %135 : vector<1x128xf32> to vector<2x128xf32>
    %159 = arith.addf %157, %158 : vector<2x128xf32>
    %160 = arith.addf %159, %0 : vector<2x128xf32>
    %161 = arith.truncf %160 : vector<2x128xf32> to vector<2x128xbf16>
    %c0_52 = arith.constant 0 : index
    %c0_53 = arith.constant 0 : index
    %162 = vector.load %arg12[%c0_52, %c0_53] : memref<128x128xbf16, #tpu.memory_space<vmem>>, vector<128x128xbf16>
    %cst_54 = arith.constant dense<0.000000e+00> : vector<2x128xf32>
    %163 = tpu.matmul %161, %162, %cst_54 {dimension_numbers = #tpu.dot_dimension_numbers<[1], [0], [0], [1], [0, 0, 1, 1], [], []>} : vector<2x128xbf16>, vector<128x128xbf16>, vector<2x128xf32> -> vector<2x128xf32>
    %c0_55 = arith.constant 0 : index
    %c0_56 = arith.constant 0 : index
    %164 = vector.load %arg13[%c0_55, %c0_56] : memref<1x128xf32, #tpu.memory_space<vmem>>, vector<1x128xf32>
    %c0_57 = arith.constant 0 : index
    %c0_58 = arith.constant 0 : index
    %165 = vector.load %arg14[%c0_57, %c0_58] : memref<1x128xf32, #tpu.memory_space<vmem>>, vector<1x128xf32>
    %cst_59 = arith.constant dense<0.000000e+00> : vector<128xf32>
    %166 = vector.multi_reduction <add>, %163, %cst_59 [0] : vector<2x128xf32> to vector<128xf32>
    %167 = vector.shape_cast %166 : vector<128xf32> to vector<1x128xf32>
    %cst_60 = arith.constant 2.000000e+00 : f32
    %168 = vector.broadcast %cst_60 : f32 to vector<1x128xf32>
    %169 = arith.divf %167, %168 : vector<1x128xf32>
    %170 = arith.mulf %163, %163 : vector<2x128xf32>
    %cst_61 = arith.constant dense<0.000000e+00> : vector<128xf32>
    %171 = vector.multi_reduction <add>, %170, %cst_61 [0] : vector<2x128xf32> to vector<128xf32>
    %172 = vector.shape_cast %171 : vector<128xf32> to vector<1x128xf32>
    %cst_62 = arith.constant 2.000000e+00 : f32
    %173 = vector.broadcast %cst_62 : f32 to vector<1x128xf32>
    %174 = arith.divf %172, %173 : vector<1x128xf32>
    %175 = arith.mulf %169, %169 : vector<1x128xf32>
    %176 = arith.subf %174, %175 : vector<1x128xf32>
    %cst_63 = arith.constant 0.000000e+00 : f32
    %177 = vector.broadcast %cst_63 : f32 to vector<1x128xf32>
    %178 = arith.maximumf %176, %177 : vector<1x128xf32>
    %179 = vector.broadcast %169 : vector<1x128xf32> to vector<2x128xf32>
    %180 = arith.subf %163, %179 : vector<2x128xf32>
    %cst_64 = arith.constant 9.99999974E-6 : f32
    %181 = vector.broadcast %cst_64 : f32 to vector<1x128xf32>
    %182 = arith.addf %178, %181 : vector<1x128xf32>
    %183 = math.rsqrt %182 : vector<1x128xf32>
    %184 = vector.broadcast %183 : vector<1x128xf32> to vector<2x128xf32>
    %185 = arith.mulf %180, %184 : vector<2x128xf32>
    %186 = vector.broadcast %164 : vector<1x128xf32> to vector<2x128xf32>
    %187 = arith.mulf %185, %186 : vector<2x128xf32>
    %188 = vector.broadcast %165 : vector<1x128xf32> to vector<2x128xf32>
    %189 = arith.addf %187, %188 : vector<2x128xf32>
    %cst_65 = arith.constant 3.000000e+00 : f32
    %190 = vector.broadcast %cst_65 : f32 to vector<2x128xf32>
    %191 = arith.addf %189, %190 : vector<2x128xf32>
    %cst_66 = arith.constant 0.000000e+00 : f32
    %cst_67 = arith.constant 6.000000e+00 : f32
    %192 = vector.broadcast %cst_66 : f32 to vector<2x128xf32>
    %193 = arith.maximumf %192, %191 : vector<2x128xf32>
    %194 = vector.broadcast %cst_67 : f32 to vector<2x128xf32>
    %195 = arith.minimumf %194, %193 : vector<2x128xf32>
    %196 = arith.mulf %189, %195 : vector<2x128xf32>
    %cst_68 = arith.constant 0.166666672 : f32
    %197 = vector.broadcast %cst_68 : f32 to vector<2x128xf32>
    %198 = arith.mulf %196, %197 : vector<2x128xf32>
    %199 = arith.truncf %198 : vector<2x128xf32> to vector<2x128xbf16>
    %c0_69 = arith.constant 0 : index
    %c0_70 = arith.constant 0 : index
    %200 = vector.load %arg15[%c0_69, %c0_70] : memref<128x128xbf16, #tpu.memory_space<vmem>>, vector<128x128xbf16>
    %cst_71 = arith.constant dense<0.000000e+00> : vector<2x128xf32>
    %201 = tpu.matmul %199, %200, %cst_71 {dimension_numbers = #tpu.dot_dimension_numbers<[1], [0], [0], [1], [0, 0, 1, 1], [], []>} : vector<2x128xbf16>, vector<128x128xbf16>, vector<2x128xf32> -> vector<2x128xf32>
    %c0_72 = arith.constant 0 : index
    %c0_73 = arith.constant 0 : index
    %202 = vector.load %arg16[%c0_72, %c0_73] : memref<1x128xf32, #tpu.memory_space<vmem>>, vector<1x128xf32>
    %203 = vector.broadcast %202 : vector<1x128xf32> to vector<2x128xf32>
    %204 = arith.addf %201, %203 : vector<2x128xf32>
    %205 = arith.addf %160, %204 : vector<2x128xf32>
    %c0_74 = arith.constant 0 : index
    %c0_75 = arith.constant 0 : index
    %206 = vector.load %arg17[%c0_74, %c0_75] : memref<2x128xf32, #tpu.memory_space<vmem>>, vector<2x128xf32>
    tpu.vector_store %arg17[%c0_74, %c0_75], %205 {strides = array<i32>} : memref<2x128xf32, #tpu.memory_space<vmem>>, vector<2x128xf32>,
    return
  }
}

module attributes {stable_mosaic.version = 11 : i64} {
  func.func @kernel(%arg0: memref<8x128xf32, #tpu.memory_space<vmem>>, %arg1: memref<128x256xbf16, #tpu.memory_space<vmem>>, %arg2: memref<1x256xf32, #tpu.memory_space<vmem>>, %arg3: memref<1x256xf32, #tpu.memory_space<vmem>>, %arg4: memref<128x512xbf16, #tpu.memory_space<vmem>>, %arg5: memref<1x512xf32, #tpu.memory_space<vmem>>, %arg6: memref<1x512xf32, #tpu.memory_space<vmem>>, %arg7: memref<8x32xf32, #tpu.memory_space<vmem>>, %arg8: memref<256x128xbf16, #tpu.memory_space<vmem>>, %arg9: memref<1x128xf32, #tpu.memory_space<vmem>>, %arg10: memref<1x128xf32, #tpu.memory_space<vmem>>, %arg11: memref<1x128xf32, #tpu.memory_space<vmem>>, %arg12: memref<128x64xbf16, #tpu.memory_space<vmem>>, %arg13: memref<1x64xf32, #tpu.memory_space<vmem>>, %arg14: memref<1x64xf32, #tpu.memory_space<vmem>>, %arg15: memref<64x128xbf16, #tpu.memory_space<vmem>>, %arg16: memref<1x128xf32, #tpu.memory_space<vmem>>, %arg17: memref<2x128xf32, #tpu.memory_space<vmem>>) attributes {dimension_semantics = [], scalar_prefetch = 0 : i64, scratch_operands = 0 : i64, tpu.core_type = #tpu.core_type<tc>} {
    %c0 = arith.constant 0 : index
    %c0_0 = arith.constant 0 : index
    %0 = vector.load %arg0[%c0, %c0_0] : memref<8x128xf32, #tpu.memory_space<vmem>>, vector<8x128xf32>
    %1 = vector.extract_strided_slice %0 {offsets = [0, 0], sizes = [1, 128], strides = [1, 1]} : vector<8x128xf32> to vector<1x128xf32>
    %2 = vector.extract_strided_slice %0 {offsets = [4, 0], sizes = [1, 128], strides = [1, 1]} : vector<8x128xf32> to vector<1x128xf32>
    %3 = tpu.concatenate %1, %2 in 0 : vector<1x128xf32>, vector<1x128xf32> -> vector<2x128xf32>
    %4 = arith.truncf %3 : vector<2x128xf32> to vector<2x128xbf16>
    %c0_1 = arith.constant 0 : index
    %c0_2 = arith.constant 0 : index
    %5 = vector.load %arg1[%c0_1, %c0_2] : memref<128x256xbf16, #tpu.memory_space<vmem>>, vector<128x256xbf16>
    %cst = arith.constant dense<0.000000e+00> : vector<2x256xf32>
    %6 = tpu.matmul %4, %5, %cst {dimension_numbers = #tpu.dot_dimension_numbers<[1], [0], [0], [1], [0, 0, 1, 1], [], []>} : vector<2x128xbf16>, vector<128x256xbf16>, vector<2x256xf32> -> vector<2x256xf32>
    %c0_3 = arith.constant 0 : index
    %c0_4 = arith.constant 0 : index
    %7 = vector.load %arg2[%c0_3, %c0_4] : memref<1x256xf32, #tpu.memory_space<vmem>>, vector<1x256xf32>
    %c0_5 = arith.constant 0 : index
    %c0_6 = arith.constant 0 : index
    %8 = vector.load %arg3[%c0_5, %c0_6] : memref<1x256xf32, #tpu.memory_space<vmem>>, vector<1x256xf32>
    %cst_7 = arith.constant dense<0.000000e+00> : vector<256xf32>
    %9 = vector.multi_reduction <add>, %6, %cst_7 [0] : vector<2x256xf32> to vector<256xf32>
    %10 = vector.shape_cast %9 : vector<256xf32> to vector<1x256xf32>
    %cst_8 = arith.constant 2.000000e+00 : f32
    %11 = vector.broadcast %cst_8 : f32 to vector<1x256xf32>
    %12 = arith.divf %10, %11 : vector<1x256xf32>
    %13 = arith.mulf %6, %6 : vector<2x256xf32>
    %cst_9 = arith.constant dense<0.000000e+00> : vector<256xf32>
    %14 = vector.multi_reduction <add>, %13, %cst_9 [0] : vector<2x256xf32> to vector<256xf32>
    %15 = vector.shape_cast %14 : vector<256xf32> to vector<1x256xf32>
    %cst_10 = arith.constant 2.000000e+00 : f32
    %16 = vector.broadcast %cst_10 : f32 to vector<1x256xf32>
    %17 = arith.divf %15, %16 : vector<1x256xf32>
    %18 = arith.mulf %12, %12 : vector<1x256xf32>
    %19 = arith.subf %17, %18 : vector<1x256xf32>
    %cst_11 = arith.constant 0.000000e+00 : f32
    %20 = vector.broadcast %cst_11 : f32 to vector<1x256xf32>
    %21 = arith.maximumf %19, %20 : vector<1x256xf32>
    %22 = vector.broadcast %12 : vector<1x256xf32> to vector<2x256xf32>
    %23 = arith.subf %6, %22 : vector<2x256xf32>
    %cst_12 = arith.constant 9.99999974E-6 : f32
    %24 = vector.broadcast %cst_12 : f32 to vector<1x256xf32>
    %25 = arith.addf %21, %24 : vector<1x256xf32>
    %26 = math.rsqrt %25 : vector<1x256xf32>
    %27 = vector.broadcast %26 : vector<1x256xf32> to vector<2x256xf32>
    %28 = arith.mulf %23, %27 : vector<2x256xf32>
    %29 = vector.broadcast %7 : vector<1x256xf32> to vector<2x256xf32>
    %30 = arith.mulf %28, %29 : vector<2x256xf32>
    %31 = vector.broadcast %8 : vector<1x256xf32> to vector<2x256xf32>
    %32 = arith.addf %30, %31 : vector<2x256xf32>
    %33 = arith.truncf %0 : vector<8x128xf32> to vector<8x128xbf16>
    %c0_13 = arith.constant 0 : index
    %c0_14 = arith.constant 0 : index
    %34 = vector.load %arg4[%c0_13, %c0_14] : memref<128x512xbf16, #tpu.memory_space<vmem>>, vector<128x512xbf16>
    %cst_15 = arith.constant dense<0.000000e+00> : vector<8x512xf32>
    %35 = tpu.matmul %33, %34, %cst_15 {dimension_numbers = #tpu.dot_dimension_numbers<[1], [0], [0], [1], [0, 0, 1, 1], [], []>} : vector<8x128xbf16>, vector<128x512xbf16>, vector<8x512xf32> -> vector<8x512xf32>
    %c0_16 = arith.constant 0 : index
    %c0_17 = arith.constant 0 : index
    %36 = vector.load %arg5[%c0_16, %c0_17] : memref<1x512xf32, #tpu.memory_space<vmem>>, vector<1x512xf32>
    %c0_18 = arith.constant 0 : index
    %c0_19 = arith.constant 0 : index
    %37 = vector.load %arg6[%c0_18, %c0_19] : memref<1x512xf32, #tpu.memory_space<vmem>>, vector<1x512xf32>
    %cst_20 = arith.constant dense<0.000000e+00> : vector<512xf32>
    %38 = vector.multi_reduction <add>, %35, %cst_20 [0] : vector<8x512xf32> to vector<512xf32>
    %39 = vector.shape_cast %38 : vector<512xf32> to vector<1x512xf32>
    %cst_21 = arith.constant 8.000000e+00 : f32
    %40 = vector.broadcast %cst_21 : f32 to vector<1x512xf32>
    %41 = arith.divf %39, %40 : vector<1x512xf32>
    %42 = arith.mulf %35, %35 : vector<8x512xf32>
    %cst_22 = arith.constant dense<0.000000e+00> : vector<512xf32>
    %43 = vector.multi_reduction <add>, %42, %cst_22 [0] : vector<8x512xf32> to vector<512xf32>
    %44 = vector.shape_cast %43 : vector<512xf32> to vector<1x512xf32>
    %cst_23 = arith.constant 8.000000e+00 : f32
    %45 = vector.broadcast %cst_23 : f32 to vector<1x512xf32>
    %46 = arith.divf %44, %45 : vector<1x512xf32>
    %47 = arith.mulf %41, %41 : vector<1x512xf32>
    %48 = arith.subf %46, %47 : vector<1x512xf32>
    %cst_24 = arith.constant 0.000000e+00 : f32
    %49 = vector.broadcast %cst_24 : f32 to vector<1x512xf32>
    %50 = arith.maximumf %48, %49 : vector<1x512xf32>
    %51 = vector.broadcast %41 : vector<1x512xf32> to vector<8x512xf32>
    %52 = arith.subf %35, %51 : vector<8x512xf32>
    %cst_25 = arith.constant 9.99999974E-6 : f32
    %53 = vector.broadcast %cst_25 : f32 to vector<1x512xf32>
    %54 = arith.addf %50, %53 : vector<1x512xf32>
    %55 = math.rsqrt %54 : vector<1x512xf32>
    %56 = vector.broadcast %55 : vector<1x512xf32> to vector<8x512xf32>
    %57 = arith.mulf %52, %56 : vector<8x512xf32>
    %58 = vector.broadcast %36 : vector<1x512xf32> to vector<8x512xf32>
    %59 = arith.mulf %57, %58 : vector<8x512xf32>
    %60 = vector.broadcast %37 : vector<1x512xf32> to vector<8x512xf32>
    %61 = arith.addf %59, %60 : vector<8x512xf32>
    %62 = vector.extract_strided_slice %61 {offsets = [0, 0], sizes = [8, 256], strides = [1, 1]} : vector<8x512xf32> to vector<8x256xf32>
    %63 = vector.extract_strided_slice %61 {offsets = [0, 256], sizes = [8, 256], strides = [1, 1]} : vector<8x512xf32> to vector<8x256xf32>
    %c0_26 = arith.constant 0 : index
    %c0_27 = arith.constant 0 : index
    %64 = vector.load %arg7[%c0_26, %c0_27] : memref<8x32xf32, #tpu.memory_space<vmem>>, vector<8x32xf32>
    %65 = vector.extract_strided_slice %32 {offsets = [0, 0], sizes = [1, 64], strides = [1, 1]} : vector<2x256xf32> to vector<1x64xf32>
    %66 = vector.extract_strided_slice %32 {offsets = [0, 64], sizes = [1, 64], strides = [1, 1]} : vector<2x256xf32> to vector<1x64xf32>
    %67 = vector.extract_strided_slice %32 {offsets = [0, 128], sizes = [1, 64], strides = [1, 1]} : vector<2x256xf32> to vector<1x64xf32>
    %68 = vector.extract_strided_slice %32 {offsets = [0, 192], sizes = [1, 64], strides = [1, 1]} : vector<2x256xf32> to vector<1x64xf32>
    %69 = vector.extract_strided_slice %32 {offsets = [1, 0], sizes = [1, 64], strides = [1, 1]} : vector<2x256xf32> to vector<1x64xf32>
    %70 = vector.extract_strided_slice %32 {offsets = [1, 64], sizes = [1, 64], strides = [1, 1]} : vector<2x256xf32> to vector<1x64xf32>
    %71 = vector.extract_strided_slice %32 {offsets = [1, 128], sizes = [1, 64], strides = [1, 1]} : vector<2x256xf32> to vector<1x64xf32>
    %72 = vector.extract_strided_slice %32 {offsets = [1, 192], sizes = [1, 64], strides = [1, 1]} : vector<2x256xf32> to vector<1x64xf32>
    %73 = tpu.concatenate %65, %66, %67, %68, %69, %70, %71, %72 in 0 : vector<1x64xf32>, vector<1x64xf32>, vector<1x64xf32>, vector<1x64xf32>, vector<1x64xf32>, vector<1x64xf32>, vector<1x64xf32>, vector<1x64xf32> -> vector<8x64xf32>
    %74 = arith.truncf %73 : vector<8x64xf32> to vector<8x64xbf16>
    %75 = vector.extract_strided_slice %62 {offsets = [0, 0], sizes = [4, 64], strides = [1, 1]} : vector<8x256xf32> to vector<4x64xf32>
    %76 = vector.extract_strided_slice %62 {offsets = [0, 64], sizes = [4, 64], strides = [1, 1]} : vector<8x256xf32> to vector<4x64xf32>
    %77 = vector.extract_strided_slice %62 {offsets = [0, 128], sizes = [4, 64], strides = [1, 1]} : vector<8x256xf32> to vector<4x64xf32>
    %78 = vector.extract_strided_slice %62 {offsets = [0, 192], sizes = [4, 64], strides = [1, 1]} : vector<8x256xf32> to vector<4x64xf32>
    %79 = vector.extract_strided_slice %62 {offsets = [4, 0], sizes = [4, 64], strides = [1, 1]} : vector<8x256xf32> to vector<4x64xf32>
    %80 = vector.extract_strided_slice %62 {offsets = [4, 64], sizes = [4, 64], strides = [1, 1]} : vector<8x256xf32> to vector<4x64xf32>
    %81 = vector.extract_strided_slice %62 {offsets = [4, 128], sizes = [4, 64], strides = [1, 1]} : vector<8x256xf32> to vector<4x64xf32>
    %82 = vector.extract_strided_slice %62 {offsets = [4, 192], sizes = [4, 64], strides = [1, 1]} : vector<8x256xf32> to vector<4x64xf32>
    %83 = tpu.concatenate %75, %76, %77, %78, %79, %80, %81, %82 in 0 : vector<4x64xf32>, vector<4x64xf32>, vector<4x64xf32>, vector<4x64xf32>, vector<4x64xf32>, vector<4x64xf32>, vector<4x64xf32>, vector<4x64xf32> -> vector<32x64xf32>
    %84 = arith.truncf %83 : vector<32x64xf32> to vector<32x64xbf16>
    %85 = vector.extract_strided_slice %63 {offsets = [0, 0], sizes = [4, 64], strides = [1, 1]} : vector<8x256xf32> to vector<4x64xf32>
    %86 = vector.extract_strided_slice %63 {offsets = [0, 64], sizes = [4, 64], strides = [1, 1]} : vector<8x256xf32> to vector<4x64xf32>
    %87 = vector.extract_strided_slice %63 {offsets = [0, 128], sizes = [4, 64], strides = [1, 1]} : vector<8x256xf32> to vector<4x64xf32>
    %88 = vector.extract_strided_slice %63 {offsets = [0, 192], sizes = [4, 64], strides = [1, 1]} : vector<8x256xf32> to vector<4x64xf32>
    %89 = vector.extract_strided_slice %63 {offsets = [4, 0], sizes = [4, 64], strides = [1, 1]} : vector<8x256xf32> to vector<4x64xf32>
    %90 = vector.extract_strided_slice %63 {offsets = [4, 64], sizes = [4, 64], strides = [1, 1]} : vector<8x256xf32> to vector<4x64xf32>
    %91 = vector.extract_strided_slice %63 {offsets = [4, 128], sizes = [4, 64], strides = [1, 1]} : vector<8x256xf32> to vector<4x64xf32>
    %92 = vector.extract_strided_slice %63 {offsets = [4, 192], sizes = [4, 64], strides = [1, 1]} : vector<8x256xf32> to vector<4x64xf32>
    %93 = tpu.concatenate %85, %86, %87, %88, %89, %90, %91, %92 in 0 : vector<4x64xf32>, vector<4x64xf32>, vector<4x64xf32>, vector<4x64xf32>, vector<4x64xf32>, vector<4x64xf32>, vector<4x64xf32>, vector<4x64xf32> -> vector<32x64xf32>
    %94 = arith.truncf %93 : vector<32x64xf32> to vector<32x64xbf16>
    %cst_28 = arith.constant dense<0.000000e+00> : vector<8x32xf32>
    %95 = tpu.matmul %74, %84, %cst_28 {dimension_numbers = #tpu.dot_dimension_numbers<[1], [1], [0], [0], [0, 0, 1, 0], [], []>} : vector<8x64xbf16>, vector<32x64xbf16>, vector<8x32xf32> -> vector<8x32xf32>
    %cst_29 = arith.constant 1.250000e-01 : f32
    %96 = vector.broadcast %cst_29 : f32 to vector<8x32xf32>
    %97 = arith.mulf %95, %96 : vector<8x32xf32>
    %98 = arith.addf %97, %64 : vector<8x32xf32>
    %cst_30 = arith.constant dense<0xFF800000> : vector<8xf32>
    %99 = vector.multi_reduction <maximumf>, %98, %cst_30 [1] : vector<8x32xf32> to vector<8xf32>
    %100 = vector.shape_cast %99 : vector<8xf32> to vector<8x1xf32>
    %101 = vector.broadcast %100 : vector<8x1xf32> to vector<8x32xf32>
    %102 = arith.subf %98, %101 : vector<8x32xf32>
    %103 = math.exp %102 : vector<8x32xf32>
    %cst_31 = arith.constant dense<0.000000e+00> : vector<8xf32>
    %104 = vector.multi_reduction <add>, %103, %cst_31 [1] : vector<8x32xf32> to vector<8xf32>
    %105 = vector.shape_cast %104 : vector<8xf32> to vector<8x1xf32>
    %106 = tpu.reciprocal %105 {approx = true} : vector<8x1xf32> -> vector<8x1xf32>
    %107 = vector.broadcast %106 : vector<8x1xf32> to vector<8x32xf32>
    %108 = arith.mulf %103, %107 : vector<8x32xf32>
    %109 = arith.truncf %108 : vector<8x32xf32> to vector<8x32xbf16>
    %cst_32 = arith.constant dense<0.000000e+00> : vector<8x64xf32>
    %110 = tpu.matmul %109, %94, %cst_32 {dimension_numbers = #tpu.dot_dimension_numbers<[1], [0], [0], [1], [0, 0, 1, 1], [], []>} : vector<8x32xbf16>, vector<32x64xbf16>, vector<8x64xf32> -> vector<8x64xf32>
    %111 = vector.extract_strided_slice %110 {offsets = [0, 0], sizes = [1, 64], strides = [1, 1]} : vector<8x64xf32> to vector<1x64xf32>
    %112 = vector.extract_strided_slice %110 {offsets = [1, 0], sizes = [1, 64], strides = [1, 1]} : vector<8x64xf32> to vector<1x64xf32>
    %113 = vector.extract_strided_slice %110 {offsets = [2, 0], sizes = [1, 64], strides = [1, 1]} : vector<8x64xf32> to vector<1x64xf32>
    %114 = vector.extract_strided_slice %110 {offsets = [3, 0], sizes = [1, 64], strides = [1, 1]} : vector<8x64xf32> to vector<1x64xf32>
    %115 = tpu.concatenate %111, %112, %113, %114 in 1 : vector<1x64xf32>, vector<1x64xf32>, vector<1x64xf32>, vector<1x64xf32> -> vector<1x256xf32>
    %116 = vector.extract_strided_slice %110 {offsets = [4, 0], sizes = [1, 64], strides = [1, 1]} : vector<8x64xf32> to vector<1x64xf32>
    %117 = vector.extract_strided_slice %110 {offsets = [5, 0], sizes = [1, 64], strides = [1, 1]} : vector<8x64xf32> to vector<1x64xf32>
    %118 = vector.extract_strided_slice %110 {offsets = [6, 0], sizes = [1, 64], strides = [1, 1]} : vector<8x64xf32> to vector<1x64xf32>
    %119 = vector.extract_strided_slice %110 {offsets = [7, 0], sizes = [1, 64], strides = [1, 1]} : vector<8x64xf32> to vector<1x64xf32>
    %120 = tpu.concatenate %116, %117, %118, %119 in 1 : vector<1x64xf32>, vector<1x64xf32>, vector<1x64xf32>, vector<1x64xf32> -> vector<1x256xf32>
    %121 = tpu.concatenate %115, %120 in 0 : vector<1x256xf32>, vector<1x256xf32> -> vector<2x256xf32>
    %cst_33 = arith.constant 3.000000e+00 : f32
    %122 = vector.broadcast %cst_33 : f32 to vector<2x256xf32>
    %123 = arith.addf %121, %122 : vector<2x256xf32>
    %cst_34 = arith.constant 0.000000e+00 : f32
    %cst_35 = arith.constant 6.000000e+00 : f32
    %124 = vector.broadcast %cst_34 : f32 to vector<2x256xf32>
    %125 = arith.maximumf %124, %123 : vector<2x256xf32>
    %126 = vector.broadcast %cst_35 : f32 to vector<2x256xf32>
    %127 = arith.minimumf %126, %125 : vector<2x256xf32>
    %128 = arith.mulf %121, %127 : vector<2x256xf32>
    %cst_36 = arith.constant 0.166666672 : f32
    %129 = vector.broadcast %cst_36 : f32 to vector<2x256xf32>
    %130 = arith.mulf %128, %129 : vector<2x256xf32>
    %131 = arith.truncf %130 : vector<2x256xf32> to vector<2x256xbf16>
    %c0_37 = arith.constant 0 : index
    %c0_38 = arith.constant 0 : index
    %132 = vector.load %arg8[%c0_37, %c0_38] : memref<256x128xbf16, #tpu.memory_space<vmem>>, vector<256x128xbf16>
    %cst_39 = arith.constant dense<0.000000e+00> : vector<2x128xf32>
    %133 = tpu.matmul %131, %132, %cst_39 {dimension_numbers = #tpu.dot_dimension_numbers<[1], [0], [0], [1], [0, 0, 1, 1], [], []>} : vector<2x256xbf16>, vector<256x128xbf16>, vector<2x128xf32> -> vector<2x128xf32>
    %c0_40 = arith.constant 0 : index
    %c0_41 = arith.constant 0 : index
    %134 = vector.load %arg9[%c0_40, %c0_41] : memref<1x128xf32, #tpu.memory_space<vmem>>, vector<1x128xf32>
    %135 = vector.broadcast %134 : vector<1x128xf32> to vector<2x128xf32>
    %136 = arith.addf %133, %135 : vector<2x128xf32>
    %c0_42 = arith.constant 0 : index
    %c0_43 = arith.constant 0 : index
    %137 = vector.load %arg10[%c0_42, %c0_43] : memref<1x128xf32, #tpu.memory_space<vmem>>, vector<1x128xf32>
    %c0_44 = arith.constant 0 : index
    %c0_45 = arith.constant 0 : index
    %138 = vector.load %arg11[%c0_44, %c0_45] : memref<1x128xf32, #tpu.memory_space<vmem>>, vector<1x128xf32>
    %cst_46 = arith.constant dense<0.000000e+00> : vector<128xf32>
    %139 = vector.multi_reduction <add>, %136, %cst_46 [0] : vector<2x128xf32> to vector<128xf32>
    %140 = vector.shape_cast %139 : vector<128xf32> to vector<1x128xf32>
    %cst_47 = arith.constant 2.000000e+00 : f32
    %141 = vector.broadcast %cst_47 : f32 to vector<1x128xf32>
    %142 = arith.divf %140, %141 : vector<1x128xf32>
    %143 = arith.mulf %136, %136 : vector<2x128xf32>
    %cst_48 = arith.constant dense<0.000000e+00> : vector<128xf32>
    %144 = vector.multi_reduction <add>, %143, %cst_48 [0] : vector<2x128xf32> to vector<128xf32>
    %145 = vector.shape_cast %144 : vector<128xf32> to vector<1x128xf32>
    %cst_49 = arith.constant 2.000000e+00 : f32
    %146 = vector.broadcast %cst_49 : f32 to vector<1x128xf32>
    %147 = arith.divf %145, %146 : vector<1x128xf32>
    %148 = arith.mulf %142, %142 : vector<1x128xf32>
    %149 = arith.subf %147, %148 : vector<1x128xf32>
    %cst_50 = arith.constant 0.000000e+00 : f32
    %150 = vector.broadcast %cst_50 : f32 to vector<1x128xf32>
    %151 = arith.maximumf %149, %150 : vector<1x128xf32>
    %152 = vector.broadcast %142 : vector<1x128xf32> to vector<2x128xf32>
    %153 = arith.subf %136, %152 : vector<2x128xf32>
    %cst_51 = arith.constant 9.99999974E-6 : f32
    %154 = vector.broadcast %cst_51 : f32 to vector<1x128xf32>
    %155 = arith.addf %151, %154 : vector<1x128xf32>
    %156 = math.rsqrt %155 : vector<1x128xf32>
    %157 = vector.broadcast %156 : vector<1x128xf32> to vector<2x128xf32>
    %158 = arith.mulf %153, %157 : vector<2x128xf32>
    %159 = vector.broadcast %137 : vector<1x128xf32> to vector<2x128xf32>
    %160 = arith.mulf %158, %159 : vector<2x128xf32>
    %161 = vector.broadcast %138 : vector<1x128xf32> to vector<2x128xf32>
    %162 = arith.addf %160, %161 : vector<2x128xf32>
    %163 = arith.truncf %162 : vector<2x128xf32> to vector<2x128xbf16>
    %c0_52 = arith.constant 0 : index
    %c0_53 = arith.constant 0 : index
    %164 = vector.load %arg12[%c0_52, %c0_53] : memref<128x64xbf16, #tpu.memory_space<vmem>>, vector<128x64xbf16>
    %cst_54 = arith.constant dense<0.000000e+00> : vector<2x64xf32>
    %165 = tpu.matmul %163, %164, %cst_54 {dimension_numbers = #tpu.dot_dimension_numbers<[1], [0], [0], [1], [0, 0, 1, 1], [], []>} : vector<2x128xbf16>, vector<128x64xbf16>, vector<2x64xf32> -> vector<2x64xf32>
    %c0_55 = arith.constant 0 : index
    %c0_56 = arith.constant 0 : index
    %166 = vector.load %arg13[%c0_55, %c0_56] : memref<1x64xf32, #tpu.memory_space<vmem>>, vector<1x64xf32>
    %c0_57 = arith.constant 0 : index
    %c0_58 = arith.constant 0 : index
    %167 = vector.load %arg14[%c0_57, %c0_58] : memref<1x64xf32, #tpu.memory_space<vmem>>, vector<1x64xf32>
    %cst_59 = arith.constant dense<0.000000e+00> : vector<64xf32>
    %168 = vector.multi_reduction <add>, %165, %cst_59 [0] : vector<2x64xf32> to vector<64xf32>
    %169 = vector.shape_cast %168 : vector<64xf32> to vector<1x64xf32>
    %cst_60 = arith.constant 2.000000e+00 : f32
    %170 = vector.broadcast %cst_60 : f32 to vector<1x64xf32>
    %171 = arith.divf %169, %170 : vector<1x64xf32>
    %172 = arith.mulf %165, %165 : vector<2x64xf32>
    %cst_61 = arith.constant dense<0.000000e+00> : vector<64xf32>
    %173 = vector.multi_reduction <add>, %172, %cst_61 [0] : vector<2x64xf32> to vector<64xf32>
    %174 = vector.shape_cast %173 : vector<64xf32> to vector<1x64xf32>
    %cst_62 = arith.constant 2.000000e+00 : f32
    %175 = vector.broadcast %cst_62 : f32 to vector<1x64xf32>
    %176 = arith.divf %174, %175 : vector<1x64xf32>
    %177 = arith.mulf %171, %171 : vector<1x64xf32>
    %178 = arith.subf %176, %177 : vector<1x64xf32>
    %cst_63 = arith.constant 0.000000e+00 : f32
    %179 = vector.broadcast %cst_63 : f32 to vector<1x64xf32>
    %180 = arith.maximumf %178, %179 : vector<1x64xf32>
    %181 = vector.broadcast %171 : vector<1x64xf32> to vector<2x64xf32>
    %182 = arith.subf %165, %181 : vector<2x64xf32>
    %cst_64 = arith.constant 9.99999974E-6 : f32
    %183 = vector.broadcast %cst_64 : f32 to vector<1x64xf32>
    %184 = arith.addf %180, %183 : vector<1x64xf32>
    %185 = math.rsqrt %184 : vector<1x64xf32>
    %186 = vector.broadcast %185 : vector<1x64xf32> to vector<2x64xf32>
    %187 = arith.mulf %182, %186 : vector<2x64xf32>
    %188 = vector.broadcast %166 : vector<1x64xf32> to vector<2x64xf32>
    %189 = arith.mulf %187, %188 : vector<2x64xf32>
    %190 = vector.broadcast %167 : vector<1x64xf32> to vector<2x64xf32>
    %191 = arith.addf %189, %190 : vector<2x64xf32>
    %cst_65 = arith.constant 3.000000e+00 : f32
    %192 = vector.broadcast %cst_65 : f32 to vector<2x64xf32>
    %193 = arith.addf %191, %192 : vector<2x64xf32>
    %cst_66 = arith.constant 0.000000e+00 : f32
    %cst_67 = arith.constant 6.000000e+00 : f32
    %194 = vector.broadcast %cst_66 : f32 to vector<2x64xf32>
    %195 = arith.maximumf %194, %193 : vector<2x64xf32>
    %196 = vector.broadcast %cst_67 : f32 to vector<2x64xf32>
    %197 = arith.minimumf %196, %195 : vector<2x64xf32>
    %198 = arith.mulf %191, %197 : vector<2x64xf32>
    %cst_68 = arith.constant 0.166666672 : f32
    %199 = vector.broadcast %cst_68 : f32 to vector<2x64xf32>
    %200 = arith.mulf %198, %199 : vector<2x64xf32>
    %201 = arith.truncf %200 : vector<2x64xf32> to vector<2x64xbf16>
    %c0_69 = arith.constant 0 : index
    %c0_70 = arith.constant 0 : index
    %202 = vector.load %arg15[%c0_69, %c0_70] : memref<64x128xbf16, #tpu.memory_space<vmem>>, vector<64x128xbf16>
    %cst_71 = arith.constant dense<0.000000e+00> : vector<2x128xf32>
    %203 = tpu.matmul %201, %202, %cst_71 {dimension_numbers = #tpu.dot_dimension_numbers<[1], [0], [0], [1], [0, 0, 1, 1], [], []>} : vector<2x64xbf16>, vector<64x128xbf16>, vector<2x128xf32> -> vector<2x128xf32>
    %c0_72 = arith.constant 0 : index
    %c0_73 = arith.constant 0 : index
    %204 = vector.load %arg16[%c0_72, %c0_73] : memref<1x128xf32, #tpu.memory_space<vmem>>, vector<1x128xf32>
    %205 = vector.broadcast %204 : vector<1x128xf32> to vector<2x128xf32>
    %206 = arith.addf %203, %205 : vector<2x128xf32>
    %207 = arith.addf %162, %206 : vector<2x128xf32>
    %c0_74 = arith.constant 0 : index
    %c0_75 = arith.constant 0 : index
    %208 = vector.load %arg17[%c0_74, %c0_75] : memref<2x128xf32, #tpu.memory_space<vmem>>, vector<2x128xf32>
    tpu.vector_store %arg17[%c0_74, %c0_75], %207 {strides = array<i32>} : memref<2x128xf32, #tpu.memory_space<vmem>>, vector<2x128xf32>,
    return
  }
}

module attributes {stable_mosaic.version = 11 : i64} {
  func.func @kernel(%arg0: memref<8x128xf32, #tpu.memory_space<vmem>>, %arg1: memref<128x256xbf16, #tpu.memory_space<vmem>>, %arg2: memref<1x256xf32, #tpu.memory_space<vmem>>, %arg3: memref<1x256xf32, #tpu.memory_space<vmem>>, %arg4: memref<128x512xbf16, #tpu.memory_space<vmem>>, %arg5: memref<1x512xf32, #tpu.memory_space<vmem>>, %arg6: memref<1x512xf32, #tpu.memory_space<vmem>>, %arg7: memref<32x32xf32, #tpu.memory_space<vmem>>, %arg8: memref<256x128xbf16, #tpu.memory_space<vmem>>, %arg9: memref<1x128xf32, #tpu.memory_space<vmem>>, %arg10: memref<1x128xf32, #tpu.memory_space<vmem>>, %arg11: memref<1x128xf32, #tpu.memory_space<vmem>>, %arg12: memref<128x128xbf16, #tpu.memory_space<vmem>>, %arg13: memref<1x128xf32, #tpu.memory_space<vmem>>, %arg14: memref<1x128xf32, #tpu.memory_space<vmem>>, %arg15: memref<128x128xbf16, #tpu.memory_space<vmem>>, %arg16: memref<1x128xf32, #tpu.memory_space<vmem>>, %arg17: memref<8x128xf32, #tpu.memory_space<vmem>>) attributes {dimension_semantics = [], scalar_prefetch = 0 : i64, scratch_operands = 0 : i64, tpu.core_type = #tpu.core_type<tc>} {
    %c0 = arith.constant 0 : index
    %c0_0 = arith.constant 0 : index
    %0 = vector.load %arg0[%c0, %c0_0] : memref<8x128xf32, #tpu.memory_space<vmem>>, vector<8x128xf32>
    %1 = arith.truncf %0 : vector<8x128xf32> to vector<8x128xbf16>
    %c0_1 = arith.constant 0 : index
    %c0_2 = arith.constant 0 : index
    %2 = vector.load %arg1[%c0_1, %c0_2] : memref<128x256xbf16, #tpu.memory_space<vmem>>, vector<128x256xbf16>
    %cst = arith.constant dense<0.000000e+00> : vector<8x256xf32>
    %3 = tpu.matmul %1, %2, %cst {dimension_numbers = #tpu.dot_dimension_numbers<[1], [0], [0], [1], [0, 0, 1, 1], [], []>} : vector<8x128xbf16>, vector<128x256xbf16>, vector<8x256xf32> -> vector<8x256xf32>
    %c0_3 = arith.constant 0 : index
    %c0_4 = arith.constant 0 : index
    %4 = vector.load %arg2[%c0_3, %c0_4] : memref<1x256xf32, #tpu.memory_space<vmem>>, vector<1x256xf32>
    %c0_5 = arith.constant 0 : index
    %c0_6 = arith.constant 0 : index
    %5 = vector.load %arg3[%c0_5, %c0_6] : memref<1x256xf32, #tpu.memory_space<vmem>>, vector<1x256xf32>
    %cst_7 = arith.constant dense<0.000000e+00> : vector<256xf32>
    %6 = vector.multi_reduction <add>, %3, %cst_7 [0] : vector<8x256xf32> to vector<256xf32>
    %7 = vector.shape_cast %6 : vector<256xf32> to vector<1x256xf32>
    %cst_8 = arith.constant 8.000000e+00 : f32
    %8 = vector.broadcast %cst_8 : f32 to vector<1x256xf32>
    %9 = arith.divf %7, %8 : vector<1x256xf32>
    %10 = arith.mulf %3, %3 : vector<8x256xf32>
    %cst_9 = arith.constant dense<0.000000e+00> : vector<256xf32>
    %11 = vector.multi_reduction <add>, %10, %cst_9 [0] : vector<8x256xf32> to vector<256xf32>
    %12 = vector.shape_cast %11 : vector<256xf32> to vector<1x256xf32>
    %cst_10 = arith.constant 8.000000e+00 : f32
    %13 = vector.broadcast %cst_10 : f32 to vector<1x256xf32>
    %14 = arith.divf %12, %13 : vector<1x256xf32>
    %15 = arith.mulf %9, %9 : vector<1x256xf32>
    %16 = arith.subf %14, %15 : vector<1x256xf32>
    %cst_11 = arith.constant 0.000000e+00 : f32
    %17 = vector.broadcast %cst_11 : f32 to vector<1x256xf32>
    %18 = arith.maximumf %16, %17 : vector<1x256xf32>
    %19 = vector.broadcast %9 : vector<1x256xf32> to vector<8x256xf32>
    %20 = arith.subf %3, %19 : vector<8x256xf32>
    %cst_12 = arith.constant 9.99999974E-6 : f32
    %21 = vector.broadcast %cst_12 : f32 to vector<1x256xf32>
    %22 = arith.addf %18, %21 : vector<1x256xf32>
    %23 = math.rsqrt %22 : vector<1x256xf32>
    %24 = vector.broadcast %23 : vector<1x256xf32> to vector<8x256xf32>
    %25 = arith.mulf %20, %24 : vector<8x256xf32>
    %26 = vector.broadcast %4 : vector<1x256xf32> to vector<8x256xf32>
    %27 = arith.mulf %25, %26 : vector<8x256xf32>
    %28 = vector.broadcast %5 : vector<1x256xf32> to vector<8x256xf32>
    %29 = arith.addf %27, %28 : vector<8x256xf32>
    %30 = arith.truncf %0 : vector<8x128xf32> to vector<8x128xbf16>
    %c0_13 = arith.constant 0 : index
    %c0_14 = arith.constant 0 : index
    %31 = vector.load %arg4[%c0_13, %c0_14] : memref<128x512xbf16, #tpu.memory_space<vmem>>, vector<128x512xbf16>
    %cst_15 = arith.constant dense<0.000000e+00> : vector<8x512xf32>
    %32 = tpu.matmul %30, %31, %cst_15 {dimension_numbers = #tpu.dot_dimension_numbers<[1], [0], [0], [1], [0, 0, 1, 1], [], []>} : vector<8x128xbf16>, vector<128x512xbf16>, vector<8x512xf32> -> vector<8x512xf32>
    %c0_16 = arith.constant 0 : index
    %c0_17 = arith.constant 0 : index
    %33 = vector.load %arg5[%c0_16, %c0_17] : memref<1x512xf32, #tpu.memory_space<vmem>>, vector<1x512xf32>
    %c0_18 = arith.constant 0 : index
    %c0_19 = arith.constant 0 : index
    %34 = vector.load %arg6[%c0_18, %c0_19] : memref<1x512xf32, #tpu.memory_space<vmem>>, vector<1x512xf32>
    %cst_20 = arith.constant dense<0.000000e+00> : vector<512xf32>
    %35 = vector.multi_reduction <add>, %32, %cst_20 [0] : vector<8x512xf32> to vector<512xf32>
    %36 = vector.shape_cast %35 : vector<512xf32> to vector<1x512xf32>
    %cst_21 = arith.constant 8.000000e+00 : f32
    %37 = vector.broadcast %cst_21 : f32 to vector<1x512xf32>
    %38 = arith.divf %36, %37 : vector<1x512xf32>
    %39 = arith.mulf %32, %32 : vector<8x512xf32>
    %cst_22 = arith.constant dense<0.000000e+00> : vector<512xf32>
    %40 = vector.multi_reduction <add>, %39, %cst_22 [0] : vector<8x512xf32> to vector<512xf32>
    %41 = vector.shape_cast %40 : vector<512xf32> to vector<1x512xf32>
    %cst_23 = arith.constant 8.000000e+00 : f32
    %42 = vector.broadcast %cst_23 : f32 to vector<1x512xf32>
    %43 = arith.divf %41, %42 : vector<1x512xf32>
    %44 = arith.mulf %38, %38 : vector<1x512xf32>
    %45 = arith.subf %43, %44 : vector<1x512xf32>
    %cst_24 = arith.constant 0.000000e+00 : f32
    %46 = vector.broadcast %cst_24 : f32 to vector<1x512xf32>
    %47 = arith.maximumf %45, %46 : vector<1x512xf32>
    %48 = vector.broadcast %38 : vector<1x512xf32> to vector<8x512xf32>
    %49 = arith.subf %32, %48 : vector<8x512xf32>
    %cst_25 = arith.constant 9.99999974E-6 : f32
    %50 = vector.broadcast %cst_25 : f32 to vector<1x512xf32>
    %51 = arith.addf %47, %50 : vector<1x512xf32>
    %52 = math.rsqrt %51 : vector<1x512xf32>
    %53 = vector.broadcast %52 : vector<1x512xf32> to vector<8x512xf32>
    %54 = arith.mulf %49, %53 : vector<8x512xf32>
    %55 = vector.broadcast %33 : vector<1x512xf32> to vector<8x512xf32>
    %56 = arith.mulf %54, %55 : vector<8x512xf32>
    %57 = vector.broadcast %34 : vector<1x512xf32> to vector<8x512xf32>
    %58 = arith.addf %56, %57 : vector<8x512xf32>
    %59 = vector.extract_strided_slice %58 {offsets = [0, 0], sizes = [8, 256], strides = [1, 1]} : vector<8x512xf32> to vector<8x256xf32>
    %60 = vector.extract_strided_slice %58 {offsets = [0, 256], sizes = [8, 256], strides = [1, 1]} : vector<8x512xf32> to vector<8x256xf32>
    %c0_26 = arith.constant 0 : index
    %c0_27 = arith.constant 0 : index
    %61 = vector.load %arg7[%c0_26, %c0_27] : memref<32x32xf32, #tpu.memory_space<vmem>>, vector<32x32xf32>
    %62 = vector.extract_strided_slice %29 {offsets = [0, 0], sizes = [4, 64], strides = [1, 1]} : vector<8x256xf32> to vector<4x64xf32>
    %63 = vector.extract_strided_slice %29 {offsets = [0, 64], sizes = [4, 64], strides = [1, 1]} : vector<8x256xf32> to vector<4x64xf32>
    %64 = vector.extract_strided_slice %29 {offsets = [0, 128], sizes = [4, 64], strides = [1, 1]} : vector<8x256xf32> to vector<4x64xf32>
    %65 = vector.extract_strided_slice %29 {offsets = [0, 192], sizes = [4, 64], strides = [1, 1]} : vector<8x256xf32> to vector<4x64xf32>
    %66 = vector.extract_strided_slice %29 {offsets = [4, 0], sizes = [4, 64], strides = [1, 1]} : vector<8x256xf32> to vector<4x64xf32>
    %67 = vector.extract_strided_slice %29 {offsets = [4, 64], sizes = [4, 64], strides = [1, 1]} : vector<8x256xf32> to vector<4x64xf32>
    %68 = vector.extract_strided_slice %29 {offsets = [4, 128], sizes = [4, 64], strides = [1, 1]} : vector<8x256xf32> to vector<4x64xf32>
    %69 = vector.extract_strided_slice %29 {offsets = [4, 192], sizes = [4, 64], strides = [1, 1]} : vector<8x256xf32> to vector<4x64xf32>
    %70 = tpu.concatenate %62, %63, %64, %65, %66, %67, %68, %69 in 0 : vector<4x64xf32>, vector<4x64xf32>, vector<4x64xf32>, vector<4x64xf32>, vector<4x64xf32>, vector<4x64xf32>, vector<4x64xf32>, vector<4x64xf32> -> vector<32x64xf32>
    %71 = arith.truncf %70 : vector<32x64xf32> to vector<32x64xbf16>
    %72 = vector.extract_strided_slice %59 {offsets = [0, 0], sizes = [4, 64], strides = [1, 1]} : vector<8x256xf32> to vector<4x64xf32>
    %73 = vector.extract_strided_slice %59 {offsets = [0, 64], sizes = [4, 64], strides = [1, 1]} : vector<8x256xf32> to vector<4x64xf32>
    %74 = vector.extract_strided_slice %59 {offsets = [0, 128], sizes = [4, 64], strides = [1, 1]} : vector<8x256xf32> to vector<4x64xf32>
    %75 = vector.extract_strided_slice %59 {offsets = [0, 192], sizes = [4, 64], strides = [1, 1]} : vector<8x256xf32> to vector<4x64xf32>
    %76 = vector.extract_strided_slice %59 {offsets = [4, 0], sizes = [4, 64], strides = [1, 1]} : vector<8x256xf32> to vector<4x64xf32>
    %77 = vector.extract_strided_slice %59 {offsets = [4, 64], sizes = [4, 64], strides = [1, 1]} : vector<8x256xf32> to vector<4x64xf32>
    %78 = vector.extract_strided_slice %59 {offsets = [4, 128], sizes = [4, 64], strides = [1, 1]} : vector<8x256xf32> to vector<4x64xf32>
    %79 = vector.extract_strided_slice %59 {offsets = [4, 192], sizes = [4, 64], strides = [1, 1]} : vector<8x256xf32> to vector<4x64xf32>
    %80 = tpu.concatenate %72, %73, %74, %75, %76, %77, %78, %79 in 0 : vector<4x64xf32>, vector<4x64xf32>, vector<4x64xf32>, vector<4x64xf32>, vector<4x64xf32>, vector<4x64xf32>, vector<4x64xf32>, vector<4x64xf32> -> vector<32x64xf32>
    %81 = arith.truncf %80 : vector<32x64xf32> to vector<32x64xbf16>
    %82 = vector.extract_strided_slice %60 {offsets = [0, 0], sizes = [4, 64], strides = [1, 1]} : vector<8x256xf32> to vector<4x64xf32>
    %83 = vector.extract_strided_slice %60 {offsets = [0, 64], sizes = [4, 64], strides = [1, 1]} : vector<8x256xf32> to vector<4x64xf32>
    %84 = vector.extract_strided_slice %60 {offsets = [0, 128], sizes = [4, 64], strides = [1, 1]} : vector<8x256xf32> to vector<4x64xf32>
    %85 = vector.extract_strided_slice %60 {offsets = [0, 192], sizes = [4, 64], strides = [1, 1]} : vector<8x256xf32> to vector<4x64xf32>
    %86 = vector.extract_strided_slice %60 {offsets = [4, 0], sizes = [4, 64], strides = [1, 1]} : vector<8x256xf32> to vector<4x64xf32>
    %87 = vector.extract_strided_slice %60 {offsets = [4, 64], sizes = [4, 64], strides = [1, 1]} : vector<8x256xf32> to vector<4x64xf32>
    %88 = vector.extract_strided_slice %60 {offsets = [4, 128], sizes = [4, 64], strides = [1, 1]} : vector<8x256xf32> to vector<4x64xf32>
    %89 = vector.extract_strided_slice %60 {offsets = [4, 192], sizes = [4, 64], strides = [1, 1]} : vector<8x256xf32> to vector<4x64xf32>
    %90 = tpu.concatenate %82, %83, %84, %85, %86, %87, %88, %89 in 0 : vector<4x64xf32>, vector<4x64xf32>, vector<4x64xf32>, vector<4x64xf32>, vector<4x64xf32>, vector<4x64xf32>, vector<4x64xf32>, vector<4x64xf32> -> vector<32x64xf32>
    %91 = arith.truncf %90 : vector<32x64xf32> to vector<32x64xbf16>
    %cst_28 = arith.constant dense<0.000000e+00> : vector<32x32xf32>
    %92 = tpu.matmul %71, %81, %cst_28 {dimension_numbers = #tpu.dot_dimension_numbers<[1], [1], [0], [0], [0, 0, 1, 0], [], []>} : vector<32x64xbf16>, vector<32x64xbf16>, vector<32x32xf32> -> vector<32x32xf32>
    %cst_29 = arith.constant 1.250000e-01 : f32
    %93 = vector.broadcast %cst_29 : f32 to vector<32x32xf32>
    %94 = arith.mulf %92, %93 : vector<32x32xf32>
    %95 = arith.addf %94, %61 : vector<32x32xf32>
    %cst_30 = arith.constant dense<0xFF800000> : vector<32xf32>
    %96 = vector.multi_reduction <maximumf>, %95, %cst_30 [1] : vector<32x32xf32> to vector<32xf32>
    %97 = vector.shape_cast %96 : vector<32xf32> to vector<32x1xf32>
    %98 = vector.broadcast %97 : vector<32x1xf32> to vector<32x32xf32>
    %99 = arith.subf %95, %98 : vector<32x32xf32>
    %100 = math.exp %99 : vector<32x32xf32>
    %cst_31 = arith.constant dense<0.000000e+00> : vector<32xf32>
    %101 = vector.multi_reduction <add>, %100, %cst_31 [1] : vector<32x32xf32> to vector<32xf32>
    %102 = vector.shape_cast %101 : vector<32xf32> to vector<32x1xf32>
    %103 = tpu.reciprocal %102 {approx = true} : vector<32x1xf32> -> vector<32x1xf32>
    %104 = vector.broadcast %103 : vector<32x1xf32> to vector<32x32xf32>
    %105 = arith.mulf %100, %104 : vector<32x32xf32>
    %106 = arith.truncf %105 : vector<32x32xf32> to vector<32x32xbf16>
    %cst_32 = arith.constant dense<0.000000e+00> : vector<32x64xf32>
    %107 = tpu.matmul %106, %91, %cst_32 {dimension_numbers = #tpu.dot_dimension_numbers<[1], [0], [0], [1], [0, 0, 1, 1], [], []>} : vector<32x32xbf16>, vector<32x64xbf16>, vector<32x64xf32> -> vector<32x64xf32>
    %108 = vector.extract_strided_slice %107 {offsets = [0, 0], sizes = [4, 64], strides = [1, 1]} : vector<32x64xf32> to vector<4x64xf32>
    %109 = vector.extract_strided_slice %107 {offsets = [4, 0], sizes = [4, 64], strides = [1, 1]} : vector<32x64xf32> to vector<4x64xf32>
    %110 = vector.extract_strided_slice %107 {offsets = [8, 0], sizes = [4, 64], strides = [1, 1]} : vector<32x64xf32> to vector<4x64xf32>
    %111 = vector.extract_strided_slice %107 {offsets = [12, 0], sizes = [4, 64], strides = [1, 1]} : vector<32x64xf32> to vector<4x64xf32>
    %112 = tpu.concatenate %108, %109, %110, %111 in 1 : vector<4x64xf32>, vector<4x64xf32>, vector<4x64xf32>, vector<4x64xf32> -> vector<4x256xf32>
    %113 = vector.extract_strided_slice %107 {offsets = [16, 0], sizes = [4, 64], strides = [1, 1]} : vector<32x64xf32> to vector<4x64xf32>
    %114 = vector.extract_strided_slice %107 {offsets = [20, 0], sizes = [4, 64], strides = [1, 1]} : vector<32x64xf32> to vector<4x64xf32>
    %115 = vector.extract_strided_slice %107 {offsets = [24, 0], sizes = [4, 64], strides = [1, 1]} : vector<32x64xf32> to vector<4x64xf32>
    %116 = vector.extract_strided_slice %107 {offsets = [28, 0], sizes = [4, 64], strides = [1, 1]} : vector<32x64xf32> to vector<4x64xf32>
    %117 = tpu.concatenate %113, %114, %115, %116 in 1 : vector<4x64xf32>, vector<4x64xf32>, vector<4x64xf32>, vector<4x64xf32> -> vector<4x256xf32>
    %118 = tpu.concatenate %112, %117 in 0 : vector<4x256xf32>, vector<4x256xf32> -> vector<8x256xf32>
    %cst_33 = arith.constant 3.000000e+00 : f32
    %119 = vector.broadcast %cst_33 : f32 to vector<8x256xf32>
    %120 = arith.addf %118, %119 : vector<8x256xf32>
    %cst_34 = arith.constant 0.000000e+00 : f32
    %cst_35 = arith.constant 6.000000e+00 : f32
    %121 = vector.broadcast %cst_34 : f32 to vector<8x256xf32>
    %122 = arith.maximumf %121, %120 : vector<8x256xf32>
    %123 = vector.broadcast %cst_35 : f32 to vector<8x256xf32>
    %124 = arith.minimumf %123, %122 : vector<8x256xf32>
    %125 = arith.mulf %118, %124 : vector<8x256xf32>
    %cst_36 = arith.constant 0.166666672 : f32
    %126 = vector.broadcast %cst_36 : f32 to vector<8x256xf32>
    %127 = arith.mulf %125, %126 : vector<8x256xf32>
    %128 = arith.truncf %127 : vector<8x256xf32> to vector<8x256xbf16>
    %c0_37 = arith.constant 0 : index
    %c0_38 = arith.constant 0 : index
    %129 = vector.load %arg8[%c0_37, %c0_38] : memref<256x128xbf16, #tpu.memory_space<vmem>>, vector<256x128xbf16>
    %cst_39 = arith.constant dense<0.000000e+00> : vector<8x128xf32>
    %130 = tpu.matmul %128, %129, %cst_39 {dimension_numbers = #tpu.dot_dimension_numbers<[1], [0], [0], [1], [0, 0, 1, 1], [], []>} : vector<8x256xbf16>, vector<256x128xbf16>, vector<8x128xf32> -> vector<8x128xf32>
    %c0_40 = arith.constant 0 : index
    %c0_41 = arith.constant 0 : index
    %131 = vector.load %arg9[%c0_40, %c0_41] : memref<1x128xf32, #tpu.memory_space<vmem>>, vector<1x128xf32>
    %132 = vector.broadcast %131 : vector<1x128xf32> to vector<8x128xf32>
    %133 = arith.addf %130, %132 : vector<8x128xf32>
    %c0_42 = arith.constant 0 : index
    %c0_43 = arith.constant 0 : index
    %134 = vector.load %arg10[%c0_42, %c0_43] : memref<1x128xf32, #tpu.memory_space<vmem>>, vector<1x128xf32>
    %c0_44 = arith.constant 0 : index
    %c0_45 = arith.constant 0 : index
    %135 = vector.load %arg11[%c0_44, %c0_45] : memref<1x128xf32, #tpu.memory_space<vmem>>, vector<1x128xf32>
    %cst_46 = arith.constant dense<0.000000e+00> : vector<128xf32>
    %136 = vector.multi_reduction <add>, %133, %cst_46 [0] : vector<8x128xf32> to vector<128xf32>
    %137 = vector.shape_cast %136 : vector<128xf32> to vector<1x128xf32>
    %cst_47 = arith.constant 8.000000e+00 : f32
    %138 = vector.broadcast %cst_47 : f32 to vector<1x128xf32>
    %139 = arith.divf %137, %138 : vector<1x128xf32>
    %140 = arith.mulf %133, %133 : vector<8x128xf32>
    %cst_48 = arith.constant dense<0.000000e+00> : vector<128xf32>
    %141 = vector.multi_reduction <add>, %140, %cst_48 [0] : vector<8x128xf32> to vector<128xf32>
    %142 = vector.shape_cast %141 : vector<128xf32> to vector<1x128xf32>
    %cst_49 = arith.constant 8.000000e+00 : f32
    %143 = vector.broadcast %cst_49 : f32 to vector<1x128xf32>
    %144 = arith.divf %142, %143 : vector<1x128xf32>
    %145 = arith.mulf %139, %139 : vector<1x128xf32>
    %146 = arith.subf %144, %145 : vector<1x128xf32>
    %cst_50 = arith.constant 0.000000e+00 : f32
    %147 = vector.broadcast %cst_50 : f32 to vector<1x128xf32>
    %148 = arith.maximumf %146, %147 : vector<1x128xf32>
    %149 = vector.broadcast %139 : vector<1x128xf32> to vector<8x128xf32>
    %150 = arith.subf %133, %149 : vector<8x128xf32>
    %cst_51 = arith.constant 9.99999974E-6 : f32
    %151 = vector.broadcast %cst_51 : f32 to vector<1x128xf32>
    %152 = arith.addf %148, %151 : vector<1x128xf32>
    %153 = math.rsqrt %152 : vector<1x128xf32>
    %154 = vector.broadcast %153 : vector<1x128xf32> to vector<8x128xf32>
    %155 = arith.mulf %150, %154 : vector<8x128xf32>
    %156 = vector.broadcast %134 : vector<1x128xf32> to vector<8x128xf32>
    %157 = arith.mulf %155, %156 : vector<8x128xf32>
    %158 = vector.broadcast %135 : vector<1x128xf32> to vector<8x128xf32>
    %159 = arith.addf %157, %158 : vector<8x128xf32>
    %160 = arith.addf %159, %0 : vector<8x128xf32>
    %161 = arith.truncf %160 : vector<8x128xf32> to vector<8x128xbf16>
    %c0_52 = arith.constant 0 : index
    %c0_53 = arith.constant 0 : index
    %162 = vector.load %arg12[%c0_52, %c0_53] : memref<128x128xbf16, #tpu.memory_space<vmem>>, vector<128x128xbf16>
    %cst_54 = arith.constant dense<0.000000e+00> : vector<8x128xf32>
    %163 = tpu.matmul %161, %162, %cst_54 {dimension_numbers = #tpu.dot_dimension_numbers<[1], [0], [0], [1], [0, 0, 1, 1], [], []>} : vector<8x128xbf16>, vector<128x128xbf16>, vector<8x128xf32> -> vector<8x128xf32>
    %c0_55 = arith.constant 0 : index
    %c0_56 = arith.constant 0 : index
    %164 = vector.load %arg13[%c0_55, %c0_56] : memref<1x128xf32, #tpu.memory_space<vmem>>, vector<1x128xf32>
    %c0_57 = arith.constant 0 : index
    %c0_58 = arith.constant 0 : index
    %165 = vector.load %arg14[%c0_57, %c0_58] : memref<1x128xf32, #tpu.memory_space<vmem>>, vector<1x128xf32>
    %cst_59 = arith.constant dense<0.000000e+00> : vector<128xf32>
    %166 = vector.multi_reduction <add>, %163, %cst_59 [0] : vector<8x128xf32> to vector<128xf32>
    %167 = vector.shape_cast %166 : vector<128xf32> to vector<1x128xf32>
    %cst_60 = arith.constant 8.000000e+00 : f32
    %168 = vector.broadcast %cst_60 : f32 to vector<1x128xf32>
    %169 = arith.divf %167, %168 : vector<1x128xf32>
    %170 = arith.mulf %163, %163 : vector<8x128xf32>
    %cst_61 = arith.constant dense<0.000000e+00> : vector<128xf32>
    %171 = vector.multi_reduction <add>, %170, %cst_61 [0] : vector<8x128xf32> to vector<128xf32>
    %172 = vector.shape_cast %171 : vector<128xf32> to vector<1x128xf32>
    %cst_62 = arith.constant 8.000000e+00 : f32
    %173 = vector.broadcast %cst_62 : f32 to vector<1x128xf32>
    %174 = arith.divf %172, %173 : vector<1x128xf32>
    %175 = arith.mulf %169, %169 : vector<1x128xf32>
    %176 = arith.subf %174, %175 : vector<1x128xf32>
    %cst_63 = arith.constant 0.000000e+00 : f32
    %177 = vector.broadcast %cst_63 : f32 to vector<1x128xf32>
    %178 = arith.maximumf %176, %177 : vector<1x128xf32>
    %179 = vector.broadcast %169 : vector<1x128xf32> to vector<8x128xf32>
    %180 = arith.subf %163, %179 : vector<8x128xf32>
    %cst_64 = arith.constant 9.99999974E-6 : f32
    %181 = vector.broadcast %cst_64 : f32 to vector<1x128xf32>
    %182 = arith.addf %178, %181 : vector<1x128xf32>
    %183 = math.rsqrt %182 : vector<1x128xf32>
    %184 = vector.broadcast %183 : vector<1x128xf32> to vector<8x128xf32>
    %185 = arith.mulf %180, %184 : vector<8x128xf32>
    %186 = vector.broadcast %164 : vector<1x128xf32> to vector<8x128xf32>
    %187 = arith.mulf %185, %186 : vector<8x128xf32>
    %188 = vector.broadcast %165 : vector<1x128xf32> to vector<8x128xf32>
    %189 = arith.addf %187, %188 : vector<8x128xf32>
    %cst_65 = arith.constant 3.000000e+00 : f32
    %190 = vector.broadcast %cst_65 : f32 to vector<8x128xf32>
    %191 = arith.addf %189, %190 : vector<8x128xf32>
    %cst_66 = arith.constant 0.000000e+00 : f32
    %cst_67 = arith.constant 6.000000e+00 : f32
    %192 = vector.broadcast %cst_66 : f32 to vector<8x128xf32>
    %193 = arith.maximumf %192, %191 : vector<8x128xf32>
    %194 = vector.broadcast %cst_67 : f32 to vector<8x128xf32>
    %195 = arith.minimumf %194, %193 : vector<8x128xf32>
    %196 = arith.mulf %189, %195 : vector<8x128xf32>
    %cst_68 = arith.constant 0.166666672 : f32
    %197 = vector.broadcast %cst_68 : f32 to vector<8x128xf32>
    %198 = arith.mulf %196, %197 : vector<8x128xf32>
    %199 = arith.truncf %198 : vector<8x128xf32> to vector<8x128xbf16>
    %c0_69 = arith.constant 0 : index
    %c0_70 = arith.constant 0 : index
    %200 = vector.load %arg15[%c0_69, %c0_70] : memref<128x128xbf16, #tpu.memory_space<vmem>>, vector<128x128xbf16>
    %cst_71 = arith.constant dense<0.000000e+00> : vector<8x128xf32>
    %201 = tpu.matmul %199, %200, %cst_71 {dimension_numbers = #tpu.dot_dimension_numbers<[1], [0], [0], [1], [0, 0, 1, 1], [], []>} : vector<8x128xbf16>, vector<128x128xbf16>, vector<8x128xf32> -> vector<8x128xf32>
    %c0_72 = arith.constant 0 : index
    %c0_73 = arith.constant 0 : index
    %202 = vector.load %arg16[%c0_72, %c0_73] : memref<1x128xf32, #tpu.memory_space<vmem>>, vector<1x128xf32>
    %203 = vector.broadcast %202 : vector<1x128xf32> to vector<8x128xf32>
    %204 = arith.addf %201, %203 : vector<8x128xf32>
    %205 = arith.addf %160, %204 : vector<8x128xf32>
    %c0_74 = arith.constant 0 : index
    %c0_75 = arith.constant 0 : index
    %206 = vector.load %arg17[%c0_74, %c0_75] : memref<8x128xf32, #tpu.memory_space<vmem>>, vector<8x128xf32>
    tpu.vector_store %arg17[%c0_74, %c0_75], %205 {strides = array<i32>} : memref<8x128xf32, #tpu.memory_space<vmem>>, vector<8x128xf32>,
    return
  }
}

module attributes {stable_mosaic.version = 11 : i64} {
  func.func @kernel(%arg0: i32, %arg1: memref<2x128xf32, #tpu.memory_space<vmem>>, %arg2: memref<128x128xbf16, #tpu.memory_space<vmem>>, %arg3: memref<1x128xf32, #tpu.memory_space<vmem>>, %arg4: memref<1x128xf32, #tpu.memory_space<vmem>>, %arg5: memref<1x128xf32, #tpu.memory_space<vmem>>, %arg6: memref<2x128xf32, #tpu.memory_space<vmem>>) attributes {dimension_semantics = [#tpu.dimension_semantics<parallel>], iteration_bounds = array<i64: 1>, scalar_prefetch = 0 : i64, scratch_operands = 0 : i64, tpu.core_type = #tpu.core_type<tc>, window_params = [{transform_indices = @transform_0, window_bounds = array<i64: 2, 128>}, {pipeline_mode = #tpu.pipeline_mode<synchronous>, transform_indices = @transform_1, window_bounds = array<i64: 128, 128>}, {pipeline_mode = #tpu.pipeline_mode<synchronous>, transform_indices = @transform_2, window_bounds = array<i64: 1, 128>}, {pipeline_mode = #tpu.pipeline_mode<synchronous>, transform_indices = @transform_3, window_bounds = array<i64: 1, 128>}, {pipeline_mode = #tpu.pipeline_mode<synchronous>, transform_indices = @transform_4, window_bounds = array<i64: 1, 128>}, {transform_indices = @transform_5, window_bounds = array<i64: 2, 128>}]} {
    %c0 = arith.constant 0 : index
    %c0_0 = arith.constant 0 : index
    %0 = vector.load %arg1[%c0, %c0_0] : memref<2x128xf32, #tpu.memory_space<vmem>>, vector<2x128xf32>
    %1 = arith.truncf %0 : vector<2x128xf32> to vector<2x128xbf16>
    %c0_1 = arith.constant 0 : index
    %c0_2 = arith.constant 0 : index
    %2 = vector.load %arg2[%c0_1, %c0_2] : memref<128x128xbf16, #tpu.memory_space<vmem>>, vector<128x128xbf16>
    %cst = arith.constant dense<0.000000e+00> : vector<2x128xf32>
    %3 = tpu.matmul %1, %2, %cst {dimension_numbers = #tpu.dot_dimension_numbers<[1], [0], [0], [1], [0, 0, 1, 1], [], []>} : vector<2x128xbf16>, vector<128x128xbf16>, vector<2x128xf32> -> vector<2x128xf32>
    %c0_3 = arith.constant 0 : index
    %c0_4 = arith.constant 0 : index
    %4 = vector.load %arg3[%c0_3, %c0_4] : memref<1x128xf32, #tpu.memory_space<vmem>>, vector<1x128xf32>
    %5 = vector.broadcast %4 : vector<1x128xf32> to vector<2x128xf32>
    %6 = arith.addf %3, %5 : vector<2x128xf32>
    %cst_5 = arith.constant 0.000000e+00 : f32
    %7 = vector.broadcast %cst_5 : f32 to vector<2x128xf32>
    %8 = arith.cmpf oge, %6, %7 : vector<2x128xf32>
    %cst_6 = arith.constant 5.000000e-02 : f32
    %9 = vector.broadcast %cst_6 : f32 to vector<2x128xf32>
    %10 = arith.mulf %9, %6 : vector<2x128xf32>
    %11 = arith.select %8, %6, %10 : vector<2x128xi1>, vector<2x128xf32>
    %c0_7 = arith.constant 0 : index
    %c0_8 = arith.constant 0 : index
    %12 = vector.load %arg4[%c0_7, %c0_8] : memref<1x128xf32, #tpu.memory_space<vmem>>, vector<1x128xf32>
    %c0_9 = arith.constant 0 : index
    %c0_10 = arith.constant 0 : index
    %13 = vector.load %arg5[%c0_9, %c0_10] : memref<1x128xf32, #tpu.memory_space<vmem>>, vector<1x128xf32>
    %cst_11 = arith.constant dense<0.000000e+00> : vector<2xf32>
    %14 = vector.multi_reduction <add>, %11, %cst_11 [1] : vector<2x128xf32> to vector<2xf32>
    %15 = vector.shape_cast %14 : vector<2xf32> to vector<2x1xf32>
    %cst_12 = arith.constant 3.200000e+01 : f32
    %16 = vector.broadcast %cst_12 : f32 to vector<2x1xf32>
    %17 = arith.divf %15, %16 : vector<2x1xf32>
    %18 = arith.mulf %11, %11 : vector<2x128xf32>
    %cst_13 = arith.constant dense<0.000000e+00> : vector<2xf32>
    %19 = vector.multi_reduction <add>, %18, %cst_13 [1] : vector<2x128xf32> to vector<2xf32>
    %20 = vector.shape_cast %19 : vector<2xf32> to vector<2x1xf32>
    %cst_14 = arith.constant 3.200000e+01 : f32
    %21 = vector.broadcast %cst_14 : f32 to vector<2x1xf32>
    %22 = arith.divf %20, %21 : vector<2x1xf32>
    %23 = arith.mulf %17, %17 : vector<2x1xf32>
    %24 = arith.subf %22, %23 : vector<2x1xf32>
    %cst_15 = arith.constant 0.000000e+00 : f32
    %25 = vector.broadcast %cst_15 : f32 to vector<2x1xf32>
    %26 = arith.maximumf %24, %25 : vector<2x1xf32>
    %27 = vector.broadcast %17 : vector<2x1xf32> to vector<2x128xf32>
    %28 = arith.subf %11, %27 : vector<2x128xf32>
    %cst_16 = arith.constant 9.99999974E-6 : f32
    %29 = vector.broadcast %cst_16 : f32 to vector<2x1xf32>
    %30 = arith.addf %26, %29 : vector<2x1xf32>
    %31 = math.rsqrt %30 : vector<2x1xf32>
    %32 = vector.broadcast %31 : vector<2x1xf32> to vector<2x128xf32>
    %33 = arith.mulf %28, %32 : vector<2x128xf32>
    %34 = vector.broadcast %12 : vector<1x128xf32> to vector<2x128xf32>
    %35 = arith.mulf %33, %34 : vector<2x128xf32>
    %36 = vector.broadcast %13 : vector<1x128xf32> to vector<2x128xf32>
    %37 = arith.addf %35, %36 : vector<2x128xf32>
    %c0_17 = arith.constant 0 : index
    %c0_18 = arith.constant 0 : index
    %38 = vector.load %arg6[%c0_17, %c0_18] : memref<2x128xf32, #tpu.memory_space<vmem>>, vector<2x128xf32>
    tpu.vector_store %arg6[%c0_17, %c0_18], %37 {strides = array<i32>} : memref<2x128xf32, #tpu.memory_space<vmem>>, vector<2x128xf32>,
    return
  }
  func.func @transform_0(%arg0: i32) -> (i32, i32) {
    %c0_i32 = arith.constant 0 : i32
    %c0_i32_0 = arith.constant 0 : i32
    return %arg0, %c0_i32 : i32, i32
  }
  func.func @transform_1(%arg0: i32) -> (i32, i32) {
    %c0_i32 = arith.constant 0 : i32
    %c0_i32_0 = arith.constant 0 : i32
    %c0_i32_1 = arith.constant 0 : i32
    return %c0_i32, %c0_i32_0 : i32, i32
  }
  func.func @transform_2(%arg0: i32) -> (i32, i32) {
    %c0_i32 = arith.constant 0 : i32
    %c0_i32_0 = arith.constant 0 : i32
    %c0_i32_1 = arith.constant 0 : i32
    return %c0_i32, %c0_i32_0 : i32, i32
  }
  func.func @transform_3(%arg0: i32) -> (i32, i32) {
    %c0_i32 = arith.constant 0 : i32
    %c0_i32_0 = arith.constant 0 : i32
    %c0_i32_1 = arith.constant 0 : i32
    return %c0_i32, %c0_i32_0 : i32, i32
  }
  func.func @transform_4(%arg0: i32) -> (i32, i32) {
    %c0_i32 = arith.constant 0 : i32
    %c0_i32_0 = arith.constant 0 : i32
    %c0_i32_1 = arith.constant 0 : i32
    return %c0_i32, %c0_i32_0 : i32, i32
  }
  func.func @transform_5(%arg0: i32) -> (i32, i32) {
    %c0_i32 = arith.constant 0 : i32
    %c0_i32_0 = arith.constant 0 : i32
    return %arg0, %c0_i32 : i32, i32
  }
}

module attributes {stable_mosaic.version = 11 : i64} {
  func.func @kernel(%arg0: memref<12x128xf32, #tpu.memory_space<vmem>>, %arg1: memref<2x128xf32, #tpu.memory_space<vmem>>, %arg2: memref<128x96xbf16, #tpu.memory_space<vmem>>, %arg3: memref<1x96xf32, #tpu.memory_space<vmem>>, %arg4: memref<32x128xbf16, #tpu.memory_space<vmem>>, %arg5: memref<1x128xf32, #tpu.memory_space<vmem>>, %arg6: memref<1x128xf32, #tpu.memory_space<vmem>>, %arg7: memref<1x128xf32, #tpu.memory_space<vmem>>, %arg8: memref<24x24xf32, #tpu.memory_space<vmem>>, %arg9: memref<128x32xbf16, #tpu.memory_space<vmem>>, %arg10: memref<1x32xf32, #tpu.memory_space<vmem>>, %arg11: memref<128x64xbf16, #tpu.memory_space<vmem>>, %arg12: memref<1x64xf32, #tpu.memory_space<vmem>>, %arg13: memref<32x128xbf16, #tpu.memory_space<vmem>>, %arg14: memref<1x128xf32, #tpu.memory_space<vmem>>, %arg15: memref<1x128xf32, #tpu.memory_space<vmem>>, %arg16: memref<1x128xf32, #tpu.memory_space<vmem>>, %arg17: memref<24x4xf32, #tpu.memory_space<vmem>>, %arg18: memref<128x128xbf16, #tpu.memory_space<vmem>>, %arg19: memref<1x128xf32, #tpu.memory_space<vmem>>, %arg20: memref<12x128xf32, #tpu.memory_space<vmem>>, %arg21: memref<12x128xf32, #tpu.memory_space<vmem>>) attributes {dimension_semantics = [], scalar_prefetch = 0 : i64, scratch_operands = 0 : i64, tpu.core_type = #tpu.core_type<tc>} {
    %c0 = arith.constant 0 : index
    %c0_0 = arith.constant 0 : index
    %0 = vector.load %arg0[%c0, %c0_0] : memref<12x128xf32, #tpu.memory_space<vmem>>, vector<12x128xf32>
    %1 = arith.truncf %0 : vector<12x128xf32> to vector<12x128xbf16>
    %c0_1 = arith.constant 0 : index
    %c0_2 = arith.constant 0 : index
    %2 = vector.load %arg2[%c0_1, %c0_2] : memref<128x96xbf16, #tpu.memory_space<vmem>>, vector<128x96xbf16>
    %cst = arith.constant dense<0.000000e+00> : vector<12x96xf32>
    %3 = tpu.matmul %1, %2, %cst {dimension_numbers = #tpu.dot_dimension_numbers<[1], [0], [0], [1], [0, 0, 1, 1], [], []>} : vector<12x128xbf16>, vector<128x96xbf16>, vector<12x96xf32> -> vector<12x96xf32>
    %c0_3 = arith.constant 0 : index
    %c0_4 = arith.constant 0 : index
    %4 = vector.load %arg3[%c0_3, %c0_4] : memref<1x96xf32, #tpu.memory_space<vmem>>, vector<1x96xf32>
    %5 = vector.broadcast %4 : vector<1x96xf32> to vector<12x96xf32>
    %6 = arith.addf %3, %5 : vector<12x96xf32>
    %7 = vector.extract_strided_slice %6 {offsets = [0, 0], sizes = [12, 32], strides = [1, 1]} : vector<12x96xf32> to vector<12x32xf32>
    %8 = vector.extract_strided_slice %6 {offsets = [0, 32], sizes = [12, 32], strides = [1, 1]} : vector<12x96xf32> to vector<12x32xf32>
    %9 = vector.extract_strided_slice %6 {offsets = [0, 64], sizes = [12, 32], strides = [1, 1]} : vector<12x96xf32> to vector<12x32xf32>
    %c0_5 = arith.constant 0 : index
    %c0_6 = arith.constant 0 : index
    %10 = vector.load %arg8[%c0_5, %c0_6] : memref<24x24xf32, #tpu.memory_space<vmem>>, vector<24x24xf32>
    %11 = vector.extract_strided_slice %7 {offsets = [0, 0], sizes = [6, 16], strides = [1, 1]} : vector<12x32xf32> to vector<6x16xf32>
    %12 = vector.extract_strided_slice %7 {offsets = [0, 16], sizes = [6, 16], strides = [1, 1]} : vector<12x32xf32> to vector<6x16xf32>
    %13 = vector.extract_strided_slice %7 {offsets = [6, 0], sizes = [6, 16], strides = [1, 1]} : vector<12x32xf32> to vector<6x16xf32>
    %14 = vector.extract_strided_slice %7 {offsets = [6, 16], sizes = [6, 16], strides = [1, 1]} : vector<12x32xf32> to vector<6x16xf32>
    %15 = tpu.concatenate %11, %12, %13, %14 in 0 : vector<6x16xf32>, vector<6x16xf32>, vector<6x16xf32>, vector<6x16xf32> -> vector<24x16xf32>
    %16 = arith.truncf %15 : vector<24x16xf32> to vector<24x16xbf16>
    %17 = vector.extract_strided_slice %8 {offsets = [0, 0], sizes = [6, 16], strides = [1, 1]} : vector<12x32xf32> to vector<6x16xf32>
    %18 = vector.extract_strided_slice %8 {offsets = [0, 16], sizes = [6, 16], strides = [1, 1]} : vector<12x32xf32> to vector<6x16xf32>
    %19 = vector.extract_strided_slice %8 {offsets = [6, 0], sizes = [6, 16], strides = [1, 1]} : vector<12x32xf32> to vector<6x16xf32>
    %20 = vector.extract_strided_slice %8 {offsets = [6, 16], sizes = [6, 16], strides = [1, 1]} : vector<12x32xf32> to vector<6x16xf32>
    %21 = tpu.concatenate %17, %18, %19, %20 in 0 : vector<6x16xf32>, vector<6x16xf32>, vector<6x16xf32>, vector<6x16xf32> -> vector<24x16xf32>
    %22 = arith.truncf %21 : vector<24x16xf32> to vector<24x16xbf16>
    %23 = vector.extract_strided_slice %9 {offsets = [0, 0], sizes = [6, 16], strides = [1, 1]} : vector<12x32xf32> to vector<6x16xf32>
    %24 = vector.extract_strided_slice %9 {offsets = [0, 16], sizes = [6, 16], strides = [1, 1]} : vector<12x32xf32> to vector<6x16xf32>
    %25 = vector.extract_strided_slice %9 {offsets = [6, 0], sizes = [6, 16], strides = [1, 1]} : vector<12x32xf32> to vector<6x16xf32>
    %26 = vector.extract_strided_slice %9 {offsets = [6, 16], sizes = [6, 16], strides = [1, 1]} : vector<12x32xf32> to vector<6x16xf32>
    %27 = tpu.concatenate %23, %24, %25, %26 in 0 : vector<6x16xf32>, vector<6x16xf32>, vector<6x16xf32>, vector<6x16xf32> -> vector<24x16xf32>
    %28 = arith.truncf %27 : vector<24x16xf32> to vector<24x16xbf16>
    %cst_7 = arith.constant dense<0.000000e+00> : vector<24x24xf32>
    %29 = tpu.matmul %16, %22, %cst_7 {dimension_numbers = #tpu.dot_dimension_numbers<[1], [1], [0], [0], [0, 0, 1, 0], [], []>} : vector<24x16xbf16>, vector<24x16xbf16>, vector<24x24xf32> -> vector<24x24xf32>
    %cst_8 = arith.constant 2.500000e-01 : f32
    %30 = vector.broadcast %cst_8 : f32 to vector<24x24xf32>
    %31 = arith.mulf %29, %30 : vector<24x24xf32>
    %32 = arith.addf %31, %10 : vector<24x24xf32>
    %cst_9 = arith.constant dense<0xFF800000> : vector<24xf32>
    %33 = vector.multi_reduction <maximumf>, %32, %cst_9 [1] : vector<24x24xf32> to vector<24xf32>
    %34 = vector.shape_cast %33 : vector<24xf32> to vector<24x1xf32>
    %35 = vector.broadcast %34 : vector<24x1xf32> to vector<24x24xf32>
    %36 = arith.subf %32, %35 : vector<24x24xf32>
    %37 = math.exp %36 : vector<24x24xf32>
    %cst_10 = arith.constant dense<0.000000e+00> : vector<24xf32>
    %38 = vector.multi_reduction <add>, %37, %cst_10 [1] : vector<24x24xf32> to vector<24xf32>
    %39 = vector.shape_cast %38 : vector<24xf32> to vector<24x1xf32>
    %40 = tpu.reciprocal %39 {approx = true} : vector<24x1xf32> -> vector<24x1xf32>
    %41 = vector.broadcast %40 : vector<24x1xf32> to vector<24x24xf32>
    %42 = arith.mulf %37, %41 : vector<24x24xf32>
    %43 = arith.truncf %42 : vector<24x24xf32> to vector<24x24xbf16>
    %cst_11 = arith.constant dense<0.000000e+00> : vector<24x16xf32>
    %44 = tpu.matmul %43, %28, %cst_11 {dimension_numbers = #tpu.dot_dimension_numbers<[1], [0], [0], [1], [0, 0, 1, 1], [], []>} : vector<24x24xbf16>, vector<24x16xbf16>, vector<24x16xf32> -> vector<24x16xf32>
    %45 = vector.extract_strided_slice %44 {offsets = [0, 0], sizes = [6, 16], strides = [1, 1]} : vector<24x16xf32> to vector<6x16xf32>
    %46 = vector.extract_strided_slice %44 {offsets = [6, 0], sizes = [6, 16], strides = [1, 1]} : vector<24x16xf32> to vector<6x16xf32>
    %47 = tpu.concatenate %45, %46 in 1 : vector<6x16xf32>, vector<6x16xf32> -> vector<6x32xf32>
    %48 = vector.extract_strided_slice %44 {offsets = [12, 0], sizes = [6, 16], strides = [1, 1]} : vector<24x16xf32> to vector<6x16xf32>
    %49 = vector.extract_strided_slice %44 {offsets = [18, 0], sizes = [6, 16], strides = [1, 1]} : vector<24x16xf32> to vector<6x16xf32>
    %50 = tpu.concatenate %48, %49 in 1 : vector<6x16xf32>, vector<6x16xf32> -> vector<6x32xf32>
    %51 = tpu.concatenate %47, %50 in 0 : vector<6x32xf32>, vector<6x32xf32> -> vector<12x32xf32>
    %52 = arith.truncf %51 : vector<12x32xf32> to vector<12x32xbf16>
    %c0_12 = arith.constant 0 : index
    %c0_13 = arith.constant 0 : index
    %53 = vector.load %arg4[%c0_12, %c0_13] : memref<32x128xbf16, #tpu.memory_space<vmem>>, vector<32x128xbf16>
    %cst_14 = arith.constant dense<0.000000e+00> : vector<12x128xf32>
    %54 = tpu.matmul %52, %53, %cst_14 {dimension_numbers = #tpu.dot_dimension_numbers<[1], [0], [0], [1], [0, 0, 1, 1], [], []>} : vector<12x32xbf16>, vector<32x128xbf16>, vector<12x128xf32> -> vector<12x128xf32>
    %c0_15 = arith.constant 0 : index
    %c0_16 = arith.constant 0 : index
    %55 = vector.load %arg5[%c0_15, %c0_16] : memref<1x128xf32, #tpu.memory_space<vmem>>, vector<1x128xf32>
    %56 = vector.broadcast %55 : vector<1x128xf32> to vector<12x128xf32>
    %57 = arith.addf %54, %56 : vector<12x128xf32>
    %58 = arith.addf %57, %0 : vector<12x128xf32>
    %c0_17 = arith.constant 0 : index
    %c0_18 = arith.constant 0 : index
    %59 = vector.load %arg6[%c0_17, %c0_18] : memref<1x128xf32, #tpu.memory_space<vmem>>, vector<1x128xf32>
    %c0_19 = arith.constant 0 : index
    %c0_20 = arith.constant 0 : index
    %60 = vector.load %arg7[%c0_19, %c0_20] : memref<1x128xf32, #tpu.memory_space<vmem>>, vector<1x128xf32>
    %cst_21 = arith.constant dense<0.000000e+00> : vector<12xf32>
    %61 = vector.multi_reduction <add>, %58, %cst_21 [1] : vector<12x128xf32> to vector<12xf32>
    %62 = vector.shape_cast %61 : vector<12xf32> to vector<12x1xf32>
    %cst_22 = arith.constant 3.200000e+01 : f32
    %63 = vector.broadcast %cst_22 : f32 to vector<12x1xf32>
    %64 = arith.divf %62, %63 : vector<12x1xf32>
    %65 = arith.mulf %58, %58 : vector<12x128xf32>
    %cst_23 = arith.constant dense<0.000000e+00> : vector<12xf32>
    %66 = vector.multi_reduction <add>, %65, %cst_23 [1] : vector<12x128xf32> to vector<12xf32>
    %67 = vector.shape_cast %66 : vector<12xf32> to vector<12x1xf32>
    %cst_24 = arith.constant 3.200000e+01 : f32
    %68 = vector.broadcast %cst_24 : f32 to vector<12x1xf32>
    %69 = arith.divf %67, %68 : vector<12x1xf32>
    %70 = arith.mulf %64, %64 : vector<12x1xf32>
    %71 = arith.subf %69, %70 : vector<12x1xf32>
    %cst_25 = arith.constant 0.000000e+00 : f32
    %72 = vector.broadcast %cst_25 : f32 to vector<12x1xf32>
    %73 = arith.maximumf %71, %72 : vector<12x1xf32>
    %74 = vector.broadcast %64 : vector<12x1xf32> to vector<12x128xf32>
    %75 = arith.subf %58, %74 : vector<12x128xf32>
    %cst_26 = arith.constant 9.99999974E-6 : f32
    %76 = vector.broadcast %cst_26 : f32 to vector<12x1xf32>
    %77 = arith.addf %73, %76 : vector<12x1xf32>
    %78 = math.rsqrt %77 : vector<12x1xf32>
    %79 = vector.broadcast %78 : vector<12x1xf32> to vector<12x128xf32>
    %80 = arith.mulf %75, %79 : vector<12x128xf32>
    %81 = vector.broadcast %59 : vector<1x128xf32> to vector<12x128xf32>
    %82 = arith.mulf %80, %81 : vector<12x128xf32>
    %83 = vector.broadcast %60 : vector<1x128xf32> to vector<12x128xf32>
    %84 = arith.addf %82, %83 : vector<12x128xf32>
    %c0_27 = arith.constant 0 : index
    %c0_28 = arith.constant 0 : index
    %85 = vector.load %arg1[%c0_27, %c0_28] : memref<2x128xf32, #tpu.memory_space<vmem>>, vector<2x128xf32>
    %86 = arith.truncf %84 : vector<12x128xf32> to vector<12x128xbf16>
    %c0_29 = arith.constant 0 : index
    %c0_30 = arith.constant 0 : index
    %87 = vector.load %arg9[%c0_29, %c0_30] : memref<128x32xbf16, #tpu.memory_space<vmem>>, vector<128x32xbf16>
    %cst_31 = arith.constant dense<0.000000e+00> : vector<12x32xf32>
    %88 = tpu.matmul %86, %87, %cst_31 {dimension_numbers = #tpu.dot_dimension_numbers<[1], [0], [0], [1], [0, 0, 1, 1], [], []>} : vector<12x128xbf16>, vector<128x32xbf16>, vector<12x32xf32> -> vector<12x32xf32>
    %c0_32 = arith.constant 0 : index
    %c0_33 = arith.constant 0 : index
    %89 = vector.load %arg10[%c0_32, %c0_33] : memref<1x32xf32, #tpu.memory_space<vmem>>, vector<1x32xf32>
    %90 = vector.broadcast %89 : vector<1x32xf32> to vector<12x32xf32>
    %91 = arith.addf %88, %90 : vector<12x32xf32>
    %92 = arith.truncf %85 : vector<2x128xf32> to vector<2x128xbf16>
    %c0_34 = arith.constant 0 : index
    %c0_35 = arith.constant 0 : index
    %93 = vector.load %arg11[%c0_34, %c0_35] : memref<128x64xbf16, #tpu.memory_space<vmem>>, vector<128x64xbf16>
    %cst_36 = arith.constant dense<0.000000e+00> : vector<2x64xf32>
    %94 = tpu.matmul %92, %93, %cst_36 {dimension_numbers = #tpu.dot_dimension_numbers<[1], [0], [0], [1], [0, 0, 1, 1], [], []>} : vector<2x128xbf16>, vector<128x64xbf16>, vector<2x64xf32> -> vector<2x64xf32>
    %c0_37 = arith.constant 0 : index
    %c0_38 = arith.constant 0 : index
    %95 = vector.load %arg12[%c0_37, %c0_38] : memref<1x64xf32, #tpu.memory_space<vmem>>, vector<1x64xf32>
    %96 = vector.broadcast %95 : vector<1x64xf32> to vector<2x64xf32>
    %97 = arith.addf %94, %96 : vector<2x64xf32>
    %98 = vector.extract_strided_slice %97 {offsets = [0, 0], sizes = [2, 32], strides = [1, 1]} : vector<2x64xf32> to vector<2x32xf32>
    %99 = vector.extract_strided_slice %97 {offsets = [0, 32], sizes = [2, 32], strides = [1, 1]} : vector<2x64xf32> to vector<2x32xf32>
    %c0_39 = arith.constant 0 : index
    %c0_40 = arith.constant 0 : index
    %100 = vector.load %arg17[%c0_39, %c0_40] : memref<24x4xf32, #tpu.memory_space<vmem>>, vector<24x4xf32>
    %101 = vector.extract_strided_slice %91 {offsets = [0, 0], sizes = [6, 16], strides = [1, 1]} : vector<12x32xf32> to vector<6x16xf32>
    %102 = vector.extract_strided_slice %91 {offsets = [0, 16], sizes = [6, 16], strides = [1, 1]} : vector<12x32xf32> to vector<6x16xf32>
    %103 = vector.extract_strided_slice %91 {offsets = [6, 0], sizes = [6, 16], strides = [1, 1]} : vector<12x32xf32> to vector<6x16xf32>
    %104 = vector.extract_strided_slice %91 {offsets = [6, 16], sizes = [6, 16], strides = [1, 1]} : vector<12x32xf32> to vector<6x16xf32>
    %105 = tpu.concatenate %101, %102, %103, %104 in 0 : vector<6x16xf32>, vector<6x16xf32>, vector<6x16xf32>, vector<6x16xf32> -> vector<24x16xf32>
    %106 = arith.truncf %105 : vector<24x16xf32> to vector<24x16xbf16>
    %107 = vector.extract_strided_slice %98 {offsets = [0, 0], sizes = [1, 16], strides = [1, 1]} : vector<2x32xf32> to vector<1x16xf32>
    %108 = vector.extract_strided_slice %98 {offsets = [0, 16], sizes = [1, 16], strides = [1, 1]} : vector<2x32xf32> to vector<1x16xf32>
    %109 = vector.extract_strided_slice %98 {offsets = [1, 0], sizes = [1, 16], strides = [1, 1]} : vector<2x32xf32> to vector<1x16xf32>
    %110 = vector.extract_strided_slice %98 {offsets = [1, 16], sizes = [1, 16], strides = [1, 1]} : vector<2x32xf32> to vector<1x16xf32>
    %111 = tpu.concatenate %107, %108, %109, %110 in 0 : vector<1x16xf32>, vector<1x16xf32>, vector<1x16xf32>, vector<1x16xf32> -> vector<4x16xf32>
    %112 = arith.truncf %111 : vector<4x16xf32> to vector<4x16xbf16>
    %113 = vector.extract_strided_slice %99 {offsets = [0, 0], sizes = [1, 16], strides = [1, 1]} : vector<2x32xf32> to vector<1x16xf32>
    %114 = vector.extract_strided_slice %99 {offsets = [0, 16], sizes = [1, 16], strides = [1, 1]} : vector<2x32xf32> to vector<1x16xf32>
    %115 = vector.extract_strided_slice %99 {offsets = [1, 0], sizes = [1, 16], strides = [1, 1]} : vector<2x32xf32> to vector<1x16xf32>
    %116 = vector.extract_strided_slice %99 {offsets = [1, 16], sizes = [1, 16], strides = [1, 1]} : vector<2x32xf32> to vector<1x16xf32>
    %117 = tpu.concatenate %113, %114, %115, %116 in 0 : vector<1x16xf32>, vector<1x16xf32>, vector<1x16xf32>, vector<1x16xf32> -> vector<4x16xf32>
    %118 = arith.truncf %117 : vector<4x16xf32> to vector<4x16xbf16>
    %cst_41 = arith.constant dense<0.000000e+00> : vector<24x4xf32>
    %119 = tpu.matmul %106, %112, %cst_41 {dimension_numbers = #tpu.dot_dimension_numbers<[1], [1], [0], [0], [0, 0, 1, 0], [], []>} : vector<24x16xbf16>, vector<4x16xbf16>, vector<24x4xf32> -> vector<24x4xf32>
    %cst_42 = arith.constant 2.500000e-01 : f32
    %120 = vector.broadcast %cst_42 : f32 to vector<24x4xf32>
    %121 = arith.mulf %119, %120 : vector<24x4xf32>
    %122 = arith.addf %121, %100 : vector<24x4xf32>
    %cst_43 = arith.constant dense<0xFF800000> : vector<24xf32>
    %123 = vector.multi_reduction <maximumf>, %122, %cst_43 [1] : vector<24x4xf32> to vector<24xf32>
    %124 = vector.shape_cast %123 : vector<24xf32> to vector<24x1xf32>
    %125 = vector.broadcast %124 : vector<24x1xf32> to vector<24x4xf32>
    %126 = arith.subf %122, %125 : vector<24x4xf32>
    %127 = math.exp %126 : vector<24x4xf32>
    %cst_44 = arith.constant dense<0.000000e+00> : vector<24xf32>
    %128 = vector.multi_reduction <add>, %127, %cst_44 [1] : vector<24x4xf32> to vector<24xf32>
    %129 = vector.shape_cast %128 : vector<24xf32> to vector<24x1xf32>
    %130 = tpu.reciprocal %129 {approx = true} : vector<24x1xf32> -> vector<24x1xf32>
    %131 = vector.broadcast %130 : vector<24x1xf32> to vector<24x4xf32>
    %132 = arith.mulf %127, %131 : vector<24x4xf32>
    %133 = arith.truncf %132 : vector<24x4xf32> to vector<24x4xbf16>
    %cst_45 = arith.constant dense<0.000000e+00> : vector<24x16xf32>
    %134 = tpu.matmul %133, %118, %cst_45 {dimension_numbers = #tpu.dot_dimension_numbers<[1], [0], [0], [1], [0, 0, 1, 1], [], []>} : vector<24x4xbf16>, vector<4x16xbf16>, vector<24x16xf32> -> vector<24x16xf32>
    %135 = vector.extract_strided_slice %134 {offsets = [0, 0], sizes = [6, 16], strides = [1, 1]} : vector<24x16xf32> to vector<6x16xf32>
    %136 = vector.extract_strided_slice %134 {offsets = [6, 0], sizes = [6, 16], strides = [1, 1]} : vector<24x16xf32> to vector<6x16xf32>
    %137 = tpu.concatenate %135, %136 in 1 : vector<6x16xf32>, vector<6x16xf32> -> vector<6x32xf32>
    %138 = vector.extract_strided_slice %134 {offsets = [12, 0], sizes = [6, 16], strides = [1, 1]} : vector<24x16xf32> to vector<6x16xf32>
    %139 = vector.extract_strided_slice %134 {offsets = [18, 0], sizes = [6, 16], strides = [1, 1]} : vector<24x16xf32> to vector<6x16xf32>
    %140 = tpu.concatenate %138, %139 in 1 : vector<6x16xf32>, vector<6x16xf32> -> vector<6x32xf32>
    %141 = tpu.concatenate %137, %140 in 0 : vector<6x32xf32>, vector<6x32xf32> -> vector<12x32xf32>
    %142 = arith.truncf %141 : vector<12x32xf32> to vector<12x32xbf16>
    %c0_46 = arith.constant 0 : index
    %c0_47 = arith.constant 0 : index
    %143 = vector.load %arg13[%c0_46, %c0_47] : memref<32x128xbf16, #tpu.memory_space<vmem>>, vector<32x128xbf16>
    %cst_48 = arith.constant dense<0.000000e+00> : vector<12x128xf32>
    %144 = tpu.matmul %142, %143, %cst_48 {dimension_numbers = #tpu.dot_dimension_numbers<[1], [0], [0], [1], [0, 0, 1, 1], [], []>} : vector<12x32xbf16>, vector<32x128xbf16>, vector<12x128xf32> -> vector<12x128xf32>
    %c0_49 = arith.constant 0 : index
    %c0_50 = arith.constant 0 : index
    %145 = vector.load %arg14[%c0_49, %c0_50] : memref<1x128xf32, #tpu.memory_space<vmem>>, vector<1x128xf32>
    %146 = vector.broadcast %145 : vector<1x128xf32> to vector<12x128xf32>
    %147 = arith.addf %144, %146 : vector<12x128xf32>
    %148 = arith.addf %147, %84 : vector<12x128xf32>
    %c0_51 = arith.constant 0 : index
    %c0_52 = arith.constant 0 : index
    %149 = vector.load %arg15[%c0_51, %c0_52] : memref<1x128xf32, #tpu.memory_space<vmem>>, vector<1x128xf32>
    %c0_53 = arith.constant 0 : index
    %c0_54 = arith.constant 0 : index
    %150 = vector.load %arg16[%c0_53, %c0_54] : memref<1x128xf32, #tpu.memory_space<vmem>>, vector<1x128xf32>
    %cst_55 = arith.constant dense<0.000000e+00> : vector<12xf32>
    %151 = vector.multi_reduction <add>, %148, %cst_55 [1] : vector<12x128xf32> to vector<12xf32>
    %152 = vector.shape_cast %151 : vector<12xf32> to vector<12x1xf32>
    %cst_56 = arith.constant 3.200000e+01 : f32
    %153 = vector.broadcast %cst_56 : f32 to vector<12x1xf32>
    %154 = arith.divf %152, %153 : vector<12x1xf32>
    %155 = arith.mulf %148, %148 : vector<12x128xf32>
    %cst_57 = arith.constant dense<0.000000e+00> : vector<12xf32>
    %156 = vector.multi_reduction <add>, %155, %cst_57 [1] : vector<12x128xf32> to vector<12xf32>
    %157 = vector.shape_cast %156 : vector<12xf32> to vector<12x1xf32>
    %cst_58 = arith.constant 3.200000e+01 : f32
    %158 = vector.broadcast %cst_58 : f32 to vector<12x1xf32>
    %159 = arith.divf %157, %158 : vector<12x1xf32>
    %160 = arith.mulf %154, %154 : vector<12x1xf32>
    %161 = arith.subf %159, %160 : vector<12x1xf32>
    %cst_59 = arith.constant 0.000000e+00 : f32
    %162 = vector.broadcast %cst_59 : f32 to vector<12x1xf32>
    %163 = arith.maximumf %161, %162 : vector<12x1xf32>
    %164 = vector.broadcast %154 : vector<12x1xf32> to vector<12x128xf32>
    %165 = arith.subf %148, %164 : vector<12x128xf32>
    %cst_60 = arith.constant 9.99999974E-6 : f32
    %166 = vector.broadcast %cst_60 : f32 to vector<12x1xf32>
    %167 = arith.addf %163, %166 : vector<12x1xf32>
    %168 = math.rsqrt %167 : vector<12x1xf32>
    %169 = vector.broadcast %168 : vector<12x1xf32> to vector<12x128xf32>
    %170 = arith.mulf %165, %169 : vector<12x128xf32>
    %171 = vector.broadcast %149 : vector<1x128xf32> to vector<12x128xf32>
    %172 = arith.mulf %170, %171 : vector<12x128xf32>
    %173 = vector.broadcast %150 : vector<1x128xf32> to vector<12x128xf32>
    %174 = arith.addf %172, %173 : vector<12x128xf32>
    %175 = arith.truncf %174 : vector<12x128xf32> to vector<12x128xbf16>
    %c0_61 = arith.constant 0 : index
    %c0_62 = arith.constant 0 : index
    %176 = vector.load %arg18[%c0_61, %c0_62] : memref<128x128xbf16, #tpu.memory_space<vmem>>, vector<128x128xbf16>
    %cst_63 = arith.constant dense<0.000000e+00> : vector<12x128xf32>
    %177 = tpu.matmul %175, %176, %cst_63 {dimension_numbers = #tpu.dot_dimension_numbers<[1], [0], [0], [1], [0, 0, 1, 1], [], []>} : vector<12x128xbf16>, vector<128x128xbf16>, vector<12x128xf32> -> vector<12x128xf32>
    %c0_64 = arith.constant 0 : index
    %c0_65 = arith.constant 0 : index
    %178 = vector.load %arg19[%c0_64, %c0_65] : memref<1x128xf32, #tpu.memory_space<vmem>>, vector<1x128xf32>
    %179 = vector.broadcast %178 : vector<1x128xf32> to vector<12x128xf32>
    %180 = arith.addf %177, %179 : vector<12x128xf32>
    %c0_66 = arith.constant 0 : index
    %c0_67 = arith.constant 0 : index
    %181 = vector.load %arg20[%c0_66, %c0_67] : memref<12x128xf32, #tpu.memory_space<vmem>>, vector<12x128xf32>
    tpu.vector_store %arg20[%c0_66, %c0_67], %174 {strides = array<i32>} : memref<12x128xf32, #tpu.memory_space<vmem>>, vector<12x128xf32>,
    %c0_68 = arith.constant 0 : index
    %c0_69 = arith.constant 0 : index
    %182 = vector.load %arg21[%c0_68, %c0_69] : memref<12x128xf32, #tpu.memory_space<vmem>>, vector<12x128xf32>
    tpu.vector_store %arg21[%c0_68, %c0_69], %180 {strides = array<i32>} : memref<12x128xf32, #tpu.memory_space<vmem>>, vector<12x128xf32>,
    return
  }
}

module attributes {stable_mosaic.version = 11 : i64} {
  func.func @kernel(%arg0: i32, %arg1: memref<12x128xf32, #tpu.memory_space<vmem>>, %arg2: memref<128x128xbf16, #tpu.memory_space<vmem>>, %arg3: memref<1x128xf32, #tpu.memory_space<vmem>>, %arg4: memref<12x128xf32, #tpu.memory_space<vmem>>, %arg5: memref<1x128xf32, #tpu.memory_space<vmem>>, %arg6: memref<1x128xf32, #tpu.memory_space<vmem>>, %arg7: memref<12x128xf32, #tpu.memory_space<vmem>>) attributes {dimension_semantics = [#tpu.dimension_semantics<parallel>], iteration_bounds = array<i64: 1>, scalar_prefetch = 0 : i64, scratch_operands = 0 : i64, tpu.core_type = #tpu.core_type<tc>, window_params = [{transform_indices = @transform_0, window_bounds = array<i64: 12, 128>}, {pipeline_mode = #tpu.pipeline_mode<synchronous>, transform_indices = @transform_1, window_bounds = array<i64: 128, 128>}, {pipeline_mode = #tpu.pipeline_mode<synchronous>, transform_indices = @transform_2, window_bounds = array<i64: 1, 128>}, {transform_indices = @transform_3, window_bounds = array<i64: 12, 128>}, {pipeline_mode = #tpu.pipeline_mode<synchronous>, transform_indices = @transform_4, window_bounds = array<i64: 1, 128>}, {pipeline_mode = #tpu.pipeline_mode<synchronous>, transform_indices = @transform_5, window_bounds = array<i64: 1, 128>}, {transform_indices = @transform_6, window_bounds = array<i64: 12, 128>}]} {
    %c0 = arith.constant 0 : index
    %c0_0 = arith.constant 0 : index
    %0 = vector.load %arg1[%c0, %c0_0] : memref<12x128xf32, #tpu.memory_space<vmem>>, vector<12x128xf32>
    %1 = arith.truncf %0 : vector<12x128xf32> to vector<12x128xbf16>
    %c0_1 = arith.constant 0 : index
    %c0_2 = arith.constant 0 : index
    %2 = vector.load %arg2[%c0_1, %c0_2] : memref<128x128xbf16, #tpu.memory_space<vmem>>, vector<128x128xbf16>
    %cst = arith.constant dense<0.000000e+00> : vector<12x128xf32>
    %3 = tpu.matmul %1, %2, %cst {dimension_numbers = #tpu.dot_dimension_numbers<[1], [0], [0], [1], [0, 0, 1, 1], [], []>} : vector<12x128xbf16>, vector<128x128xbf16>, vector<12x128xf32> -> vector<12x128xf32>
    %c0_3 = arith.constant 0 : index
    %c0_4 = arith.constant 0 : index
    %4 = vector.load %arg3[%c0_3, %c0_4] : memref<1x128xf32, #tpu.memory_space<vmem>>, vector<1x128xf32>
    %5 = vector.broadcast %4 : vector<1x128xf32> to vector<12x128xf32>
    %6 = arith.addf %3, %5 : vector<12x128xf32>
    %c0_5 = arith.constant 0 : index
    %c0_6 = arith.constant 0 : index
    %7 = vector.load %arg4[%c0_5, %c0_6] : memref<12x128xf32, #tpu.memory_space<vmem>>, vector<12x128xf32>
    %8 = arith.addf %6, %7 : vector<12x128xf32>
    %c0_7 = arith.constant 0 : index
    %c0_8 = arith.constant 0 : index
    %9 = vector.load %arg5[%c0_7, %c0_8] : memref<1x128xf32, #tpu.memory_space<vmem>>, vector<1x128xf32>
    %c0_9 = arith.constant 0 : index
    %c0_10 = arith.constant 0 : index
    %10 = vector.load %arg6[%c0_9, %c0_10] : memref<1x128xf32, #tpu.memory_space<vmem>>, vector<1x128xf32>
    %cst_11 = arith.constant dense<0.000000e+00> : vector<12xf32>
    %11 = vector.multi_reduction <add>, %8, %cst_11 [1] : vector<12x128xf32> to vector<12xf32>
    %12 = vector.shape_cast %11 : vector<12xf32> to vector<12x1xf32>
    %cst_12 = arith.constant 3.200000e+01 : f32
    %13 = vector.broadcast %cst_12 : f32 to vector<12x1xf32>
    %14 = arith.divf %12, %13 : vector<12x1xf32>
    %15 = arith.mulf %8, %8 : vector<12x128xf32>
    %cst_13 = arith.constant dense<0.000000e+00> : vector<12xf32>
    %16 = vector.multi_reduction <add>, %15, %cst_13 [1] : vector<12x128xf32> to vector<12xf32>
    %17 = vector.shape_cast %16 : vector<12xf32> to vector<12x1xf32>
    %cst_14 = arith.constant 3.200000e+01 : f32
    %18 = vector.broadcast %cst_14 : f32 to vector<12x1xf32>
    %19 = arith.divf %17, %18 : vector<12x1xf32>
    %20 = arith.mulf %14, %14 : vector<12x1xf32>
    %21 = arith.subf %19, %20 : vector<12x1xf32>
    %cst_15 = arith.constant 0.000000e+00 : f32
    %22 = vector.broadcast %cst_15 : f32 to vector<12x1xf32>
    %23 = arith.maximumf %21, %22 : vector<12x1xf32>
    %24 = vector.broadcast %14 : vector<12x1xf32> to vector<12x128xf32>
    %25 = arith.subf %8, %24 : vector<12x128xf32>
    %cst_16 = arith.constant 9.99999974E-6 : f32
    %26 = vector.broadcast %cst_16 : f32 to vector<12x1xf32>
    %27 = arith.addf %23, %26 : vector<12x1xf32>
    %28 = math.rsqrt %27 : vector<12x1xf32>
    %29 = vector.broadcast %28 : vector<12x1xf32> to vector<12x128xf32>
    %30 = arith.mulf %25, %29 : vector<12x128xf32>
    %31 = vector.broadcast %9 : vector<1x128xf32> to vector<12x128xf32>
    %32 = arith.mulf %30, %31 : vector<12x128xf32>
    %33 = vector.broadcast %10 : vector<1x128xf32> to vector<12x128xf32>
    %34 = arith.addf %32, %33 : vector<12x128xf32>
    %c0_17 = arith.constant 0 : index
    %c0_18 = arith.constant 0 : index
    %35 = vector.load %arg7[%c0_17, %c0_18] : memref<12x128xf32, #tpu.memory_space<vmem>>, vector<12x128xf32>
    tpu.vector_store %arg7[%c0_17, %c0_18], %34 {strides = array<i32>} : memref<12x128xf32, #tpu.memory_space<vmem>>, vector<12x128xf32>,
    return
  }
  func.func @transform_0(%arg0: i32) -> (i32, i32) {
    %c0_i32 = arith.constant 0 : i32
    %c0_i32_0 = arith.constant 0 : i32
    return %arg0, %c0_i32 : i32, i32
  }
  func.func @transform_1(%arg0: i32) -> (i32, i32) {
    %c0_i32 = arith.constant 0 : i32
    %c0_i32_0 = arith.constant 0 : i32
    %c0_i32_1 = arith.constant 0 : i32
    return %c0_i32, %c0_i32_0 : i32, i32
  }
  func.func @transform_2(%arg0: i32) -> (i32, i32) {
    %c0_i32 = arith.constant 0 : i32
    %c0_i32_0 = arith.constant 0 : i32
    %c0_i32_1 = arith.constant 0 : i32
    return %c0_i32, %c0_i32_0 : i32, i32
  }
  func.func @transform_3(%arg0: i32) -> (i32, i32) {
    %c0_i32 = arith.constant 0 : i32
    %c0_i32_0 = arith.constant 0 : i32
    return %arg0, %c0_i32 : i32, i32
  }
  func.func @transform_4(%arg0: i32) -> (i32, i32) {
    %c0_i32 = arith.constant 0 : i32
    %c0_i32_0 = arith.constant 0 : i32
    %c0_i32_1 = arith.constant 0 : i32
    return %c0_i32, %c0_i32_0 : i32, i32
  }
  func.func @transform_5(%arg0: i32) -> (i32, i32) {
    %c0_i32 = arith.constant 0 : i32
    %c0_i32_0 = arith.constant 0 : i32
    %c0_i32_1 = arith.constant 0 : i32
    return %c0_i32, %c0_i32_0 : i32, i32
  }
  func.func @transform_6(%arg0: i32) -> (i32, i32) {
    %c0_i32 = arith.constant 0 : i32
    %c0_i32_0 = arith.constant 0 : i32
    return %arg0, %c0_i32 : i32, i32
  }
}

module attributes {stable_mosaic.version = 11 : i64} {
  func.func @kernel(%arg0: i32, %arg1: memref<12x128xf32, #tpu.memory_space<vmem>>, %arg2: memref<128x128xbf16, #tpu.memory_space<vmem>>, %arg3: memref<1x128xf32, #tpu.memory_space<vmem>>, %arg4: memref<12x128xf32, #tpu.memory_space<vmem>>) attributes {dimension_semantics = [#tpu.dimension_semantics<parallel>], iteration_bounds = array<i64: 1>, scalar_prefetch = 0 : i64, scratch_operands = 0 : i64, tpu.core_type = #tpu.core_type<tc>, window_params = [{transform_indices = @transform_0, window_bounds = array<i64: 12, 128>}, {pipeline_mode = #tpu.pipeline_mode<synchronous>, transform_indices = @transform_1, window_bounds = array<i64: 128, 128>}, {pipeline_mode = #tpu.pipeline_mode<synchronous>, transform_indices = @transform_2, window_bounds = array<i64: 1, 128>}, {transform_indices = @transform_3, window_bounds = array<i64: 12, 128>}]} {
    %c0 = arith.constant 0 : index
    %c0_0 = arith.constant 0 : index
    %0 = vector.load %arg1[%c0, %c0_0] : memref<12x128xf32, #tpu.memory_space<vmem>>, vector<12x128xf32>
    %1 = arith.truncf %0 : vector<12x128xf32> to vector<12x128xbf16>
    %c0_1 = arith.constant 0 : index
    %c0_2 = arith.constant 0 : index
    %2 = vector.load %arg2[%c0_1, %c0_2] : memref<128x128xbf16, #tpu.memory_space<vmem>>, vector<128x128xbf16>
    %cst = arith.constant dense<0.000000e+00> : vector<12x128xf32>
    %3 = tpu.matmul %1, %2, %cst {dimension_numbers = #tpu.dot_dimension_numbers<[1], [0], [0], [1], [0, 0, 1, 1], [], []>} : vector<12x128xbf16>, vector<128x128xbf16>, vector<12x128xf32> -> vector<12x128xf32>
    %c0_3 = arith.constant 0 : index
    %c0_4 = arith.constant 0 : index
    %4 = vector.load %arg3[%c0_3, %c0_4] : memref<1x128xf32, #tpu.memory_space<vmem>>, vector<1x128xf32>
    %5 = vector.broadcast %4 : vector<1x128xf32> to vector<12x128xf32>
    %6 = arith.addf %3, %5 : vector<12x128xf32>
    %c0_5 = arith.constant 0 : index
    %c0_6 = arith.constant 0 : index
    %7 = vector.load %arg4[%c0_5, %c0_6] : memref<12x128xf32, #tpu.memory_space<vmem>>, vector<12x128xf32>
    tpu.vector_store %arg4[%c0_5, %c0_6], %6 {strides = array<i32>} : memref<12x128xf32, #tpu.memory_space<vmem>>, vector<12x128xf32>,
    return
  }
  func.func @transform_0(%arg0: i32) -> (i32, i32) {
    %c0_i32 = arith.constant 0 : i32
    %c0_i32_0 = arith.constant 0 : i32
    return %arg0, %c0_i32 : i32, i32
  }
  func.func @transform_1(%arg0: i32) -> (i32, i32) {
    %c0_i32 = arith.constant 0 : i32
    %c0_i32_0 = arith.constant 0 : i32
    %c0_i32_1 = arith.constant 0 : i32
    return %c0_i32, %c0_i32_0 : i32, i32
  }
  func.func @transform_2(%arg0: i32) -> (i32, i32) {
    %c0_i32 = arith.constant 0 : i32
    %c0_i32_0 = arith.constant 0 : i32
    %c0_i32_1 = arith.constant 0 : i32
    return %c0_i32, %c0_i32_0 : i32, i32
  }
  func.func @transform_3(%arg0: i32) -> (i32, i32) {
    %c0_i32 = arith.constant 0 : i32
    %c0_i32_0 = arith.constant 0 : i32
    return %arg0, %c0_i32 : i32, i32
  }
}

</mosaic_0001>

<bundles_post_ra>
// kernel: _lambda_.11
= control target key start
LH: loop header
LB: loop body
LE: loop exit
PB: predicated region body
PF: predicated region fallthrough
CT: control target
= control target key end

     0   :  { %vm227_vm0 = vcmask 1044480   ;;  %vm228_vm1 = vcmask 1045504   ;;  %v521_v2 = vmov 65535   ;;  %vm130_vm2 = vcmask 220160   ;;  %s1036_s1 = inlined_call_operand.vmem [shape: bf16[27,128], index: 1, kind: input, shape index: {}]   ;;  %s1037_s0 = inlined_call_operand.vmem [shape: f32[512,27], index: 0, kind: input, shape index: {}]   ;;  %s1038_s2 = inlined_call_operand.vmem [shape: f32[1,128], index: 2, kind: input, shape index: {}]   ;;  %s1039_s3 = inlined_call_operand.vmem [shape: f32[512,128], index: 3, kind: output, shape index: {}]  }
   0x1   :  { %v477_v0 = vld [vmem:[%s1036_s1 + $0x8] sm:$0xf]  ;;  %v512_v1 = vld [vmem:[%s1036_s1 + $0x8] sm:$0x30]  ;;  %v229_v3 = vsel %vm227_vm0, 4294967295, %v521_v2  ;;  %v511_v7 = vld [vmem:[%s1036_s1] sm:$0xff] }
   0x2   :  { %v478_v4 = vor.u32 %v512_v1, %v477_v0  ;;  %v230_v5 = vsel %vm228_vm1, %v229_v3, 0  ;;  %v15_v8 = vld [vmem:[%s1037_s0] sm:$0xff]  ;;  %v16_v9 = vld [vmem:[%s1037_s0 + $0x8] sm:$0xff]  ;;  %v17_v20 = vld [vmem:[%s1037_s0 + $0x10] sm:$0xff] }
   0x3   :  { %v31_v10 = vld [vmem:[%s1037_s0 + $0x80] sm:$0xff]  ;;  %v32_v11 = vld [vmem:[%s1037_s0 + $0x88] sm:$0xff]  ;;  %v79_v16 = vpack.c.bf16 %v16_v9, %v15_v8  ;;  %v18_v21 = vld [vmem:[%s1037_s0 + $0x18] sm:$0xff] }
   0x4   :  { %v232_v6 = vand.u32 %v478_v4, %v230_v5  ;;  %v47_v12 = vld [vmem:[%s1037_s0 + $0x100] sm:$0xff]  ;;  %v48_v13 = vld [vmem:[%s1037_s0 + $0x108] sm:$0xff]  ;;  %v87_v17 = vpack.c.bf16 %v32_v11, %v31_v10  ;;  %v33_v22 = vld [vmem:[%s1037_s0 + $0x90] sm:$0xff]  ;;  %v80_v28 = vpack.c.bf16 %v18_v21, %v17_v20 }
   0x5   :  { %v63_v14 = vld [vmem:[%s1037_s0 + $0x180] sm:$0xff]  ;;  %v64_v15 = vld [vmem:[%s1037_s0 + $0x188] sm:$0xff]  ;;  %v95_v18 = vpack.c.bf16 %v48_v13, %v47_v12  ;;  %v34_v23 = vld [vmem:[%s1037_s0 + $0x98] sm:$0xff] }
   0x6   :  { %240 = vmatpush.bf16.msra.mxu0 %v232_v6  ;;  %513 = vmatpush.bf16.msra.mxu1 %v232_v6  ;;  %v103_v19 = vpack.c.bf16 %v64_v15, %v63_v14  ;;  %v49_v24 = vld [vmem:[%s1037_s0 + $0x110] sm:$0xff]  ;;  %v50_v25 = vld [vmem:[%s1037_s0 + $0x118] sm:$0xff]  ;;  %v88_v29 = vpack.c.bf16 %v34_v23, %v33_v22  ;;  %v19_v32 = vld [vmem:[%s1037_s0 + $0x20] sm:$0xff] }
   0x7   :  { %514 = vmatpush.bf16.msra.mxu2 %v232_v6  ;;  %515 = vmatpush.bf16.msra.mxu3 %v232_v6  ;;  %v65_v26 = vld [vmem:[%s1037_s0 + $0x190] sm:$0xff]  ;;  %v66_v27 = vld [vmem:[%s1037_s0 + $0x198] sm:$0xff]  ;;  %v96_v30 = vpack.c.bf16 %v50_v25, %v49_v24  ;;  %v20_v33 = vld [vmem:[%s1037_s0 + $0x28] sm:$0xff] }
   0x8   :  { %v104_v31 = vpack.c.bf16 %v66_v27, %v65_v26  ;;  %v35_v34 = vld [vmem:[%s1037_s0 + $0xa0] sm:$0xff]  ;;  %v36_v35 = vld [vmem:[%s1037_s0 + $0xa8] sm:$0xff]  ;;  %v81_v40 = vpack.c.bf16 %v20_v33, %v19_v32  ;;  %v21_v44 = vld [vmem:[%s1037_s0 + $0x30] sm:$0xff] }
   0x9   :  { %v51_v36 = vld [vmem:[%s1037_s0 + $0x120] sm:$0xff]  ;;  %v52_v37 = vld [vmem:[%s1037_s0 + $0x128] sm:$0xff]  ;;  %v89_v41 = vpack.c.bf16 %v36_v35, %v35_v34  ;;  %v22_v45 = vld [vmem:[%s1037_s0 + $0x38] sm:$0xff] }
   0xa   :  { %241 = vmatpush.bf16.msra.mxu0 %v511_v7  ;;  %516 = vmatpush.bf16.msra.mxu1 %v511_v7  ;;  %v67_v38 = vld [vmem:[%s1037_s0 + $0x1a0] sm:$0xff]  ;;  %v68_v39 = vld [vmem:[%s1037_s0 + $0x1a8] sm:$0xff]  ;;  %v97_v42 = vpack.c.bf16 %v52_v37, %v51_v36  ;;  %v37_v46 = vld [vmem:[%s1037_s0 + $0xb0] sm:$0xff]  ;;  %v82_v52 = vpack.c.bf16 %v22_v45, %v21_v44 }
   0xb   :  { %517 = vmatpush.bf16.msra.mxu2 %v511_v7  ;;  %518 = vmatpush.bf16.msra.mxu3 %v511_v7  ;;  %v105_v43 = vpack.c.bf16 %v68_v39, %v67_v38  ;;  %v38_v47 = vld [vmem:[%s1037_s0 + $0xb8] sm:$0xff]  ;;  %v53_v48 = vld [vmem:[%s1037_s0 + $0x130] sm:$0xff]  ;;  %v23_v56 = vld [vmem:[%s1037_s0 + $0x40] sm:$0xff] }
   0xc   :  { %v54_v49 = vld [vmem:[%s1037_s0 + $0x138] sm:$0xff]  ;;  %v69_v50 = vld [vmem:[%s1037_s0 + $0x1b0] sm:$0xff]  ;;  %v90_v53 = vpack.c.bf16 %v38_v47, %v37_v46  ;;  %v24_v57 = vld [vmem:[%s1037_s0 + $0x48] sm:$0xff] }
   0xd   :  { %479 = vmatmul.msk.bf16.vlgmr.msra.gmra.mxu0 %vm130_vm2, %v79_v16  ;;  %487 = vmatmul.msk.bf16.vlgmr.msra.gmra.mxu1 %vm130_vm2, %v87_v17  ;;  %v70_v51 = vld [vmem:[%s1037_s0 + $0x1b8] sm:$0xff]  ;;  %v98_v54 = vpack.c.bf16 %v54_v49, %v53_v48  ;;  %v39_v58 = vld [vmem:[%s1037_s0 + $0xc0] sm:$0xff]  ;;  %v40_v59 = vld [vmem:[%s1037_s0 + $0xc8] sm:$0xff]  ;;  %v83_v0 = vpack.c.bf16 %v24_v57, %v23_v56 }
   0xe   :  { %495 = vmatmul.msk.bf16.vlgmr.msra.gmra.mxu2 %vm130_vm2, %v95_v18  ;;  %503 = vmatmul.msk.bf16.vlgmr.msra.gmra.mxu3 %vm130_vm2, %v103_v19  ;;  %v106_v55 = vpack.c.bf16 %v70_v51, %v69_v50  ;;  %v55_v60 = vld [vmem:[%s1037_s0 + $0x140] sm:$0xff]  ;;  %v56_v61 = vld [vmem:[%s1037_s0 + $0x148] sm:$0xff]  ;;  %v91_v1 = vpack.c.bf16 %v40_v59, %v39_v58  ;;  %v25_v4 = vld [vmem:[%s1037_s0 + $0x50] sm:$0xff] }
   0xf   :  { %v71_v62 = vld [vmem:[%s1037_s0 + $0x1c0] sm:$0xff]  ;;  %v72_v63 = vld [vmem:[%s1037_s0 + $0x1c8] sm:$0xff]  ;;  %v99_v2 = vpack.c.bf16 %v56_v61, %v55_v60  ;;  %v26_v5 = vld [vmem:[%s1037_s0 + $0x58] sm:$0xff] }
  0x10   :  { %v107_v3 = vpack.c.bf16 %v72_v63, %v71_v62  ;;  %v41_v6 = vld [vmem:[%s1037_s0 + $0xd0] sm:$0xff]  ;;  %v42_v7 = vld [vmem:[%s1037_s0 + $0xd8] sm:$0xff]  ;;  %v84_v12 = vpack.c.bf16 %v26_v5, %v25_v4  ;;  %v27_v16 = vld [vmem:[%s1037_s0 + $0x60] sm:$0xff] }
  0x11   :  { %v57_v8 = vld [vmem:[%s1037_s0 + $0x150] sm:$0xff]  ;;  %v58_v9 = vld [vmem:[%s1037_s0 + $0x158] sm:$0xff]  ;;  %v92_v13 = vpack.c.bf16 %v42_v7, %v41_v6  ;;  %v28_v17 = vld [vmem:[%s1037_s0 + $0x68] sm:$0xff] }
  0x12   :  { %v73_v10 = vld [vmem:[%s1037_s0 + $0x1d0] sm:$0xff]  ;;  %v74_v11 = vld [vmem:[%s1037_s0 + $0x1d8] sm:$0xff]  ;;  %v100_v14 = vpack.c.bf16 %v58_v9, %v57_v8  ;;  %v43_v18 = vld [vmem:[%s1037_s0 + $0xe0] sm:$0xff]  ;;  %v85_v24 = vpack.c.bf16 %v28_v17, %v27_v16 }
  0x13   :  { %v108_v15 = vpack.c.bf16 %v74_v11, %v73_v10  ;;  %v44_v19 = vld [vmem:[%s1037_s0 + $0xe8] sm:$0xff]  ;;  %v59_v20 = vld [vmem:[%s1037_s0 + $0x160] sm:$0xff]  ;;  %v61_v32 = vld [vmem:[%s1037_s0 + $0x170] sm:$0xff] }
  0x14   :  { %v60_v21 = vld [vmem:[%s1037_s0 + $0x168] sm:$0xff]  ;;  %v75_v22 = vld [vmem:[%s1037_s0 + $0x1e0] sm:$0xff]  ;;  %v93_v25 = vpack.c.bf16 %v44_v19, %v43_v18  ;;  %v62_v33 = vld [vmem:[%s1037_s0 + $0x178] sm:$0xff] }
  0x15   :  { %v76_v23 = vld [vmem:[%s1037_s0 + $0x1e8] sm:$0xff]  ;;  %v101_v26 = vpack.c.bf16 %v60_v21, %v59_v20  ;;  %v77_v34 = vld [vmem:[%s1037_s0 + $0x1f0] sm:$0xff]  ;;  %v78_v35 = vld [vmem:[%s1037_s0 + $0x1f8] sm:$0xff]  ;;  %v102_v38 = vpack.c.bf16 %v62_v33, %v61_v32 }
  0x16   :  { %v109_v27 = vpack.c.bf16 %v76_v23, %v75_v22  ;;  %v110_v39 = vpack.c.bf16 %v78_v35, %v77_v34 }
  0x1d   :  { %480 = vmatmul.msk.bf16.gmra.mxu0 %vm130_vm2, %v80_v28  ;;  %488 = vmatmul.msk.bf16.gmra.mxu1 %vm130_vm2, %v88_v29  ;;  %v29_v28 = vld [vmem:[%s1037_s0 + $0x70] sm:$0xff]  ;;  %v30_v29 = vld [vmem:[%s1037_s0 + $0x78] sm:$0xff] }
  0x1e   :  { %496 = vmatmul.msk.bf16.gmra.mxu2 %vm130_vm2, %v96_v30  ;;  %504 = vmatmul.msk.bf16.gmra.mxu3 %vm130_vm2, %v104_v31  ;;  %v45_v30 = vld [vmem:[%s1037_s0 + $0xf0] sm:$0xff]  ;;  %v46_v31 = vld [vmem:[%s1037_s0 + $0xf8] sm:$0xff]  ;;  %v86_v36 = vpack.c.bf16 %v30_v29, %v29_v28 }
  0x1f   :  { %v94_v37 = vpack.c.bf16 %v46_v31, %v45_v30 }
  0x2d   :  { %481 = vmatmul.msk.bf16.gmra.mxu0 %vm130_vm2, %v81_v40  ;;  %489 = vmatmul.msk.bf16.gmra.mxu1 %vm130_vm2, %v89_v41  ;;  %v778_v40 = vld [vmem:[%s1038_s2] ss:$0 sm:$0xff] }
  0x2e   :  { %497 = vmatmul.msk.bf16.gmra.mxu2 %vm130_vm2, %v97_v42  ;;  %505 = vmatmul.msk.bf16.gmra.mxu3 %vm130_vm2, %v105_v43 }
  0x3d   :  { %482 = vmatmul.msk.bf16.gmra.mxu0 %vm130_vm2, %v82_v52  ;;  %490 = vmatmul.msk.bf16.gmra.mxu1 %vm130_vm2, %v90_v53 }
  0x3e   :  { %498 = vmatmul.msk.bf16.gmra.mxu2 %vm130_vm2, %v98_v54  ;;  %506 = vmatmul.msk.bf16.gmra.mxu3 %vm130_vm2, %v106_v55 }
  0x4d   :  { %483 = vmatmul.msk.bf16.gmra.mxu0 %vm130_vm2, %v83_v0  ;;  %491 = vmatmul.msk.bf16.gmra.mxu1 %vm130_vm2, %v91_v1 }
  0x4e   :  { %499 = vmatmul.msk.bf16.gmra.mxu2 %vm130_vm2, %v99_v2  ;;  %507 = vmatmul.msk.bf16.gmra.mxu3 %vm130_vm2, %v107_v3 }
  0x5d   :  { %484 = vmatmul.msk.bf16.gmra.mxu0 %vm130_vm2, %v84_v12  ;;  %492 = vmatmul.msk.bf16.gmra.mxu1 %vm130_vm2, %v92_v13 }
  0x5e   :  { %500 = vmatmul.msk.bf16.gmra.mxu2 %vm130_vm2, %v100_v14  ;;  %508 = vmatmul.msk.bf16.gmra.mxu3 %vm130_vm2, %v108_v15 }
  0x6d   :  { %485 = vmatmul.msk.bf16.gmra.mxu0 %vm130_vm2, %v85_v24  ;;  %493 = vmatmul.msk.bf16.gmra.mxu1 %vm130_vm2, %v93_v25 }
  0x6e   :  { %501 = vmatmul.msk.bf16.gmra.mxu2 %vm130_vm2, %v101_v26  ;;  %509 = vmatmul.msk.bf16.gmra.mxu3 %vm130_vm2, %v109_v27 }
  0x7d   :  { %486 = vmatmul.msk.bf16.gmra.mxu0 %vm130_vm2, %v86_v36  ;;  %494 = vmatmul.msk.bf16.gmra.mxu1 %vm130_vm2, %v94_v37 }
  0x7e   :  { %502 = vmatmul.msk.bf16.gmra.mxu2 %vm130_vm2, %v102_v38  ;;  %510 = vmatmul.msk.bf16.gmra.mxu3 %vm130_vm2, %v110_v39 }
  0x8a   :  { %v243_v41 = vpop.f32.mrf.mxu0  ;;  %v283_v42 = vpop.f32.mrf.mxu1 }
  0x8b   :  { %v244_v43 = vadd.f32 %v778_v40, %v243_v41  ;;  %v284_v44 = vadd.f32 %v778_v40, %v283_v42 }
  0x8d   :  { %403 = vst [vmem:[%s1039_s3] sm:$0xff] %v244_v43 }
  0x8e   :  { %419 = vst [vmem:[%s1039_s3 + $0x80] sm:$0xff] %v284_v44 }
  0x91   :  { %v323_v45 = vpop.f32.mrf.mxu2  ;;  %v363_v46 = vpop.f32.mrf.mxu3 }
  0x92   :  { %v324_v47 = vadd.f32 %v778_v40, %v323_v45  ;;  %v364_v48 = vadd.f32 %v778_v40, %v363_v46  ;;  %v245_v49 = vpop.f32.mrf.mxu0  ;;  %v285_v50 = vpop.f32.mrf.mxu1 }
  0x93   :  { %v246_v51 = vadd.f32 %v778_v40, %v245_v49  ;;  %v286_v52 = vadd.f32 %v778_v40, %v285_v50 }
  0x94   :  { %435 = vst [vmem:[%s1039_s3 + $0x100] sm:$0xff] %v324_v47 }
  0x95   :  { %451 = vst [vmem:[%s1039_s3 + $0x180] sm:$0xff] %v364_v48 }
  0x96   :  { %404 = vst [vmem:[%s1039_s3 + $0x8] sm:$0xff] %v246_v51 }
  0x97   :  { %420 = vst [vmem:[%s1039_s3 + $0x88] sm:$0xff] %v286_v52 }
  0x99   :  { %v325_v53 = vpop.f32.mrf.mxu2  ;;  %v365_v54 = vpop.f32.mrf.mxu3 }
  0x9a   :  { %v326_v55 = vadd.f32 %v778_v40, %v325_v53  ;;  %v366_v56 = vadd.f32 %v778_v40, %v365_v54  ;;  %v248_v57 = vpop.f32.mrf.mxu0  ;;  %v288_v58 = vpop.f32.mrf.mxu1 }
  0x9b   :  { %v249_v59 = vadd.f32 %v778_v40, %v248_v57  ;;  %v289_v60 = vadd.f32 %v778_v40, %v288_v58 }
  0x9c   :  { %436 = vst [vmem:[%s1039_s3 + $0x108] sm:$0xff] %v326_v55 }
  0x9d   :  { %452 = vst [vmem:[%s1039_s3 + $0x188] sm:$0xff] %v366_v56 }
  0x9e   :  { %405 = vst [vmem:[%s1039_s3 + $0x10] sm:$0xff] %v249_v59 }
  0x9f   :  { %421 = vst [vmem:[%s1039_s3 + $0x90] sm:$0xff] %v289_v60 }
  0xa1   :  { %v328_v61 = vpop.f32.mrf.mxu2  ;;  %v368_v62 = vpop.f32.mrf.mxu3 }
  0xa2   :  { %v329_v63 = vadd.f32 %v778_v40, %v328_v61  ;;  %v369_v0 = vadd.f32 %v778_v40, %v368_v62  ;;  %v250_v1 = vpop.f32.mrf.mxu0  ;;  %v290_v2 = vpop.f32.mrf.mxu1 }
  0xa3   :  { %v251_v3 = vadd.f32 %v778_v40, %v250_v1  ;;  %v291_v4 = vadd.f32 %v778_v40, %v290_v2 }
  0xa4   :  { %437 = vst [vmem:[%s1039_s3 + $0x110] sm:$0xff] %v329_v63 }
  0xa5   :  { %453 = vst [vmem:[%s1039_s3 + $0x190] sm:$0xff] %v369_v0 }
  0xa6   :  { %406 = vst [vmem:[%s1039_s3 + $0x18] sm:$0xff] %v251_v3 }
  0xa7   :  { %422 = vst [vmem:[%s1039_s3 + $0x98] sm:$0xff] %v291_v4 }
  0xa9   :  { %v330_v5 = vpop.f32.mrf.mxu2  ;;  %v370_v6 = vpop.f32.mrf.mxu3 }
  0xaa   :  { %v331_v7 = vadd.f32 %v778_v40, %v330_v5  ;;  %v371_v8 = vadd.f32 %v778_v40, %v370_v6  ;;  %v253_v9 = vpop.f32.mrf.mxu0  ;;  %v293_v10 = vpop.f32.mrf.mxu1 }
  0xab   :  { %v254_v11 = vadd.f32 %v778_v40, %v253_v9  ;;  %v294_v12 = vadd.f32 %v778_v40, %v293_v10 }
  0xac   :  { %438 = vst [vmem:[%s1039_s3 + $0x118] sm:$0xff] %v331_v7 }
  0xad   :  { %454 = vst [vmem:[%s1039_s3 + $0x198] sm:$0xff] %v371_v8 }
  0xae   :  { %407 = vst [vmem:[%s1039_s3 + $0x20] sm:$0xff] %v254_v11 }
  0xaf   :  { %423 = vst [vmem:[%s1039_s3 + $0xa0] sm:$0xff] %v294_v12 }
  0xb1   :  { %v333_v13 = vpop.f32.mrf.mxu2  ;;  %v373_v14 = vpop.f32.mrf.mxu3 }
  0xb2   :  { %v334_v15 = vadd.f32 %v778_v40, %v333_v13  ;;  %v374_v16 = vadd.f32 %v778_v40, %v373_v14  ;;  %v255_v17 = vpop.f32.mrf.mxu0  ;;  %v295_v18 = vpop.f32.mrf.mxu1 }
  0xb3   :  { %v256_v19 = vadd.f32 %v778_v40, %v255_v17  ;;  %v296_v20 = vadd.f32 %v778_v40, %v295_v18 }
  0xb4   :  { %439 = vst [vmem:[%s1039_s3 + $0x120] sm:$0xff] %v334_v15 }
  0xb5   :  { %455 = vst [vmem:[%s1039_s3 + $0x1a0] sm:$0xff] %v374_v16 }
  0xb6   :  { %408 = vst [vmem:[%s1039_s3 + $0x28] sm:$0xff] %v256_v19 }
  0xb7   :  { %424 = vst [vmem:[%s1039_s3 + $0xa8] sm:$0xff] %v296_v20 }
  0xb9   :  { %v335_v21 = vpop.f32.mrf.mxu2  ;;  %v375_v22 = vpop.f32.mrf.mxu3 }
  0xba   :  { %v336_v23 = vadd.f32 %v778_v40, %v335_v21  ;;  %v376_v24 = vadd.f32 %v778_v40, %v375_v22  ;;  %v258_v25 = vpop.f32.mrf.mxu0  ;;  %v298_v26 = vpop.f32.mrf.mxu1 }
  0xbb   :  { %v259_v27 = vadd.f32 %v778_v40, %v258_v25  ;;  %v299_v28 = vadd.f32 %v778_v40, %v298_v26 }
  0xbc   :  { %440 = vst [vmem:[%s1039_s3 + $0x128] sm:$0xff] %v336_v23 }
  0xbd   :  { %456 = vst [vmem:[%s1039_s3 + $0x1a8] sm:$0xff] %v376_v24 }
  0xbe   :  { %409 = vst [vmem:[%s1039_s3 + $0x30] sm:$0xff] %v259_v27 }
  0xbf   :  { %425 = vst [vmem:[%s1039_s3 + $0xb0] sm:$0xff] %v299_v28 }
  0xc1   :  { %v338_v29 = vpop.f32.mrf.mxu2  ;;  %v378_v30 = vpop.f32.mrf.mxu3 }
  0xc2   :  { %v339_v31 = vadd.f32 %v778_v40, %v338_v29  ;;  %v379_v32 = vadd.f32 %v778_v40, %v378_v30  ;;  %v260_v33 = vpop.f32.mrf.mxu0  ;;  %v300_v34 = vpop.f32.mrf.mxu1 }
  0xc3   :  { %v261_v35 = vadd.f32 %v778_v40, %v260_v33  ;;  %v301_v36 = vadd.f32 %v778_v40, %v300_v34 }
  0xc4   :  { %441 = vst [vmem:[%s1039_s3 + $0x130] sm:$0xff] %v339_v31 }
  0xc5   :  { %457 = vst [vmem:[%s1039_s3 + $0x1b0] sm:$0xff] %v379_v32 }
  0xc6   :  { %410 = vst [vmem:[%s1039_s3 + $0x38] sm:$0xff] %v261_v35 }
  0xc7   :  { %426 = vst [vmem:[%s1039_s3 + $0xb8] sm:$0xff] %v301_v36 }
  0xc9   :  { %v340_v37 = vpop.f32.mrf.mxu2  ;;  %v380_v38 = vpop.f32.mrf.mxu3 }
  0xca   :  { %v341_v39 = vadd.f32 %v778_v40, %v340_v37  ;;  %v381_v41 = vadd.f32 %v778_v40, %v380_v38  ;;  %v263_v42 = vpop.f32.mrf.mxu0  ;;  %v303_v43 = vpop.f32.mrf.mxu1 }
  0xcb   :  { %v264_v44 = vadd.f32 %v778_v40, %v263_v42  ;;  %v304_v45 = vadd.f32 %v778_v40, %v303_v43 }
  0xcc   :  { %442 = vst [vmem:[%s1039_s3 + $0x138] sm:$0xff] %v341_v39 }
  0xcd   :  { %458 = vst [vmem:[%s1039_s3 + $0x1b8] sm:$0xff] %v381_v41 }
  0xce   :  { %411 = vst [vmem:[%s1039_s3 + $0x40] sm:$0xff] %v264_v44 }
  0xcf   :  { %427 = vst [vmem:[%s1039_s3 + $0xc0] sm:$0xff] %v304_v45 }
  0xd1   :  { %v343_v46 = vpop.f32.mrf.mxu2  ;;  %v383_v47 = vpop.f32.mrf.mxu3 }
  0xd2   :  { %v344_v48 = vadd.f32 %v778_v40, %v343_v46  ;;  %v384_v49 = vadd.f32 %v778_v40, %v383_v47  ;;  %v265_v50 = vpop.f32.mrf.mxu0  ;;  %v305_v51 = vpop.f32.mrf.mxu1 }
  0xd3   :  { %v266_v52 = vadd.f32 %v778_v40, %v265_v50  ;;  %v306_v53 = vadd.f32 %v778_v40, %v305_v51 }
  0xd4   :  { %443 = vst [vmem:[%s1039_s3 + $0x140] sm:$0xff] %v344_v48 }
  0xd5   :  { %459 = vst [vmem:[%s1039_s3 + $0x1c0] sm:$0xff] %v384_v49 }
  0xd6   :  { %412 = vst [vmem:[%s1039_s3 + $0x48] sm:$0xff] %v266_v52 }
  0xd7   :  { %428 = vst [vmem:[%s1039_s3 + $0xc8] sm:$0xff] %v306_v53 }
  0xd9   :  { %v345_v54 = vpop.f32.mrf.mxu2  ;;  %v385_v55 = vpop.f32.mrf.mxu3 }
  0xda   :  { %v346_v56 = vadd.f32 %v778_v40, %v345_v54  ;;  %v386_v57 = vadd.f32 %v778_v40, %v385_v55  ;;  %v268_v58 = vpop.f32.mrf.mxu0  ;;  %v308_v59 = vpop.f32.mrf.mxu1 }
  0xdb   :  { %v269_v60 = vadd.f32 %v778_v40, %v268_v58  ;;  %v309_v61 = vadd.f32 %v778_v40, %v308_v59 }
  0xdc   :  { %444 = vst [vmem:[%s1039_s3 + $0x148] sm:$0xff] %v346_v56 }
  0xdd   :  { %460 = vst [vmem:[%s1039_s3 + $0x1c8] sm:$0xff] %v386_v57 }
  0xde   :  { %413 = vst [vmem:[%s1039_s3 + $0x50] sm:$0xff] %v269_v60 }
  0xdf   :  { %429 = vst [vmem:[%s1039_s3 + $0xd0] sm:$0xff] %v309_v61 }
  0xe1   :  { %v348_v62 = vpop.f32.mrf.mxu2  ;;  %v388_v63 = vpop.f32.mrf.mxu3 }
  0xe2   :  { %v349_v0 = vadd.f32 %v778_v40, %v348_v62  ;;  %v389_v1 = vadd.f32 %v778_v40, %v388_v63  ;;  %v270_v2 = vpop.f32.mrf.mxu0  ;;  %v310_v3 = vpop.f32.mrf.mxu1 }
  0xe3   :  { %v271_v4 = vadd.f32 %v778_v40, %v270_v2  ;;  %v311_v5 = vadd.f32 %v778_v40, %v310_v3 }
  0xe4   :  { %445 = vst [vmem:[%s1039_s3 + $0x150] sm:$0xff] %v349_v0 }
  0xe5   :  { %461 = vst [vmem:[%s1039_s3 + $0x1d0] sm:$0xff] %v389_v1 }
  0xe6   :  { %414 = vst [vmem:[%s1039_s3 + $0x58] sm:$0xff] %v271_v4 }
  0xe7   :  { %430 = vst [vmem:[%s1039_s3 + $0xd8] sm:$0xff] %v311_v5 }
  0xe9   :  { %v350_v6 = vpop.f32.mrf.mxu2  ;;  %v390_v7 = vpop.f32.mrf.mxu3 }
  0xea   :  { %v351_v8 = vadd.f32 %v778_v40, %v350_v6  ;;  %v391_v9 = vadd.f32 %v778_v40, %v390_v7  ;;  %v273_v10 = vpop.f32.mrf.mxu0  ;;  %v313_v11 = vpop.f32.mrf.mxu1 }
  0xeb   :  { %v274_v12 = vadd.f32 %v778_v40, %v273_v10  ;;  %v314_v13 = vadd.f32 %v778_v40, %v313_v11 }
  0xec   :  { %446 = vst [vmem:[%s1039_s3 + $0x158] sm:$0xff] %v351_v8 }
  0xed   :  { %462 = vst [vmem:[%s1039_s3 + $0x1d8] sm:$0xff] %v391_v9 }
  0xee   :  { %415 = vst [vmem:[%s1039_s3 + $0x60] sm:$0xff] %v274_v12 }
  0xef   :  { %431 = vst [vmem:[%s1039_s3 + $0xe0] sm:$0xff] %v314_v13 }
  0xf1   :  { %v353_v14 = vpop.f32.mrf.mxu2  ;;  %v393_v15 = vpop.f32.mrf.mxu3 }
  0xf2   :  { %v354_v16 = vadd.f32 %v778_v40, %v353_v14  ;;  %v394_v17 = vadd.f32 %v778_v40, %v393_v15  ;;  %v275_v18 = vpop.f32.mrf.mxu0  ;;  %v315_v19 = vpop.f32.mrf.mxu1 }
  0xf3   :  { %v276_v20 = vadd.f32 %v778_v40, %v275_v18  ;;  %v316_v21 = vadd.f32 %v778_v40, %v315_v19 }
  0xf4   :  { %447 = vst [vmem:[%s1039_s3 + $0x160] sm:$0xff] %v354_v16 }
  0xf5   :  { %463 = vst [vmem:[%s1039_s3 + $0x1e0] sm:$0xff] %v394_v17 }
  0xf6   :  { %416 = vst [vmem:[%s1039_s3 + $0x68] sm:$0xff] %v276_v20 }
  0xf7   :  { %432 = vst [vmem:[%s1039_s3 + $0xe8] sm:$0xff] %v316_v21 }
  0xf9   :  { %v355_v22 = vpop.f32.mrf.mxu2  ;;  %v395_v23 = vpop.f32.mrf.mxu3 }
  0xfa   :  { %v356_v24 = vadd.f32 %v778_v40, %v355_v22  ;;  %v396_v25 = vadd.f32 %v778_v40, %v395_v23  ;;  %v278_v26 = vpop.f32.mrf.mxu0  ;;  %v318_v27 = vpop.f32.mrf.mxu1 }
  0xfb   :  { %v279_v28 = vadd.f32 %v778_v40, %v278_v26  ;;  %v319_v29 = vadd.f32 %v778_v40, %v318_v27 }
  0xfc   :  { %448 = vst [vmem:[%s1039_s3 + $0x168] sm:$0xff] %v356_v24 }
  0xfd   :  { %464 = vst [vmem:[%s1039_s3 + $0x1e8] sm:$0xff] %v396_v25 }
  0xfe   :  { %417 = vst [vmem:[%s1039_s3 + $0x70] sm:$0xff] %v279_v28 }
  0xff   :  { %433 = vst [vmem:[%s1039_s3 + $0xf0] sm:$0xff] %v319_v29 }
 0x101   :  { %v358_v30 = vpop.f32.mrf.mxu2  ;;  %v398_v31 = vpop.f32.mrf.mxu3 }
 0x102   :  { %v359_v32 = vadd.f32 %v778_v40, %v358_v30  ;;  %v399_v33 = vadd.f32 %v778_v40, %v398_v31  ;;  %v280_v34 = vpop.f32.mrf.mxu0  ;;  %v320_v35 = vpop.f32.mrf.mxu1 }
 0x103   :  { %v281_v36 = vadd.f32 %v778_v40, %v280_v34  ;;  %v321_v37 = vadd.f32 %v778_v40, %v320_v35 }
 0x104   :  { %449 = vst [vmem:[%s1039_s3 + $0x170] sm:$0xff] %v359_v32 }
 0x105   :  { %465 = vst [vmem:[%s1039_s3 + $0x1f0] sm:$0xff] %v399_v33 }
 0x106   :  { %418 = vst [vmem:[%s1039_s3 + $0x78] sm:$0xff] %v281_v36 }
 0x107   :  { %434 = vst [vmem:[%s1039_s3 + $0xf8] sm:$0xff] %v321_v37 }
 0x109   :  { %v360_v38 = vpop.f32.mrf.mxu2  ;;  %v400_v39 = vpop.f32.mrf.mxu3 }
 0x10a   :  { %v361_v41 = vadd.f32 %v778_v40, %v360_v38  ;;  %v401_v42 = vadd.f32 %v778_v40, %v400_v39 }
 0x10c   :  { %450 = vst [vmem:[%s1039_s3 + $0x178] sm:$0xff] %v361_v41 }
 0x10d   :  { %466 = vst [vmem:[%s1039_s3 + $0x1f8] sm:$0xff] %v401_v42 }

// kernel: _lambda_.12
= control target key start
LH: loop header
LB: loop body
LE: loop exit
PB: predicated region body
PF: predicated region fallthrough
CT: control target
= control target key end

     0   :  { %s2477_s1 = inlined_call_operand.vmem [shape: bf16[1152,128], index: 1, kind: input, shape index: {}]   ;;  %s2478_s2 = inlined_call_operand.vmem [shape: f32[1,128], index: 2, kind: input, shape index: {}]   ;;  %s2479_s0 = inlined_call_operand.vmem [shape: f32[128,1152], index: 0, kind: input, shape index: {}]   ;;  %s2480_s3 = inlined_call_operand.vmem [shape: f32[128,128], index: 3, kind: output, shape index: {}]  }
   0x1   :  { %v1566_v0 = vld [vmem:[%s2477_s1 + $0x38] sm:$0xff]  ;;  %v1565_v1 = vld [vmem:[%s2477_s1 + $0x30] sm:$0xff]  ;;  %v1564_v2 = vld [vmem:[%s2477_s1 + $0x28] sm:$0xff] }
   0x2   :  { %1631 = vmatpush.bf16.msra.mxu1 %v1566_v0  ;;  %1632 = vmatpush.bf16.msra.mxu2 %v1566_v0  ;;  %v1563_v3 = vld [vmem:[%s2477_s1 + $0x20] sm:$0xff]  ;;  %v1562_v4 = vld [vmem:[%s2477_s1 + $0x18] sm:$0xff]  ;;  %v1561_v5 = vld [vmem:[%s2477_s1 + $0x10] sm:$0xff] }
   0x3   :  { %1633 = vmatpush.bf16.msra.mxu3 %v1566_v0  ;;  %810 = vmatpush.bf16.msra.mxu0 %v1566_v0  ;;  %v1560_v6 = vld [vmem:[%s2477_s1 + $0x8] sm:$0xff]  ;;  %v1559_v7 = vld [vmem:[%s2477_s1] sm:$0xff]  ;;  %v1582_v16 = vld [vmem:[%s2477_s1 + $0xb8] sm:$0xff] }
   0x4   :  { %v50_v8 = vld [vmem:[%s2479_s0 + $0x120] sm:$0xff]  ;;  %v59_v9 = vld [vmem:[%s2479_s0 + $0x168] sm:$0xff]  ;;  %v1574_v17 = vld [vmem:[%s2477_s1 + $0x78] sm:$0xff] }
   0x5   :  { %v86_v10 = vld [vmem:[%s2479_s0 + $0x240] sm:$0xff]  ;;  %v95_v11 = vld [vmem:[%s2479_s0 + $0x288] sm:$0xff]  ;;  %v176_v18 = vpack.c.bf16 %v59_v9, %v50_v8  ;;  %v1590_v22 = vld [vmem:[%s2477_s1 + $0xf8] sm:$0xff] }
   0x6   :  { %1634 = vmatpush.bf16.msra.mxu1 %v1565_v1  ;;  %1635 = vmatpush.bf16.msra.mxu2 %v1565_v1  ;;  %v122_v12 = vld [vmem:[%s2479_s0 + $0x360] sm:$0xff]  ;;  %v131_v13 = vld [vmem:[%s2479_s0 + $0x3a8] sm:$0xff]  ;;  %v194_v19 = vpack.c.bf16 %v95_v11, %v86_v10  ;;  %v1598_v23 = vld [vmem:[%s2477_s1 + $0x138] sm:$0xff] }
   0x7   :  { %1636 = vmatpush.bf16.msra.mxu3 %v1565_v1  ;;  %811 = vmatpush.bf16.msra.mxu0 %v1565_v1  ;;  %v14_v14 = vld [vmem:[%s2479_s0] sm:$0xff]  ;;  %v23_v15 = vld [vmem:[%s2479_s0 + $0x48] sm:$0xff]  ;;  %v212_v20 = vpack.c.bf16 %v131_v13, %v122_v12  ;;  %v1581_v24 = vld [vmem:[%s2477_s1 + $0xb0] sm:$0xff] }
   0x8   :  { %v158_v21 = vpack.c.bf16 %v23_v15, %v14_v14  ;;  %v1573_v25 = vld [vmem:[%s2477_s1 + $0x70] sm:$0xff]  ;;  %v1580_v28 = vld [vmem:[%s2477_s1 + $0xa8] sm:$0xff]  ;;  %v1579_v32 = vld [vmem:[%s2477_s1 + $0xa0] sm:$0xff] }
   0x9   :  { %v1589_v26 = vld [vmem:[%s2477_s1 + $0xf0] sm:$0xff]  ;;  %v1572_v29 = vld [vmem:[%s2477_s1 + $0x68] sm:$0xff]  ;;  %v1571_v33 = vld [vmem:[%s2477_s1 + $0x60] sm:$0xff] }
   0xa   :  { %1637 = vmatpush.bf16.msra.mxu1 %v1564_v2  ;;  %1638 = vmatpush.bf16.msra.mxu2 %v1564_v2  ;;  %v1597_v27 = vld [vmem:[%s2477_s1 + $0x130] sm:$0xff]  ;;  %v1588_v30 = vld [vmem:[%s2477_s1 + $0xe8] sm:$0xff]  ;;  %v1587_v34 = vld [vmem:[%s2477_s1 + $0xe0] sm:$0xff] }
   0xb   :  { %1639 = vmatpush.bf16.msra.mxu3 %v1564_v2  ;;  %812 = vmatpush.bf16.msra.mxu0 %v1564_v2  ;;  %v1596_v31 = vld [vmem:[%s2477_s1 + $0x128] sm:$0xff]  ;;  %v1595_v35 = vld [vmem:[%s2477_s1 + $0x120] sm:$0xff]  ;;  %v68_v36 = vld [vmem:[%s2479_s0 + $0x1b0] sm:$0xff] }
   0xc   :  { %v77_v37 = vld [vmem:[%s2479_s0 + $0x1f8] sm:$0xff]  ;;  %v104_v38 = vld [vmem:[%s2479_s0 + $0x2d0] sm:$0xff]  ;;  %v1576_v56 = vld [vmem:[%s2477_s1 + $0x88] sm:$0xff] }
   0xd   :  { %v113_v39 = vld [vmem:[%s2479_s0 + $0x318] sm:$0xff]  ;;  %v140_v40 = vld [vmem:[%s2479_s0 + $0x3f0] sm:$0xff]  ;;  %v185_v46 = vpack.c.bf16 %v77_v37, %v68_v36  ;;  %v1568_v57 = vld [vmem:[%s2477_s1 + $0x48] sm:$0xff] }
   0xe   :  { %1640 = vmatpush.bf16.msra.mxu1 %v1563_v3  ;;  %1641 = vmatpush.bf16.msra.mxu2 %v1563_v3  ;;  %v149_v41 = vld [vmem:[%s2479_s0 + $0x438] sm:$0xff]  ;;  %v32_v42 = vld [vmem:[%s2479_s0 + $0x90] sm:$0xff]  ;;  %v203_v47 = vpack.c.bf16 %v113_v39, %v104_v38  ;;  %v1584_v58 = vld [vmem:[%s2477_s1 + $0xc8] sm:$0xff] }
   0xf   :  { %1642 = vmatpush.bf16.msra.mxu3 %v1563_v3  ;;  %813 = vmatpush.bf16.msra.mxu0 %v1563_v3  ;;  %v41_v43 = vld [vmem:[%s2479_s0 + $0xd8] sm:$0xff]  ;;  %v221_v48 = vpack.c.bf16 %v149_v41, %v140_v40  ;;  %v1577_v52 = vld [vmem:[%s2477_s1 + $0x90] sm:$0xff]  ;;  %v1592_v59 = vld [vmem:[%s2477_s1 + $0x108] sm:$0xff] }
  0x10   :  { %v1578_v44 = vld [vmem:[%s2477_s1 + $0x98] sm:$0xff]  ;;  %v167_v49 = vpack.c.bf16 %v41_v43, %v32_v42  ;;  %v1569_v53 = vld [vmem:[%s2477_s1 + $0x50] sm:$0xff]  ;;  %v1575_v60 = vld [vmem:[%s2477_s1 + $0x80] sm:$0xff] }
  0x11   :  { %v1570_v45 = vld [vmem:[%s2477_s1 + $0x58] sm:$0xff]  ;;  %v1585_v54 = vld [vmem:[%s2477_s1 + $0xd0] sm:$0xff]  ;;  %v1567_v61 = vld [vmem:[%s2477_s1 + $0x40] sm:$0xff] }
  0x12   :  { %1643 = vmatpush.bf16.msra.mxu1 %v1562_v4  ;;  %1644 = vmatpush.bf16.msra.mxu2 %v1562_v4  ;;  %v1586_v50 = vld [vmem:[%s2477_s1 + $0xd8] sm:$0xff]  ;;  %v1593_v55 = vld [vmem:[%s2477_s1 + $0x110] sm:$0xff]  ;;  %v15_v62 = vld [vmem:[%s2479_s0 + $0x8] sm:$0xff] }
  0x13   :  { %1645 = vmatpush.bf16.msra.mxu3 %v1562_v4  ;;  %814 = vmatpush.bf16.msra.mxu0 %v1562_v4  ;;  %v1594_v51 = vld [vmem:[%s2477_s1 + $0x118] sm:$0xff]  ;;  %v1583_v63 = vld [vmem:[%s2477_s1 + $0xc0] sm:$0xff]  ;;  %v24_v1 = vld [vmem:[%s2479_s0 + $0x50] sm:$0xff] }
  0x14   :  { %v1591_v0 = vld [vmem:[%s2477_s1 + $0x100] sm:$0xff]  ;;  %v1614_v2 = vld [vmem:[%s2477_s1 + $0x1b8] sm:$0xff]  ;;  %v16_v4 = vld [vmem:[%s2479_s0 + $0x10] sm:$0xff]  ;;  %v159_v12 = vpack.c.bf16 %v24_v1, %v15_v62 }
  0x15   :  { %v1606_v3 = vld [vmem:[%s2477_s1 + $0x178] sm:$0xff]  ;;  %v18_v8 = vld [vmem:[%s2479_s0 + $0x20] sm:$0xff]  ;;  %v27_v9 = vld [vmem:[%s2479_s0 + $0x68] sm:$0xff] }
  0x16   :  { %1646 = vmatpush.bf16.msra.mxu1 %v1561_v5  ;;  %1647 = vmatpush.bf16.msra.mxu2 %v1561_v5  ;;  %v1622_v10 = vld [vmem:[%s2477_s1 + $0x1f8] sm:$0xff]  ;;  %v162_v15 = vpack.c.bf16 %v27_v9, %v18_v8  ;;  %v1611_v36 = vld [vmem:[%s2477_s1 + $0x1a0] sm:$0xff]  ;;  %v51_v40 = vld [vmem:[%s2479_s0 + $0x128] sm:$0xff] }
  0x17   :  { %1648 = vmatpush.bf16.msra.mxu3 %v1561_v5  ;;  %815 = vmatpush.bf16.msra.mxu0 %v1561_v5  ;;  %v25_v5 = vld [vmem:[%s2479_s0 + $0x58] sm:$0xff]  ;;  %v1619_v37 = vld [vmem:[%s2477_s1 + $0x1e0] sm:$0xff]  ;;  %v60_v41 = vld [vmem:[%s2479_s0 + $0x170] sm:$0xff] }
  0x18   :  { %v1630_v11 = vld [vmem:[%s2477_s1 + $0x238] sm:$0xff]  ;;  %v160_v13 = vpack.c.bf16 %v25_v5, %v16_v4  ;;  %v1603_v38 = vld [vmem:[%s2477_s1 + $0x160] sm:$0xff]  ;;  %v52_v42 = vld [vmem:[%s2479_s0 + $0x130] sm:$0xff] }
  0x19   :  { %v1627_v39 = vld [vmem:[%s2477_s1 + $0x220] sm:$0xff]  ;;  %v61_v43 = vld [vmem:[%s2479_s0 + $0x178] sm:$0xff]  ;;  %v72_v62 = vld [vmem:[%s2479_s0 + $0x1d0] sm:$0xff] }
  0x1a   :  { %1649 = vmatpush.bf16.msra.mxu1 %v1560_v6  ;;  %1650 = vmatpush.bf16.msra.mxu2 %v1560_v6  ;;  %v1609_v4 = vld [vmem:[%s2477_s1 + $0x190] sm:$0xff]  ;;  %v87_v8 = vld [vmem:[%s2479_s0 + $0x248] sm:$0xff] }
  0x1b   :  { %1651 = vmatpush.bf16.msra.mxu3 %v1560_v6  ;;  %816 = vmatpush.bf16.msra.mxu0 %v1560_v6  ;;  %v17_v6 = vld [vmem:[%s2479_s0 + $0x18] sm:$0xff]  ;;  %v1617_v5 = vld [vmem:[%s2477_s1 + $0x1d0] sm:$0xff] }
  0x1c   :  { %v96_v9 = vld [vmem:[%s2479_s0 + $0x290] sm:$0xff] }
  0x1e   :  { %1652 = vmatpush.bf16.msra.mxu1 %v1559_v7  ;;  %1653 = vmatpush.bf16.msra.mxu2 %v1559_v7 }
  0x1f   :  { %1654 = vmatpush.bf16.msra.mxu3 %v1559_v7  ;;  %817 = vmatpush.bf16.msra.mxu0 %v1559_v7  ;;  %v26_v7 = vld [vmem:[%s2479_s0 + $0x60] sm:$0xff] }
  0x20   :  { %v161_v14 = vpack.c.bf16 %v26_v7, %v17_v6  ;;  %v1601_v6 = vld [vmem:[%s2477_s1 + $0x150] sm:$0xff] }
  0x21   :  { %828 = vmatmul.bf16.vlgmr.msra.gmra.mxu1 %v176_v18  ;;  %838 = vmatmul.bf16.vlgmr.msra.gmra.mxu2 %v194_v19  ;;  %v1621_v18 = vld [vmem:[%s2477_s1 + $0x1f0] sm:$0xff] }
  0x22   :  { %908 = vmatpush.bf16.msrb.mxu2 %v1582_v16  ;;  %859 = vmatpush.bf16.msrb.mxu1 %v1574_v17  ;;  %v1613_v16 = vld [vmem:[%s2477_s1 + $0x1b0] sm:$0xff] }
  0x23   :  { %848 = vmatmul.bf16.vlgmr.msra.gmra.mxu3 %v212_v20  ;;  %818 = vmatmul.bf16.vlgmr.msra.gmra.mxu0 %v158_v21  ;;  %v1605_v17 = vld [vmem:[%s2477_s1 + $0x170] sm:$0xff]  ;;  %v1612_v20 = vld [vmem:[%s2477_s1 + $0x1a8] sm:$0xff] }
  0x24   :  { %957 = vmatpush.bf16.msrb.mxu3 %v1590_v22  ;;  %1006 = vmatpush.bf16.msrb.mxu0 %v1598_v23  ;;  %v1629_v19 = vld [vmem:[%s2477_s1 + $0x230] sm:$0xff]  ;;  %v1604_v21 = vld [vmem:[%s2477_s1 + $0x168] sm:$0xff] }
  0x25   :  { %v1620_v22 = vld [vmem:[%s2477_s1 + $0x1e8] sm:$0xff]  ;;  %v1625_v7 = vld [vmem:[%s2477_s1 + $0x210] sm:$0xff] }
  0x26   :  { %909 = vmatpush.bf16.msrb.mxu2 %v1581_v24  ;;  %860 = vmatpush.bf16.msrb.mxu1 %v1573_v25  ;;  %v1628_v23 = vld [vmem:[%s2477_s1 + $0x228] sm:$0xff]  ;;  %v33_v24 = vld [vmem:[%s2479_s0 + $0x98] sm:$0xff]  ;;  %v42_v25 = vld [vmem:[%s2479_s0 + $0xe0] sm:$0xff] }
  0x28   :  { %958 = vmatpush.bf16.msrb.mxu3 %v1589_v26  ;;  %1007 = vmatpush.bf16.msrb.mxu0 %v1597_v27  ;;  %v34_v26 = vld [vmem:[%s2479_s0 + $0xa0] sm:$0xff]  ;;  %v43_v27 = vld [vmem:[%s2479_s0 + $0xe8] sm:$0xff] }
  0x2a   :  { %910 = vmatpush.bf16.msrb.mxu2 %v1580_v28  ;;  %861 = vmatpush.bf16.msrb.mxu1 %v1572_v29  ;;  %v35_v28 = vld [vmem:[%s2479_s0 + $0xa8] sm:$0xff]  ;;  %v44_v29 = vld [vmem:[%s2479_s0 + $0xf0] sm:$0xff] }
  0x2c   :  { %959 = vmatpush.bf16.msrb.mxu3 %v1588_v30  ;;  %1008 = vmatpush.bf16.msrb.mxu0 %v1596_v31  ;;  %v36_v30 = vld [vmem:[%s2479_s0 + $0xb0] sm:$0xff]  ;;  %v45_v31 = vld [vmem:[%s2479_s0 + $0xf8] sm:$0xff] }
  0x2e   :  { %911 = vmatpush.bf16.msrb.mxu2 %v1579_v32  ;;  %862 = vmatpush.bf16.msrb.mxu1 %v1571_v33  ;;  %v168_v32 = vpack.c.bf16 %v42_v25, %v33_v24  ;;  %v169_v33 = vpack.c.bf16 %v43_v27, %v34_v26  ;;  %v105_v24 = vld [vmem:[%s2479_s0 + $0x2d8] sm:$0xff]  ;;  %v114_v25 = vld [vmem:[%s2479_s0 + $0x320] sm:$0xff]  ;;  %v115_v27 = vld [vmem:[%s2479_s0 + $0x328] sm:$0xff] }
  0x2f   :  { %v106_v26 = vld [vmem:[%s2479_s0 + $0x2e0] sm:$0xff] }
  0x30   :  { %960 = vmatpush.bf16.msrb.mxu3 %v1587_v34  ;;  %1009 = vmatpush.bf16.msrb.mxu0 %v1595_v35  ;;  %v170_v34 = vpack.c.bf16 %v44_v29, %v35_v28  ;;  %v171_v35 = vpack.c.bf16 %v45_v31, %v36_v30  ;;  %v107_v28 = vld [vmem:[%s2479_s0 + $0x2e8] sm:$0xff]  ;;  %v116_v29 = vld [vmem:[%s2479_s0 + $0x330] sm:$0xff]  ;;  %v117_v31 = vld [vmem:[%s2479_s0 + $0x338] sm:$0xff] }
  0x31   :  { %833 = vmatmul.bf16.gmra.mxu1 %v185_v46  ;;  %843 = vmatmul.bf16.gmra.mxu2 %v203_v47  ;;  %v54_v46 = vld [vmem:[%s2479_s0 + $0x140] sm:$0xff]  ;;  %v63_v47 = vld [vmem:[%s2479_s0 + $0x188] sm:$0xff]  ;;  %v108_v30 = vld [vmem:[%s2479_s0 + $0x2f0] sm:$0xff] }
  0x32   :  { %912 = vmatpush.bf16.msrb.mxu2 %v1578_v44  ;;  %863 = vmatpush.bf16.msrb.mxu1 %v1570_v45  ;;  %v53_v44 = vld [vmem:[%s2479_s0 + $0x138] sm:$0xff]  ;;  %v62_v45 = vld [vmem:[%s2479_s0 + $0x180] sm:$0xff] }
  0x33   :  { %853 = vmatmul.bf16.gmra.mxu3 %v221_v48  ;;  %823 = vmatmul.bf16.gmra.mxu0 %v167_v49  ;;  %v177_v48 = vpack.c.bf16 %v60_v41, %v51_v40  ;;  %v178_v49 = vpack.c.bf16 %v61_v43, %v52_v42  ;;  %v123_v40 = vld [vmem:[%s2479_s0 + $0x368] sm:$0xff]  ;;  %v132_v41 = vld [vmem:[%s2479_s0 + $0x3b0] sm:$0xff]  ;;  %v133_v43 = vld [vmem:[%s2479_s0 + $0x3b8] sm:$0xff] }
  0x34   :  { %961 = vmatpush.bf16.msrb.mxu3 %v1586_v50  ;;  %1010 = vmatpush.bf16.msrb.mxu0 %v1594_v51  ;;  %v179_v50 = vpack.c.bf16 %v62_v45, %v53_v44  ;;  %v180_v51 = vpack.c.bf16 %v63_v47, %v54_v46  ;;  %v124_v42 = vld [vmem:[%s2479_s0 + $0x370] sm:$0xff]  ;;  %v125_v44 = vld [vmem:[%s2479_s0 + $0x378] sm:$0xff]  ;;  %v134_v45 = vld [vmem:[%s2479_s0 + $0x3c0] sm:$0xff] }
  0x35   :  { %v126_v46 = vld [vmem:[%s2479_s0 + $0x380] sm:$0xff]  ;;  %v135_v47 = vld [vmem:[%s2479_s0 + $0x3c8] sm:$0xff] }
  0x36   :  { %913 = vmatpush.bf16.msrb.mxu2 %v1577_v52  ;;  %864 = vmatpush.bf16.msrb.mxu1 %v1569_v53  ;;  %v1610_v52 = vld [vmem:[%s2477_s1 + $0x198] sm:$0xff] }
  0x37   :  { %v1618_v53 = vld [vmem:[%s2477_s1 + $0x1d8] sm:$0xff] }
  0x38   :  { %962 = vmatpush.bf16.msrb.mxu3 %v1585_v54  ;;  %1011 = vmatpush.bf16.msrb.mxu0 %v1593_v55  ;;  %v1602_v54 = vld [vmem:[%s2477_s1 + $0x158] sm:$0xff] }
  0x39   :  { %v1626_v55 = vld [vmem:[%s2477_s1 + $0x218] sm:$0xff] }
  0x3a   :  { %914 = vmatpush.bf16.msrb.mxu2 %v1576_v56  ;;  %865 = vmatpush.bf16.msrb.mxu1 %v1568_v57  ;;  %v69_v56 = vld [vmem:[%s2479_s0 + $0x1b8] sm:$0xff]  ;;  %v78_v57 = vld [vmem:[%s2479_s0 + $0x200] sm:$0xff] }
  0x3c   :  { %963 = vmatpush.bf16.msrb.mxu3 %v1584_v58  ;;  %1012 = vmatpush.bf16.msrb.mxu0 %v1592_v59  ;;  %v70_v58 = vld [vmem:[%s2479_s0 + $0x1c0] sm:$0xff]  ;;  %v79_v59 = vld [vmem:[%s2479_s0 + $0x208] sm:$0xff] }
  0x3d   :  { %v187_v1 = vpack.c.bf16 %v79_v59, %v70_v58 }
  0x3e   :  { %915 = vmatpush.bf16.msrb.mxu2 %v1575_v60  ;;  %866 = vmatpush.bf16.msrb.mxu1 %v1567_v61  ;;  %v71_v60 = vld [vmem:[%s2479_s0 + $0x1c8] sm:$0xff]  ;;  %v80_v61 = vld [vmem:[%s2479_s0 + $0x210] sm:$0xff] }
  0x40   :  { %964 = vmatpush.bf16.msrb.mxu3 %v1583_v63  ;;  %1013 = vmatpush.bf16.msrb.mxu0 %v1591_v0  ;;  %v81_v63 = vld [vmem:[%s2479_s0 + $0x218] sm:$0xff]  ;;  %v186_v0 = vpack.c.bf16 %v78_v57, %v69_v56 }
  0x41   :  { %867 = vmatmul.bf16.vlgmr.msrb.gmra.mxu1 %v159_v12  ;;  %916 = vmatmul.bf16.vlgmr.msrb.gmra.mxu2 %v160_v13  ;;  %v89_v12 = vld [vmem:[%s2479_s0 + $0x258] sm:$0xff]  ;;  %v98_v13 = vld [vmem:[%s2479_s0 + $0x2a0] sm:$0xff] }
  0x42   :  { %1104 = vmatpush.bf16.msra.mxu2 %v1614_v2  ;;  %1055 = vmatpush.bf16.msra.mxu1 %v1606_v3  ;;  %v188_v2 = vpack.c.bf16 %v80_v61, %v71_v60  ;;  %v189_v3 = vpack.c.bf16 %v81_v63, %v72_v62  ;;  %v141_v61 = vld [vmem:[%s2479_s0 + $0x3f8] sm:$0xff]  ;;  %v150_v62 = vld [vmem:[%s2479_s0 + $0x440] sm:$0xff] }
  0x43   :  { %965 = vmatmul.bf16.vlgmr.msrb.gmra.mxu3 %v161_v14  ;;  %1014 = vmatmul.bf16.vlgmr.msrb.gmra.mxu0 %v162_v15  ;;  %v90_v14 = vld [vmem:[%s2479_s0 + $0x260] sm:$0xff]  ;;  %v99_v15 = vld [vmem:[%s2479_s0 + $0x2a8] sm:$0xff] }
  0x44   :  { %1153 = vmatpush.bf16.msra.mxu3 %v1622_v10  ;;  %1202 = vmatpush.bf16.msra.mxu0 %v1630_v11  ;;  %v88_v10 = vld [vmem:[%s2479_s0 + $0x250] sm:$0xff]  ;;  %v97_v11 = vld [vmem:[%s2479_s0 + $0x298] sm:$0xff]  ;;  %v142_v63 = vld [vmem:[%s2479_s0 + $0x400] sm:$0xff] }
  0x46   :  { %1105 = vmatpush.bf16.msra.mxu2 %v1613_v16  ;;  %1056 = vmatpush.bf16.msra.mxu1 %v1605_v17  ;;  %v195_v16 = vpack.c.bf16 %v96_v9, %v87_v8  ;;  %v196_v17 = vpack.c.bf16 %v97_v11, %v88_v10  ;;  %v222_v8 = vpack.c.bf16 %v150_v62, %v141_v61  ;;  %v40_v61 = vld [vmem:[%s2479_s0 + $0xd0] sm:$0xff]  ;;  %v49_v62 = vld [vmem:[%s2479_s0 + $0x118] sm:$0xff] }
  0x48   :  { %1154 = vmatpush.bf16.msra.mxu3 %v1621_v18  ;;  %1203 = vmatpush.bf16.msra.mxu0 %v1629_v19  ;;  %v197_v18 = vpack.c.bf16 %v98_v13, %v89_v12  ;;  %v198_v19 = vpack.c.bf16 %v99_v15, %v90_v14 }
  0x4a   :  { %1106 = vmatpush.bf16.msra.mxu2 %v1612_v20  ;;  %1057 = vmatpush.bf16.msra.mxu1 %v1604_v21  ;;  %v1608_v20 = vld [vmem:[%s2477_s1 + $0x188] sm:$0xff] }
  0x4b   :  { %v1616_v21 = vld [vmem:[%s2477_s1 + $0x1c8] sm:$0xff] }
  0x4c   :  { %1155 = vmatpush.bf16.msra.mxu3 %v1620_v22  ;;  %1204 = vmatpush.bf16.msra.mxu0 %v1628_v23  ;;  %v1600_v22 = vld [vmem:[%s2477_s1 + $0x148] sm:$0xff] }
  0x4d   :  { %v1624_v23 = vld [vmem:[%s2477_s1 + $0x208] sm:$0xff] }
  0x4e   :  { %1107 = vmatpush.bf16.msra.mxu2 %v1611_v36  ;;  %1058 = vmatpush.bf16.msra.mxu1 %v1603_v38  ;;  %v1607_v36 = vld [vmem:[%s2477_s1 + $0x180] sm:$0xff] }
  0x4f   :  { %v1599_v38 = vld [vmem:[%s2477_s1 + $0x140] sm:$0xff] }
  0x50   :  { %1156 = vmatpush.bf16.msra.mxu3 %v1619_v37  ;;  %1205 = vmatpush.bf16.msra.mxu0 %v1627_v39  ;;  %v1615_v37 = vld [vmem:[%s2477_s1 + $0x1c0] sm:$0xff] }
  0x51   :  { %872 = vmatmul.bf16.gmra.mxu1 %v168_v32  ;;  %921 = vmatmul.bf16.gmra.mxu2 %v169_v33  ;;  %v204_v32 = vpack.c.bf16 %v114_v25, %v105_v24  ;;  %v205_v33 = vpack.c.bf16 %v115_v27, %v106_v26  ;;  %v1623_v39 = vld [vmem:[%s2477_s1 + $0x200] sm:$0xff]  ;;  %v29_v24 = vld [vmem:[%s2479_s0 + $0x78] sm:$0xff] }
  0x52   :  { %1108 = vmatpush.bf16.msra.mxu2 %v1610_v52  ;;  %1059 = vmatpush.bf16.msra.mxu1 %v1602_v54  ;;  %v216_v52 = vpack.c.bf16 %v135_v47, %v126_v46  ;;  %v2113_v54 = vld [vmem:[%s2478_s2] ss:$0 sm:$0xff]  ;;  %v21_v25 = vld [vmem:[%s2479_s0 + $0x38] sm:$0xff] }
  0x53   :  { %970 = vmatmul.bf16.gmra.mxu3 %v170_v34  ;;  %1019 = vmatmul.bf16.gmra.mxu0 %v171_v35  ;;  %v206_v34 = vpack.c.bf16 %v116_v29, %v107_v28  ;;  %v207_v35 = vpack.c.bf16 %v117_v31, %v108_v30  ;;  %v30_v26 = vld [vmem:[%s2479_s0 + $0x80] sm:$0xff]  ;;  %v31_v28 = vld [vmem:[%s2479_s0 + $0x88] sm:$0xff] }
  0x54   :  { %1157 = vmatpush.bf16.msra.mxu3 %v1618_v53  ;;  %1206 = vmatpush.bf16.msra.mxu0 %v1626_v55  ;;  %v22_v27 = vld [vmem:[%s2479_s0 + $0x40] sm:$0xff] }
  0x56   :  { %1109 = vmatpush.bf16.msra.mxu2 %v1609_v4  ;;  %1060 = vmatpush.bf16.msra.mxu1 %v1601_v6  ;;  %v153_v4 = vld [vmem:[%s2479_s0 + $0x458] sm:$0xff] }
  0x58   :  { %1158 = vmatpush.bf16.msra.mxu3 %v1617_v5  ;;  %1207 = vmatpush.bf16.msra.mxu0 %v1625_v7 }
  0x5a   :  { %1110 = vmatpush.bf16.msra.mxu2 %v1608_v20  ;;  %1061 = vmatpush.bf16.msra.mxu1 %v1600_v22  ;;  %v28_v22 = vld [vmem:[%s2479_s0 + $0x70] sm:$0xff] }
  0x5c   :  { %1159 = vmatpush.bf16.msra.mxu3 %v1616_v21  ;;  %1208 = vmatpush.bf16.msra.mxu0 %v1624_v23  ;;  %v19_v21 = vld [vmem:[%s2479_s0 + $0x28] sm:$0xff]  ;;  %v20_v23 = vld [vmem:[%s2479_s0 + $0x30] sm:$0xff] }
  0x5e   :  { %1111 = vmatpush.bf16.msra.mxu2 %v1607_v36  ;;  %1062 = vmatpush.bf16.msra.mxu1 %v1599_v38  ;;  %v166_v38 = vpack.c.bf16 %v31_v28, %v22_v27  ;;  %v55_v27 = vld [vmem:[%s2479_s0 + $0x148] sm:$0xff]  ;;  %v64_v28 = vld [vmem:[%s2479_s0 + $0x190] sm:$0xff] }
  0x60   :  { %1160 = vmatpush.bf16.msra.mxu3 %v1615_v37  ;;  %1209 = vmatpush.bf16.msra.mxu0 %v1623_v39  ;;  %v165_v37 = vpack.c.bf16 %v30_v26, %v21_v25 }
  0x61   :  { %877 = vmatmul.bf16.gmra.mxu1 %v177_v48  ;;  %926 = vmatmul.bf16.gmra.mxu2 %v178_v49  ;;  %v213_v48 = vpack.c.bf16 %v132_v41, %v123_v40  ;;  %v214_v49 = vpack.c.bf16 %v133_v43, %v124_v42 }
  0x63   :  { %975 = vmatmul.bf16.gmra.mxu3 %v179_v50  ;;  %1024 = vmatmul.bf16.gmra.mxu0 %v180_v51  ;;  %v215_v51 = vpack.c.bf16 %v134_v45, %v125_v44 }
  0x71   :  { %882 = vmatmul.bf16.gmra.mxu1 %v186_v0  ;;  %931 = vmatmul.bf16.gmra.mxu2 %v187_v1  ;;  %v151_v0 = vld [vmem:[%s2479_s0 + $0x448] sm:$0xff] }
  0x72   :  { %v143_v1 = vld [vmem:[%s2479_s0 + $0x408] sm:$0xff]  ;;  %v223_v9 = vpack.c.bf16 %v151_v0, %v142_v63 }
  0x73   :  { %980 = vmatmul.bf16.gmra.mxu3 %v188_v2  ;;  %1029 = vmatmul.bf16.gmra.mxu0 %v189_v3  ;;  %v152_v2 = vld [vmem:[%s2479_s0 + $0x450] sm:$0xff] }
  0x74   :  { %v144_v3 = vld [vmem:[%s2479_s0 + $0x410] sm:$0xff]  ;;  %v224_v12 = vpack.c.bf16 %v152_v2, %v143_v1 }
  0x75   :  { %v225_v13 = vpack.c.bf16 %v153_v4, %v144_v3 }
  0x81   :  { %887 = vmatmul.bf16.gmra.mxu1 %v195_v16  ;;  %936 = vmatmul.bf16.gmra.mxu2 %v196_v17 }
  0x83   :  { %985 = vmatmul.bf16.gmra.mxu3 %v197_v18  ;;  %1034 = vmatmul.bf16.gmra.mxu0 %v198_v19 }
  0x91   :  { %892 = vmatmul.bf16.gmra.mxu1 %v204_v32  ;;  %941 = vmatmul.bf16.gmra.mxu2 %v205_v33  ;;  %v163_v33 = vpack.c.bf16 %v28_v22, %v19_v21 }
  0x93   :  { %990 = vmatmul.bf16.gmra.mxu3 %v206_v34  ;;  %1039 = vmatmul.bf16.gmra.mxu0 %v207_v35  ;;  %v164_v34 = vpack.c.bf16 %v29_v24, %v20_v23 }
  0x9e   :  { %v2108_v50 = vpop.f32.mrf.mxu1 }
  0xa0   :  { %v819_v53 = vpop.f32.mrf.mxu0 }
  0xa1   :  { %897 = vmatmul.bf16.gmra.mxu1 %v213_v48  ;;  %946 = vmatmul.bf16.gmra.mxu2 %v214_v49  ;;  %v820_v30 = vadd.f32 %v2113_v54, %v819_v53  ;;  %v37_v49 = vld [vmem:[%s2479_s0 + $0xb8] sm:$0xff]  ;;  %v38_v53 = vld [vmem:[%s2479_s0 + $0xc0] sm:$0xff] }
  0xa3   :  { %995 = vmatmul.bf16.gmra.mxu3 %v215_v51  ;;  %1044 = vmatmul.bf16.gmra.mxu0 %v216_v52  ;;  %v46_v51 = vld [vmem:[%s2479_s0 + $0x100] sm:$0xff] }
  0xa4   :  { %v839_v55 = vpop.f32.mrf.mxu2  ;;  %v172_v3 = vpack.c.bf16 %v46_v51, %v37_v49 }
  0xa5   :  { %v2116_v56 = vadd.f32 %v2113_v54, %v839_v55  ;;  %v47_v55 = vld [vmem:[%s2479_s0 + $0x108] sm:$0xff] }
  0xa6   :  { %v849_v57 = vpop.f32.mrf.mxu3  ;;  %v2121_v59 = vpop.f32.mrf.mxu1  ;;  %v173_v4 = vpack.c.bf16 %v47_v55, %v38_v53 }
  0xa7   :  { %v2119_v58 = vadd.f32 %v2113_v54, %v849_v57  ;;  %v39_v57 = vld [vmem:[%s2479_s0 + $0xc8] sm:$0xff] }
  0xa8   :  { %v821_v60 = vpop.f32.mrf.mxu0 }
  0xa9   :  { %v822_v42 = vadd.f32 %v2113_v54, %v821_v60  ;;  %v48_v60 = vld [vmem:[%s2479_s0 + $0x110] sm:$0xff] }
  0xac   :  { %v841_v5 = vpop.f32.mrf.mxu2 }
  0xad   :  { %v2148_v6 = vadd.f32 %v2113_v54, %v841_v5 }
  0xae   :  { %v851_v7 = vpop.f32.mrf.mxu3  ;;  %v2153_v11 = vpop.f32.mrf.mxu1 }
  0xaf   :  { %v2151_v10 = vadd.f32 %v2113_v54, %v851_v7  ;;  %v174_v7 = vpack.c.bf16 %v48_v60, %v39_v57 }
  0xb0   :  { %v824_v14 = vpop.f32.mrf.mxu0 }
  0xb1   :  { %902 = vmatmul.bf16.gmra.mxu1 %v222_v8  ;;  %951 = vmatmul.bf16.gmra.mxu2 %v223_v9  ;;  %v825_v0 = vadd.f32 %v2113_v54, %v824_v14  ;;  %v175_v8 = vpack.c.bf16 %v49_v62, %v40_v61 }
  0xb3   :  { %1000 = vmatmul.bf16.gmra.mxu3 %v224_v12  ;;  %1049 = vmatmul.bf16.gmra.mxu0 %v225_v13 }
  0xb4   :  { %v844_v15 = vpop.f32.mrf.mxu2 }
  0xb5   :  { %v2156_v16 = vadd.f32 %v2113_v54, %v844_v15 }
  0xb6   :  { %v854_v17 = vpop.f32.mrf.mxu3  ;;  %v2161_v19 = vpop.f32.mrf.mxu1 }
  0xb7   :  { %v2159_v18 = vadd.f32 %v2113_v54, %v854_v17 }
  0xb8   :  { %v826_v20 = vpop.f32.mrf.mxu0 }
  0xb9   :  { %v827_v21 = vadd.f32 %v2113_v54, %v826_v20  ;;  %v56_v20 = vld [vmem:[%s2479_s0 + $0x150] sm:$0xff] }
  0xbc   :  { %v846_v29 = vpop.f32.mrf.mxu2 }
  0xbd   :  { %v2189_v31 = vadd.f32 %v2113_v54, %v846_v29 }
  0xbe   :  { %v856_v32 = vpop.f32.mrf.mxu3  ;;  %v868_v36 = vpop.f32.mrf.mxu1 }
  0xbf   :  { %v2192_v35 = vadd.f32 %v2113_v54, %v856_v32  ;;  %v869_v39 = vadd.f32 %v868_v36, %v820_v30  ;;  %v65_v30 = vld [vmem:[%s2479_s0 + $0x198] sm:$0xff]  ;;  %v67_v36 = vld [vmem:[%s2479_s0 + $0x1a8] sm:$0xff] }
  0xc0   :  { %v1015_v40 = vpop.f32.mrf.mxu0  ;;  %v57_v32 = vld [vmem:[%s2479_s0 + $0x158] sm:$0xff] }
  0xc1   :  { %1063 = vmatmul.bf16.vlgmr.msra.gmra.mxu1 %v163_v33  ;;  %1112 = vmatmul.bf16.vlgmr.msra.gmra.mxu2 %v164_v34  ;;  %v66_v33 = vld [vmem:[%s2479_s0 + $0x1a0] sm:$0xff] }
  0xc2   :  { %v58_v34 = vld [vmem:[%s2479_s0 + $0x160] sm:$0xff] }
  0xc3   :  { %1161 = vmatmul.bf16.vlgmr.msra.gmra.mxu3 %v165_v37  ;;  %1210 = vmatmul.bf16.vlgmr.msra.gmra.mxu0 %v166_v38  ;;  %v830_v38 = vadd.f32 %v2113_v54, %v2108_v50  ;;  %v832_v50 = vadd.f32 %v2113_v54, %v2121_v59  ;;  %v74_v59 = vld [vmem:[%s2479_s0 + $0x1e0] sm:$0xff] }
  0xc4   :  { %v917_v41 = vpop.f32.mrf.mxu2 }
  0xc5   :  { %v918_v43 = vadd.f32 %v917_v41, %v869_v39  ;;  %v181_v41 = vpack.c.bf16 %v64_v28, %v55_v27 }
  0xc6   :  { %v966_v44 = vpop.f32.mrf.mxu3  ;;  %v870_v45 = vpop.f32.mrf.mxu1 }
  0xc7   :  { %v967_v46 = vadd.f32 %v966_v44, %v918_v43  ;;  %v871_v47 = vadd.f32 %v870_v45, %v822_v42  ;;  %v182_v42 = vpack.c.bf16 %v65_v30, %v56_v20  ;;  %v183_v44 = vpack.c.bf16 %v66_v33, %v57_v32 }
  0xc8   :  { %v1017_v48 = vpop.f32.mrf.mxu0  ;;  %v184_v45 = vpack.c.bf16 %v67_v36, %v58_v34 }
  0xc9   :  { %v2201_v52 = vadd.f32 %v1015_v40, %v967_v46 }
  0xcc   :  { %v919_v63 = vpop.f32.mrf.mxu2 }
  0xcd   :  { %v920_v1 = vadd.f32 %v919_v63, %v871_v47  ;;  %v73_v63 = vld [vmem:[%s2479_s0 + $0x1d8] sm:$0xff] }
  0xce   :  { %v968_v2 = vpop.f32.mrf.mxu3  ;;  %v873_v5 = vpop.f32.mrf.mxu1 }
  0xcf   :  { %v969_v9 = vadd.f32 %v968_v2, %v920_v1  ;;  %v874_v12 = vadd.f32 %v873_v5, %v825_v0  ;;  %v82_v0 = vld [vmem:[%s2479_s0 + $0x220] sm:$0xff]  ;;  %v83_v2 = vld [vmem:[%s2479_s0 + $0x228] sm:$0xff]  ;;  %v76_v5 = vld [vmem:[%s2479_s0 + $0x1f0] sm:$0xff] }
  0xd0   :  { %v1020_v13 = vpop.f32.mrf.mxu0 }
  0xd1   :  { %1068 = vmatmul.bf16.gmra.mxu1 %v172_v3  ;;  %1117 = vmatmul.bf16.gmra.mxu2 %v173_v4  ;;  %v2222_v15 = vadd.f32 %v1017_v48, %v969_v9  ;;  %v75_v3 = vld [vmem:[%s2479_s0 + $0x1e8] sm:$0xff]  ;;  %v84_v4 = vld [vmem:[%s2479_s0 + $0x230] sm:$0xff]  ;;  %v835_v9 = vadd.f32 %v2113_v54, %v2153_v11  ;;  %v837_v11 = vadd.f32 %v2113_v54, %v2161_v19  ;;  %v101_v19 = vld [vmem:[%s2479_s0 + $0x2b8] sm:$0xff] }
  0xd2   :  { %v92_v54 = vld [vmem:[%s2479_s0 + $0x270] sm:$0xff] }
  0xd3   :  { %1166 = vmatmul.bf16.gmra.mxu3 %v174_v7  ;;  %1215 = vmatmul.bf16.gmra.mxu0 %v175_v8  ;;  %v85_v7 = vld [vmem:[%s2479_s0 + $0x238] sm:$0xff] }
  0xd4   :  { %v922_v17 = vpop.f32.mrf.mxu2 }
  0xd5   :  { %v923_v14 = vadd.f32 %v922_v17, %v874_v12  ;;  %v190_v17 = vpack.c.bf16 %v82_v0, %v73_v63 }
  0xd6   :  { %v971_v22 = vpop.f32.mrf.mxu3  ;;  %v875_v23 = vpop.f32.mrf.mxu1 }
  0xd7   :  { %v972_v24 = vadd.f32 %v971_v22, %v923_v14  ;;  %v876_v25 = vadd.f32 %v875_v23, %v827_v21  ;;  %v191_v21 = vpack.c.bf16 %v83_v2, %v74_v59  ;;  %v192_v22 = vpack.c.bf16 %v84_v4, %v75_v3 }
  0xd8   :  { %v1022_v26 = vpop.f32.mrf.mxu0  ;;  %v193_v23 = vpack.c.bf16 %v85_v7, %v76_v5  ;;  %v109_v5 = vld [vmem:[%s2479_s0 + $0x2f8] sm:$0xff] }
  0xd9   :  { %v2231_v29 = vadd.f32 %v1020_v13, %v972_v24 }
  0xdc   :  { %v924_v37 = vpop.f32.mrf.mxu2 }
  0xdd   :  { %v925_v39 = vadd.f32 %v924_v37, %v876_v25  ;;  %v91_v37 = vld [vmem:[%s2479_s0 + $0x268] sm:$0xff] }
  0xde   :  { %v973_v40 = vpop.f32.mrf.mxu3  ;;  %v878_v43 = vpop.f32.mrf.mxu1 }
  0xdf   :  { %v974_v46 = vadd.f32 %v973_v40, %v925_v39  ;;  %v879_v47 = vadd.f32 %v878_v43, %v830_v38  ;;  %v100_v38 = vld [vmem:[%s2479_s0 + $0x2b0] sm:$0xff]  ;;  %v93_v40 = vld [vmem:[%s2479_s0 + $0x278] sm:$0xff]  ;;  %v103_v43 = vld [vmem:[%s2479_s0 + $0x2c8] sm:$0xff] }
  0xe0   :  { %v1025_v48 = vpop.f32.mrf.mxu0 }
  0xe1   :  { %1073 = vmatmul.bf16.gmra.mxu1 %v181_v41  ;;  %1122 = vmatmul.bf16.gmra.mxu2 %v182_v42  ;;  %v2253_v49 = vadd.f32 %v1022_v26, %v974_v46  ;;  %v102_v41 = vld [vmem:[%s2479_s0 + $0x2c0] sm:$0xff] }
  0xe2   :  { %v94_v42 = vld [vmem:[%s2479_s0 + $0x280] sm:$0xff] }
  0xe3   :  { %1171 = vmatmul.bf16.gmra.mxu3 %v183_v44  ;;  %1220 = vmatmul.bf16.gmra.mxu0 %v184_v45 }
  0xe4   :  { %v927_v51 = vpop.f32.mrf.mxu2 }
  0xe5   :  { %v928_v53 = vadd.f32 %v927_v51, %v879_v47  ;;  %v199_v47 = vpack.c.bf16 %v100_v38, %v91_v37 }
  0xe6   :  { %v976_v55 = vpop.f32.mrf.mxu3  ;;  %v880_v57 = vpop.f32.mrf.mxu1 }
  0xe7   :  { %v977_v60 = vadd.f32 %v976_v55, %v928_v53  ;;  %v881_v61 = vadd.f32 %v880_v57, %v832_v50  ;;  %v201_v50 = vpack.c.bf16 %v102_v41, %v93_v40  ;;  %v202_v53 = vpack.c.bf16 %v103_v43, %v94_v42  ;;  %v127_v40 = vld [vmem:[%s2479_s0 + $0x388] sm:$0xff]  ;;  %v128_v42 = vld [vmem:[%s2479_s0 + $0x390] sm:$0xff]  ;;  %v137_v43 = vld [vmem:[%s2479_s0 + $0x3d8] sm:$0xff] }
  0xe8   :  { %v1027_v62 = vpop.f32.mrf.mxu0 }
  0xe9   :  { %v2263_v1 = vadd.f32 %v1025_v48, %v977_v60  ;;  %v200_v48 = vpack.c.bf16 %v101_v19, %v92_v54 }
  0xec   :  { %v929_v8 = vpop.f32.mrf.mxu2 }
  0xed   :  { %v930_v12 = vadd.f32 %v929_v8, %v881_v61  ;;  %v110_v8 = vld [vmem:[%s2479_s0 + $0x300] sm:$0xff] }
  0xee   :  { %v978_v13 = vpop.f32.mrf.mxu3  ;;  %v883_v14 = vpop.f32.mrf.mxu1 }
  0xef   :  { %v979_v24 = vadd.f32 %v978_v13, %v930_v12  ;;  %v884_v25 = vadd.f32 %v883_v14, %v835_v9  ;;  %v119_v9 = vld [vmem:[%s2479_s0 + $0x348] sm:$0xff]  ;;  %v120_v12 = vld [vmem:[%s2479_s0 + $0x350] sm:$0xff] }
  0xf0   :  { %v1030_v26 = vpop.f32.mrf.mxu0  ;;  %v112_v13 = vld [vmem:[%s2479_s0 + $0x310] sm:$0xff] }
  0xf1   :  { %1078 = vmatmul.bf16.gmra.mxu1 %v190_v17  ;;  %1127 = vmatmul.bf16.gmra.mxu2 %v191_v21  ;;  %v2285_v27 = vadd.f32 %v1027_v62, %v979_v24  ;;  %v121_v17 = vld [vmem:[%s2479_s0 + $0x358] sm:$0xff]  ;;  %v209_v24 = vpack.c.bf16 %v119_v9, %v110_v8 }
  0xf3   :  { %1176 = vmatmul.bf16.gmra.mxu3 %v192_v22  ;;  %1225 = vmatmul.bf16.gmra.mxu0 %v193_v23 }
  0xf4   :  { %v932_v28 = vpop.f32.mrf.mxu2 }
  0xf5   :  { %v933_v20 = vadd.f32 %v932_v28, %v884_v25  ;;  %v211_v28 = vpack.c.bf16 %v121_v17, %v112_v13  ;;  %v146_v13 = vld [vmem:[%s2479_s0 + $0x420] sm:$0xff]  ;;  %v155_v17 = vld [vmem:[%s2479_s0 + $0x468] sm:$0xff] }
  0xf6   :  { %v981_v30 = vpop.f32.mrf.mxu3  ;;  %v885_v32 = vpop.f32.mrf.mxu1 }
  0xf7   :  { %v982_v33 = vadd.f32 %v981_v30, %v933_v20  ;;  %v886_v34 = vadd.f32 %v885_v32, %v837_v11 }
  0xf8   :  { %v1032_v36 = vpop.f32.mrf.mxu0 }
  0xf9   :  { %v2295_v39 = vadd.f32 %v1030_v26, %v982_v33 }
  0xfc   :  { %v934_v44 = vpop.f32.mrf.mxu2 }
  0xfd   :  { %v935_v45 = vadd.f32 %v934_v44, %v886_v34  ;;  %v138_v44 = vld [vmem:[%s2479_s0 + $0x3e0] sm:$0xff] }
  0xfe   :  { %v983_v46 = vpop.f32.mrf.mxu3  ;;  %v888_v51 = vpop.f32.mrf.mxu1 }
  0xff   :  { %v984_v55 = vadd.f32 %v983_v46, %v935_v45  ;;  %v889_v57 = vadd.f32 %v888_v51, %v2116_v56  ;;  %v118_v56 = vld [vmem:[%s2479_s0 + $0x340] sm:$0xff]  ;;  %v139_v46 = vld [vmem:[%s2479_s0 + $0x3e8] sm:$0xff] }
 0x100   :  { %v1035_v60 = vpop.f32.mrf.mxu0  ;;  %v208_v23 = vpack.c.bf16 %v118_v56, %v109_v5  ;;  %v130_v45 = vld [vmem:[%s2479_s0 + $0x3a0] sm:$0xff] }
 0x101   :  { %1083 = vmatmul.bf16.gmra.mxu1 %v199_v47  ;;  %1132 = vmatmul.bf16.gmra.mxu2 %v200_v48  ;;  %v2316_v61 = vadd.f32 %v1032_v36, %v984_v55 }
 0x103   :  { %1181 = vmatmul.bf16.gmra.mxu3 %v201_v50  ;;  %1230 = vmatmul.bf16.gmra.mxu0 %v202_v53  ;;  %v218_v53 = vpack.c.bf16 %v137_v43, %v128_v42 }
 0x104   :  { %v937_v62 = vpop.f32.mrf.mxu2 }
 0x105   :  { %v938_v63 = vadd.f32 %v937_v62, %v889_v57 }
 0x106   :  { %v986_v0 = vpop.f32.mrf.mxu3  ;;  %v890_v59 = vpop.f32.mrf.mxu1 }
 0x107   :  { %v987_v2 = vadd.f32 %v986_v0, %v938_v63  ;;  %v891_v3 = vadd.f32 %v890_v59, %v2148_v6  ;;  %v111_v6 = vld [vmem:[%s2479_s0 + $0x308] sm:$0xff] }
 0x108   :  { %v1037_v4 = vpop.f32.mrf.mxu0  ;;  %v210_v26 = vpack.c.bf16 %v120_v12, %v111_v6  ;;  %v145_v6 = vld [vmem:[%s2479_s0 + $0x418] sm:$0xff] }
 0x109   :  { %v2325_v7 = vadd.f32 %v1035_v60, %v987_v2  ;;  %v220_v60 = vpack.c.bf16 %v139_v46, %v130_v45 }
 0x10c   :  { %v939_v21 = vpop.f32.mrf.mxu2 }
 0x10d   :  { %v940_v14 = vadd.f32 %v939_v21, %v891_v3  ;;  %v156_v21 = vld [vmem:[%s2479_s0 + $0x470] sm:$0xff] }
 0x10e   :  { %v988_v22 = vpop.f32.mrf.mxu3  ;;  %v893_v25 = vpop.f32.mrf.mxu1 }
 0x10f   :  { %v989_v11 = vadd.f32 %v988_v22, %v940_v14  ;;  %v894_v20 = vadd.f32 %v893_v25, %v2156_v16  ;;  %v136_v16 = vld [vmem:[%s2479_s0 + $0x3d0] sm:$0xff]  ;;  %v157_v22 = vld [vmem:[%s2479_s0 + $0x478] sm:$0xff] }
 0x110   :  { %v1040_v30 = vpop.f32.mrf.mxu0  ;;  %v217_v50 = vpack.c.bf16 %v136_v16, %v127_v40  ;;  %v148_v14 = vld [vmem:[%s2479_s0 + $0x430] sm:$0xff] }
 0x111   :  { %1088 = vmatmul.bf16.gmra.mxu1 %v208_v23  ;;  %1137 = vmatmul.bf16.gmra.mxu2 %v209_v24  ;;  %v2346_v32 = vadd.f32 %v1037_v4, %v989_v11 }
 0x113   :  { %1186 = vmatmul.bf16.gmra.mxu3 %v210_v26  ;;  %1235 = vmatmul.bf16.gmra.mxu0 %v211_v28  ;;  %v227_v28 = vpack.c.bf16 %v155_v17, %v146_v13 }
 0x114   :  { %v942_v33 = vpop.f32.mrf.mxu2 }
 0x115   :  { %v943_v34 = vadd.f32 %v942_v33, %v894_v20 }
 0x116   :  { %v991_v36 = vpop.f32.mrf.mxu3  ;;  %v895_v37 = vpop.f32.mrf.mxu1 }
 0x117   :  { %v992_v38 = vadd.f32 %v991_v36, %v943_v34  ;;  %v896_v54 = vadd.f32 %v895_v37, %v2189_v31  ;;  %v129_v31 = vld [vmem:[%s2479_s0 + $0x398] sm:$0xff] }
 0x118   :  { %v1042_v19 = vpop.f32.mrf.mxu0  ;;  %v219_v57 = vpack.c.bf16 %v138_v44, %v129_v31 }
 0x119   :  { %v2355_v41 = vadd.f32 %v1040_v30, %v992_v38  ;;  %v229_v30 = vpack.c.bf16 %v157_v22, %v148_v14 }
 0x11c   :  { %v944_v47 = vpop.f32.mrf.mxu2 }
 0x11d   :  { %v945_v48 = vadd.f32 %v944_v47, %v896_v54 }
 0x11e   :  { %v993_v51 = vpop.f32.mrf.mxu3  ;;  %v898_v55 = vpop.f32.mrf.mxu1 }
 0x11f   :  { %v994_v62 = vadd.f32 %v993_v51, %v945_v48  ;;  %v899_v63 = vadd.f32 %v898_v55, %v2119_v58  ;;  %v154_v58 = vld [vmem:[%s2479_s0 + $0x460] sm:$0xff] }
 0x120   :  { %v1045_v0 = vpop.f32.mrf.mxu0  ;;  %v226_v26 = vpack.c.bf16 %v154_v58, %v145_v6 }
 0x121   :  { %1093 = vmatmul.bf16.gmra.mxu1 %v217_v50  ;;  %1142 = vmatmul.bf16.gmra.mxu2 %v218_v53  ;;  %v2376_v59 = vadd.f32 %v1042_v19, %v994_v62 }
 0x123   :  { %1191 = vmatmul.bf16.gmra.mxu3 %v219_v57  ;;  %1240 = vmatmul.bf16.gmra.mxu0 %v220_v60 }
 0x124   :  { %v947_v2 = vpop.f32.mrf.mxu2 }
 0x125   :  { %v948_v3 = vadd.f32 %v947_v2, %v899_v63 }
 0x126   :  { %v996_v4 = vpop.f32.mrf.mxu3  ;;  %v900_v5 = vpop.f32.mrf.mxu1 }
 0x127   :  { %v997_v56 = vadd.f32 %v996_v4, %v948_v3  ;;  %v901_v8 = vadd.f32 %v900_v5, %v2151_v10  ;;  %v147_v10 = vld [vmem:[%s2479_s0 + $0x428] sm:$0xff] }
 0x128   :  { %v1047_v9 = vpop.f32.mrf.mxu0  ;;  %v228_v20 = vpack.c.bf16 %v156_v21, %v147_v10 }
 0x129   :  { %v2385_v12 = vadd.f32 %v1045_v0, %v997_v56 }
 0x12c   :  { %v949_v23 = vpop.f32.mrf.mxu2 }
 0x12d   :  { %v950_v24 = vadd.f32 %v949_v23, %v901_v8 }
 0x12e   :  { %v998_v25 = vpop.f32.mrf.mxu3  ;;  %v903_v11 = vpop.f32.mrf.mxu1 }
 0x12f   :  { %v999_v33 = vadd.f32 %v998_v25, %v950_v24  ;;  %v904_v34 = vadd.f32 %v903_v11, %v2159_v18 }
 0x130   :  { %v1050_v36 = vpop.f32.mrf.mxu0 }
 0x131   :  { %1098 = vmatmul.bf16.gmra.mxu1 %v226_v26  ;;  %1147 = vmatmul.bf16.gmra.mxu2 %v227_v28  ;;  %v2406_v37 = vadd.f32 %v1047_v9, %v999_v33 }
 0x133   :  { %1196 = vmatmul.bf16.gmra.mxu3 %v228_v20  ;;  %1245 = vmatmul.bf16.gmra.mxu0 %v229_v30 }
 0x134   :  { %v952_v38 = vpop.f32.mrf.mxu2 }
 0x135   :  { %v953_v54 = vadd.f32 %v952_v38, %v904_v34 }
 0x136   :  { %v1001_v19 = vpop.f32.mrf.mxu3  ;;  %v905_v40 = vpop.f32.mrf.mxu1 }
 0x137   :  { %v1002_v16 = vadd.f32 %v1001_v19, %v953_v54  ;;  %v906_v42 = vadd.f32 %v905_v40, %v2192_v35 }
 0x138   :  { %v1052_v43 = vpop.f32.mrf.mxu0 }
 0x139   :  { %v2409_v31 = vadd.f32 %v1050_v36, %v1002_v16 }
 0x13c   :  { %v954_v44 = vpop.f32.mrf.mxu2 }
 0x13d   :  { %v955_v45 = vadd.f32 %v954_v44, %v906_v42 }
 0x13e   :  { %v1003_v18 = vpop.f32.mrf.mxu3  ;;  %v1064_v46 = vpop.f32.mrf.mxu1 }
 0x13f   :  { %v1004_v47 = vadd.f32 %v1003_v18, %v955_v45  ;;  %v1065_v50 = vadd.f32 %v1064_v46, %v2201_v52 }
 0x140   :  { %v1211_v48 = vpop.f32.mrf.mxu0 }
 0x141   :  { %v2411_v51 = vadd.f32 %v1052_v43, %v1004_v47 }
 0x144   :  { %v1113_v53 = vpop.f32.mrf.mxu2 }
 0x145   :  { %v1114_v55 = vadd.f32 %v1113_v53, %v1065_v50 }
 0x146   :  { %v1162_v57 = vpop.f32.mrf.mxu3  ;;  %v1066_v60 = vpop.f32.mrf.mxu1 }
 0x147   :  { %v1163_v62 = vadd.f32 %v1162_v57, %v1114_v55  ;;  %v1067_v0 = vadd.f32 %v1066_v60, %v2222_v15 }
 0x148   :  { %v1213_v63 = vpop.f32.mrf.mxu0 }
 0x149   :  { %v1212_v35 = vadd.f32 %v1211_v48, %v1163_v62 }
 0x14b   :  { %1251 = vst [vmem:[%s2480_s3] sm:$0xff] %v1212_v35 }
 0x14c   :  { %v1115_v2 = vpop.f32.mrf.mxu2 }
 0x14d   :  { %v1116_v3 = vadd.f32 %v1115_v2, %v1067_v0 }
 0x14e   :  { %v1164_v4 = vpop.f32.mrf.mxu3  ;;  %v1069_v5 = vpop.f32.mrf.mxu1 }
 0x14f   :  { %v1165_v56 = vadd.f32 %v1164_v4, %v1116_v3  ;;  %v1070_v9 = vadd.f32 %v1069_v5, %v2231_v29 }
 0x150   :  { %v1216_v8 = vpop.f32.mrf.mxu0 }
 0x151   :  { %v1214_v52 = vadd.f32 %v1213_v63, %v1165_v56 }
 0x153   :  { %1252 = vst [vmem:[%s2480_s3 + $0x8] sm:$0xff] %v1214_v52 }
 0x154   :  { %v1118_v6 = vpop.f32.mrf.mxu2 }
 0x155   :  { %v1119_v58 = vadd.f32 %v1118_v6, %v1070_v9 }
 0x156   :  { %v1167_v13 = vpop.f32.mrf.mxu3  ;;  %v1071_v17 = vpop.f32.mrf.mxu1 }
 0x157   :  { %v1168_v10 = vadd.f32 %v1167_v13, %v1119_v58  ;;  %v1072_v14 = vadd.f32 %v1071_v17, %v2253_v49 }
 0x158   :  { %v1218_v21 = vpop.f32.mrf.mxu0 }
 0x159   :  { %v1217_v15 = vadd.f32 %v1216_v8, %v1168_v10 }
 0x15b   :  { %1253 = vst [vmem:[%s2480_s3 + $0x10] sm:$0xff] %v1217_v15 }
 0x15c   :  { %v1120_v22 = vpop.f32.mrf.mxu2 }
 0x15d   :  { %v1121_v23 = vadd.f32 %v1120_v22, %v1072_v14 }
 0x15e   :  { %v1169_v24 = vpop.f32.mrf.mxu3  ;;  %v1074_v25 = vpop.f32.mrf.mxu1 }
 0x15f   :  { %v1170_v26 = vadd.f32 %v1169_v24, %v1121_v23  ;;  %v1075_v11 = vadd.f32 %v1074_v25, %v2263_v1 }
 0x160   :  { %v1221_v28 = vpop.f32.mrf.mxu0 }
 0x161   :  { %v1219_v29 = vadd.f32 %v1218_v21, %v1170_v26 }
 0x163   :  { %1254 = vst [vmem:[%s2480_s3 + $0x18] sm:$0xff] %v1219_v29 }
 0x164   :  { %v1123_v20 = vpop.f32.mrf.mxu2 }
 0x165   :  { %v1124_v30 = vadd.f32 %v1123_v20, %v1075_v11 }
 0x166   :  { %v1172_v33 = vpop.f32.mrf.mxu3  ;;  %v1076_v34 = vpop.f32.mrf.mxu1 }
 0x167   :  { %v1173_v36 = vadd.f32 %v1172_v33, %v1124_v30  ;;  %v1077_v54 = vadd.f32 %v1076_v34, %v2285_v27 }
 0x168   :  { %v1223_v38 = vpop.f32.mrf.mxu0 }
 0x169   :  { %v1222_v49 = vadd.f32 %v1221_v28, %v1173_v36 }
 0x16b   :  { %1255 = vst [vmem:[%s2480_s3 + $0x20] sm:$0xff] %v1222_v49 }
 0x16c   :  { %v1125_v19 = vpop.f32.mrf.mxu2 }
 0x16d   :  { %v1126_v40 = vadd.f32 %v1125_v19, %v1077_v54 }
 0x16e   :  { %v1174_v16 = vpop.f32.mrf.mxu3  ;;  %v1079_v42 = vpop.f32.mrf.mxu1 }
 0x16f   :  { %v1175_v43 = vadd.f32 %v1174_v16, %v1126_v40  ;;  %v1080_v45 = vadd.f32 %v1079_v42, %v2295_v39 }
 0x170   :  { %v1226_v44 = vpop.f32.mrf.mxu0 }
 0x171   :  { %v1224_v1 = vadd.f32 %v1223_v38, %v1175_v43 }
 0x173   :  { %1256 = vst [vmem:[%s2480_s3 + $0x28] sm:$0xff] %v1224_v1 }
 0x174   :  { %v1128_v18 = vpop.f32.mrf.mxu2 }
 0x175   :  { %v1129_v46 = vadd.f32 %v1128_v18, %v1080_v45 }
 0x176   :  { %v1177_v47 = vpop.f32.mrf.mxu3  ;;  %v1081_v48 = vpop.f32.mrf.mxu1 }
 0x177   :  { %v1178_v50 = vadd.f32 %v1177_v47, %v1129_v46  ;;  %v1082_v55 = vadd.f32 %v1081_v48, %v2316_v61 }
 0x178   :  { %v1228_v53 = vpop.f32.mrf.mxu0 }
 0x179   :  { %v1227_v27 = vadd.f32 %v1226_v44, %v1178_v50 }
 0x17b   :  { %1257 = vst [vmem:[%s2480_s3 + $0x30] sm:$0xff] %v1227_v27 }
 0x17c   :  { %v1130_v57 = vpop.f32.mrf.mxu2 }
 0x17d   :  { %v1131_v60 = vadd.f32 %v1130_v57, %v1082_v55 }
 0x17e   :  { %v1179_v62 = vpop.f32.mrf.mxu3  ;;  %v1084_v63 = vpop.f32.mrf.mxu1 }
 0x17f   :  { %v1180_v35 = vadd.f32 %v1179_v62, %v1131_v60  ;;  %v1085_v2 = vadd.f32 %v1084_v63, %v2325_v7 }
 0x180   :  { %v1231_v0 = vpop.f32.mrf.mxu0 }
 0x181   :  { %v1229_v39 = vadd.f32 %v1228_v53, %v1180_v35 }
 0x183   :  { %1258 = vst [vmem:[%s2480_s3 + $0x38] sm:$0xff] %v1229_v39 }
 0x184   :  { %v1133_v3 = vpop.f32.mrf.mxu2 }
 0x185   :  { %v1134_v4 = vadd.f32 %v1133_v3, %v1085_v2 }
 0x186   :  { %v1182_v5 = vpop.f32.mrf.mxu3  ;;  %v1086_v56 = vpop.f32.mrf.mxu1 }
 0x187   :  { %v1183_v8 = vadd.f32 %v1182_v5, %v1134_v4  ;;  %v1087_v9 = vadd.f32 %v1086_v56, %v2346_v32 }
 0x188   :  { %v1233_v52 = vpop.f32.mrf.mxu0 }
 0x189   :  { %v1232_v61 = vadd.f32 %v1231_v0, %v1183_v8 }
 0x18b   :  { %1259 = vst [vmem:[%s2480_s3 + $0x40] sm:$0xff] %v1232_v61 }
 0x18c   :  { %v1135_v6 = vpop.f32.mrf.mxu2 }
 0x18d   :  { %v1136_v58 = vadd.f32 %v1135_v6, %v1087_v9 }
 0x18e   :  { %v1184_v13 = vpop.f32.mrf.mxu3  ;;  %v1089_v17 = vpop.f32.mrf.mxu1 }
 0x18f   :  { %v1185_v10 = vadd.f32 %v1184_v13, %v1136_v58  ;;  %v1090_v15 = vadd.f32 %v1089_v17, %v2355_v41 }
 0x190   :  { %v1236_v21 = vpop.f32.mrf.mxu0 }
 0x191   :  { %v1234_v7 = vadd.f32 %v1233_v52, %v1185_v10 }
 0x193   :  { %1260 = vst [vmem:[%s2480_s3 + $0x48] sm:$0xff] %v1234_v7 }
 0x194   :  { %v1138_v14 = vpop.f32.mrf.mxu2 }
 0x195   :  { %v1139_v22 = vadd.f32 %v1138_v14, %v1090_v15 }
 0x196   :  { %v1187_v23 = vpop.f32.mrf.mxu3  ;;  %v1091_v24 = vpop.f32.mrf.mxu1 }
 0x197   :  { %v1188_v25 = vadd.f32 %v1187_v23, %v1139_v22  ;;  %v1092_v28 = vadd.f32 %v1091_v24, %v2376_v59 }
 0x198   :  { %v1238_v26 = vpop.f32.mrf.mxu0 }
 0x199   :  { %v1237_v32 = vadd.f32 %v1236_v21, %v1188_v25 }
 0x19b   :  { %1261 = vst [vmem:[%s2480_s3 + $0x50] sm:$0xff] %v1237_v32 }
 0x19c   :  { %v1140_v29 = vpop.f32.mrf.mxu2 }
 0x19d   :  { %v1141_v11 = vadd.f32 %v1140_v29, %v1092_v28 }
 0x19e   :  { %v1189_v20 = vpop.f32.mrf.mxu3  ;;  %v1094_v30 = vpop.f32.mrf.mxu1 }
 0x19f   :  { %v1190_v33 = vadd.f32 %v1189_v20, %v1141_v11  ;;  %v1095_v36 = vadd.f32 %v1094_v30, %v2385_v12 }
 0x1a0   :  { %v1241_v41 = vpop.f32.mrf.mxu0 }
 0x1a1   :  { %v1239_v34 = vadd.f32 %v1238_v26, %v1190_v33 }
 0x1a3   :  { %1262 = vst [vmem:[%s2480_s3 + $0x58] sm:$0xff] %v1239_v34 }
 0x1a4   :  { %v1143_v38 = vpop.f32.mrf.mxu2 }
 0x1a5   :  { %v1144_v49 = vadd.f32 %v1143_v38, %v1095_v36 }
 0x1a6   :  { %v1192_v54 = vpop.f32.mrf.mxu3  ;;  %v1096_v19 = vpop.f32.mrf.mxu1 }
 0x1a7   :  { %v1193_v40 = vadd.f32 %v1192_v54, %v1144_v49  ;;  %v1097_v59 = vadd.f32 %v1096_v19, %v2406_v37 }
 0x1a8   :  { %v1243_v42 = vpop.f32.mrf.mxu0 }
 0x1a9   :  { %v1242_v16 = vadd.f32 %v1241_v41, %v1193_v40 }
 0x1ab   :  { %1263 = vst [vmem:[%s2480_s3 + $0x60] sm:$0xff] %v1242_v16 }
 0x1ac   :  { %v1145_v43 = vpop.f32.mrf.mxu2 }
 0x1ad   :  { %v1146_v44 = vadd.f32 %v1145_v43, %v1097_v59 }
 0x1ae   :  { %v1194_v1 = vpop.f32.mrf.mxu3  ;;  %v1099_v45 = vpop.f32.mrf.mxu1 }
 0x1af   :  { %v1195_v18 = vadd.f32 %v1194_v1, %v1146_v44  ;;  %v1100_v12 = vadd.f32 %v1099_v45, %v2409_v31 }
 0x1b0   :  { %v1246_v53 = vpop.f32.mrf.mxu0 }
 0x1b1   :  { %v1244_v46 = vadd.f32 %v1243_v42, %v1195_v18 }
 0x1b3   :  { %1264 = vst [vmem:[%s2480_s3 + $0x68] sm:$0xff] %v1244_v46 }
 0x1b4   :  { %v1148_v47 = vpop.f32.mrf.mxu2 }
 0x1b5   :  { %v1149_v48 = vadd.f32 %v1148_v47, %v1100_v12 }
 0x1b6   :  { %v1197_v50 = vpop.f32.mrf.mxu3  ;;  %v1101_v55 = vpop.f32.mrf.mxu1 }
 0x1b7   :  { %v1198_v27 = vadd.f32 %v1197_v50, %v1149_v48  ;;  %v1102_v57 = vadd.f32 %v1101_v55, %v2411_v51 }
 0x1b8   :  { %v1248_v0 = vpop.f32.mrf.mxu0 }
 0x1b9   :  { %v1247_v37 = vadd.f32 %v1246_v53, %v1198_v27 }
 0x1bb   :  { %1265 = vst [vmem:[%s2480_s3 + $0x70] sm:$0xff] %v1247_v37 }
 0x1bc   :  { %v1150_v60 = vpop.f32.mrf.mxu2 }
 0x1bd   :  { %v1151_v62 = vadd.f32 %v1150_v60, %v1102_v57 }
 0x1be   :  { %v1199_v63 = vpop.f32.mrf.mxu3 }
 0x1bf   :  { %v1200_v35 = vadd.f32 %v1199_v63, %v1151_v62 }
 0x1c1   :  { %v1249_v39 = vadd.f32 %v1248_v0, %v1200_v35 }
 0x1c3   :  { %1266 = vst [vmem:[%s2480_s3 + $0x78] sm:$0xff] %v1249_v39 }

// kernel: _lambda_.13
= control target key start
LH: loop header
LB: loop body
LE: loop exit
PB: predicated region body
PF: predicated region fallthrough
CT: control target
= control target key end

     0   :  { %s1555_s1 = inlined_call_operand.vmem [shape: bf16[1152,128], index: 1, kind: input, shape index: {}]   ;;  %s1556_s0 = inlined_call_operand.vmem [shape: f32[32,1152], index: 0, kind: input, shape index: {}]   ;;  %s1557_s2 = inlined_call_operand.vmem [shape: f32[1,128], index: 2, kind: input, shape index: {}]   ;;  %s1558_s3 = inlined_call_operand.vmem [shape: f32[32,128], index: 3, kind: output, shape index: {}]  }
   0x1   :  { %v1122_v0 = vld [vmem:[%s1555_s1 + $0x38] sm:$0xff]  ;;  %v1121_v4 = vld [vmem:[%s1555_s1 + $0x30] sm:$0xff]  ;;  %v1120_v8 = vld [vmem:[%s1555_s1 + $0x28] sm:$0xff] }
   0x2   :  { %v1130_v1 = vld [vmem:[%s1555_s1 + $0x78] sm:$0xff]  ;;  %648 = vmatpush.bf16.msra.mxu0 %v1122_v0  ;;  %v1129_v5 = vld [vmem:[%s1555_s1 + $0x70] sm:$0xff]  ;;  %v1128_v9 = vld [vmem:[%s1555_s1 + $0x68] sm:$0xff] }
   0x3   :  { %v1138_v2 = vld [vmem:[%s1555_s1 + $0xb8] sm:$0xff]  ;;  %667 = vmatpush.bf16.msra.mxu1 %v1130_v1  ;;  %v1137_v6 = vld [vmem:[%s1555_s1 + $0xb0] sm:$0xff]  ;;  %v1136_v10 = vld [vmem:[%s1555_s1 + $0xa8] sm:$0xff] }
   0x4   :  { %v1146_v3 = vld [vmem:[%s1555_s1 + $0xf8] sm:$0xff]  ;;  %686 = vmatpush.bf16.msra.mxu2 %v1138_v2  ;;  %v1145_v7 = vld [vmem:[%s1555_s1 + $0xf0] sm:$0xff]  ;;  %v1144_v11 = vld [vmem:[%s1555_s1 + $0xe8] sm:$0xff] }
   0x5   :  { %705 = vmatpush.bf16.msra.mxu3 %v1146_v3  ;;  %v1119_v12 = vld [vmem:[%s1555_s1 + $0x20] sm:$0xff]  ;;  %v1118_v16 = vld [vmem:[%s1555_s1 + $0x18] sm:$0xff]  ;;  %v1117_v20 = vld [vmem:[%s1555_s1 + $0x10] sm:$0xff] }
   0x6   :  { %649 = vmatpush.bf16.msra.mxu0 %v1121_v4  ;;  %v1127_v13 = vld [vmem:[%s1555_s1 + $0x60] sm:$0xff]  ;;  %v1126_v17 = vld [vmem:[%s1555_s1 + $0x58] sm:$0xff]  ;;  %v1125_v21 = vld [vmem:[%s1555_s1 + $0x50] sm:$0xff] }
   0x7   :  { %668 = vmatpush.bf16.msra.mxu1 %v1129_v5  ;;  %v1135_v14 = vld [vmem:[%s1555_s1 + $0xa0] sm:$0xff]  ;;  %v1134_v18 = vld [vmem:[%s1555_s1 + $0x98] sm:$0xff]  ;;  %v1133_v22 = vld [vmem:[%s1555_s1 + $0x90] sm:$0xff] }
   0x8   :  { %687 = vmatpush.bf16.msra.mxu2 %v1137_v6  ;;  %v1143_v15 = vld [vmem:[%s1555_s1 + $0xe0] sm:$0xff]  ;;  %v1142_v19 = vld [vmem:[%s1555_s1 + $0xd8] sm:$0xff]  ;;  %v1141_v23 = vld [vmem:[%s1555_s1 + $0xd0] sm:$0xff] }
   0x9   :  { %706 = vmatpush.bf16.msra.mxu3 %v1145_v7  ;;  %v1116_v24 = vld [vmem:[%s1555_s1 + $0x8] sm:$0xff]  ;;  %v1115_v28 = vld [vmem:[%s1555_s1] sm:$0xff]  ;;  %v24_v35 = vld [vmem:[%s1556_s0 + $0x50] sm:$0xff] }
   0xa   :  { %650 = vmatpush.bf16.msra.mxu0 %v1120_v8  ;;  %v1124_v25 = vld [vmem:[%s1555_s1 + $0x48] sm:$0xff]  ;;  %v1123_v29 = vld [vmem:[%s1555_s1 + $0x40] sm:$0xff]  ;;  %v16_v36 = vld [vmem:[%s1556_s0 + $0x10] sm:$0xff] }
   0xb   :  { %669 = vmatpush.bf16.msra.mxu1 %v1128_v9  ;;  %v1132_v26 = vld [vmem:[%s1555_s1 + $0x88] sm:$0xff]  ;;  %v1131_v30 = vld [vmem:[%s1555_s1 + $0x80] sm:$0xff]  ;;  %v25_v37 = vld [vmem:[%s1556_s0 + $0x58] sm:$0xff] }
   0xc   :  { %688 = vmatpush.bf16.msra.mxu2 %v1136_v10  ;;  %v1140_v27 = vld [vmem:[%s1555_s1 + $0xc8] sm:$0xff]  ;;  %v1139_v31 = vld [vmem:[%s1555_s1 + $0xc0] sm:$0xff]  ;;  %v17_v38 = vld [vmem:[%s1556_s0 + $0x18] sm:$0xff]  ;;  %v52_v44 = vpack.c.bf16 %v25_v37, %v16_v36 }
   0xd   :  { %707 = vmatpush.bf16.msra.mxu3 %v1144_v11  ;;  %v14_v32 = vld [vmem:[%s1556_s0] sm:$0xff]  ;;  %v23_v33 = vld [vmem:[%s1556_s0 + $0x48] sm:$0xff]  ;;  %v1154_v40 = vld [vmem:[%s1555_s1 + $0x138] sm:$0xff] }
   0xe   :  { %651 = vmatpush.bf16.msra.mxu0 %v1119_v12  ;;  %v15_v34 = vld [vmem:[%s1556_s0 + $0x8] sm:$0xff]  ;;  %v26_v39 = vld [vmem:[%s1556_s0 + $0x60] sm:$0xff]  ;;  %v1162_v41 = vld [vmem:[%s1555_s1 + $0x178] sm:$0xff]  ;;  %v50_v42 = vpack.c.bf16 %v23_v33, %v14_v32 }
   0xf   :  { %670 = vmatpush.bf16.msra.mxu1 %v1127_v13  ;;  %v51_v43 = vpack.c.bf16 %v24_v35, %v15_v34  ;;  %v53_v45 = vpack.c.bf16 %v26_v39, %v17_v38  ;;  %v1170_v46 = vld [vmem:[%s1555_s1 + $0x1b8] sm:$0xff]  ;;  %v1153_v48 = vld [vmem:[%s1555_s1 + $0x130] sm:$0xff]  ;;  %v1152_v52 = vld [vmem:[%s1555_s1 + $0x128] sm:$0xff] }
  0x10   :  { %689 = vmatpush.bf16.msra.mxu2 %v1135_v14  ;;  %v1178_v47 = vld [vmem:[%s1555_s1 + $0x1f8] sm:$0xff]  ;;  %v1161_v49 = vld [vmem:[%s1555_s1 + $0x170] sm:$0xff]  ;;  %v1160_v53 = vld [vmem:[%s1555_s1 + $0x168] sm:$0xff] }
  0x11   :  { %708 = vmatpush.bf16.msra.mxu3 %v1143_v15  ;;  %v1169_v50 = vld [vmem:[%s1555_s1 + $0x1b0] sm:$0xff]  ;;  %v1168_v54 = vld [vmem:[%s1555_s1 + $0x1a8] sm:$0xff]  ;;  %v1151_v56 = vld [vmem:[%s1555_s1 + $0x120] sm:$0xff] }
  0x12   :  { %652 = vmatpush.bf16.msra.mxu0 %v1118_v16  ;;  %v1177_v51 = vld [vmem:[%s1555_s1 + $0x1f0] sm:$0xff]  ;;  %v1176_v55 = vld [vmem:[%s1555_s1 + $0x1e8] sm:$0xff]  ;;  %v1159_v57 = vld [vmem:[%s1555_s1 + $0x160] sm:$0xff] }
  0x13   :  { %671 = vmatpush.bf16.msra.mxu1 %v1126_v17  ;;  %v1167_v58 = vld [vmem:[%s1555_s1 + $0x1a0] sm:$0xff]  ;;  %v32_v60 = vld [vmem:[%s1556_s0 + $0x90] sm:$0xff]  ;;  %v41_v61 = vld [vmem:[%s1556_s0 + $0xd8] sm:$0xff] }
  0x14   :  { %690 = vmatpush.bf16.msra.mxu2 %v1134_v18  ;;  %v1175_v59 = vld [vmem:[%s1555_s1 + $0x1e0] sm:$0xff]  ;;  %v33_v62 = vld [vmem:[%s1556_s0 + $0x98] sm:$0xff]  ;;  %v43_v1 = vld [vmem:[%s1556_s0 + $0xe8] sm:$0xff]  ;;  %v59_v6 = vpack.c.bf16 %v41_v61, %v32_v60 }
  0x15   :  { %709 = vmatpush.bf16.msra.mxu3 %v1142_v19  ;;  %v42_v63 = vld [vmem:[%s1556_s0 + $0xe0] sm:$0xff]  ;;  %v35_v2 = vld [vmem:[%s1556_s0 + $0xa8] sm:$0xff]  ;;  %v44_v3 = vld [vmem:[%s1556_s0 + $0xf0] sm:$0xff] }
  0x16   :  { %653 = vmatpush.bf16.msra.mxu0 %v1117_v20  ;;  %v34_v0 = vld [vmem:[%s1556_s0 + $0xa0] sm:$0xff]  ;;  %v1150_v4 = vld [vmem:[%s1555_s1 + $0x118] sm:$0xff]  ;;  %v60_v7 = vpack.c.bf16 %v42_v63, %v33_v62  ;;  %v62_v9 = vpack.c.bf16 %v44_v3, %v35_v2  ;;  %v1149_v12 = vld [vmem:[%s1555_s1 + $0x110] sm:$0xff] }
  0x17   :  { %672 = vmatpush.bf16.msra.mxu1 %v1125_v21  ;;  %v1158_v5 = vld [vmem:[%s1555_s1 + $0x158] sm:$0xff]  ;;  %v61_v8 = vpack.c.bf16 %v43_v1, %v34_v0  ;;  %v1157_v13 = vld [vmem:[%s1555_s1 + $0x150] sm:$0xff]  ;;  %v1148_v16 = vld [vmem:[%s1555_s1 + $0x108] sm:$0xff] }
  0x18   :  { %691 = vmatpush.bf16.msra.mxu2 %v1133_v22  ;;  %v1166_v10 = vld [vmem:[%s1555_s1 + $0x198] sm:$0xff]  ;;  %v1165_v14 = vld [vmem:[%s1555_s1 + $0x190] sm:$0xff]  ;;  %v1156_v17 = vld [vmem:[%s1555_s1 + $0x148] sm:$0xff] }
  0x19   :  { %710 = vmatpush.bf16.msra.mxu3 %v1141_v23  ;;  %v1174_v11 = vld [vmem:[%s1555_s1 + $0x1d8] sm:$0xff]  ;;  %v1173_v15 = vld [vmem:[%s1555_s1 + $0x1d0] sm:$0xff]  ;;  %v1164_v18 = vld [vmem:[%s1555_s1 + $0x188] sm:$0xff] }
  0x1a   :  { %654 = vmatpush.bf16.msra.mxu0 %v1116_v24  ;;  %v1172_v19 = vld [vmem:[%s1555_s1 + $0x1c8] sm:$0xff]  ;;  %v1147_v20 = vld [vmem:[%s1555_s1 + $0x100] sm:$0xff]  ;;  %v1185_v37 = vld [vmem:[%s1555_s1 + $0x230] sm:$0xff] }
  0x1b   :  { %673 = vmatpush.bf16.msra.mxu1 %v1124_v25  ;;  %v1155_v21 = vld [vmem:[%s1555_s1 + $0x140] sm:$0xff]  ;;  %v27_v25 = vld [vmem:[%s1556_s0 + $0x68] sm:$0xff] }
  0x1c   :  { %692 = vmatpush.bf16.msra.mxu2 %v1132_v26  ;;  %v1163_v22 = vld [vmem:[%s1555_s1 + $0x180] sm:$0xff]  ;;  %v1186_v26 = vld [vmem:[%s1555_s1 + $0x238] sm:$0xff]  ;;  %v1184_v38 = vld [vmem:[%s1555_s1 + $0x228] sm:$0xff] }
  0x1d   :  { %711 = vmatpush.bf16.msra.mxu3 %v1140_v27  ;;  %v1171_v23 = vld [vmem:[%s1555_s1 + $0x1c0] sm:$0xff]  ;;  %v19_v27 = vld [vmem:[%s1556_s0 + $0x28] sm:$0xff] }
  0x1e   :  { %655 = vmatpush.bf16.msra.mxu0 %v1115_v28  ;;  %v18_v24 = vld [vmem:[%s1556_s0 + $0x20] sm:$0xff]  ;;  %v28_v28 = vld [vmem:[%s1556_s0 + $0x70] sm:$0xff] }
  0x1f   :  { %674 = vmatpush.bf16.msra.mxu1 %v1123_v29  ;;  %v20_v29 = vld [vmem:[%s1556_s0 + $0x30] sm:$0xff]  ;;  %v30_v32 = vld [vmem:[%s1556_s0 + $0x80] sm:$0xff]  ;;  %v54_v33 = vpack.c.bf16 %v27_v25, %v18_v24  ;;  %v55_v34 = vpack.c.bf16 %v28_v28, %v19_v27 }
  0x20   :  { %693 = vmatpush.bf16.msra.mxu2 %v1131_v30  ;;  %v29_v30 = vld [vmem:[%s1556_s0 + $0x78] sm:$0xff]  ;;  %v1183_v39 = vld [vmem:[%s1555_s1 + $0x220] sm:$0xff] }
  0x21   :  { %712 = vmatpush.bf16.msra.mxu3 %v1139_v31  ;;  %656 = vmatmul.bf16.vlgmr.msra.gmra.mxu0 %v50_v42  ;;  %v21_v31 = vld [vmem:[%s1556_s0 + $0x38] sm:$0xff]  ;;  %v56_v35 = vpack.c.bf16 %v29_v30, %v20_v29 }
  0x22   :  { %724 = vmatpush.bf16.msrb.mxu0 %v1154_v40  ;;  %675 = vmatmul.bf16.vlgmr.msra.gmra.mxu1 %v51_v43  ;;  %v57_v36 = vpack.c.bf16 %v30_v32, %v21_v31  ;;  %v36_v40 = vld [vmem:[%s1556_s0 + $0xb0] sm:$0xff]  ;;  %v37_v42 = vld [vmem:[%s1556_s0 + $0xb8] sm:$0xff]  ;;  %v46_v43 = vld [vmem:[%s1556_s0 + $0x100] sm:$0xff] }
  0x23   :  { %743 = vmatpush.bf16.msrb.mxu1 %v1162_v41  ;;  %694 = vmatmul.bf16.vlgmr.msra.gmra.mxu2 %v52_v44  ;;  %v45_v41 = vld [vmem:[%s1556_s0 + $0xf8] sm:$0xff]  ;;  %v38_v44 = vld [vmem:[%s1556_s0 + $0xc0] sm:$0xff] }
  0x24   :  { %713 = vmatmul.bf16.vlgmr.msra.gmra.mxu3 %v53_v45  ;;  %762 = vmatpush.bf16.msrb.mxu2 %v1170_v46  ;;  %v47_v45 = vld [vmem:[%s1556_s0 + $0x108] sm:$0xff] }
  0x25   :  { %781 = vmatpush.bf16.msrb.mxu3 %v1178_v47  ;;  %v39_v46 = vld [vmem:[%s1556_s0 + $0xc8] sm:$0xff]  ;;  %v48_v47 = vld [vmem:[%s1556_s0 + $0x110] sm:$0xff] }
  0x26   :  { %725 = vmatpush.bf16.msrb.mxu0 %v1153_v48  ;;  %v1182_v48 = vld [vmem:[%s1555_s1 + $0x218] sm:$0xff] }
  0x27   :  { %744 = vmatpush.bf16.msrb.mxu1 %v1161_v49  ;;  %v63_v49 = vpack.c.bf16 %v45_v41, %v36_v40 }
  0x28   :  { %763 = vmatpush.bf16.msrb.mxu2 %v1169_v50  ;;  %v64_v50 = vpack.c.bf16 %v46_v43, %v37_v42 }
  0x29   :  { %782 = vmatpush.bf16.msrb.mxu3 %v1177_v51  ;;  %v65_v51 = vpack.c.bf16 %v47_v45, %v38_v44 }
  0x2a   :  { %726 = vmatpush.bf16.msrb.mxu0 %v1152_v52  ;;  %v66_v52 = vpack.c.bf16 %v48_v47, %v39_v46 }
  0x2b   :  { %745 = vmatpush.bf16.msrb.mxu1 %v1160_v53  ;;  %v1181_v53 = vld [vmem:[%s1555_s1 + $0x210] sm:$0xff] }
  0x2c   :  { %764 = vmatpush.bf16.msrb.mxu2 %v1168_v54  ;;  %v1180_v54 = vld [vmem:[%s1555_s1 + $0x208] sm:$0xff] }
  0x2d   :  { %783 = vmatpush.bf16.msrb.mxu3 %v1176_v55  ;;  %v1179_v55 = vld [vmem:[%s1555_s1 + $0x200] sm:$0xff] }
  0x2e   :  { %727 = vmatpush.bf16.msrb.mxu0 %v1151_v56  ;;  %v22_v56 = vld [vmem:[%s1556_s0 + $0x40] sm:$0xff] }
  0x2f   :  { %746 = vmatpush.bf16.msrb.mxu1 %v1159_v57  ;;  %v31_v57 = vld [vmem:[%s1556_s0 + $0x88] sm:$0xff] }
  0x30   :  { %765 = vmatpush.bf16.msrb.mxu2 %v1167_v58  ;;  %v40_v58 = vld [vmem:[%s1556_s0 + $0xd0] sm:$0xff]  ;;  %v58_v60 = vpack.c.bf16 %v31_v57, %v22_v56 }
  0x31   :  { %784 = vmatpush.bf16.msrb.mxu3 %v1175_v59  ;;  %661 = vmatmul.bf16.gmra.mxu0 %v59_v6  ;;  %v49_v59 = vld [vmem:[%s1556_s0 + $0x118] sm:$0xff] }
  0x32   :  { %728 = vmatpush.bf16.msrb.mxu0 %v1150_v4  ;;  %680 = vmatmul.bf16.gmra.mxu1 %v60_v7  ;;  %v67_v61 = vpack.c.bf16 %v49_v59, %v40_v58 }
  0x33   :  { %747 = vmatpush.bf16.msrb.mxu1 %v1158_v5  ;;  %699 = vmatmul.bf16.gmra.mxu2 %v61_v8 }
  0x34   :  { %718 = vmatmul.bf16.gmra.mxu3 %v62_v9  ;;  %766 = vmatpush.bf16.msrb.mxu2 %v1166_v10 }
  0x35   :  { %785 = vmatpush.bf16.msrb.mxu3 %v1174_v11 }
  0x36   :  { %729 = vmatpush.bf16.msrb.mxu0 %v1149_v12 }
  0x37   :  { %748 = vmatpush.bf16.msrb.mxu1 %v1157_v13 }
  0x38   :  { %767 = vmatpush.bf16.msrb.mxu2 %v1165_v14 }
  0x39   :  { %786 = vmatpush.bf16.msrb.mxu3 %v1173_v15 }
  0x3a   :  { %730 = vmatpush.bf16.msrb.mxu0 %v1148_v16  ;;  %v1195_v16 = vld [vmem:[%s1557_s2] ss:$0 sm:$0xff] }
  0x3b   :  { %749 = vmatpush.bf16.msrb.mxu1 %v1156_v17 }
  0x3c   :  { %768 = vmatpush.bf16.msrb.mxu2 %v1164_v18 }
  0x3d   :  { %787 = vmatpush.bf16.msrb.mxu3 %v1172_v19 }
  0x3e   :  { %731 = vmatpush.bf16.msrb.mxu0 %v1147_v20 }
  0x3f   :  { %750 = vmatpush.bf16.msrb.mxu1 %v1155_v21 }
  0x40   :  { %769 = vmatpush.bf16.msrb.mxu2 %v1163_v22 }
  0x41   :  { %788 = vmatpush.bf16.msrb.mxu3 %v1171_v23  ;;  %732 = vmatmul.bf16.vlgmr.msrb.gmra.mxu0 %v54_v33 }
  0x42   :  { %800 = vmatpush.bf16.msra.mxu0 %v1186_v26  ;;  %751 = vmatmul.bf16.vlgmr.msrb.gmra.mxu1 %v55_v34 }
  0x43   :  { %1187 = vmatpush.bf16.msra.mxu1 %v1186_v26  ;;  %770 = vmatmul.bf16.vlgmr.msrb.gmra.mxu2 %v56_v35 }
  0x44   :  { %789 = vmatmul.bf16.vlgmr.msrb.gmra.mxu3 %v57_v36 }
  0x46   :  { %801 = vmatpush.bf16.msra.mxu0 %v1185_v37 }
  0x47   :  { %1188 = vmatpush.bf16.msra.mxu1 %v1185_v37 }
  0x4a   :  { %802 = vmatpush.bf16.msra.mxu0 %v1184_v38 }
  0x4b   :  { %1189 = vmatpush.bf16.msra.mxu1 %v1184_v38 }
  0x4e   :  { %803 = vmatpush.bf16.msra.mxu0 %v1183_v39 }
  0x4f   :  { %1190 = vmatpush.bf16.msra.mxu1 %v1183_v39 }
  0x51   :  { %737 = vmatmul.bf16.gmra.mxu0 %v63_v49 }
  0x52   :  { %804 = vmatpush.bf16.msra.mxu0 %v1182_v48  ;;  %756 = vmatmul.bf16.gmra.mxu1 %v64_v50 }
  0x53   :  { %1191 = vmatpush.bf16.msra.mxu1 %v1182_v48  ;;  %775 = vmatmul.bf16.gmra.mxu2 %v65_v51 }
  0x54   :  { %794 = vmatmul.bf16.gmra.mxu3 %v66_v52 }
  0x56   :  { %805 = vmatpush.bf16.msra.mxu0 %v1181_v53 }
  0x57   :  { %1192 = vmatpush.bf16.msra.mxu1 %v1181_v53 }
  0x5a   :  { %806 = vmatpush.bf16.msra.mxu0 %v1180_v54 }
  0x5b   :  { %1193 = vmatpush.bf16.msra.mxu1 %v1180_v54 }
  0x5e   :  { %807 = vmatpush.bf16.msra.mxu0 %v1179_v55 }
  0x5f   :  { %1194 = vmatpush.bf16.msra.mxu1 %v1179_v55 }
  0x61   :  { %808 = vmatmul.bf16.vlgmr.msra.gmra.mxu0 %v58_v60 }
  0x62   :  { %813 = vmatmul.bf16.vlgmr.msra.gmra.mxu1 %v67_v61 }
  0x9e   :  { %v657_v62 = vpop.f32.mrf.mxu0 }
  0x9f   :  { %v676_v63 = vpop.f32.mrf.mxu1  ;;  %v658_v21 = vadd.f32 %v1195_v16, %v657_v62 }
  0xa1   :  { %v677_v23 = vadd.f32 %v676_v63, %v658_v21 }
  0xa6   :  { %v695_v0 = vpop.f32.mrf.mxu2  ;;  %v659_v2 = vpop.f32.mrf.mxu0 }
  0xa7   :  { %v714_v1 = vpop.f32.mrf.mxu3  ;;  %v678_v3 = vpop.f32.mrf.mxu1  ;;  %v696_v25 = vadd.f32 %v695_v0, %v677_v23  ;;  %v660_v30 = vadd.f32 %v1195_v16, %v659_v2 }
  0xa9   :  { %v715_v33 = vadd.f32 %v714_v1, %v696_v25  ;;  %v679_v35 = vadd.f32 %v678_v3, %v660_v30 }
  0xae   :  { %v697_v4 = vpop.f32.mrf.mxu2  ;;  %v662_v6 = vpop.f32.mrf.mxu0 }
  0xaf   :  { %v716_v5 = vpop.f32.mrf.mxu3  ;;  %v681_v7 = vpop.f32.mrf.mxu1  ;;  %v663_v22 = vadd.f32 %v1195_v16, %v662_v6  ;;  %v698_v39 = vadd.f32 %v697_v4, %v679_v35 }
  0xb1   :  { %v682_v24 = vadd.f32 %v681_v7, %v663_v22  ;;  %v717_v46 = vadd.f32 %v716_v5, %v698_v39 }
  0xb6   :  { %v700_v8 = vpop.f32.mrf.mxu2  ;;  %v664_v10 = vpop.f32.mrf.mxu0 }
  0xb7   :  { %v719_v9 = vpop.f32.mrf.mxu3  ;;  %v683_v11 = vpop.f32.mrf.mxu1  ;;  %v701_v26 = vadd.f32 %v700_v8, %v682_v24  ;;  %v665_v31 = vadd.f32 %v1195_v16, %v664_v10 }
  0xb9   :  { %v720_v34 = vadd.f32 %v719_v9, %v701_v26  ;;  %v684_v36 = vadd.f32 %v683_v11, %v665_v31 }
  0xbe   :  { %v702_v12 = vpop.f32.mrf.mxu2  ;;  %v733_v14 = vpop.f32.mrf.mxu0 }
  0xbf   :  { %v721_v13 = vpop.f32.mrf.mxu3  ;;  %v752_v15 = vpop.f32.mrf.mxu1  ;;  %v734_v37 = vadd.f32 %v733_v14, %v715_v33  ;;  %v703_v40 = vadd.f32 %v702_v12, %v684_v36 }
  0xc1   :  { %v753_v44 = vadd.f32 %v752_v15, %v734_v37  ;;  %v722_v47 = vadd.f32 %v721_v13, %v703_v40 }
  0xc6   :  { %v771_v17 = vpop.f32.mrf.mxu2  ;;  %v735_v19 = vpop.f32.mrf.mxu0 }
  0xc7   :  { %v790_v18 = vpop.f32.mrf.mxu3  ;;  %v754_v20 = vpop.f32.mrf.mxu1  ;;  %v772_v48 = vadd.f32 %v771_v17, %v753_v44  ;;  %v736_v51 = vadd.f32 %v735_v19, %v717_v46 }
  0xc9   :  { %v791_v53 = vadd.f32 %v790_v18, %v772_v48  ;;  %v755_v58 = vadd.f32 %v754_v20, %v736_v51 }
  0xce   :  { %v773_v27 = vpop.f32.mrf.mxu2  ;;  %v738_v28 = vpop.f32.mrf.mxu0 }
  0xcf   :  { %v757_v29 = vpop.f32.mrf.mxu1  ;;  %v792_v32 = vpop.f32.mrf.mxu3  ;;  %v739_v38 = vadd.f32 %v738_v28, %v720_v34  ;;  %v774_v62 = vadd.f32 %v773_v27, %v755_v58 }
  0xd1   :  { %v758_v45 = vadd.f32 %v757_v29, %v739_v38  ;;  %v793_v1 = vadd.f32 %v792_v32, %v774_v62 }
  0xd6   :  { %v776_v41 = vpop.f32.mrf.mxu2  ;;  %v740_v42 = vpop.f32.mrf.mxu0 }
  0xd7   :  { %v759_v43 = vpop.f32.mrf.mxu1  ;;  %v777_v49 = vadd.f32 %v776_v41, %v758_v45  ;;  %v795_v50 = vpop.f32.mrf.mxu3  ;;  %v741_v52 = vadd.f32 %v740_v42, %v722_v47 }
  0xd9   :  { %v796_v54 = vadd.f32 %v795_v50, %v777_v49  ;;  %v760_v59 = vadd.f32 %v759_v43, %v741_v52 }
  0xde   :  { %v778_v55 = vpop.f32.mrf.mxu2  ;;  %v809_v56 = vpop.f32.mrf.mxu0 }
  0xdf   :  { %v814_v57 = vpop.f32.mrf.mxu1  ;;  %v810_v60 = vadd.f32 %v809_v56, %v791_v53  ;;  %v779_v63 = vadd.f32 %v778_v55, %v760_v59  ;;  %v797_v0 = vpop.f32.mrf.mxu3 }
  0xe0   :  { %v815_v61 = vadd.f32 %v814_v57, %v796_v54 }
  0xe1   :  { %819 = vst [vmem:[%s1558_s3] sm:$0xff] %v810_v60  ;;  %v798_v2 = vadd.f32 %v797_v0, %v779_v63 }
  0xe2   :  { %821 = vst [vmem:[%s1558_s3 + $0x10] sm:$0xff] %v815_v61 }
  0xe6   :  { %v811_v3 = vpop.f32.mrf.mxu0 }
  0xe7   :  { %v816_v4 = vpop.f32.mrf.mxu1  ;;  %v812_v5 = vadd.f32 %v811_v3, %v793_v1 }
  0xe8   :  { %v817_v6 = vadd.f32 %v816_v4, %v798_v2 }
  0xe9   :  { %820 = vst [vmem:[%s1558_s3 + $0x8] sm:$0xff] %v812_v5 }
  0xea   :  { %822 = vst [vmem:[%s1558_s3 + $0x18] sm:$0xff] %v817_v6 }

// kernel: _lambda_.14
= control target key start
LH: loop header
LB: loop body
LE: loop exit
PB: predicated region body
PF: predicated region fallthrough
CT: control target
= control target key end

     0   :  { %vm623_vm0 = vcmask 1040384   ;;  %vm624_vm1 = vcmask 1041408   ;;  %vm619_vm2 = vcmask 23552   ;;  %s1404_s1 = inlined_call_operand.vmem [shape: bf16[1155,128], index: 1, kind: input, shape index: {}]   ;;  %s1405_s2 = inlined_call_operand.vmem [shape: f32[1,128], index: 2, kind: input, shape index: {}]   ;;  %s1406_s0 = inlined_call_operand.vmem [shape: f32[8,1155], index: 0, kind: input, shape index: {}]   ;;  %s1407_s3 = inlined_call_operand.vmem [shape: f32[8,128], index: 3, kind: output, shape index: {}]  }
   0x1   :  { %v1061_v0 = vld [vmem:[%s1404_s1 + $0x38] sm:$0xff]  ;;  %v1060_v4 = vld [vmem:[%s1404_s1 + $0x30] sm:$0xff]  ;;  %v1059_v8 = vld [vmem:[%s1404_s1 + $0x28] sm:$0xff] }
   0x2   :  { %v1077_v1 = vld [vmem:[%s1404_s1 + $0xb8] sm:$0xff]  ;;  %630 = vmatpush.bf16.msra.mxu0 %v1061_v0  ;;  %v1076_v5 = vld [vmem:[%s1404_s1 + $0xb0] sm:$0xff]  ;;  %v1075_v9 = vld [vmem:[%s1404_s1 + $0xa8] sm:$0xff] }
   0x3   :  { %v1085_v2 = vld [vmem:[%s1404_s1 + $0xf8] sm:$0xff]  ;;  %656 = vmatpush.bf16.msra.mxu2 %v1077_v1  ;;  %v1084_v6 = vld [vmem:[%s1404_s1 + $0xf0] sm:$0xff]  ;;  %v1083_v10 = vld [vmem:[%s1404_s1 + $0xe8] sm:$0xff] }
   0x4   :  { %v1069_v3 = vld [vmem:[%s1404_s1 + $0x78] sm:$0xff]  ;;  %669 = vmatpush.bf16.msra.mxu3 %v1085_v2  ;;  %v1068_v7 = vld [vmem:[%s1404_s1 + $0x70] sm:$0xff]  ;;  %v1067_v11 = vld [vmem:[%s1404_s1 + $0x68] sm:$0xff] }
   0x5   :  { %643 = vmatpush.bf16.msra.mxu1 %v1069_v3  ;;  %v1058_v12 = vld [vmem:[%s1404_s1 + $0x20] sm:$0xff]  ;;  %v1057_v16 = vld [vmem:[%s1404_s1 + $0x18] sm:$0xff]  ;;  %v1056_v20 = vld [vmem:[%s1404_s1 + $0x10] sm:$0xff] }
   0x6   :  { %631 = vmatpush.bf16.msra.mxu0 %v1060_v4  ;;  %v1074_v13 = vld [vmem:[%s1404_s1 + $0xa0] sm:$0xff]  ;;  %v1073_v17 = vld [vmem:[%s1404_s1 + $0x98] sm:$0xff]  ;;  %v1072_v21 = vld [vmem:[%s1404_s1 + $0x90] sm:$0xff] }
   0x7   :  { %657 = vmatpush.bf16.msra.mxu2 %v1076_v5  ;;  %v1082_v14 = vld [vmem:[%s1404_s1 + $0xe0] sm:$0xff]  ;;  %v1081_v18 = vld [vmem:[%s1404_s1 + $0xd8] sm:$0xff]  ;;  %v1080_v22 = vld [vmem:[%s1404_s1 + $0xd0] sm:$0xff] }
   0x8   :  { %670 = vmatpush.bf16.msra.mxu3 %v1084_v6  ;;  %v1066_v15 = vld [vmem:[%s1404_s1 + $0x60] sm:$0xff]  ;;  %v1065_v19 = vld [vmem:[%s1404_s1 + $0x58] sm:$0xff]  ;;  %v1064_v23 = vld [vmem:[%s1404_s1 + $0x50] sm:$0xff]  ;;  %v1128_v6 = vmov 65535  }
   0x9   :  { %644 = vmatpush.bf16.msra.mxu1 %v1068_v7  ;;  %v1055_v24 = vld [vmem:[%s1404_s1 + $0x8] sm:$0xff]  ;;  %v1054_v28 = vld [vmem:[%s1404_s1] sm:$0xff]  ;;  %v1093_v30 = vld [vmem:[%s1404_s1 + $0x138] sm:$0xff]  ;;  %v625_v7 = vsel %vm623_vm0, 4294967295, %v1128_v6 }
   0xa   :  { %632 = vmatpush.bf16.msra.mxu0 %v1059_v8  ;;  %v1071_v25 = vld [vmem:[%s1404_s1 + $0x88] sm:$0xff]  ;;  %v1070_v29 = vld [vmem:[%s1404_s1 + $0x80] sm:$0xff]  ;;  %v1109_v31 = vld [vmem:[%s1404_s1 + $0x1b8] sm:$0xff] }
   0xb   :  { %658 = vmatpush.bf16.msra.mxu2 %v1075_v9  ;;  %v1079_v26 = vld [vmem:[%s1404_s1 + $0xc8] sm:$0xff]  ;;  %v17_v32 = vld [vmem:[%s1406_s0 + $0x10] sm:$0xff]  ;;  %v15_v33 = vld [vmem:[%s1406_s0] sm:$0xff] }
   0xc   :  { %671 = vmatpush.bf16.msra.mxu3 %v1083_v10  ;;  %v1063_v27 = vld [vmem:[%s1404_s1 + $0x48] sm:$0xff]  ;;  %v1078_v34 = vld [vmem:[%s1404_s1 + $0xc0] sm:$0xff]  ;;  %v1117_v35 = vld [vmem:[%s1404_s1 + $0x1f8] sm:$0xff]  ;;  %v27_v40 = vpack.c.bf16 %v17_v32, %v17_v32  ;;  %v25_v41 = vpack.c.bf16 %v15_v33, %v15_v33 }
   0xd   :  { %645 = vmatpush.bf16.msra.mxu1 %v1067_v11  ;;  %v1062_v36 = vld [vmem:[%s1404_s1 + $0x40] sm:$0xff]  ;;  %v1101_v37 = vld [vmem:[%s1404_s1 + $0x178] sm:$0xff]  ;;  %v16_v39 = vld [vmem:[%s1406_s0 + $0x8] sm:$0xff] }
   0xe   :  { %633 = vmatpush.bf16.msra.mxu0 %v1058_v12  ;;  %v18_v38 = vld [vmem:[%s1406_s0 + $0x18] sm:$0xff]  ;;  %v1092_v42 = vld [vmem:[%s1404_s1 + $0x130] sm:$0xff]  ;;  %v26_v45 = vpack.c.bf16 %v16_v39, %v16_v39  ;;  %v1091_v48 = vld [vmem:[%s1404_s1 + $0x128] sm:$0xff] }
   0xf   :  { %659 = vmatpush.bf16.msra.mxu2 %v1074_v13  ;;  %v1108_v43 = vld [vmem:[%s1404_s1 + $0x1b0] sm:$0xff]  ;;  %v28_v44 = vpack.c.bf16 %v18_v38, %v18_v38  ;;  %v1107_v49 = vld [vmem:[%s1404_s1 + $0x1a8] sm:$0xff]  ;;  %v1090_v52 = vld [vmem:[%s1404_s1 + $0x120] sm:$0xff] }
  0x10   :  { %672 = vmatpush.bf16.msra.mxu3 %v1082_v14  ;;  %v1116_v46 = vld [vmem:[%s1404_s1 + $0x1f0] sm:$0xff]  ;;  %v1115_v50 = vld [vmem:[%s1404_s1 + $0x1e8] sm:$0xff]  ;;  %v1106_v53 = vld [vmem:[%s1404_s1 + $0x1a0] sm:$0xff]  ;;  %v626_v14 = vsel %vm624_vm1, %v625_v7, 0 }
  0x11   :  { %646 = vmatpush.bf16.msra.mxu1 %v1066_v15  ;;  %v1100_v47 = vld [vmem:[%s1404_s1 + $0x170] sm:$0xff]  ;;  %v1099_v51 = vld [vmem:[%s1404_s1 + $0x168] sm:$0xff]  ;;  %v1114_v54 = vld [vmem:[%s1404_s1 + $0x1e0] sm:$0xff] }
  0x12   :  { %634 = vmatpush.bf16.msra.mxu0 %v1057_v16  ;;  %v1098_v55 = vld [vmem:[%s1404_s1 + $0x160] sm:$0xff]  ;;  %v1089_v56 = vld [vmem:[%s1404_s1 + $0x118] sm:$0xff]  ;;  %v1088_v60 = vld [vmem:[%s1404_s1 + $0x110] sm:$0xff] }
  0x13   :  { %660 = vmatpush.bf16.msra.mxu2 %v1073_v17  ;;  %v1105_v57 = vld [vmem:[%s1404_s1 + $0x198] sm:$0xff]  ;;  %v1104_v61 = vld [vmem:[%s1404_s1 + $0x190] sm:$0xff]  ;;  %v179_v62 = vld [vmem:[%s1404_s1 + $0x240] sm:$0x3] }
  0x14   :  { %673 = vmatpush.bf16.msra.mxu3 %v1081_v18  ;;  %v1113_v58 = vld [vmem:[%s1404_s1 + $0x1d8] sm:$0xff]  ;;  %v1112_v63 = vld [vmem:[%s1404_s1 + $0x1d0] sm:$0xff]  ;;  %v1087_v1 = vld [vmem:[%s1404_s1 + $0x108] sm:$0xff]  ;;  %v473_v3 = vunpack.c.l.b16 %v179_v62 }
  0x15   :  { %647 = vmatpush.bf16.msra.mxu1 %v1065_v19  ;;  %v1097_v59 = vld [vmem:[%s1404_s1 + $0x158] sm:$0xff]  ;;  %v1096_v0 = vld [vmem:[%s1404_s1 + $0x150] sm:$0xff]  ;;  %v1103_v2 = vld [vmem:[%s1404_s1 + $0x188] sm:$0xff] }
  0x16   :  { %635 = vmatpush.bf16.msra.mxu0 %v1056_v20  ;;  %v1111_v4 = vld [vmem:[%s1404_s1 + $0x1c8] sm:$0xff]  ;;  %v1086_v8 = vld [vmem:[%s1404_s1 + $0x100] sm:$0xff]  ;;  %v21_v10 = vld [vmem:[%s1406_s0 + $0x30] sm:$0xff]  ;;  %v546_v12 = vpack.c.b16 %v473_v3, %v473_v3 }
  0x17   :  { %661 = vmatpush.bf16.msra.mxu2 %v1072_v21  ;;  %v1095_v5 = vld [vmem:[%s1404_s1 + $0x148] sm:$0xff]  ;;  %v1102_v9 = vld [vmem:[%s1404_s1 + $0x180] sm:$0xff]  ;;  %v1125_v13 = vld [vmem:[%s1404_s1 + $0x238] sm:$0xff]  ;;  %v31_v18 = vpack.c.bf16 %v21_v10, %v21_v10 }
  0x18   :  { %674 = vmatpush.bf16.msra.mxu3 %v1080_v22  ;;  %v19_v11 = vld [vmem:[%s1406_s0 + $0x20] sm:$0xff]  ;;  %v22_v17 = vld [vmem:[%s1406_s0 + $0x38] sm:$0xff]  ;;  %v20_v20 = vld [vmem:[%s1406_s0 + $0x28] sm:$0xff]  ;;  %v628_v21 = vand.u32 %v626_v14, %v546_v12 }
  0x19   :  { %648 = vmatpush.bf16.msra.mxu1 %v1064_v23  ;;  %v1110_v15 = vld [vmem:[%s1404_s1 + $0x1c0] sm:$0xff]  ;;  %v29_v19 = vpack.c.bf16 %v19_v11, %v19_v11  ;;  %v1124_v22 = vld [vmem:[%s1404_s1 + $0x230] sm:$0xff]  ;;  %v32_v23 = vpack.c.bf16 %v22_v17, %v22_v17 }
  0x1a   :  { %636 = vmatpush.bf16.msra.mxu0 %v1055_v24  ;;  %v1094_v16 = vld [vmem:[%s1404_s1 + $0x140] sm:$0xff]  ;;  %v30_v24 = vpack.c.bf16 %v20_v20, %v20_v20 }
  0x1b   :  { %662 = vmatpush.bf16.msra.mxu2 %v1071_v25  ;;  %v1123_v25 = vld [vmem:[%s1404_s1 + $0x228] sm:$0xff]  ;;  %v1118_v32 = vld [vmem:[%s1404_s1 + $0x200] sm:$0xff] }
  0x1c   :  { %675 = vmatpush.bf16.msra.mxu3 %v1079_v26  ;;  %v1122_v26 = vld [vmem:[%s1404_s1 + $0x220] sm:$0xff] }
  0x1d   :  { %649 = vmatpush.bf16.msra.mxu1 %v1063_v27  ;;  %v1121_v27 = vld [vmem:[%s1404_s1 + $0x218] sm:$0xff]  ;;  %v23_v33 = vld [vmem:[%s1406_s0 + $0x40] sm:$0xff] }
  0x1e   :  { %637 = vmatpush.bf16.msra.mxu0 %v1054_v28  ;;  %v24_v28 = vld [vmem:[%s1406_s0 + $0x48] sm:$0xff] }
  0x1f   :  { %663 = vmatpush.bf16.msra.mxu2 %v1070_v29  ;;  %v1120_v29 = vld [vmem:[%s1404_s1 + $0x210] sm:$0xff] }
  0x20   :  { %676 = vmatpush.bf16.msra.mxu3 %v1078_v34  ;;  %v33_v34 = vpack.c.bf16 %v23_v33, %v23_v33 }
  0x21   :  { %650 = vmatpush.bf16.msra.mxu1 %v1062_v36  ;;  %638 = vmatmul.bf16.vlgmr.msra.gmra.mxu0 %v25_v41 }
  0x22   :  { %682 = vmatpush.bf16.msrb.mxu0 %v1093_v30  ;;  %664 = vmatmul.bf16.vlgmr.msra.gmra.mxu2 %v27_v40  ;;  %v34_v30 = vpack.c.bf16 %v24_v28, %v24_v28 }
  0x23   :  { %708 = vmatpush.bf16.msrb.mxu2 %v1109_v31  ;;  %677 = vmatmul.bf16.vlgmr.msra.gmra.mxu3 %v28_v44  ;;  %v1119_v31 = vld [vmem:[%s1404_s1 + $0x208] sm:$0xff] }
  0x24   :  { %721 = vmatpush.bf16.msrb.mxu3 %v1117_v35  ;;  %651 = vmatmul.bf16.vlgmr.msra.gmra.mxu1 %v26_v45 }
  0x25   :  { %695 = vmatpush.bf16.msrb.mxu1 %v1101_v37 }
  0x26   :  { %683 = vmatpush.bf16.msrb.mxu0 %v1092_v42 }
  0x27   :  { %709 = vmatpush.bf16.msrb.mxu2 %v1108_v43  ;;  %v1127_v43 = vld [vmem:[%s1405_s2] ss:$0 sm:$0xff] }
  0x28   :  { %722 = vmatpush.bf16.msrb.mxu3 %v1116_v46 }
  0x29   :  { %696 = vmatpush.bf16.msrb.mxu1 %v1100_v47 }
  0x2a   :  { %684 = vmatpush.bf16.msrb.mxu0 %v1091_v48 }
  0x2b   :  { %710 = vmatpush.bf16.msrb.mxu2 %v1107_v49 }
  0x2c   :  { %723 = vmatpush.bf16.msrb.mxu3 %v1115_v50 }
  0x2d   :  { %697 = vmatpush.bf16.msrb.mxu1 %v1099_v51 }
  0x2e   :  { %685 = vmatpush.bf16.msrb.mxu0 %v1090_v52 }
  0x2f   :  { %711 = vmatpush.bf16.msrb.mxu2 %v1106_v53 }
  0x30   :  { %724 = vmatpush.bf16.msrb.mxu3 %v1114_v54 }
  0x31   :  { %698 = vmatpush.bf16.msrb.mxu1 %v1098_v55 }
  0x32   :  { %686 = vmatpush.bf16.msrb.mxu0 %v1089_v56 }
  0x33   :  { %712 = vmatpush.bf16.msrb.mxu2 %v1105_v57 }
  0x34   :  { %725 = vmatpush.bf16.msrb.mxu3 %v1113_v58 }
  0x35   :  { %699 = vmatpush.bf16.msrb.mxu1 %v1097_v59 }
  0x36   :  { %687 = vmatpush.bf16.msrb.mxu0 %v1088_v60 }
  0x37   :  { %713 = vmatpush.bf16.msrb.mxu2 %v1104_v61 }
  0x38   :  { %726 = vmatpush.bf16.msrb.mxu3 %v1112_v63 }
  0x39   :  { %700 = vmatpush.bf16.msrb.mxu1 %v1096_v0 }
  0x3a   :  { %688 = vmatpush.bf16.msrb.mxu0 %v1087_v1 }
  0x3b   :  { %714 = vmatpush.bf16.msrb.mxu2 %v1103_v2 }
  0x3c   :  { %727 = vmatpush.bf16.msrb.mxu3 %v1111_v4 }
  0x3d   :  { %701 = vmatpush.bf16.msrb.mxu1 %v1095_v5 }
  0x3e   :  { %689 = vmatpush.bf16.msrb.mxu0 %v1086_v8 }
  0x3f   :  { %715 = vmatpush.bf16.msrb.mxu2 %v1102_v9 }
  0x40   :  { %728 = vmatpush.bf16.msrb.mxu3 %v1110_v15 }
  0x41   :  { %702 = vmatpush.bf16.msrb.mxu1 %v1094_v16  ;;  %690 = vmatmul.bf16.vlgmr.msrb.gmra.mxu0 %v29_v19 }
  0x42   :  { %734 = vmatpush.bf16.msra.mxu0 %v1125_v13  ;;  %716 = vmatmul.bf16.vlgmr.msrb.gmra.mxu2 %v31_v18 }
  0x43   :  { %729 = vmatmul.bf16.vlgmr.msrb.gmra.mxu3 %v32_v23 }
  0x44   :  { %703 = vmatmul.bf16.vlgmr.msrb.gmra.mxu1 %v30_v24 }
  0x45   :  { %754 = vmatpush.bf16.msra.mxu1 %v628_v21 }
  0x46   :  { %735 = vmatpush.bf16.msra.mxu0 %v1124_v22 }
  0x4a   :  { %736 = vmatpush.bf16.msra.mxu0 %v1123_v25 }
  0x4e   :  { %737 = vmatpush.bf16.msra.mxu0 %v1122_v26 }
  0x52   :  { %738 = vmatpush.bf16.msra.mxu0 %v1121_v27 }
  0x54   :  { %1053 = vmatmul.msk.bf16.vlgmr.msra.gmra.mxu1 %vm619_vm2, %v34_v30 }
  0x56   :  { %739 = vmatpush.bf16.msra.mxu0 %v1120_v29 }
  0x5a   :  { %740 = vmatpush.bf16.msra.mxu0 %v1119_v31 }
  0x5e   :  { %741 = vmatpush.bf16.msra.mxu0 %v1118_v32 }
  0x61   :  { %742 = vmatmul.bf16.vlgmr.msra.gmra.mxu0 %v33_v34 }
  0x9e   :  { %v639_v35 = vpop.f32.mrf.mxu0 }
  0x9f   :  { %v640_v44 = vadd.f32 %v1127_v43, %v639_v35 }
  0xa1   :  { %v652_v36 = vpop.f32.mrf.mxu1 }
  0xa2   :  { %v653_v47 = vadd.f32 %v652_v36, %v640_v44 }
  0xa5   :  { %v665_v37 = vpop.f32.mrf.mxu2 }
  0xa6   :  { %v678_v38 = vpop.f32.mrf.mxu3  ;;  %v641_v39 = vpop.f32.mrf.mxu0  ;;  %v666_v49 = vadd.f32 %v665_v37, %v653_v47 }
  0xa8   :  { %v679_v53 = vadd.f32 %v678_v38, %v666_v49 }
  0xa9   :  { %v654_v40 = vpop.f32.mrf.mxu1 }
  0xad   :  { %v667_v41 = vpop.f32.mrf.mxu2 }
  0xae   :  { %v680_v42 = vpop.f32.mrf.mxu3 }
  0xbe   :  { %v691_v45 = vpop.f32.mrf.mxu0 }
  0xbf   :  { %v692_v55 = vadd.f32 %v691_v45, %v679_v53 }
  0xc1   :  { %v704_v46 = vpop.f32.mrf.mxu1 }
  0xc2   :  { %v705_v58 = vadd.f32 %v704_v46, %v692_v55 }
  0xc5   :  { %v717_v48 = vpop.f32.mrf.mxu2 }
  0xc6   :  { %v730_v50 = vpop.f32.mrf.mxu3  ;;  %v693_v51 = vpop.f32.mrf.mxu0  ;;  %v718_v59 = vadd.f32 %v717_v48, %v705_v58 }
  0xc8   :  { %v731_v61 = vadd.f32 %v730_v50, %v718_v59 }
  0xc9   :  { %v706_v52 = vpop.f32.mrf.mxu1 }
  0xcd   :  { %v719_v54 = vpop.f32.mrf.mxu2 }
  0xce   :  { %v732_v56 = vpop.f32.mrf.mxu3 }
  0xd1   :  { %v756_v57 = vpop.f32.mrf.mxu1 }
  0xd9   :  { %v758_v60 = vpop.f32.mrf.mxu1 }
  0xde   :  { %v743_v62 = vpop.f32.mrf.mxu0 }
  0xdf   :  { %v744_v63 = vadd.f32 %v743_v62, %v731_v61 }
  0xe1   :  { %v757_v0 = vadd.f32 %v756_v57, %v744_v63 }
  0xe3   :  { %760 = vst [vmem:[%s1407_s3] sm:$0xff] %v757_v0 }
  0xe6   :  { %v745_v1 = vpop.f32.mrf.mxu0 }

// kernel: _lambda_.16
= control target key start
LH: loop header
LB: loop body
LE: loop exit
PB: predicated region body
PF: predicated region fallthrough
CT: control target
= control target key end

     0   :  { %s2619_s0 = inlined_call_operand.vmem [shape: f32[8,128], index: 0, kind: input, shape index: {}]   ;;  %s2620_s1 = inlined_call_operand.vmem [shape: bf16[128,256], index: 1, kind: input, shape index: {}]   ;;  %s2621_s2 = inlined_call_operand.vmem [shape: f32[1,256], index: 2, kind: input, shape index: {}]   ;;  %s2622_s3 = inlined_call_operand.vmem [shape: f32[1,256], index: 3, kind: input, shape index: {}]   ;;  %s2623_s4 = inlined_call_operand.vmem [shape: bf16[128,512], index: 4, kind: input, shape index: {}]   ;;  %s2624_s5 = inlined_call_operand.vmem [shape: f32[1,512], index: 5, kind: input, shape index: {}]   ;;  %s2625_s6 = inlined_call_operand.vmem [shape: f32[1,512], index: 6, kind: input, shape index: {}]   ;;  %s2626_s7 = inlined_call_operand.vmem [shape: f32[8,32], index: 7, kind: input, shape index: {}]   ;;  %s2627_s8 = inlined_call_operand.vmem [shape: bf16[256,128], index: 8, kind: input, shape index: {}]   ;;  %s2628_s9 = inlined_call_operand.hbm [shape: f32[1,128], index: 9, kind: input, shape index: {}]   ;;  %s2629_s10 = inlined_call_operand.hbm [shape: f32[1,128], index: 10, kind: input, shape index: {}]   ;;  %s2630_s11 = inlined_call_operand.hbm [shape: f32[1,128], index: 11, kind: input, shape index: {}]   ;;  %s2631_s12 = inlined_call_operand.vmem [shape: bf16[128,64], index: 12, kind: input, shape index: {}]   ;;  %s2632_s13 = inlined_call_operand.hbm [shape: f32[1,64], index: 13, kind: input, shape index: {}]   ;;  %s2633_s14 = inlined_call_operand.hbm [shape: f32[1,64], index: 14, kind: input, shape index: {}]   ;;  %s2634_s15 = inlined_call_operand.vmem [shape: bf16[64,128], index: 15, kind: input, shape index: {}]   ;;  %s2635_s16 = inlined_call_operand.hbm [shape: f32[1,128], index: 16, kind: input, shape index: {}]   ;;  %s2636_s17 = inlined_call_operand.vmem [shape: f32[2,128], index: 17, kind: output, shape index: {}]  }
   0x1   :  { %2638 = sst [smem:[#allocation16_spill]] %s2619_s0 }
   0x2   :  { %2639 = sst [smem:[#allocation17_spill]] %s2620_s1 }
   0x3   :  { %22 = vsyncpa [#allocation3], 0 }
   0x4   :  { %23 = vsyncpa [#allocation5], 0 }
   0x5   :  { %24 = vsyncpa [#allocation8], 0  ;;  %s60_s26 = sshll.u32 %s2629_s10, 4  ;;  %s61_s26 = int_to_ptr.hbm [resolvable:$true] %s60_s26 }
   0x6   :  { %25 = vsyncpa [#allocation11], 0  ;;  %s1930_s27 = smov [#allocation4]   ;;  %s84_s30 = sshll.u32 %s2632_s13, 4  ;;  %s85_s30 = int_to_ptr.hbm [resolvable:$true] %s84_s30 }
   0x7   :  { %s62_s28 = sshll.u32 %s1930_s27, 4  ;;  %s1931_s18 = smov [#allocation7]   ;;  %s63_s28 = int_to_ptr.vmem [resolvable:$true] %s62_s28 }
   0x8   :  { %65 = dma.hbm_to_vmem [thread:$0]  %s61_s26, 16, %s63_s28, [#allocation5]  }
   0x9   :  { %s86_s19 = sshll.u32 %s1931_s18, 4  ;;  %s49_s21 = sshll.u32 %s2628_s9, 4  ;;  %s87_s19 = int_to_ptr.vmem [resolvable:$true] %s86_s19  ;;  %s50_s21 = int_to_ptr.hbm [resolvable:$true] %s49_s21 }
   0xa   :  { %89 = dma.hbm_to_vmem [thread:$0]  %s85_s30, 16, %s87_s19, [#allocation8]  }
   0xb   :  { %s71_s23 = sshll.u32 %s2630_s11, 4  ;;  %s1932_s24 = smov [#allocation2]   ;;  %s72_s23 = int_to_ptr.hbm [resolvable:$true] %s71_s23 }
   0xc   :  { %s51_s25 = sshll.u32 %s1932_s24, 4  ;;  %s1933_s13 = smov [#allocation6]   ;;  %s52_s25 = int_to_ptr.vmem [resolvable:$true] %s51_s25 }
   0xd   :  { %54 = dma.hbm_to_vmem [thread:$0]  %s50_s21, 16, %s52_s25, [#allocation3]  }
   0xe   :  { %s73_s26 = sshll.u32 %s1933_s13, 4  ;;  %s95_s29 = sshll.u32 %s2633_s14, 4  ;;  %s74_s26 = int_to_ptr.vmem [resolvable:$true] %s73_s26  ;;  %s96_s29 = int_to_ptr.hbm [resolvable:$true] %s95_s29 }
   0xf   :  { %76 = dma.hbm_to_vmem [thread:$0]  %s72_s23, 16, %s74_s26, [#allocation5]  }
  0x10   :  { %s108_s30 = sshll.u32 %s2635_s16, 4  ;;  %s1934_s18 = smov [#allocation9]   ;;  %s109_s30 = int_to_ptr.hbm [resolvable:$true] %s108_s30 }
  0x11   :  { %s97_s11 = sshll.u32 %s1934_s18, 4  ;;  %s1935_s19 = smov [#allocation10]   ;;  %s98_s11 = int_to_ptr.vmem [resolvable:$true] %s97_s11 }
  0x12   :  { %100 = dma.hbm_to_vmem [thread:$0]  %s96_s29, 16, %s98_s11, [#allocation8]  }
  0x13   :  { %s110_s1 = sshll.u32 %s1935_s19, 4  ;;  %s111_s1 = int_to_ptr.vmem [resolvable:$true] %s110_s1 }
  0x14   :  { %113 = dma.hbm_to_vmem [thread:$0]  %s109_s30, 16, %s111_s1, [#allocation11]  }
  0x15   :  { %1922 = dma.done.wait [#allocation3], 16  }
  0x16   :  { %1923 = vsyncadd [#allocation3], 4294967280 }
  0x17   :  { %1924 = dma.done.wait [#allocation5], 32  }
  0x18   :  { %1925 = vsyncadd [#allocation5], 4294967264 }
  0x19   :  { %1926 = dma.done.wait [#allocation8], 32  }
  0x1a   :  { %1927 = vsyncadd [#allocation8], 4294967264 }
  0x1b   :  { %1928 = dma.done.wait [#allocation11], 16  }
  0x1c   :  { %1929 = vsyncadd [#allocation11], 4294967280  ;;  %s2640_s16 = sld [smem:[#allocation17_spill]]  ;;  %v1504_v5 = vld [vmem:[%s2623_s4 + $0xe0] sm:$0xf]  ;;  %vm143_vm0 = vcmask 1040384  }
  0x1d   :  { %v1679_v6 = vld [vmem:[%s2623_s4 + $0xec] sm:$0xf0]  ;;  %v1677_v9 = vld [vmem:[%s2623_s4 + $0xe4] sm:$0xf]  ;;  %v1506_v10 = vld [vmem:[%s2623_s4 + $0xf0] sm:$0xf0] }
  0x1e   :  { %v1505_v8 = vor.u32 %v1679_v6, %v1504_v5  ;;  %v1509_v12 = vor.u32 %v1677_v9, %v1506_v10  ;;  %v1488_v18 = vld [vmem:[%s2623_s4 + $0xc0] sm:$0xf]  ;;  %v1675_v19 = vld [vmem:[%s2623_s4 + $0xcc] sm:$0xf0]  ;;  %v1673_v20 = vld [vmem:[%s2623_s4 + $0xc4] sm:$0xf] }
  0x1f   :  { %v1489_v21 = vor.u32 %v1675_v19, %v1488_v18  ;;  %v1490_v22 = vld [vmem:[%s2623_s4 + $0xd0] sm:$0xf0]  ;;  %v1472_v28 = vld [vmem:[%s2623_s4 + $0xa0] sm:$0xf]  ;;  %v1671_v30 = vld [vmem:[%s2623_s4 + $0xac] sm:$0xf0] }
  0x20   :  { %551 = vmatpush.bf16.msra.mxu2 %v1505_v8  ;;  %564 = vmatpush.bf16.msra.mxu3 %v1509_v12  ;;  %v1493_v25 = vor.u32 %v1673_v20, %v1490_v22  ;;  %v1669_v31 = vld [vmem:[%s2623_s4 + $0xa4] sm:$0xf]  ;;  %v1474_v32 = vld [vmem:[%s2623_s4 + $0xb0] sm:$0xf0]  ;;  %v1473_v34 = vor.u32 %v1671_v30, %v1472_v28  ;;  %v1456_v40 = vld [vmem:[%s2623_s4 + $0x80] sm:$0xf] }
  0x21   :  { %v1477_v38 = vor.u32 %v1669_v31, %v1474_v32  ;;  %v1667_v41 = vld [vmem:[%s2623_s4 + $0x8c] sm:$0xf0]  ;;  %v1665_v42 = vld [vmem:[%s2623_s4 + $0x84] sm:$0xf]  ;;  %v1458_v43 = vld [vmem:[%s2623_s4 + $0x90] sm:$0xf0] }
  0x22   :  { %v1384_v0 = vld [vmem:[%s2640_s16 + $0x70] sm:$0xf]  ;;  %v1648_v1 = vld [vmem:[%s2640_s16 + $0x74] sm:$0xf0]  ;;  %v1647_v2 = vld [vmem:[%s2640_s16 + $0x74] sm:$0xf]  ;;  %v1457_v46 = vor.u32 %v1667_v41, %v1456_v40  ;;  %v1461_v50 = vor.u32 %v1665_v42, %v1458_v43 }
  0x23   :  { %v1385_v3 = vor.u32 %v1648_v1, %v1384_v0  ;;  %v1386_v4 = vld [vmem:[%s2640_s16 + $0x78] sm:$0xf0]  ;;  %v1376_v11 = vld [vmem:[%s2640_s16 + $0x60] sm:$0xf]  ;;  %v1646_v13 = vld [vmem:[%s2640_s16 + $0x64] sm:$0xf0] }
  0x24   :  { %v1389_v7 = vor.u32 %v1647_v2, %v1386_v4  ;;  %v1645_v14 = vld [vmem:[%s2640_s16 + $0x64] sm:$0xf]  ;;  %v1378_v15 = vld [vmem:[%s2640_s16 + $0x68] sm:$0xf0]  ;;  %v1377_v16 = vor.u32 %v1646_v13, %v1376_v11  ;;  %v1368_v23 = vld [vmem:[%s2640_s16 + $0x50] sm:$0xf]  ;;  %552 = vmatpush.bf16.msra.mxu2 %v1489_v21  ;;  %565 = vmatpush.bf16.msra.mxu3 %v1493_v25 }
  0x25   :  { %242 = vmatpush.bf16.msra.mxu0 %v1385_v3  ;;  %v1381_v17 = vor.u32 %v1645_v14, %v1378_v15  ;;  %v1644_v24 = vld [vmem:[%s2640_s16 + $0x54] sm:$0xf0]  ;;  %v1643_v26 = vld [vmem:[%s2640_s16 + $0x54] sm:$0xf]  ;;  %v1370_v27 = vld [vmem:[%s2640_s16 + $0x58] sm:$0xf0] }
  0x26   :  { %255 = vmatpush.bf16.msra.mxu1 %v1389_v7  ;;  %v1369_v29 = vor.u32 %v1644_v24, %v1368_v23  ;;  %v1373_v33 = vor.u32 %v1643_v26, %v1370_v27  ;;  %v1360_v35 = vld [vmem:[%s2640_s16 + $0x40] sm:$0xf]  ;;  %v1642_v36 = vld [vmem:[%s2640_s16 + $0x44] sm:$0xf0]  ;;  %v1641_v37 = vld [vmem:[%s2640_s16 + $0x44] sm:$0xf] }
  0x27   :  { %v1362_v39 = vld [vmem:[%s2640_s16 + $0x48] sm:$0xf0]  ;;  %v1361_v44 = vor.u32 %v1642_v36, %v1360_v35  ;;  %v1352_v47 = vld [vmem:[%s2640_s16 + $0x30] sm:$0xf]  ;;  %v1640_v48 = vld [vmem:[%s2640_s16 + $0x34] sm:$0xf0] }
  0x28   :  { %553 = vmatpush.bf16.msra.mxu2 %v1473_v34  ;;  %v1365_v45 = vor.u32 %v1641_v37, %v1362_v39  ;;  %v1639_v49 = vld [vmem:[%s2640_s16 + $0x34] sm:$0xf]  ;;  %566 = vmatpush.bf16.msra.mxu3 %v1477_v38  ;;  %v1354_v51 = vld [vmem:[%s2640_s16 + $0x38] sm:$0xf0]  ;;  %v1440_v52 = vld [vmem:[%s2623_s4 + $0x60] sm:$0xf]  ;;  %v1353_v56 = vor.u32 %v1640_v48, %v1352_v47 }
  0x29   :  { %243 = vmatpush.bf16.msra.mxu0 %v1377_v16  ;;  %v1663_v53 = vld [vmem:[%s2623_s4 + $0x6c] sm:$0xf0]  ;;  %v1661_v54 = vld [vmem:[%s2623_s4 + $0x64] sm:$0xf]  ;;  %v1442_v55 = vld [vmem:[%s2623_s4 + $0x70] sm:$0xf0]  ;;  %v1357_v57 = vor.u32 %v1639_v49, %v1354_v51 }
  0x2a   :  { %256 = vmatpush.bf16.msra.mxu1 %v1381_v17  ;;  %v1441_v58 = vor.u32 %v1663_v53, %v1440_v52  ;;  %v1344_v59 = vld [vmem:[%s2640_s16 + $0x20] sm:$0xf]  ;;  %v1638_v60 = vld [vmem:[%s2640_s16 + $0x24] sm:$0xf0]  ;;  %v1637_v61 = vld [vmem:[%s2640_s16 + $0x24] sm:$0xf]  ;;  %v1445_v62 = vor.u32 %v1661_v54, %v1442_v55 }
  0x2b   :  { %v1346_v63 = vld [vmem:[%s2640_s16 + $0x28] sm:$0xf0]  ;;  %v1424_v0 = vld [vmem:[%s2623_s4 + $0x40] sm:$0xf]  ;;  %v1659_v1 = vld [vmem:[%s2623_s4 + $0x4c] sm:$0xf0]  ;;  %v1345_v5 = vor.u32 %v1638_v60, %v1344_v59 }
  0x2c   :  { %554 = vmatpush.bf16.msra.mxu2 %v1457_v46  ;;  %567 = vmatpush.bf16.msra.mxu3 %v1461_v50  ;;  %v1657_v2 = vld [vmem:[%s2623_s4 + $0x44] sm:$0xf]  ;;  %v1426_v3 = vld [vmem:[%s2623_s4 + $0x50] sm:$0xf0]  ;;  %v1336_v4 = vld [vmem:[%s2640_s16 + $0x10] sm:$0xf]  ;;  %v1349_v9 = vor.u32 %v1637_v61, %v1346_v63  ;;  %v1425_v10 = vor.u32 %v1659_v1, %v1424_v0 }
  0x2d   :  { %244 = vmatpush.bf16.msra.mxu0 %v1369_v29  ;;  %v1636_v6 = vld [vmem:[%s2640_s16 + $0x14] sm:$0xf0]  ;;  %v1635_v7 = vld [vmem:[%s2640_s16 + $0x14] sm:$0xf]  ;;  %v1338_v8 = vld [vmem:[%s2640_s16 + $0x18] sm:$0xf0]  ;;  %v1429_v14 = vor.u32 %v1657_v2, %v1426_v3 }
  0x2e   :  { %257 = vmatpush.bf16.msra.mxu1 %v1373_v33  ;;  %v1408_v11 = vld [vmem:[%s2623_s4 + $0x20] sm:$0xf]  ;;  %v1655_v12 = vld [vmem:[%s2623_s4 + $0x2c] sm:$0xf0]  ;;  %v1653_v13 = vld [vmem:[%s2623_s4 + $0x24] sm:$0xf]  ;;  %v1337_v19 = vor.u32 %v1636_v6, %v1336_v4  ;;  %v1341_v20 = vor.u32 %v1635_v7, %v1338_v8 }
  0x2f   :  { %v1410_v15 = vld [vmem:[%s2623_s4 + $0x30] sm:$0xf0]  ;;  %s2641_s0 = sld [smem:[#allocation16_spill]]  ;;  %v1328_v17 = vld [vmem:[%s2640_s16] sm:$0xf]  ;;  %v1409_v21 = vor.u32 %v1655_v12, %v1408_v11  ;;  %v1936_v37 = vmov 2.0  }
  0x30   :  { %555 = vmatpush.bf16.msra.mxu2 %v1441_v58  ;;  %568 = vmatpush.bf16.msra.mxu3 %v1445_v62  ;;  %v1634_v22 = vld [vmem:[%s2640_s16 + $0x4] sm:$0xf0]  ;;  %v1633_v23 = vld [vmem:[%s2640_s16 + $0x4] sm:$0xf]  ;;  %v1413_v24 = vor.u32 %v1653_v13, %v1410_v15  ;;  %v1330_v25 = vld [vmem:[%s2640_s16 + $0x8] sm:$0xf0]  ;;  %1754 = vrcp.f32 %v1936_v37 }
  0x31   :  { %245 = vmatpush.bf16.msra.mxu0 %v1361_v44  ;;  %v1392_v26 = vld [vmem:[%s2623_s4] sm:$0xf]  ;;  %v1651_v27 = vld [vmem:[%s2623_s4 + $0xc] sm:$0xf0]  ;;  %v1649_v28 = vld [vmem:[%s2623_s4 + $0x4] sm:$0xf]  ;;  %v1329_v30 = vor.u32 %v1634_v22, %v1328_v17  ;;  %v1333_v32 = vor.u32 %v1633_v23, %v1330_v25 }
  0x32   :  { %258 = vmatpush.bf16.msra.mxu1 %v1365_v45  ;;  %v1394_v29 = vld [vmem:[%s2623_s4 + $0x10] sm:$0xf0]  ;;  %v1393_v33 = vor.u32 %v1651_v27, %v1392_v26  ;;  %v1937_v38 = vmov 8.0   ;;  %vm270_vm1 = vcmask 1041408   ;;  %s1938_s22 = smov 64  }
  0x33   :  { %v1397_v34 = vor.u32 %v1649_v28, %v1394_v29  ;;  %1756 = vrcp.f32 %v1937_v38 }
  0x34   :  { %556 = vmatpush.bf16.msra.mxu2 %v1425_v10  ;;  %569 = vmatpush.bf16.msra.mxu3 %v1429_v14 }
  0x35   :  { %246 = vmatpush.bf16.msra.mxu0 %v1353_v56  ;;  %v139_v16 = vld [vmem:[%s2641_s0] sm:$0xff] }
  0x36   :  { %259 = vmatpush.bf16.msra.mxu1 %v1357_v57  ;;  %v141_v18 = vrot.slane %v139_v16, 3  ;;  %v2243_v36 = vpack.c.bf16 %v139_v16, %v139_v16  ;;  %v1755_v39 = vpop.eup %1754 }
  0x37   :  { %v286_v40 = vmul.f32 2.0, %v1755_v39  ;;  %vm290_vm2 = vweird.f32 %v1755_v39 }
  0x38   :  { %v144_v31 = vsel %vm143_vm0, %v139_v16, %v141_v18  ;;  %557 = vmatpush.bf16.msra.mxu2 %v1409_v21  ;;  %570 = vmatpush.bf16.msra.mxu3 %v1413_v24 }
  0x39   :  { %247 = vmatpush.bf16.msra.mxu0 %v1345_v5  ;;  %v145_v35 = vpack.c.bf16 %v144_v31, %v144_v31  ;;  %v2247_v41 = vpop.eup %1756  ;;  %v287_v42 = vsub.f32 1.0, %v286_v40 }
  0x3a   :  { %260 = vmatpush.bf16.msra.mxu1 %v1349_v9  ;;  %v630_v43 = vmul.f32 8.0, %v2247_v41  ;;  %vm634_vm3 = vweird.f32 %v2247_v41 }
  0x3b   :  { %v288_v49 = vmul.f32 %v1755_v39, %v287_v42 }
  0x3c   :  { %558 = vmatpush.bf16.msra.mxu2 %v1393_v33  ;;  %571 = vmatpush.bf16.msra.mxu3 %v1397_v34  ;;  %v631_v54 = vsub.f32 1.0, %v630_v43 }
  0x3d   :  { %248 = vmatpush.bf16.msra.mxu0 %v1337_v19  ;;  %v289_v61 = vadd.f32 %v1755_v39, %v288_v49 }
  0x3e   :  { %261 = vmatpush.bf16.msra.mxu1 %v1341_v20  ;;  %v632_v2 = vmul.f32 %v2247_v41, %v631_v54 }
  0x3f   :  { %559 = vmatmul.bf16.vlgmr.msra.gmra.mxu2 %v2243_v36  ;;  %572 = vmatmul.bf16.vlgmr.msra.gmra.mxu3 %v2243_v36  ;;  %v2274_v14 = vsel %vm290_vm2, %v1755_v39, %v289_v61  ;;  %vm791_vm2 = vcmask 1043456  }
  0x40   :  { %v633_v23 = vadd.f32 %v2247_v41, %v632_v2 }
  0x41   :  { %249 = vmatpush.bf16.msra.mxu0 %v1329_v30 }
  0x42   :  { %262 = vmatpush.bf16.msra.mxu1 %v1333_v32 }
  0x44   :  { %250 = vmatmul.bf16.vlgmr.msra.gmra.mxu0 %v145_v35 }
  0x45   :  { %263 = vmatmul.bf16.vlgmr.msra.gmra.mxu1 %v145_v35 }
  0xc1   :  { %v2250_v44 = vpop.f32.mrf.mxu0 }
  0xc2   :  { %v271_v45 = vsel %vm270_vm1, %v2250_v44, 0.0  ;;  %v294_v46 = vmul.f32 %v2250_v44, %v2250_v44  ;;  %v2256_v47 = vpop.f32.mrf.mxu1  ;;  %v2264_v1 = vpop.f32.mrf.mxu2 }
  0xc3   :  { %v272_v48 = vrot.slane %v271_v45, 4  ;;  %v278_v50 = vsel %vm270_vm1, %v2256_v47, 0.0  ;;  %v295_v51 = vmul.f32 %v2256_v47, %v2256_v47  ;;  %v605_v5 = vrot.slane %v2264_v1, 4  ;;  %v2270_v7 = vpop.f32.mrf.mxu3 }
  0xc4   :  { %v296_v52 = vsel %vm270_vm1, %v294_v46, 0.0  ;;  %v279_v53 = vrot.slane %v278_v50, 4  ;;  %v640_v6 = vmul.f32 %v2264_v1, %v2264_v1  ;;  %v611_v11 = vrot.slane %v2270_v7, 4 }
  0xc5   :  { %v273_v55 = vadd.f32 %v272_v48, %v271_v45  ;;  %v297_v56 = vrot.slane %v296_v52, 4  ;;  %v303_v57 = vsel %vm270_vm1, %v295_v51, 0.0  ;;  %v606_v16 = vadd.f32 %v605_v5, %v2264_v1 }
  0xc6   :  { %v280_v58 = vadd.f32 %v279_v53, %v278_v50  ;;  %v304_v59 = vrot.slane %v303_v57, 4  ;;  %v644_v19 = vrot.slane %v640_v6, 4  ;;  %v612_v20 = vadd.f32 %v611_v11, %v2270_v7 }
  0xc7   :  { %v274_v60 = vrot.slane %v273_v55, 2  ;;  %v298_v62 = vadd.f32 %v297_v56, %v296_v52  ;;  %v607_v26 = vrot.slane %v606_v16, 2  ;;  %v641_v31 = vmul.f32 %v2270_v7, %v2270_v7 }
  0xc8   :  { %v281_v63 = vrot.slane %v280_v58, 2  ;;  %v305_v0 = vadd.f32 %v304_v59, %v303_v57  ;;  %v645_v27 = vadd.f32 %v644_v19, %v640_v6  ;;  %v613_v30 = vrot.slane %v612_v20, 2 }
  0xc9   :  { %v275_v3 = vadd.f32 %v274_v60, %v273_v55  ;;  %v299_v4 = vrot.slane %v298_v62, 2  ;;  %v253_v8 = vpop.f32.mrf.mxu0  ;;  %v608_v34 = vadd.f32 %v607_v26, %v606_v16  ;;  %v2297_v48 = vsel %vm634_vm3, %v2247_v41, %v633_v23 }
  0xca   :  { %v282_v9 = vadd.f32 %v281_v63, %v280_v58  ;;  %v306_v10 = vrot.slane %v305_v0, 2  ;;  %v266_v12 = vpop.f32.mrf.mxu1  ;;  %v646_v35 = vrot.slane %v645_v27, 2  ;;  %v562_v37 = vpop.f32.mrf.mxu2  ;;  %v614_v40 = vadd.f32 %v613_v30, %v612_v20 }
  0xcb   :  { %v276_v13 = vrot.slane %v275_v3, 1  ;;  %v300_v15 = vadd.f32 %v299_v4, %v298_v62  ;;  %v575_v42 = vpop.f32.mrf.mxu3  ;;  %v609_v46 = vrot.slane %v608_v34, 1  ;;  %v650_v52 = vrot.slane %v641_v31, 4 }
  0xcc   :  { %v283_v17 = vrot.slane %v282_v9, 1  ;;  %v307_v18 = vadd.f32 %v306_v10, %v305_v0  ;;  %v647_v50 = vadd.f32 %v646_v35, %v645_v27  ;;  %v615_v51 = vrot.slane %v614_v40, 1 }
  0xcd   :  { %v277_v21 = vadd.f32 %v276_v13, %v275_v3  ;;  %v301_v22 = vrot.slane %v300_v15, 1  ;;  %v610_v54 = vadd.f32 %v609_v46, %v608_v34  ;;  %v651_v57 = vadd.f32 %v650_v52, %v641_v31  ;;  %v1680_v46 = vld [vmem:[%s2623_s4 + $0xf4] sm:$0xf0] }
  0xce   :  { %v284_v24 = vadd.f32 %v283_v17, %v282_v9  ;;  %v308_v25 = vrot.slane %v307_v18, 1  ;;  %v648_v56 = vrot.slane %v647_v50, 1  ;;  %v616_v60 = vadd.f32 %v615_v51, %v614_v40  ;;  %v1676_v51 = vld [vmem:[%s2623_s4 + $0xd4] sm:$0xf0] }
  0xcf   :  { %v2281_v28 = vmul.f32 %v2274_v14, %v277_v21  ;;  %v302_v29 = vadd.f32 %v301_v22, %v300_v15  ;;  %v2300_v59 = vmul.f32 %v2297_v48, %v610_v54  ;;  %v652_v63 = vrot.slane %v651_v57, 2  ;;  %v268_v21 = vld [vmem:[%s2621_s2] sm:$0x3] }
  0xd0   :  { %v2286_v32 = vmul.f32 %v2274_v14, %v284_v24  ;;  %v309_v33 = vadd.f32 %v308_v25, %v307_v18  ;;  %v649_v62 = vadd.f32 %v648_v56, %v647_v50  ;;  %v2306_v4 = vmul.f32 %v2297_v48, %v616_v60  ;;  %v269_v25 = vld [vmem:[%s2622_s3] sm:$0x3]  ;;  %v1674_v56 = vld [vmem:[%s2623_s4 + $0xcc] sm:$0xf] }
  0xd1   :  { %v310_v38 = vmul.f32 %v302_v29, %v2274_v14  ;;  %v312_v39 = vmul.f32 %v2281_v28, %v2281_v28  ;;  %v672_v41 = vmul.f32 %v2300_v59, %v2300_v59  ;;  %v653_v3 = vadd.f32 %v652_v63, %v651_v57  ;;  %v1498_v57 = vld [vmem:[%s2623_s4 + $0xd8] sm:$0xf0] }
  0xd2   :  { %v311_v43 = vmul.f32 %v309_v33, %v2274_v14  ;;  %v313_v45 = vmul.f32 %v2286_v32, %v2286_v32  ;;  %v668_v2 = vmul.f32 %v649_v62, %v2297_v48  ;;  %v673_v10 = vmul.f32 %v2306_v4, %v2306_v4 }
  0xd3   :  { %v314_v49 = vsub.f32 %v310_v38, %v312_v39  ;;  %v654_v6 = vrot.slane %v653_v3, 1  ;;  %v345_v30 = vperm.slane %v268_v21, 0  ;;  %v318_v35 = vsub.f32 %v2250_v44, %v2281_v28  ;;  %v1678_v44 = vld [vmem:[%s2623_s4 + $0xec] sm:$0xf] }
  0xd4   :  { %v315_v53 = vsub.f32 %v311_v43, %v313_v45  ;;  %v676_v5 = vsub.f32 %v668_v2, %v672_v41  ;;  %v352_v37 = vperm.slane %v269_v25, 0  ;;  %v346_v39 = vperm.slane %v268_v21, 1  ;;  %v1512_v45 = vld [vmem:[%s2623_s4 + $0xe8] sm:$0xf]  ;;  %v1672_v2 = vld [vmem:[%s2623_s4 + $0xb4] sm:$0xf0] }
  0xd5   :  { %v316_v55 = vmax.f32 %v314_v49, 0.0  ;;  %v655_v9 = vadd.f32 %v654_v6, %v653_v3  ;;  %v319_v42 = vsub.f32 %v2256_v47, %v2286_v32  ;;  %v1513_v50 = vor.u32 %v1680_v46, %v1512_v45  ;;  %v1514_v47 = vld [vmem:[%s2623_s4 + $0xf8] sm:$0xf0]  ;;  %v1496_v32 = vld [vmem:[%s2623_s4 + $0xc8] sm:$0xf] }
  0xd6   :  { %v317_v58 = vmax.f32 %v315_v53, 0.0  ;;  %v680_v8 = vmax.f32 %v676_v5, 0.0  ;;  %v353_v53 = vperm.slane %v269_v25, 1  ;;  %v1497_v60 = vor.u32 %v1676_v51, %v1496_v32  ;;  %v1480_v41 = vld [vmem:[%s2623_s4 + $0xa8] sm:$0xf] }
  0xd7   :  { %v320_v61 = vadd.f32 1e-05, %v316_v55  ;;  %v669_v13 = vmul.f32 %v655_v9, %v2297_v48  ;;  %v1517_v55 = vor.u32 %v1678_v44, %v1514_v47  ;;  %577 = vmatpush.bf16.msrb.mxu0 %v1513_v50  ;;  %v1670_v6 = vld [vmem:[%s2623_s4 + $0xac] sm:$0xf]  ;;  %v1464_v21 = vld [vmem:[%s2623_s4 + $0x88] sm:$0xf] }
  0xd8   :  { %v321_v0 = vadd.f32 1e-05, %v317_v58  ;;  %v2310_v12 = vadd.f32 1e-05, %v680_v8  ;;  %v1482_v8 = vld [vmem:[%s2623_s4 + $0xb8] sm:$0xf0] }
  0xd9   :  { %1758 = vrsqrt.f32 %v320_v61  ;;  %v677_v19 = vsub.f32 %v669_v13, %v673_v10  ;;  %vm328_vm6 = vweird.f32 %v320_v61  ;;  %590 = vmatpush.bf16.msrb.mxu1 %v1517_v55  ;;  %v1432_v50 = vld [vmem:[%s2623_s4 + $0x48] sm:$0xf]  ;;  %v1660_v47 = vld [vmem:[%s2623_s4 + $0x54] sm:$0xf0]  ;;  %v1658_v32 = vld [vmem:[%s2623_s4 + $0x4c] sm:$0xf] }
  0xda   :  { %1760 = vrsqrt.f32 %v321_v0  ;;  %vm338_vm8 = vweird.f32 %v321_v0  ;;  %vm698_vm11 = vweird.f32 %v2310_v12  ;;  %v1434_v51 = vld [vmem:[%s2623_s4 + $0x58] sm:$0xf0]  ;;  %v1433_v55 = vor.u32 %v1660_v47, %v1432_v50 }
  0xdb   :  { %1762 = vrsqrt.f32 %v2310_v12  ;;  %v681_v23 = vmax.f32 %v677_v19, 0.0  ;;  %578 = vmatpush.bf16.msrb.mxu0 %v1497_v60  ;;  %v1656_v60 = vld [vmem:[%s2623_s4 + $0x34] sm:$0xf0]  ;;  %vm848_vm3 = vcmask 523264  }
  0xdd   :  { %v2320_v27 = vadd.f32 1e-05, %v681_v23 }
  0xdf   :  { %v1759_v11 = vpop.eup %1758  ;;  %1764 = vrsqrt.f32 %v2320_v27  ;;  %vm708_vm14 = vweird.f32 %v2320_v27 }
  0xe0   :  { %v1761_v15 = vpop.eup %1760  ;;  %v323_v16 = vmul.f32 %v1759_v11, %v320_v61  ;;  %vm329_vm4 = vweird.f32 %v1759_v11 }
  0xe1   :  { %v333_v17 = vmul.f32 %v1761_v15, %v321_v0  ;;  %vm339_vm5 = vweird.f32 %v1761_v15  ;;  %v2322_v29 = vpop.eup %1762  ;;  %vm330_vm7 = vmor %vm328_vm6, %vm329_vm4  ;;  %v1501_v0 = vor.u32 %v1674_v56, %v1498_v57  ;;  %v1437_v57 = vor.u32 %v1658_v32, %v1434_v51 }
  0xe2   :  { %v324_v18 = vmul.f32 %v1759_v11, %v323_v16  ;;  %v693_v34 = vmul.f32 %v2322_v29, %v2310_v12  ;;  %vm340_vm9 = vmor %vm338_vm8, %vm339_vm5  ;;  %vm699_vm10 = vweird.f32 %v2322_v29  ;;  %v2384_v16 = vld [vmem:[%s2624_s5] sm:$0xf]  ;;  %vm789_vm4 = vcmask 1042432  }
  0xe3   :  { %v334_v20 = vmul.f32 %v1761_v15, %v333_v17  ;;  %vm2376_vm12 = vmor %vm698_vm11, %vm699_vm10  ;;  %v1481_v17 = vor.u32 %v1672_v2, %v1480_v41  ;;  %591 = vmatpush.bf16.msrb.mxu1 %v1501_v0  ;;  %v1400_v2 = vld [vmem:[%s2623_s4 + $0x8] sm:$0xf]  ;;  %vm793_vm5 = vcmask 1044480   ;;  %vm795_vm6 = vcmask 1045504  }
  0xe4   :  { %v325_v22 = vmul.f32 0.5, %v324_v18  ;;  %v694_v43 = vmul.f32 %v2322_v29, %v693_v34  ;;  %v684_v18 = vsub.f32 %v2264_v1, %v2300_v59  ;;  %v1666_v1 = vld [vmem:[%s2623_s4 + $0x8c] sm:$0xf]  ;;  %v1466_v59 = vld [vmem:[%s2623_s4 + $0x98] sm:$0xf0] }
  0xe5   :  { %v335_v24 = vmul.f32 0.5, %v334_v20  ;;  %v1765_v61 = vpop.eup %1764  ;;  %v1485_v20 = vor.u32 %v1670_v6, %v1482_v8  ;;  %579 = vmatpush.bf16.msrb.mxu0 %v1481_v17  ;;  %v1448_v34 = vld [vmem:[%s2623_s4 + $0x68] sm:$0xf]  ;;  %v1650_v6 = vld [vmem:[%s2623_s4 + $0xc] sm:$0xf] }
  0xe6   :  { %v326_v26 = vsub.f32 1.5, %v325_v22  ;;  %v695_v54 = vmul.f32 0.5, %v694_v43  ;;  %v703_v5 = vmul.f32 %v1765_v61, %v2320_v27  ;;  %v1668_v22 = vld [vmem:[%s2623_s4 + $0x94] sm:$0xf0]  ;;  %vm709_vm13 = vweird.f32 %v1765_v61  ;;  %v1402_v8 = vld [vmem:[%s2623_s4 + $0x18] sm:$0xf0] }
  0xe7   :  { %v336_v31 = vsub.f32 1.5, %v335_v24  ;;  %592 = vmatpush.bf16.msrb.mxu1 %v1485_v20  ;;  %vm710_vm15 = vmor %vm708_vm14, %vm709_vm13  ;;  %vm873_vm14 = vcmask 261120  }
  0xe8   :  { %v327_v33 = vmul.f32 %v1759_v11, %v326_v26  ;;  %v696_v63 = vsub.f32 1.5, %v695_v54  ;;  %v704_v13 = vmul.f32 %v1765_v61, %v703_v5  ;;  %v737_v26 = vperm.slane %v2384_v16, 0  ;;  %v1652_v5 = vld [vmem:[%s2623_s4 + $0x14] sm:$0xf0] }
  0xe9   :  { %v337_v38 = vmul.f32 %v1761_v15, %v336_v31  ;;  %v1465_v31 = vor.u32 %v1668_v22, %v1464_v21 }
  0xea   :  { %v331_v40 = vsel %vm330_vm7, %v1759_v11, %v327_v33  ;;  %v697_v10 = vmul.f32 %v2322_v29, %v696_v63  ;;  %v705_v23 = vmul.f32 0.5, %v704_v13  ;;  %v1469_v33 = vor.u32 %v1666_v1, %v1466_v59 }
  0xeb   :  { %v342_v28 = vmul.f32 %v331_v40, %v318_v35  ;;  %v341_v49 = vsel %vm340_vm9, %v1761_v15, %v337_v38  ;;  %v1664_v35 = vld [vmem:[%s2623_s4 + $0x74] sm:$0xf0]  ;;  %v1662_v40 = vld [vmem:[%s2623_s4 + $0x6c] sm:$0xf]  ;;  %580 = vmatpush.bf16.msrb.mxu0 %v1465_v31  ;;  %v1401_v13 = vor.u32 %v1652_v5, %v1400_v2  ;;  %vm797_vm7 = vcmask 1046528  }
  0xec   :  { %v343_v52 = vmul.f32 %v341_v49, %v319_v42  ;;  %v701_v12 = vsel %vm2376_vm12, %v2322_v29, %v697_v10  ;;  %v706_v29 = vsub.f32 1.5, %v705_v23  ;;  %v1450_v42 = vld [vmem:[%s2623_s4 + $0x78] sm:$0xf0]  ;;  %v1449_v46 = vor.u32 %v1664_v35, %v1448_v34  ;;  %593 = vmatpush.bf16.msrb.mxu1 %v1469_v33 }
  0xed   :  { %v349_v58 = vmul.f32 %v345_v30, %v342_v28  ;;  %v732_v24 = vmul.f32 %v701_v12, %v684_v18  ;;  %v2408_v30 = vld [vmem:[%s2625_s6] sm:$0xf]  ;;  %v1453_v49 = vor.u32 %v1662_v40, %v1450_v42 }
  0xee   :  { %v350_v62 = vmul.f32 %v346_v39, %v343_v52  ;;  %v707_v38 = vmul.f32 %v1765_v61, %v706_v29  ;;  %v738_v39 = vperm.slane %v2384_v16, 1  ;;  %v750_v45 = vperm.slane %v2408_v30, 0 }
  0xef   :  { %v2363_v3 = vadd.f32 %v352_v37, %v349_v58  ;;  %v685_v37 = vsub.f32 %v2270_v7, %v2306_v4  ;;  %v745_v43 = vmul.f32 %v737_v26, %v732_v24  ;;  %v751_v28 = vperm.slane %v2408_v30, 1  ;;  %581 = vmatpush.bf16.msrb.mxu0 %v1449_v46  ;;  %v1416_v58 = vld [vmem:[%s2623_s4 + $0x28] sm:$0xf] }
  0xf0   :  { %v2372_v9 = vadd.f32 %v353_v53, %v350_v62  ;;  %v711_v27 = vsel %vm710_vm15, %v1765_v61, %v707_v38  ;;  %594 = vmatpush.bf16.msrb.mxu1 %v1453_v49  ;;  %v1654_v61 = vld [vmem:[%s2623_s4 + $0x2c] sm:$0xf]  ;;  %v1418_v62 = vld [vmem:[%s2623_s4 + $0x38] sm:$0xf0]  ;;  %v1417_v0 = vor.u32 %v1656_v60, %v1416_v58 }
  0xf1   :  { %v764_v15 = vrot.slane %v2363_v3, 7  ;;  %v777_v7 = vrot.slane %v2363_v3, 4  ;;  %v733_v44 = vmul.f32 %v711_v27, %v685_v37  ;;  %v2444_v53 = vadd.f32 %v750_v45, %v745_v43 }
  0xf2   :  { %v771_v19 = vrot.slane %v2372_v9, 5  ;;  %v783_v4 = vrot.slane %v2372_v9, 2  ;;  %v1421_v41 = vor.u32 %v1654_v61, %v1418_v62  ;;  %v769_v23 = vrot.slane %v2372_v9, 6 }
  0xf3   :  { %v746_v52 = vmul.f32 %v738_v39, %v733_v44  ;;  %582 = vmatpush.bf16.msrb.mxu0 %v1433_v55  ;;  %v801_v10 = vrot.slane %v2444_v53, 4  ;;  %v775_v34 = vrot.slane %v2363_v3, 5  ;;  %v781_v45 = vrot.slane %v2372_v9, 3 }
  0xf4   :  { %v1728_v25 = vpack.i.bf16 %v771_v19, %v764_v15  ;;  %v1733_v54 = vpack.i.bf16 %v783_v4, %v777_v7  ;;  %595 = vmatpush.bf16.msrb.mxu1 %v1437_v57  ;;  %v1405_v15 = vor.u32 %v1650_v6, %v1402_v8 }
  0xf5   :  { %v759_v56 = vadd.f32 %v751_v28, %v746_v52 }
  0xf6   :  { %1729 = vrot.lane.b32.xlu1 %v1728_v25, %s1938_s22 }
  0xf7   :  { %v1718_v63 = vpack.i.bf16 %v759_v56, %v2444_v53  ;;  %v806_v11 = vrot.slane %v759_v56, 4  ;;  %583 = vmatpush.bf16.msrb.mxu0 %v1417_v0 }
  0xf8   :  { %596 = vmatpush.bf16.msrb.mxu1 %v1421_v41 }
  0xf9   :  { %1719 = vrot.lane.b32.xlu0 %v1718_v63, %s1938_s22  ;;  %v1723_v17 = vpack.i.bf16 %v806_v11, %v801_v10 }
  0xfb   :  { %584 = vmatpush.bf16.msrb.mxu0 %v1401_v13 }
  0xfc   :  { %597 = vmatpush.bf16.msrb.mxu1 %v1405_v15 }
  0xfe   :  { %1734 = vrot.lane.b32.xlu1 %v1733_v54, %s1938_s22  ;;  %585 = vmatmul.bf16.vlgmr.msrb.gmra.mxu0 %v2243_v36 }
  0xff   :  { %598 = vmatmul.bf16.vlgmr.msrb.gmra.mxu1 %v2243_v36 }
 0x101   :  { %1724 = vrot.lane.b32.xlu0 %v1723_v17, %s1938_s22 }
 0x168   :  { %v1730_v18 = vpop.permute.xlu1 %1729 }
 0x169   :  { %v1731_v12 = vunpack.i.l.bf16 %v1730_v18  ;;  %v1732_v26 = vunpack.i.h.bf16 %v1730_v18 }
 0x16b   :  { %v1720_v19 = vpop.permute.xlu0 %1719  ;;  %v787_v20 = vsel %vm143_vm0, %v2363_v3, %v1731_v12 }
 0x16c   :  { %v1722_v21 = vunpack.i.h.bf16 %v1720_v19  ;;  %v1721_v22 = vunpack.i.l.bf16 %v1720_v19  ;;  %v788_v24 = vsel %vm270_vm1, %v787_v20, %v769_v23 }
 0x16d   :  { %v790_v31 = vsel %vm789_vm4, %v788_v24, %v1732_v26 }
 0x16e   :  { %v820_v1 = vsel %vm791_vm2, %v801_v10, %v1721_v22  ;;  %v821_v59 = vsel %vm791_vm2, %v806_v11, %v1722_v21  ;;  %v792_v39 = vsel %vm791_vm2, %v790_v31, %v775_v34 }
 0x16f   :  { %v823_v25 = vpack.c.bf16 %v821_v59, %v820_v1 }
 0x170   :  { %v1735_v36 = vpop.permute.xlu1 %1734 }
 0x171   :  { %v856_v29 = vsel %vm848_vm3, %v823_v25, 0  ;;  %v1736_v33 = vunpack.i.l.bf16 %v1735_v36  ;;  %v1737_v27 = vunpack.i.h.bf16 %v1735_v36 }
 0x172   :  { %864 = vmatpush.bf16.xpose.msrb.mxu2 %v856_v29 }
 0x173   :  { %v1725_v35 = vpop.permute.xlu0 %1724  ;;  %v794_v40 = vsel %vm793_vm5, %v792_v39, %v1736_v33 }
 0x174   :  { %v1727_v37 = vunpack.i.h.bf16 %v1725_v35  ;;  %v1726_v38 = vunpack.i.l.bf16 %v1725_v35  ;;  %v796_v4 = vsel %vm795_vm6, %v794_v40, %v781_v45 }
 0x175   :  { %v798_v46 = vsel %vm797_vm7, %v796_v4, %v1737_v27 }
 0x176   :  { %v818_v42 = vsel %vm791_vm2, %v2444_v53, %v1726_v38  ;;  %v819_v43 = vsel %vm791_vm2, %v759_v56, %v1727_v37  ;;  %v799_v44 = vpack.c.bf16 %v798_v46, %v798_v46 }
 0x177   :  { %v822_v7 = vpack.c.bf16 %v819_v43, %v818_v42 }
 0x179   :  { %v853_v3 = vsel %vm848_vm3, %v822_v7, 0  ;;  %v739_v7 = vperm.slane %v2384_v16, 2 }
 0x17a   :  { %865 = vmatpush.bf16.xpose.msrb.mxu2 %v853_v3 }
 0x17b   :  { %v2491_v28 = vpop.f32.mrf.mxu0 }
 0x17c   :  { %v617_v49 = vrot.slane %v2491_v28, 4  ;;  %v642_v50 = vmul.f32 %v2491_v28, %v2491_v28  ;;  %v599_v60 = vpop.f32.mrf.mxu1 }
 0x17d   :  { %v623_v61 = vrot.slane %v599_v60, 4  ;;  %v643_v62 = vmul.f32 %v599_v60, %v599_v60 }
 0x17e   :  { %v618_v9 = vadd.f32 %v617_v49, %v2491_v28  ;;  %v656_v47 = vrot.slane %v642_v50, 4  ;;  %v752_v49 = vperm.slane %v2408_v30, 2 }
 0x17f   :  { %v624_v41 = vadd.f32 %v623_v61, %v599_v60  ;;  %v662_v2 = vrot.slane %v643_v62, 4 }
 0x180   :  { %v619_v32 = vrot.slane %v618_v9, 2  ;;  %v657_v51 = vadd.f32 %v656_v47, %v642_v50 }
 0x181   :  { %1518 = vmatmul.msk.bf16.vlgmr.msrb.gmra.mxu2 %vm848_vm3, %v799_v44  ;;  %v625_v8 = vrot.slane %v624_v41, 2  ;;  %v663_v10 = vadd.f32 %v662_v2, %v643_v62  ;;  %v740_v44 = vperm.slane %v2384_v16, 3  ;;  %v762_v16 = vld [vmem:[%s2626_s7] sm:$0xff] }
 0x182   :  { %v620_v52 = vadd.f32 %v619_v32, %v618_v9  ;;  %v658_v53 = vrot.slane %v657_v51, 2 }
 0x183   :  { %v588_v54 = vpop.f32.mrf.mxu0  ;;  %v626_v13 = vadd.f32 %v625_v8, %v624_v41  ;;  %v664_v15 = vrot.slane %v663_v10, 2 }
 0x184   :  { %v621_v55 = vrot.slane %v620_v52, 1  ;;  %v659_v56 = vadd.f32 %v658_v53, %v657_v51  ;;  %v601_v18 = vpop.f32.mrf.mxu1 }
 0x185   :  { %v627_v12 = vrot.slane %v626_v13, 1  ;;  %v665_v19 = vadd.f32 %v664_v15, %v663_v10 }
 0x186   :  { %v622_v57 = vadd.f32 %v621_v55, %v620_v52  ;;  %v660_v58 = vrot.slane %v659_v56, 1 }
 0x187   :  { %v628_v21 = vadd.f32 %v627_v12, %v626_v13  ;;  %v666_v22 = vrot.slane %v665_v19, 1 }
 0x188   :  { %v638_v63 = vmul.f32 %v2297_v48, %v622_v57  ;;  %v661_v0 = vadd.f32 %v660_v58, %v659_v56 }
 0x189   :  { %v639_v23 = vmul.f32 %v2297_v48, %v628_v21  ;;  %v667_v1 = vadd.f32 %v666_v22, %v665_v19 }
 0x18a   :  { %v670_v5 = vmul.f32 %v661_v0, %v2297_v48  ;;  %v674_v6 = vmul.f32 %v638_v63, %v638_v63  ;;  %v686_v40 = vsub.f32 %v2491_v28, %v638_v63  ;;  %v753_v28 = vperm.slane %v2408_v30, 3 }
 0x18b   :  { %v671_v59 = vmul.f32 %v667_v1, %v2297_v48  ;;  %v675_v24 = vmul.f32 %v639_v23, %v639_v23  ;;  %v687_v3 = vsub.f32 %v599_v60, %v639_v23  ;;  %v1688_v1 = vld [vmem:[%s2627_s8 + $0x38] sm:$0xff] }
 0x18c   :  { %v678_v11 = vsub.f32 %v670_v5, %v674_v6  ;;  %1067 = vmatpush.bf16.msra.mxu2 %v1688_v1 }
 0x18d   :  { %v679_v36 = vsub.f32 %v671_v59, %v675_v24  ;;  %v1687_v59 = vld [vmem:[%s2627_s8 + $0x30] sm:$0xff]  ;;  %v1686_v24 = vld [vmem:[%s2627_s8 + $0x28] sm:$0xff] }
 0x18e   :  { %v682_v17 = vmax.f32 %v678_v11, 0.0 }
 0x18f   :  { %v683_v29 = vmax.f32 %v679_v36, 0.0  ;;  %v1685_v36 = vld [vmem:[%s2627_s8 + $0x20] sm:$0xff] }
 0x190   :  { %v690_v20 = vadd.f32 1e-05, %v682_v17  ;;  %1068 = vmatpush.bf16.msra.mxu2 %v1687_v59 }
 0x191   :  { %v691_v33 = vadd.f32 1e-05, %v683_v29 }
 0x192   :  { %1766 = vrsqrt.f32 %v690_v20  ;;  %vm718_vm8 = vweird.f32 %v690_v20 }
 0x193   :  { %1768 = vrsqrt.f32 %v691_v33  ;;  %vm728_vm11 = vweird.f32 %v691_v33 }
 0x194   :  { %1069 = vmatpush.bf16.msra.mxu2 %v1686_v24 }
 0x198   :  { %v1767_v25 = vpop.eup %1766  ;;  %1070 = vmatpush.bf16.msra.mxu2 %v1685_v36  ;;  %v1698_v36 = vld [vmem:[%s2631_s12 + $0x8] sm:$0xff] }
 0x199   :  { %v713_v26 = vmul.f32 %v1767_v25, %v690_v20  ;;  %vm719_vm9 = vweird.f32 %v1767_v25  ;;  %v1769_v38 = vpop.eup %1768 }
 0x19a   :  { %vm720_vm10 = vmor %vm718_vm8, %vm719_vm9  ;;  %v723_v39 = vmul.f32 %v1769_v38, %v691_v33  ;;  %vm729_vm12 = vweird.f32 %v1769_v38  ;;  %v1684_v33 = vld [vmem:[%s2627_s8 + $0x18] sm:$0xff] }
 0x19b   :  { %v714_v31 = vmul.f32 %v1767_v25, %v713_v26  ;;  %vm730_vm13 = vmor %vm728_vm11, %vm729_vm12 }
 0x19c   :  { %v724_v48 = vmul.f32 %v1769_v38, %v723_v39  ;;  %1071 = vmatpush.bf16.msra.mxu2 %v1684_v33  ;;  %v1695_v39 = vld [vmem:[%s2627_s8 + $0x70] sm:$0xff] }
 0x19d   :  { %v715_v34 = vmul.f32 0.5, %v714_v31 }
 0x19e   :  { %v725_v43 = vmul.f32 0.5, %v724_v48  ;;  %v1692_v48 = vld [vmem:[%s2627_s8 + $0x58] sm:$0xff] }
 0x19f   :  { %v716_v35 = vsub.f32 1.5, %v715_v34  ;;  %v1683_v34 = vld [vmem:[%s2627_s8 + $0x10] sm:$0xff] }
 0x1a0   :  { %v726_v4 = vsub.f32 1.5, %v725_v43  ;;  %1072 = vmatpush.bf16.msra.mxu2 %v1683_v34  ;;  %v1691_v43 = vld [vmem:[%s2627_s8 + $0x50] sm:$0xff] }
 0x1a1   :  { %v717_v37 = vmul.f32 %v1767_v25, %v716_v35  ;;  %v1682_v35 = vld [vmem:[%s2627_s8 + $0x8] sm:$0xff] }
 0x1a2   :  { %v727_v27 = vmul.f32 %v1769_v38, %v726_v4  ;;  %v1690_v4 = vld [vmem:[%s2627_s8 + $0x48] sm:$0xff] }
 0x1a3   :  { %v721_v42 = vsel %vm720_vm10, %v1767_v25, %v717_v37  ;;  %v1696_v37 = vld [vmem:[%s2627_s8 + $0x78] sm:$0xff] }
 0x1a4   :  { %v734_v45 = vmul.f32 %v721_v42, %v686_v40  ;;  %v731_v50 = vsel %vm730_vm13, %v1769_v38, %v727_v27  ;;  %1073 = vmatpush.bf16.msra.mxu2 %v1682_v35  ;;  %v1681_v38 = vld [vmem:[%s2627_s8] sm:$0xff]  ;;  %v1694_v40 = vld [vmem:[%s2627_s8 + $0x68] sm:$0xff] }
 0x1a5   :  { %v735_v9 = vmul.f32 %v731_v50, %v687_v3  ;;  %v1693_v42 = vld [vmem:[%s2627_s8 + $0x60] sm:$0xff] }
 0x1a6   :  { %v747_v46 = vmul.f32 %v739_v7, %v734_v45 }
 0x1a7   :  { %v748_v47 = vmul.f32 %v740_v44, %v735_v9  ;;  %v1689_v44 = vld [vmem:[%s2627_s8 + $0x40] sm:$0xff] }
 0x1a8   :  { %v760_v32 = vadd.f32 %v752_v49, %v747_v46  ;;  %1074 = vmatpush.bf16.msra.mxu2 %v1681_v38 }
 0x1a9   :  { %v761_v51 = vadd.f32 %v753_v28, %v748_v47 }
 0x1aa   :  { %v825_v52 = vrot.slane %v760_v32, 4 }
 0x1ab   :  { %v1738_v53 = vpack.i.bf16 %v761_v51, %v760_v32  ;;  %v830_v54 = vrot.slane %v761_v51, 4 }
 0x1ad   :  { %1739 = vrot.lane.b32.xlu0 %v1738_v53, %s1938_s22  ;;  %v1743_v55 = vpack.i.bf16 %v830_v54, %v825_v52 }
 0x1af   :  { %1744 = vrot.lane.b32.xlu1 %v1743_v55, %s1938_s22 }
 0x204   :  { %v867_v56 = vpop.f32.mrf.mxu2 }
 0x205   :  { %v871_v57 = vmul.f32 0.125, %v867_v56 }
 0x207   :  { %v872_v58 = vadd.f32 %v871_v57, %v762_v16 }
 0x209   :  { %v874_v30 = vsel %vm873_vm14, %v872_v58, -inf }
 0x20a   :  { %875 = vmax.xlane.f32.xlu2 %v874_v30 }
 0x20c   :  { %v869_v60 = vpop.f32.mrf.mxu2 }
 0x21f   :  { %v1740_v61 = vpop.permute.xlu0 %1739 }
 0x220   :  { %v1742_v62 = vunpack.i.h.bf16 %v1740_v61  ;;  %v1741_v63 = vunpack.i.l.bf16 %v1740_v61 }
 0x221   :  { %v1745_v0 = vpop.permute.xlu1 %1744 }
 0x222   :  { %v1747_v41 = vunpack.i.h.bf16 %v1745_v0  ;;  %v1746_v2 = vunpack.i.l.bf16 %v1745_v0  ;;  %v844_v5 = vsel %vm791_vm2, %v825_v52, %v1741_v63  ;;  %v845_v6 = vsel %vm791_vm2, %v830_v54, %v1742_v62  ;;  %v1704_v62 = vld [vmem:[%s2631_s12 + $0x38] sm:$0xff]  ;;  %v1703_v63 = vld [vmem:[%s2631_s12 + $0x30] sm:$0xff]  ;;  %v1748_v0 = vld [vmem:[#allocation2] ss:$0 sm:$0xff] }
 0x223   :  { %v847_v8 = vpack.c.bf16 %v845_v6, %v844_v5  ;;  %1201 = vmatpush.bf16.msra.mxu0 %v1704_v62  ;;  %v1701_v6 = vld [vmem:[%s2631_s12 + $0x20] sm:$0xff] }
 0x224   :  { %v842_v10 = vsel %vm791_vm2, %v760_v32, %v1746_v2  ;;  %v843_v11 = vsel %vm791_vm2, %v761_v51, %v1747_v41  ;;  %v1702_v41 = vld [vmem:[%s2631_s12 + $0x28] sm:$0xff]  ;;  %vm1216_vm2 = vcmask 517120  }
 0x225   :  { %895 = vmatpush.bf16.msrb.mxu3 %v847_v8  ;;  %v846_v13 = vpack.c.bf16 %v843_v11, %v842_v10 }
 0x227   :  { %1202 = vmatpush.bf16.msra.mxu0 %v1703_v63  ;;  %v1708_v63 = vld [vmem:[%s2634_s15 + $0x18] sm:$0xff] }
 0x228   :  { %1307 = vmatpush.bf16.msra.mxu1 %v1708_v63 }
 0x229   :  { %896 = vmatpush.bf16.msrb.mxu3 %v846_v13 }
 0x22b   :  { %1203 = vmatpush.bf16.msra.mxu0 %v1702_v41 }
 0x22d   :  { %1080 = vmatpush.bf16.msra.mxu3 %v1696_v37 }
 0x22f   :  { %1204 = vmatpush.bf16.msra.mxu0 %v1701_v6  ;;  %v1707_v6 = vld [vmem:[%s2634_s15 + $0x10] sm:$0xff] }
 0x230   :  { %1308 = vmatpush.bf16.msra.mxu1 %v1707_v6 }
 0x231   :  { %1081 = vmatpush.bf16.msra.mxu3 %v1695_v39 }
 0x235   :  { %1082 = vmatpush.bf16.msra.mxu3 %v1694_v40 }
 0x239   :  { %1083 = vmatpush.bf16.msra.mxu3 %v1693_v42 }
 0x23d   :  { %1084 = vmatpush.bf16.msra.mxu3 %v1692_v48 }
 0x241   :  { %1085 = vmatpush.bf16.msra.mxu3 %v1691_v43 }
 0x245   :  { %1086 = vmatpush.bf16.msra.mxu3 %v1690_v4 }
 0x249   :  { %1087 = vmatpush.bf16.msra.mxu3 %v1689_v44  ;;  %v1750_v44 = vld [vmem:[#allocation6] ss:$0 sm:$0xff] }
 0x27d   :  { %v876_v15 = vpop.xlane.xlu2 %875 }
 0x27e   :  { %v877_v17 = vsub.f32 %v872_v58, %v876_v15  ;;  %v1700_v15 = vld [vmem:[%s2631_s12 + $0x18] sm:$0xff] }
 0x27f   :  { %1205 = vmatpush.bf16.msra.mxu0 %v1700_v15  ;;  %v1705_v15 = vld [vmem:[%s2634_s15] sm:$0xff] }
 0x280   :  { %v878_v18 = vmul.f32 1.442695, %v877_v17 }
 0x282   :  { %1770 = vpow2.f32 %v878_v18 }
 0x288   :  { %v1771_v12 = vpop.eup %1770 }
 0x289   :  { %v880_v19 = vsel %vm873_vm14, %v1771_v12, 0.0 }
 0x28a   :  { %881 = vadd.xlane.f32.xlu2 %v880_v19 }
 0x2fd   :  { %v882_v20 = vpop.xlane.xlu2 %881 }
 0x2fe   :  { %1772 = vrcp.f32 %v882_v20 }
 0x304   :  { %v1773_v21 = vpop.eup %1772 }
 0x305   :  { %v884_v22 = vmul.f32 %v1773_v21, %v1771_v12 }
 0x307   :  { %v885_v23 = vpack.c.bf16 %v884_v22, %v884_v22  ;;  %v1699_v22 = vld [vmem:[%s2631_s12 + $0x10] sm:$0xff] }
 0x308   :  { %1206 = vmatpush.bf16.msra.mxu0 %v1699_v22  ;;  %v1751_v22 = vld [vmem:[#allocation7] ss:$0 sm:$0xff] }
 0x309   :  { %1519 = vmatmul.msk.bf16.vlgmr.msrb.gmra.mxu3 %vm873_vm14, %v885_v23 }
 0x30c   :  { %1207 = vmatpush.bf16.msra.mxu0 %v1698_v36 }
 0x38c   :  { %v898_v25 = vpop.f32.mrf.mxu3 }
 0x38d   :  { %v909_v26 = vrot.slane %v898_v25, 3  ;;  %v903_v29 = vrot.slane %v898_v25, 1  ;;  %v907_v32 = vrot.slane %v898_v25, 2 }
 0x38f   :  { %910 = vrot.lane.b32.xlu0 %v909_v26, %s1938_s22  ;;  %904 = vrot.lane.b32.xlu2 %v903_v29, %s1938_s22  ;;  %v1697_v29 = vld [vmem:[%s2631_s12] sm:$0xff] }
 0x390   :  { %1208 = vmatpush.bf16.msra.mxu0 %v1697_v29 }
 0x394   :  { %v900_v31 = vpop.f32.mrf.mxu3 }
 0x3e9   :  { %v905_v45 = vpop.permute.xlu2 %904 }
 0x3ea   :  { %v913_v7 = vsel %vm848_vm3, %v898_v25, %v905_v45 }
 0x3eb   :  { %v917_v3 = vrot.slane %v913_v7, 3 }
 0x3ed   :  { %v921_v27 = vsel %vm143_vm0, %v913_v7, %v917_v3  ;;  %v1749_v3 = vld [vmem:[#allocation4] ss:$0 sm:$0xff] }
 0x3ee   :  { %v923_v46 = vadd.f32 3.0, %v921_v27 }
 0x3f0   :  { %v925_v49 = vmax.f32 %v923_v46, 0.0 }
 0x3f2   :  { %v927_v50 = vmin.f32 %v925_v49, 6.0 }
 0x3f4   :  { %v929_v9 = vmul.f32 %v927_v50, %v921_v27 }
 0x3f6   :  { %v931_v28 = vmul.f32 0.16666667, %v929_v9 }
 0x3f8   :  { %v933_v47 = vpack.c.bf16 %v931_v28, %v931_v28 }
 0x3fa   :  { %1075 = vmatmul.bf16.vlgmr.msra.gmra.mxu2 %v933_v47 }
 0x401   :  { %v911_v51 = vpop.permute.xlu0 %910 }
 0x402   :  { %v914_v52 = vsel %vm848_vm3, %v907_v32, %v911_v51 }
 0x403   :  { %v918_v53 = vrot.slane %v914_v52, 3 }
 0x405   :  { %v922_v54 = vsel %vm143_vm0, %v914_v52, %v918_v53 }
 0x406   :  { %v924_v55 = vadd.f32 3.0, %v922_v54 }
 0x408   :  { %v926_v56 = vmax.f32 %v924_v55, 0.0 }
 0x40a   :  { %v928_v16 = vmin.f32 %v926_v56, 6.0 }
 0x40c   :  { %v930_v57 = vmul.f32 %v928_v16, %v922_v54 }
 0x40e   :  { %v932_v58 = vmul.f32 0.16666667, %v930_v57 }
 0x410   :  { %v934_v30 = vpack.c.bf16 %v932_v58, %v932_v58 }
 0x412   :  { %1088 = vmatmul.bf16.vlgmr.msra.gmra.mxu3 %v934_v30 }
 0x47d   :  { %v1076_v60 = vpop.f32.mrf.mxu2 }
 0x47e   :  { %v1077_v2 = vadd.f32 %v1748_v0, %v1076_v60 }
 0x485   :  { %v1078_v61 = vpop.f32.mrf.mxu2 }
 0x495   :  { %v1089_v5 = vpop.f32.mrf.mxu3 }
 0x496   :  { %v1090_v8 = vadd.f32 %v1089_v5, %v1077_v2 }
 0x498   :  { %v1095_v10 = vsel %vm270_vm1, %v1090_v8, 0.0  ;;  %v1103_v11 = vmul.f32 %v1090_v8, %v1090_v8 }
 0x499   :  { %v1096_v13 = vrot.slane %v1095_v10, 4 }
 0x49a   :  { %v1104_v17 = vsel %vm270_vm1, %v1103_v11, 0.0  ;;  %v1706_v11 = vld [vmem:[%s2634_s15 + $0x8] sm:$0xff] }
 0x49b   :  { %v1097_v18 = vadd.f32 %v1096_v13, %v1095_v10  ;;  %v1105_v12 = vrot.slane %v1104_v17, 4  ;;  %1309 = vmatpush.bf16.msra.mxu1 %v1706_v11 }
 0x49d   :  { %v1098_v19 = vrot.slane %v1097_v18, 2  ;;  %v1106_v20 = vadd.f32 %v1105_v12, %v1104_v17  ;;  %v1091_v21 = vpop.f32.mrf.mxu3 }
 0x49f   :  { %v1099_v23 = vadd.f32 %v1098_v19, %v1097_v18  ;;  %v1107_v1 = vrot.slane %v1106_v20, 2  ;;  %1310 = vmatpush.bf16.msra.mxu1 %v1705_v15 }
 0x4a1   :  { %v1100_v59 = vrot.slane %v1099_v23, 1  ;;  %v1108_v24 = vadd.f32 %v1107_v1, %v1106_v20 }
 0x4a3   :  { %v1101_v25 = vadd.f32 %v1100_v59, %v1099_v23  ;;  %v1109_v26 = vrot.slane %v1108_v24, 1  ;;  %v1752_v59 = vld [vmem:[#allocation9] ss:$0 sm:$0xff] }
 0x4a5   :  { %v1102_v31 = vmul.f32 %v1101_v25, %v2274_v14  ;;  %v1110_v33 = vadd.f32 %v1109_v26, %v1108_v24 }
 0x4a7   :  { %v1111_v34 = vmul.f32 %v1110_v33, %v2274_v14  ;;  %v1112_v35 = vmul.f32 %v1102_v31, %v1102_v31  ;;  %v1115_v4 = vsub.f32 %v1090_v8, %v1102_v31 }
 0x4a9   :  { %v1113_v37 = vsub.f32 %v1111_v34, %v1112_v35  ;;  %v1753_v35 = vld [vmem:[#allocation10] ss:$0 sm:$0xff] }
 0x4ab   :  { %v1114_v38 = vmax.f32 %v1113_v37, 0.0 }
 0x4ad   :  { %v1116_v39 = vadd.f32 1e-05, %v1114_v38 }
 0x4af   :  { %1774 = vrsqrt.f32 %v1116_v39  ;;  %vm1123_vm1 = vweird.f32 %v1116_v39 }
 0x4b5   :  { %v1775_v40 = vpop.eup %1774 }
 0x4b6   :  { %v1118_v42 = vmul.f32 %v1775_v40, %v1116_v39  ;;  %vm1124_vm0 = vweird.f32 %v1775_v40 }
 0x4b7   :  { %vm1125_vm15 = vmor %vm1123_vm1, %vm1124_vm0 }
 0x4b8   :  { %v1119_v48 = vmul.f32 %v1775_v40, %v1118_v42 }
 0x4ba   :  { %v1120_v43 = vmul.f32 0.5, %v1119_v48 }
 0x4bc   :  { %v1121_v45 = vsub.f32 1.5, %v1120_v43 }
 0x4be   :  { %v1122_v7 = vmul.f32 %v1775_v40, %v1121_v45 }
 0x4c0   :  { %v1126_v27 = vsel %vm1125_vm15, %v1775_v40, %v1122_v7 }
 0x4c1   :  { %v1127_v46 = vmul.f32 %v1126_v27, %v1115_v4 }
 0x4c3   :  { %v1131_v49 = vmul.f32 %v1749_v3, %v1127_v46 }
 0x4c5   :  { %v1135_v50 = vadd.f32 %v1750_v44, %v1131_v49 }
 0x4c7   :  { %v1136_v9 = vpack.c.bf16 %v1135_v50, %v1135_v50 }
 0x4c9   :  { %1209 = vmatmul.bf16.vlgmr.msra.gmra.mxu0 %v1136_v9 }
 0x546   :  { %v1210_v28 = vpop.f32.mrf.mxu0 }
 0x547   :  { %v1217_v47 = vsel %vm1216_vm2, %v1210_v28, 0.0  ;;  %v1225_v32 = vmul.f32 %v1210_v28, %v1210_v28 }
 0x548   :  { %v1218_v51 = vrot.slane %v1217_v47, 4 }
 0x549   :  { %v1226_v52 = vsel %vm1216_vm2, %v1225_v32, 0.0 }
 0x54a   :  { %v1219_v53 = vadd.f32 %v1218_v51, %v1217_v47  ;;  %v1227_v54 = vrot.slane %v1226_v52, 4 }
 0x54c   :  { %v1220_v55 = vrot.slane %v1219_v53, 2  ;;  %v1228_v56 = vadd.f32 %v1227_v54, %v1226_v52 }
 0x54e   :  { %v1221_v16 = vadd.f32 %v1220_v55, %v1219_v53  ;;  %v1229_v57 = vrot.slane %v1228_v56, 2  ;;  %v1212_v58 = vpop.f32.mrf.mxu0 }
 0x550   :  { %v1222_v30 = vrot.slane %v1221_v16, 1  ;;  %v1230_v60 = vadd.f32 %v1229_v57, %v1228_v56 }
 0x552   :  { %v1223_v61 = vadd.f32 %v1222_v30, %v1221_v16  ;;  %v1231_v62 = vrot.slane %v1230_v60, 1 }
 0x554   :  { %v1224_v0 = vmul.f32 %v1223_v61, %v2274_v14  ;;  %v1232_v41 = vadd.f32 %v1231_v62, %v1230_v60 }
 0x556   :  { %v1233_v2 = vmul.f32 %v1232_v41, %v2274_v14  ;;  %v1234_v5 = vmul.f32 %v1224_v0, %v1224_v0  ;;  %v1237_v21 = vsub.f32 %v1210_v28, %v1224_v0 }
 0x558   :  { %v1235_v8 = vsub.f32 %v1233_v2, %v1234_v5 }
 0x55a   :  { %v1236_v10 = vmax.f32 %v1235_v8, 0.0 }
 0x55c   :  { %v1238_v13 = vadd.f32 1e-05, %v1236_v10 }
 0x55e   :  { %1776 = vrsqrt.f32 %v1238_v13  ;;  %vm1245_vm5 = vweird.f32 %v1238_v13 }
 0x564   :  { %v1777_v14 = vpop.eup %1776 }
 0x565   :  { %v1240_v17 = vmul.f32 %v1777_v14, %v1238_v13  ;;  %vm1246_vm4 = vweird.f32 %v1777_v14 }
 0x566   :  { %vm1247_vm6 = vmor %vm1245_vm5, %vm1246_vm4 }
 0x567   :  { %v1241_v18 = vmul.f32 %v1777_v14, %v1240_v17 }
 0x569   :  { %v1242_v12 = vmul.f32 0.5, %v1241_v18 }
 0x56b   :  { %v1243_v19 = vsub.f32 1.5, %v1242_v12 }
 0x56d   :  { %v1244_v20 = vmul.f32 %v1777_v14, %v1243_v19 }
 0x56f   :  { %v1248_v23 = vsel %vm1247_vm6, %v1777_v14, %v1244_v20 }
 0x570   :  { %v1249_v1 = vmul.f32 %v1248_v23, %v1237_v21 }
 0x572   :  { %v1253_v24 = vmul.f32 %v1751_v22, %v1249_v1 }
 0x574   :  { %v1257_v36 = vadd.f32 %v1752_v59, %v1253_v24 }
 0x576   :  { %v1258_v25 = vadd.f32 3.0, %v1257_v36 }
 0x578   :  { %v1259_v26 = vmax.f32 %v1258_v25, 0.0 }
 0x57a   :  { %v1260_v29 = vmin.f32 %v1259_v26, 6.0 }
 0x57c   :  { %v1261_v31 = vmul.f32 %v1260_v29, %v1257_v36 }
 0x57e   :  { %v1262_v33 = vmul.f32 0.16666667, %v1261_v31 }
 0x580   :  { %v1263_v34 = vpack.c.bf16 %v1262_v33, %v1262_v33 }
 0x582   :  { %1632 = vmatmul.msk.bf16.vlgmr.msra.gmra.mxu1 %vm848_vm3, %v1263_v34 }
 0x5ff   :  { %v1312_v37 = vpop.f32.mrf.mxu1 }
 0x600   :  { %v1313_v38 = vadd.f32 %v1753_v35, %v1312_v37 }
 0x602   :  { %v1316_v39 = vadd.f32 %v1313_v38, %v1135_v50 }
 0x604   :  { %1317 = vst [vmem:[%s2636_s17] sm:$0x3] %v1316_v39 }
 0x607   :  { %v1314_v40 = vpop.f32.mrf.mxu1 }
 0x608   :  { %1322 = vsyncpa [#allocation3], 1 }
 0x609   :  { %1323 = vsyncpa [#allocation5], 1 }
 0x60a   :  { %1324 = vsyncpa [#allocation8], 1 }
 0x60b   :  { %1325 = vsyncpa [#allocation11], 1 }

// kernel: _lambda_.17
= control target key start
LH: loop header
LB: loop body
LE: loop exit
PB: predicated region body
PF: predicated region fallthrough
CT: control target
= control target key end

     0   :  { %s2658_s0 = inlined_call_operand.vmem [shape: f32[2,128], index: 0, kind: input, shape index: {}]   ;;  %s2659_s1 = inlined_call_operand.vmem [shape: bf16[128,256], index: 1, kind: input, shape index: {}]   ;;  %s2660_s2 = inlined_call_operand.vmem [shape: f32[1,256], index: 2, kind: input, shape index: {}]   ;;  %s2661_s3 = inlined_call_operand.vmem [shape: f32[1,256], index: 3, kind: input, shape index: {}]   ;;  %s2662_s4 = inlined_call_operand.vmem [shape: bf16[128,512], index: 4, kind: input, shape index: {}]   ;;  %s2663_s5 = inlined_call_operand.vmem [shape: f32[1,512], index: 5, kind: input, shape index: {}]   ;;  %s2664_s6 = inlined_call_operand.vmem [shape: f32[1,512], index: 6, kind: input, shape index: {}]   ;;  %s2665_s7 = inlined_call_operand.vmem [shape: f32[8,8], index: 7, kind: input, shape index: {}]   ;;  %s2666_s8 = inlined_call_operand.vmem [shape: bf16[256,128], index: 8, kind: input, shape index: {}]   ;;  %s2667_s9 = inlined_call_operand.vmem [shape: f32[1,128], index: 9, kind: input, shape index: {}]   ;;  %s2668_s10 = inlined_call_operand.hbm [shape: f32[1,128], index: 10, kind: input, shape index: {}]   ;;  %s2669_s11 = inlined_call_operand.hbm [shape: f32[1,128], index: 11, kind: input, shape index: {}]   ;;  %s2670_s12 = inlined_call_operand.vmem [shape: bf16[128,128], index: 12, kind: input, shape index: {}]   ;;  %s2671_s13 = inlined_call_operand.hbm [shape: f32[1,128], index: 13, kind: input, shape index: {}]   ;;  %s2672_s14 = inlined_call_operand.hbm [shape: f32[1,128], index: 14, kind: input, shape index: {}]   ;;  %s2673_s15 = inlined_call_operand.vmem [shape: bf16[128,128], index: 15, kind: input, shape index: {}]   ;;  %s2674_s16 = inlined_call_operand.hbm [shape: f32[1,128], index: 16, kind: input, shape index: {}]   ;;  %s2675_s17 = inlined_call_operand.vmem [shape: f32[2,128], index: 17, kind: output, shape index: {}]  }
   0x1   :  { %2678 = sst [smem:[#allocation13_spill]] %s2658_s0 }
   0x2   :  { %2679 = sst [smem:[#allocation14_spill]] %s2659_s1 }
   0x3   :  { %22 = vsyncpa [#allocation3], 0 }
   0x4   :  { %23 = vsyncpa [#allocation5], 0  ;;  %s61_s26 = sshll.u32 %s2669_s11, 4  ;;  %s62_s26 = int_to_ptr.hbm [resolvable:$true] %s61_s26 }
   0x5   :  { %24 = vsyncpa [#allocation8], 0  ;;  %s1946_s27 = smov [#allocation4]   ;;  %s85_s30 = sshll.u32 %s2672_s14, 4  ;;  %s86_s30 = int_to_ptr.hbm [resolvable:$true] %s85_s30 }
   0x6   :  { %s63_s28 = sshll.u32 %s1946_s27, 4  ;;  %s1947_s18 = smov [#allocation7]   ;;  %s64_s28 = int_to_ptr.vmem [resolvable:$true] %s63_s28 }
   0x7   :  { %66 = dma.hbm_to_vmem [thread:$0]  %s62_s26, 16, %s64_s28, [#allocation5]  }
   0x8   :  { %s87_s19 = sshll.u32 %s1947_s18, 4  ;;  %s50_s21 = sshll.u32 %s2668_s10, 4  ;;  %s88_s19 = int_to_ptr.vmem [resolvable:$true] %s87_s19  ;;  %s51_s21 = int_to_ptr.hbm [resolvable:$true] %s50_s21 }
   0x9   :  { %90 = dma.hbm_to_vmem [thread:$0]  %s86_s30, 16, %s88_s19, [#allocation8]  }
   0xa   :  { %s74_s23 = sshll.u32 %s2671_s13, 4  ;;  %s1948_s24 = smov [#allocation2]   ;;  %s75_s23 = int_to_ptr.hbm [resolvable:$true] %s74_s23 }
   0xb   :  { %s52_s25 = sshll.u32 %s1948_s24, 4  ;;  %s1949_s14 = smov [#allocation6]   ;;  %s53_s25 = int_to_ptr.vmem [resolvable:$true] %s52_s25 }
   0xc   :  { %55 = dma.hbm_to_vmem [thread:$0]  %s51_s21, 16, %s53_s25, [#allocation3]  }
   0xd   :  { %s76_s26 = sshll.u32 %s1949_s14, 4  ;;  %s98_s29 = sshll.u32 %s2674_s16, 4  ;;  %s77_s26 = int_to_ptr.vmem [resolvable:$true] %s76_s26  ;;  %s99_s29 = int_to_ptr.hbm [resolvable:$true] %s98_s29 }
   0xe   :  { %79 = dma.hbm_to_vmem [thread:$0]  %s75_s23, 16, %s77_s26, [#allocation5]  }
   0xf   :  { %s1950_s10 = smov [#allocation9]  }
  0x10   :  { %s100_s0 = sshll.u32 %s1950_s10, 4  ;;  %s101_s0 = int_to_ptr.vmem [resolvable:$true] %s100_s0 }
  0x11   :  { %103 = dma.hbm_to_vmem [thread:$0]  %s99_s29, 16, %s101_s0, [#allocation8]  }
  0x12   :  { %1940 = dma.done.wait [#allocation3], 16  }
  0x13   :  { %1941 = vsyncadd [#allocation3], 4294967280 }
  0x14   :  { %1942 = dma.done.wait [#allocation5], 32  }
  0x15   :  { %1943 = vsyncadd [#allocation5], 4294967264 }
  0x16   :  { %1944 = dma.done.wait [#allocation8], 32  }
  0x17   :  { %1945 = vsyncadd [#allocation8], 4294967264  ;;  %s2680_s18 = sld [smem:[#allocation14_spill]]  ;;  %v1530_v5 = vld [vmem:[%s2662_s4 + $0xe0] sm:$0xf]  ;;  %vm251_vm0 = vcmask 1041408  }
  0x18   :  { %v1720_v6 = vld [vmem:[%s2662_s4 + $0xec] sm:$0xf0]  ;;  %v1718_v9 = vld [vmem:[%s2662_s4 + $0xe4] sm:$0xf]  ;;  %v1532_v10 = vld [vmem:[%s2662_s4 + $0xf0] sm:$0xf0] }
  0x19   :  { %v1531_v8 = vor.u32 %v1720_v6, %v1530_v5  ;;  %v1535_v12 = vor.u32 %v1718_v9, %v1532_v10  ;;  %v1514_v18 = vld [vmem:[%s2662_s4 + $0xc0] sm:$0xf]  ;;  %v1716_v19 = vld [vmem:[%s2662_s4 + $0xcc] sm:$0xf0]  ;;  %v1714_v20 = vld [vmem:[%s2662_s4 + $0xc4] sm:$0xf] }
  0x1a   :  { %v1515_v21 = vor.u32 %v1716_v19, %v1514_v18  ;;  %v1516_v22 = vld [vmem:[%s2662_s4 + $0xd0] sm:$0xf0]  ;;  %v1498_v28 = vld [vmem:[%s2662_s4 + $0xa0] sm:$0xf]  ;;  %v1712_v30 = vld [vmem:[%s2662_s4 + $0xac] sm:$0xf0] }
  0x1b   :  { %531 = vmatpush.bf16.msra.mxu2 %v1531_v8  ;;  %544 = vmatpush.bf16.msra.mxu3 %v1535_v12  ;;  %v1519_v25 = vor.u32 %v1714_v20, %v1516_v22  ;;  %v1710_v31 = vld [vmem:[%s2662_s4 + $0xa4] sm:$0xf]  ;;  %v1500_v32 = vld [vmem:[%s2662_s4 + $0xb0] sm:$0xf0]  ;;  %v1499_v34 = vor.u32 %v1712_v30, %v1498_v28  ;;  %v1482_v40 = vld [vmem:[%s2662_s4 + $0x80] sm:$0xf] }
  0x1c   :  { %v1503_v38 = vor.u32 %v1710_v31, %v1500_v32  ;;  %v1708_v41 = vld [vmem:[%s2662_s4 + $0x8c] sm:$0xf0]  ;;  %v1706_v42 = vld [vmem:[%s2662_s4 + $0x84] sm:$0xf]  ;;  %v1484_v43 = vld [vmem:[%s2662_s4 + $0x90] sm:$0xf0] }
  0x1d   :  { %v1410_v0 = vld [vmem:[%s2680_s18 + $0x70] sm:$0xf]  ;;  %v1689_v1 = vld [vmem:[%s2680_s18 + $0x74] sm:$0xf0]  ;;  %v1688_v2 = vld [vmem:[%s2680_s18 + $0x74] sm:$0xf]  ;;  %v1483_v46 = vor.u32 %v1708_v41, %v1482_v40  ;;  %v1487_v50 = vor.u32 %v1706_v42, %v1484_v43 }
  0x1e   :  { %v1411_v3 = vor.u32 %v1689_v1, %v1410_v0  ;;  %v1412_v4 = vld [vmem:[%s2680_s18 + $0x78] sm:$0xf0]  ;;  %v1402_v11 = vld [vmem:[%s2680_s18 + $0x60] sm:$0xf]  ;;  %v1687_v13 = vld [vmem:[%s2680_s18 + $0x64] sm:$0xf0] }
  0x1f   :  { %v1415_v7 = vor.u32 %v1688_v2, %v1412_v4  ;;  %v1686_v14 = vld [vmem:[%s2680_s18 + $0x64] sm:$0xf]  ;;  %v1404_v15 = vld [vmem:[%s2680_s18 + $0x68] sm:$0xf0]  ;;  %v1403_v16 = vor.u32 %v1687_v13, %v1402_v11  ;;  %v1394_v23 = vld [vmem:[%s2680_s18 + $0x50] sm:$0xf]  ;;  %532 = vmatpush.bf16.msra.mxu2 %v1515_v21  ;;  %545 = vmatpush.bf16.msra.mxu3 %v1519_v25 }
  0x20   :  { %223 = vmatpush.bf16.msra.mxu0 %v1411_v3  ;;  %v1407_v17 = vor.u32 %v1686_v14, %v1404_v15  ;;  %v1685_v24 = vld [vmem:[%s2680_s18 + $0x54] sm:$0xf0]  ;;  %v1684_v26 = vld [vmem:[%s2680_s18 + $0x54] sm:$0xf]  ;;  %v1396_v27 = vld [vmem:[%s2680_s18 + $0x58] sm:$0xf0] }
  0x21   :  { %236 = vmatpush.bf16.msra.mxu1 %v1415_v7  ;;  %v1395_v29 = vor.u32 %v1685_v24, %v1394_v23  ;;  %v1399_v33 = vor.u32 %v1684_v26, %v1396_v27  ;;  %v1386_v35 = vld [vmem:[%s2680_s18 + $0x40] sm:$0xf]  ;;  %v1683_v36 = vld [vmem:[%s2680_s18 + $0x44] sm:$0xf0]  ;;  %v1682_v37 = vld [vmem:[%s2680_s18 + $0x44] sm:$0xf] }
  0x22   :  { %v1388_v39 = vld [vmem:[%s2680_s18 + $0x48] sm:$0xf0]  ;;  %v1387_v44 = vor.u32 %v1683_v36, %v1386_v35  ;;  %v1378_v47 = vld [vmem:[%s2680_s18 + $0x30] sm:$0xf]  ;;  %v1681_v48 = vld [vmem:[%s2680_s18 + $0x34] sm:$0xf0] }
  0x23   :  { %533 = vmatpush.bf16.msra.mxu2 %v1499_v34  ;;  %v1391_v45 = vor.u32 %v1682_v37, %v1388_v39  ;;  %v1680_v49 = vld [vmem:[%s2680_s18 + $0x34] sm:$0xf]  ;;  %546 = vmatpush.bf16.msra.mxu3 %v1503_v38  ;;  %v1380_v51 = vld [vmem:[%s2680_s18 + $0x38] sm:$0xf0]  ;;  %v1466_v52 = vld [vmem:[%s2662_s4 + $0x60] sm:$0xf]  ;;  %v1379_v56 = vor.u32 %v1681_v48, %v1378_v47 }
  0x24   :  { %224 = vmatpush.bf16.msra.mxu0 %v1403_v16  ;;  %v1704_v53 = vld [vmem:[%s2662_s4 + $0x6c] sm:$0xf0]  ;;  %v1702_v54 = vld [vmem:[%s2662_s4 + $0x64] sm:$0xf]  ;;  %v1468_v55 = vld [vmem:[%s2662_s4 + $0x70] sm:$0xf0]  ;;  %v1383_v57 = vor.u32 %v1680_v49, %v1380_v51 }
  0x25   :  { %237 = vmatpush.bf16.msra.mxu1 %v1407_v17  ;;  %v1467_v58 = vor.u32 %v1704_v53, %v1466_v52  ;;  %v1370_v59 = vld [vmem:[%s2680_s18 + $0x20] sm:$0xf]  ;;  %v1679_v60 = vld [vmem:[%s2680_s18 + $0x24] sm:$0xf0]  ;;  %v1678_v61 = vld [vmem:[%s2680_s18 + $0x24] sm:$0xf]  ;;  %v1471_v62 = vor.u32 %v1702_v54, %v1468_v55 }
  0x26   :  { %v1372_v63 = vld [vmem:[%s2680_s18 + $0x28] sm:$0xf0]  ;;  %v1450_v0 = vld [vmem:[%s2662_s4 + $0x40] sm:$0xf]  ;;  %v1700_v1 = vld [vmem:[%s2662_s4 + $0x4c] sm:$0xf0]  ;;  %v1371_v4 = vor.u32 %v1679_v60, %v1370_v59 }
  0x27   :  { %534 = vmatpush.bf16.msra.mxu2 %v1483_v46  ;;  %547 = vmatpush.bf16.msra.mxu3 %v1487_v50  ;;  %v1698_v2 = vld [vmem:[%s2662_s4 + $0x44] sm:$0xf]  ;;  %v1452_v3 = vld [vmem:[%s2662_s4 + $0x50] sm:$0xf0]  ;;  %v1362_v5 = vld [vmem:[%s2680_s18 + $0x10] sm:$0xf]  ;;  %v1375_v8 = vor.u32 %v1678_v61, %v1372_v63  ;;  %v1451_v9 = vor.u32 %v1700_v1, %v1450_v0 }
  0x28   :  { %225 = vmatpush.bf16.msra.mxu0 %v1395_v29  ;;  %v1677_v6 = vld [vmem:[%s2680_s18 + $0x14] sm:$0xf0]  ;;  %v1676_v7 = vld [vmem:[%s2680_s18 + $0x14] sm:$0xf]  ;;  %v1364_v10 = vld [vmem:[%s2680_s18 + $0x18] sm:$0xf0]  ;;  %v1455_v13 = vor.u32 %v1698_v2, %v1452_v3 }
  0x29   :  { %238 = vmatpush.bf16.msra.mxu1 %v1399_v33  ;;  %v1434_v11 = vld [vmem:[%s2662_s4 + $0x20] sm:$0xf]  ;;  %v1696_v12 = vld [vmem:[%s2662_s4 + $0x2c] sm:$0xf0]  ;;  %v1694_v14 = vld [vmem:[%s2662_s4 + $0x24] sm:$0xf]  ;;  %v1363_v16 = vor.u32 %v1677_v6, %v1362_v5  ;;  %v1367_v17 = vor.u32 %v1676_v7, %v1364_v10 }
  0x2a   :  { %v1436_v15 = vld [vmem:[%s2662_s4 + $0x30] sm:$0xf0]  ;;  %v1435_v18 = vor.u32 %v1696_v12, %v1434_v11  ;;  %v1354_v19 = vld [vmem:[%s2680_s18] sm:$0xf]  ;;  %v1675_v20 = vld [vmem:[%s2680_s18 + $0x4] sm:$0xf0] }
  0x2b   :  { %535 = vmatpush.bf16.msra.mxu2 %v1467_v58  ;;  %548 = vmatpush.bf16.msra.mxu3 %v1471_v62  ;;  %v1674_v21 = vld [vmem:[%s2680_s18 + $0x4] sm:$0xf]  ;;  %v1439_v22 = vor.u32 %v1694_v14, %v1436_v15  ;;  %v1356_v23 = vld [vmem:[%s2680_s18 + $0x8] sm:$0xf0]  ;;  %v1418_v24 = vld [vmem:[%s2662_s4] sm:$0xf]  ;;  %v1355_v28 = vor.u32 %v1675_v20, %v1354_v19 }
  0x2c   :  { %226 = vmatpush.bf16.msra.mxu0 %v1387_v44  ;;  %v1692_v25 = vld [vmem:[%s2662_s4 + $0xc] sm:$0xf0]  ;;  %v1690_v26 = vld [vmem:[%s2662_s4 + $0x4] sm:$0xf]  ;;  %v1420_v27 = vld [vmem:[%s2662_s4 + $0x10] sm:$0xf0]  ;;  %v1359_v30 = vor.u32 %v1674_v21, %v1356_v23 }
  0x2d   :  { %239 = vmatpush.bf16.msra.mxu1 %v1391_v45  ;;  %s2681_s28 = sld [smem:[#allocation13_spill]]  ;;  %v1419_v31 = vor.u32 %v1692_v25, %v1418_v24  ;;  %v1423_v32 = vor.u32 %v1690_v26, %v1420_v27  ;;  %v1951_v34 = vmov 2.0   ;;  %s1952_s1 = smov 64   ;;  %vm768_vm14 = vcmask 1040384  }
  0x2e   :  { %1797 = vrcp.f32 %v1951_v34  ;;  %vm771_vm15 = vcmask 1042432  }
  0x2f   :  { %536 = vmatpush.bf16.msra.mxu2 %v1451_v9  ;;  %549 = vmatpush.bf16.msra.mxu3 %v1455_v13 }
  0x30   :  { %227 = vmatpush.bf16.msra.mxu0 %v1379_v56 }
  0x31   :  { %240 = vmatpush.bf16.msra.mxu1 %v1383_v57 }
  0x33   :  { %v125_v29 = vld [vmem:[%s2681_s28] sm:$0x3]  ;;  %537 = vmatpush.bf16.msra.mxu2 %v1435_v18  ;;  %550 = vmatpush.bf16.msra.mxu3 %v1439_v22 }
  0x34   :  { %228 = vmatpush.bf16.msra.mxu0 %v1371_v4  ;;  %v2253_v33 = vpack.c.bf16 %v125_v29, %v125_v29  ;;  %v1798_v35 = vpop.eup %1797 }
  0x35   :  { %241 = vmatpush.bf16.msra.mxu1 %v1375_v8  ;;  %v267_v36 = vmul.f32 2.0, %v1798_v35  ;;  %vm271_vm1 = vweird.f32 %v1798_v35 }
  0x37   :  { %538 = vmatpush.bf16.msra.mxu2 %v1419_v31  ;;  %551 = vmatpush.bf16.msra.mxu3 %v1423_v32  ;;  %v268_v37 = vsub.f32 1.0, %v267_v36 }
  0x38   :  { %229 = vmatpush.bf16.msra.mxu0 %v1363_v16 }
  0x39   :  { %242 = vmatpush.bf16.msra.mxu1 %v1367_v17  ;;  %v269_v40 = vmul.f32 %v1798_v35, %v268_v37 }
  0x3a   :  { %539 = vmatmul.bf16.vlgmr.msra.gmra.mxu2 %v2253_v33  ;;  %552 = vmatmul.bf16.vlgmr.msra.gmra.mxu3 %v2253_v33 }
  0x3b   :  { %v270_v51 = vadd.f32 %v1798_v35, %v269_v40 }
  0x3c   :  { %230 = vmatpush.bf16.msra.mxu0 %v1355_v28 }
  0x3d   :  { %243 = vmatpush.bf16.msra.mxu1 %v1359_v30  ;;  %v2281_v1 = vsel %vm271_vm1, %v1798_v35, %v270_v51  ;;  %vm773_vm1 = vcmask 1043456  }
  0x3f   :  { %231 = vmatmul.bf16.vlgmr.msra.gmra.mxu0 %v2253_v33 }
  0x40   :  { %244 = vmatmul.bf16.vlgmr.msra.gmra.mxu1 %v2253_v33 }
  0xbc   :  { %v2259_v38 = vpop.f32.mrf.mxu0 }
  0xbd   :  { %v252_v39 = vsel %vm251_vm0, %v2259_v38, 0.0  ;;  %v275_v41 = vmul.f32 %v2259_v38, %v2259_v38  ;;  %v2265_v42 = vpop.f32.mrf.mxu1  ;;  %v2273_v58 = vpop.f32.mrf.mxu2 }
  0xbe   :  { %v253_v43 = vrot.slane %v252_v39, 4  ;;  %v259_v44 = vsel %vm251_vm0, %v2265_v42, 0.0  ;;  %v276_v45 = vmul.f32 %v2265_v42, %v2265_v42  ;;  %v585_v61 = vsel %vm251_vm0, %v2273_v58, 0.0  ;;  %v2279_v63 = vpop.f32.mrf.mxu3 }
  0xbf   :  { %v277_v46 = vsel %vm251_vm0, %v275_v41, 0.0  ;;  %v260_v47 = vrot.slane %v259_v44, 4  ;;  %v617_v62 = vmul.f32 %v2273_v58, %v2273_v58  ;;  %v586_v4 = vrot.slane %v585_v61, 4 }
  0xc0   :  { %v254_v48 = vadd.f32 %v253_v43, %v252_v39  ;;  %v278_v49 = vrot.slane %v277_v46, 4  ;;  %v284_v50 = vsel %vm251_vm0, %v276_v45, 0.0  ;;  %v592_v9 = vsel %vm251_vm0, %v2279_v63, 0.0 }
  0xc1   :  { %v261_v52 = vadd.f32 %v260_v47, %v259_v44  ;;  %v285_v53 = vrot.slane %v284_v50, 4  ;;  %v621_v8 = vsel %vm251_vm0, %v617_v62, 0.0  ;;  %v587_v12 = vadd.f32 %v586_v4, %v585_v61 }
  0xc2   :  { %v255_v54 = vrot.slane %v254_v48, 2  ;;  %v279_v55 = vadd.f32 %v278_v49, %v277_v46  ;;  %v622_v13 = vrot.slane %v621_v8, 4  ;;  %v593_v22 = vrot.slane %v592_v9, 4 }
  0xc3   :  { %v262_v56 = vrot.slane %v261_v52, 2  ;;  %v286_v57 = vadd.f32 %v285_v53, %v284_v50  ;;  %v588_v18 = vrot.slane %v587_v12, 2  ;;  %v618_v43 = vmul.f32 %v2279_v63, %v2279_v63 }
  0xc4   :  { %v256_v59 = vadd.f32 %v255_v54, %v254_v48  ;;  %v280_v60 = vrot.slane %v279_v55, 2  ;;  %v234_v0 = vpop.f32.mrf.mxu0  ;;  %v623_v19 = vadd.f32 %v622_v13, %v621_v8  ;;  %v594_v30 = vadd.f32 %v593_v22, %v592_v9  ;;  %v250_v22 = vld [vmem:[%s2661_s3] sm:$0x3] }
  0xc5   :  { %v263_v2 = vadd.f32 %v262_v56, %v261_v52  ;;  %v287_v3 = vrot.slane %v286_v57, 2  ;;  %v247_v5 = vpop.f32.mrf.mxu1  ;;  %v589_v25 = vadd.f32 %v588_v18, %v587_v12  ;;  %v542_v27 = vpop.f32.mrf.mxu2  ;;  %v628_v49 = vsel %vm251_vm0, %v618_v43, 0.0 }
  0xc6   :  { %v257_v6 = vrot.slane %v256_v59, 1  ;;  %v281_v7 = vadd.f32 %v280_v60, %v279_v55  ;;  %v624_v26 = vrot.slane %v623_v19, 2  ;;  %v555_v31 = vpop.f32.mrf.mxu3  ;;  %v595_v39 = vrot.slane %v594_v30, 2 }
  0xc7   :  { %v264_v10 = vrot.slane %v263_v2, 1  ;;  %v288_v11 = vadd.f32 %v287_v3, %v286_v57  ;;  %v590_v35 = vrot.slane %v589_v25, 1  ;;  %v629_v53 = vrot.slane %v628_v49, 4 }
  0xc8   :  { %v258_v14 = vadd.f32 %v257_v6, %v256_v59  ;;  %v282_v15 = vrot.slane %v281_v7, 1  ;;  %v625_v37 = vadd.f32 %v624_v26, %v623_v19  ;;  %v596_v46 = vadd.f32 %v595_v39, %v594_v30 }
  0xc9   :  { %v265_v16 = vadd.f32 %v264_v10, %v263_v2  ;;  %v289_v17 = vrot.slane %v288_v11, 1  ;;  %v591_v41 = vadd.f32 %v590_v35, %v589_v25  ;;  %v630_v59 = vadd.f32 %v629_v53, %v628_v49  ;;  %v1719_v49 = vld [vmem:[%s2662_s4 + $0xec] sm:$0xf]  ;;  %v1522_v53 = vld [vmem:[%s2662_s4 + $0xc8] sm:$0xf] }
  0xca   :  { %v2287_v20 = vmul.f32 %v2281_v1, %v258_v14  ;;  %v283_v21 = vadd.f32 %v282_v15, %v281_v7  ;;  %v626_v45 = vrot.slane %v625_v37, 1  ;;  %v597_v52 = vrot.slane %v596_v46, 1 }
  0xcb   :  { %v2290_v23 = vmul.f32 %v2281_v1, %v265_v16  ;;  %v290_v24 = vadd.f32 %v289_v17, %v288_v11  ;;  %v2301_v48 = vmul.f32 %v591_v41, %v2281_v1  ;;  %v631_v61 = vrot.slane %v630_v59, 2  ;;  %v249_v16 = vld [vmem:[%s2660_s2] sm:$0x3] }
  0xcc   :  { %v291_v28 = vmul.f32 %v283_v21, %v2281_v1  ;;  %v293_v29 = vmul.f32 %v2287_v20, %v2287_v20  ;;  %v627_v51 = vadd.f32 %v626_v45, %v625_v37  ;;  %v598_v57 = vadd.f32 %v597_v52, %v596_v46  ;;  %v1540_v52 = vld [vmem:[%s2662_s4 + $0xf8] sm:$0xf0] }
  0xcd   :  { %v292_v32 = vmul.f32 %v290_v24, %v2281_v1  ;;  %v294_v34 = vmul.f32 %v2290_v23, %v2290_v23  ;;  %v653_v55 = vmul.f32 %v2301_v48, %v2301_v48  ;;  %v632_v2 = vadd.f32 %v631_v61, %v630_v59  ;;  %v1717_v59 = vld [vmem:[%s2662_s4 + $0xd4] sm:$0xf0]  ;;  %v2360_v61 = vld [vmem:[%s2663_s5] sm:$0xf] }
  0xce   :  { %v295_v36 = vsub.f32 %v291_v28, %v293_v29  ;;  %v649_v56 = vmul.f32 %v627_v51, %v2281_v1  ;;  %v2308_v0 = vmul.f32 %v598_v57, %v2281_v1  ;;  %v299_v27 = vsub.f32 %v2259_v38, %v2287_v20 }
  0xcf   :  { %v296_v40 = vsub.f32 %v292_v32, %v294_v34  ;;  %v633_v7 = vrot.slane %v632_v2, 1  ;;  %v326_v28 = vperm.slane %v249_v16, 0  ;;  %v327_v30 = vperm.slane %v249_v16, 1 }
  0xd0   :  { %v297_v44 = vmax.f32 %v295_v36, 0.0  ;;  %v657_v60 = vsub.f32 %v649_v56, %v653_v55  ;;  %v654_v11 = vmul.f32 %v2308_v0, %v2308_v0  ;;  %v300_v32 = vsub.f32 %v2265_v42, %v2290_v23  ;;  %v1538_v23 = vld [vmem:[%s2662_s4 + $0xe8] sm:$0xf]  ;;  %v1697_v55 = vld [vmem:[%s2662_s4 + $0x34] sm:$0xf0] }
  0xd1   :  { %v298_v47 = vmax.f32 %v296_v40, 0.0  ;;  %v634_v10 = vadd.f32 %v633_v7, %v632_v2  ;;  %v333_v37 = vperm.slane %v250_v22, 0  ;;  %v334_v41 = vperm.slane %v250_v22, 1 }
  0xd2   :  { %v301_v50 = vadd.f32 1e-05, %v297_v44  ;;  %v661_v62 = vmax.f32 %v657_v60, 0.0  ;;  %v1543_v57 = vor.u32 %v1719_v49, %v1540_v52  ;;  %v1715_v60 = vld [vmem:[%s2662_s4 + $0xcc] sm:$0xf] }
  0xd3   :  { %v302_v54 = vadd.f32 1e-05, %v298_v47  ;;  %v650_v14 = vmul.f32 %v634_v10, %v2281_v1  ;;  %v1721_v47 = vld [vmem:[%s2662_s4 + $0xf4] sm:$0xf0] }
  0xd4   :  { %1799 = vrsqrt.f32 %v301_v50  ;;  %v669_v4 = vadd.f32 1e-05, %v661_v62  ;;  %vm309_vm2 = vweird.f32 %v301_v50  ;;  %v1539_v51 = vor.u32 %v1721_v47, %v1538_v23  ;;  %570 = vmatpush.bf16.msrb.mxu1 %v1543_v57  ;;  %v1699_v23 = vld [vmem:[%s2662_s4 + $0x4c] sm:$0xf]  ;;  %v1460_v47 = vld [vmem:[%s2662_s4 + $0x58] sm:$0xf0] }
  0xd5   :  { %1801 = vrsqrt.f32 %v302_v54  ;;  %v658_v18 = vsub.f32 %v650_v14, %v654_v11  ;;  %vm319_vm4 = vweird.f32 %v302_v54  ;;  %v1711_v11 = vld [vmem:[%s2662_s4 + $0xac] sm:$0xf]  ;;  %v1444_v57 = vld [vmem:[%s2662_s4 + $0x38] sm:$0xf0] }
  0xd6   :  { %1803 = vrsqrt.f32 %v669_v4  ;;  %vm679_vm9 = vweird.f32 %v669_v4  ;;  %557 = vmatpush.bf16.msrb.mxu0 %v1539_v51 }
  0xd7   :  { %v662_v26 = vmax.f32 %v658_v18, 0.0 }
  0xd9   :  { %v2323_v35 = vadd.f32 1e-05, %v662_v26 }
  0xda   :  { %v1800_v3 = vpop.eup %1799 }
  0xdb   :  { %v1802_v5 = vpop.eup %1801  ;;  %v304_v6 = vmul.f32 %v1800_v3, %v301_v50  ;;  %vm310_vm3 = vweird.f32 %v1800_v3  ;;  %1805 = vrsqrt.f32 %v2323_v35  ;;  %vm689_vm12 = vweird.f32 %v2323_v35 }
  0xdc   :  { %v314_v8 = vmul.f32 %v1802_v5, %v302_v54  ;;  %v1804_v19 = vpop.eup %1803  ;;  %vm320_vm5 = vweird.f32 %v1802_v5  ;;  %vm311_vm6 = vmor %vm309_vm2, %vm310_vm3  ;;  %vm775_vm2 = vcmask 1044480   ;;  %vm777_vm3 = vcmask 1045504  }
  0xdd   :  { %v305_v9 = vmul.f32 %v1800_v3, %v304_v6  ;;  %v674_v25 = vmul.f32 %v1804_v19, %v669_v4  ;;  %vm321_vm7 = vmor %vm319_vm4, %vm320_vm5  ;;  %vm680_vm8 = vweird.f32 %v1804_v19  ;;  %v1524_v4 = vld [vmem:[%s2662_s4 + $0xd8] sm:$0xf0]  ;;  %vm779_vm4 = vcmask 1046528  }
  0xde   :  { %v315_v12 = vmul.f32 %v1802_v5, %v314_v8  ;;  %vm2346_vm10 = vmor %vm679_vm9, %vm680_vm8  ;;  %v1527_v7 = vor.u32 %v1715_v60, %v1524_v4  ;;  %v1506_v8 = vld [vmem:[%s2662_s4 + $0xa8] sm:$0xf]  ;;  %v1691_v4 = vld [vmem:[%s2662_s4 + $0xc] sm:$0xf]  ;;  %vm846_vm5 = vcmask 523264  }
  0xdf   :  { %v306_v13 = vmul.f32 0.5, %v305_v9  ;;  %v675_v34 = vmul.f32 %v1804_v19, %v674_v25  ;;  %v1713_v9 = vld [vmem:[%s2662_s4 + $0xb4] sm:$0xf0]  ;;  %v1492_v25 = vld [vmem:[%s2662_s4 + $0x98] sm:$0xf0] }
  0xe0   :  { %v316_v15 = vmul.f32 0.5, %v315_v12  ;;  %v718_v12 = vperm.slane %v2360_v61, 0  ;;  %571 = vmatpush.bf16.msrb.mxu1 %v1527_v7 }
  0xe1   :  { %v307_v17 = vsub.f32 1.5, %v306_v13  ;;  %v676_v43 = vmul.f32 0.5, %v675_v34  ;;  %v1806_v54 = vpop.eup %1805  ;;  %v2387_v13 = vld [vmem:[%s2664_s6] sm:$0xf] }
  0xe2   :  { %v317_v21 = vsub.f32 1.5, %v316_v15  ;;  %v684_v2 = vmul.f32 %v1806_v54, %v2323_v35  ;;  %v1507_v15 = vor.u32 %v1713_v9, %v1506_v8  ;;  %vm690_vm11 = vweird.f32 %v1806_v54 }
  0xe3   :  { %v308_v24 = vmul.f32 %v1800_v3, %v307_v17  ;;  %v677_v44 = vsub.f32 1.5, %v676_v43  ;;  %vm691_vm13 = vmor %vm689_vm12, %vm690_vm11  ;;  %vm868_vm12 = vcmask 64512  }
  0xe4   :  { %v318_v29 = vmul.f32 %v1802_v5, %v317_v21  ;;  %v685_v10 = vmul.f32 %v1806_v54, %v684_v2  ;;  %v1709_v21 = vld [vmem:[%s2662_s4 + $0x94] sm:$0xf0]  ;;  %v1426_v2 = vld [vmem:[%s2662_s4 + $0x8] sm:$0xf] }
  0xe5   :  { %v312_v31 = vsel %vm311_vm6, %v1800_v3, %v308_v24  ;;  %v678_v42 = vmul.f32 %v1804_v19, %v677_v44  ;;  %v1523_v3 = vor.u32 %v1717_v59, %v1522_v53  ;;  %v1707_v24 = vld [vmem:[%s2662_s4 + $0x8c] sm:$0xf]  ;;  %v1458_v44 = vld [vmem:[%s2662_s4 + $0x48] sm:$0xf]  ;;  %v1463_v53 = vor.u32 %v1699_v23, %v1460_v47 }
  0xe6   :  { %v323_v36 = vmul.f32 %v312_v31, %v299_v27  ;;  %v322_v39 = vsel %vm321_vm7, %v1802_v5, %v318_v29  ;;  %v665_v5 = vsub.f32 %v2273_v58, %v2301_v48  ;;  %v1508_v58 = vld [vmem:[%s2662_s4 + $0xb8] sm:$0xf0]  ;;  %v686_v14 = vmul.f32 0.5, %v685_v10 }
  0xe7   :  { %v324_v40 = vmul.f32 %v322_v39, %v300_v32  ;;  %v682_v62 = vsel %vm2346_vm10, %v1804_v19, %v678_v42  ;;  %558 = vmatpush.bf16.msrb.mxu0 %v1523_v3  ;;  %v1511_v18 = vor.u32 %v1711_v11, %v1508_v58  ;;  %v1490_v19 = vld [vmem:[%s2662_s4 + $0x88] sm:$0xf]  ;;  %v731_v27 = vperm.slane %v2387_v13, 0  ;;  %v1703_v39 = vld [vmem:[%s2662_s4 + $0x6c] sm:$0xf] }
  0xe8   :  { %v330_v38 = vmul.f32 %v326_v28, %v323_v36  ;;  %v713_v48 = vmul.f32 %v682_v62, %v665_v5  ;;  %v687_v22 = vsub.f32 1.5, %v686_v14  ;;  %v1491_v29 = vor.u32 %v1709_v21, %v1490_v19  ;;  %v1474_v36 = vld [vmem:[%s2662_s4 + $0x68] sm:$0xf]  ;;  %v1701_v42 = vld [vmem:[%s2662_s4 + $0x54] sm:$0xf0] }
  0xe9   :  { %v331_v20 = vmul.f32 %v327_v30, %v324_v40  ;;  %v666_v30 = vsub.f32 %v2279_v63, %v2308_v0  ;;  %v719_v31 = vperm.slane %v2360_v61, 1  ;;  %572 = vmatpush.bf16.msrb.mxu1 %v1511_v18  ;;  %v1495_v34 = vor.u32 %v1707_v24, %v1492_v25  ;;  %v1476_v63 = vld [vmem:[%s2662_s4 + $0x78] sm:$0xf0]  ;;  %v1693_v3 = vld [vmem:[%s2662_s4 + $0x14] sm:$0xf0] }
  0xea   :  { %v2326_v45 = vadd.f32 %v333_v37, %v330_v38  ;;  %v726_v26 = vmul.f32 %v718_v12, %v713_v48  ;;  %v688_v28 = vmul.f32 %v1806_v54, %v687_v22  ;;  %v1705_v37 = vld [vmem:[%s2662_s4 + $0x74] sm:$0xf0]  ;;  %v1459_v51 = vor.u32 %v1701_v42, %v1458_v44  ;;  %v1428_v5 = vld [vmem:[%s2662_s4 + $0x18] sm:$0xf0] }
  0xeb   :  { %v2328_v46 = vadd.f32 %v334_v41, %v331_v20  ;;  %559 = vmatpush.bf16.msrb.mxu0 %v1507_v15  ;;  %v732_v41 = vperm.slane %v2387_v13, 1  ;;  %v1475_v43 = vor.u32 %v1705_v37, %v1474_v36  ;;  %v1479_v20 = vor.u32 %v1703_v39, %v1476_v63 }
  0xec   :  { %v745_v50 = vrot.slane %v2326_v45, 7  ;;  %v758_v16 = vrot.slane %v2326_v45, 4  ;;  %v692_v35 = vsel %vm691_vm13, %v1806_v54, %v688_v28  ;;  %v2420_v0 = vadd.f32 %v731_v27, %v726_v26  ;;  %v1442_v54 = vld [vmem:[%s2662_s4 + $0x28] sm:$0xf] }
  0xed   :  { %v752_v56 = vrot.slane %v2328_v46, 5  ;;  %v764_v17 = vrot.slane %v2328_v46, 2  ;;  %v714_v40 = vmul.f32 %v692_v35, %v666_v30  ;;  %573 = vmatpush.bf16.msrb.mxu1 %v1495_v34  ;;  %v1443_v60 = vor.u32 %v1697_v55, %v1442_v54 }
  0xee   :  { %v1427_v8 = vor.u32 %v1693_v3, %v1426_v2  ;;  %v1431_v9 = vor.u32 %v1691_v4, %v1428_v5  ;;  %v794_v25 = vrot.slane %v2420_v0, 5  ;;  %v756_v30 = vrot.slane %v2326_v45, 5 }
  0xef   :  { %v1771_v6 = vpack.i.bf16 %v752_v56, %v745_v50  ;;  %v1776_v32 = vpack.i.bf16 %v764_v17, %v758_v16  ;;  %560 = vmatpush.bf16.msrb.mxu0 %v1491_v29  ;;  %v727_v38 = vmul.f32 %v719_v31, %v714_v40  ;;  %v783_v50 = vrot.slane %v2420_v0, 7  ;;  %v1695_v56 = vld [vmem:[%s2662_s4 + $0x2c] sm:$0xf] }
  0xf0   :  { %v1447_v62 = vor.u32 %v1695_v56, %v1444_v57  ;;  %v750_v17 = vrot.slane %v2328_v46, 6 }
  0xf1   :  { %1772 = vrot.lane.b32.xlu1 %v1771_v6, %s1952_s1  ;;  %v2436_v49 = vadd.f32 %v732_v41, %v727_v38  ;;  %574 = vmatpush.bf16.msrb.mxu1 %v1479_v20  ;;  %v796_v6 = vrot.slane %v2420_v0, 4 }
  0xf3   :  { %561 = vmatpush.bf16.msrb.mxu0 %v1475_v43  ;;  %v790_v52 = vrot.slane %v2436_v49, 5  ;;  %v802_v7 = vrot.slane %v2436_v49, 2  ;;  %v788_v14 = vrot.slane %v2436_v49, 6 }
  0xf5   :  { %v1761_v59 = vpack.i.bf16 %v790_v52, %v783_v50  ;;  %575 = vmatpush.bf16.msrb.mxu1 %v1463_v53  ;;  %v1766_v10 = vpack.i.bf16 %v802_v7, %v796_v6 }
  0xf7   :  { %562 = vmatpush.bf16.msrb.mxu0 %v1459_v51  ;;  %1762 = vrot.lane.b32.xlu0 %v1761_v59, %s1952_s1 }
  0xf9   :  { %1777 = vrot.lane.b32.xlu1 %v1776_v32, %s1952_s1  ;;  %576 = vmatpush.bf16.msrb.mxu1 %v1447_v62  ;;  %v800_v32 = vrot.slane %v2436_v49, 3 }
  0xfb   :  { %563 = vmatpush.bf16.msrb.mxu0 %v1443_v60 }
  0xfd   :  { %577 = vmatpush.bf16.msrb.mxu1 %v1431_v9 }
  0xff   :  { %564 = vmatpush.bf16.msrb.mxu0 %v1427_v8  ;;  %1767 = vrot.lane.b32.xlu0 %v1766_v10, %s1952_s1 }
 0x100   :  { %578 = vmatmul.bf16.vlgmr.msrb.gmra.mxu1 %v2253_v33 }
 0x102   :  { %565 = vmatmul.bf16.vlgmr.msrb.gmra.mxu0 %v2253_v33 }
 0x163   :  { %v1773_v11 = vpop.permute.xlu1 %1772 }
 0x164   :  { %v1774_v58 = vunpack.i.l.bf16 %v1773_v11  ;;  %v1775_v22 = vunpack.i.h.bf16 %v1773_v11 }
 0x166   :  { %v769_v15 = vsel %vm768_vm14, %v2326_v45, %v1774_v58  ;;  %v762_v45 = vrot.slane %v2328_v46, 3 }
 0x167   :  { %v770_v33 = vsel %vm251_vm0, %v769_v15, %v750_v17 }
 0x168   :  { %v772_v27 = vsel %vm771_vm15, %v770_v33, %v1775_v22 }
 0x169   :  { %v1763_v48 = vpop.permute.xlu0 %1762  ;;  %v774_v37 = vsel %vm773_vm1, %v772_v27, %v756_v30 }
 0x16a   :  { %v1764_v12 = vunpack.i.l.bf16 %v1763_v48  ;;  %v1765_v19 = vunpack.i.h.bf16 %v1763_v48 }
 0x16b   :  { %v1778_v21 = vpop.permute.xlu1 %1777 }
 0x16c   :  { %v806_v16 = vsel %vm768_vm14, %v2420_v0, %v1764_v12  ;;  %v1779_v28 = vunpack.i.l.bf16 %v1778_v21  ;;  %v1780_v43 = vunpack.i.h.bf16 %v1778_v21 }
 0x16d   :  { %v807_v18 = vsel %vm251_vm0, %v806_v16, %v788_v14 }
 0x16e   :  { %v808_v24 = vsel %vm771_vm15, %v807_v18, %v1765_v19  ;;  %v776_v39 = vsel %vm775_vm2, %v774_v37, %v1779_v28 }
 0x16f   :  { %v809_v31 = vsel %vm773_vm1, %v808_v24, %v794_v25  ;;  %v778_v40 = vsel %vm777_vm3, %v776_v39, %v762_v45 }
 0x170   :  { %v780_v38 = vsel %vm779_vm4, %v778_v40, %v1780_v43 }
 0x171   :  { %v1768_v26 = vpop.permute.xlu0 %1767  ;;  %v781_v44 = vpack.c.bf16 %v780_v38, %v780_v38 }
 0x172   :  { %v1769_v29 = vunpack.i.l.bf16 %v1768_v26  ;;  %v1770_v34 = vunpack.i.h.bf16 %v1768_v26 }
 0x174   :  { %v810_v36 = vsel %vm775_vm2, %v809_v31, %v1769_v29 }
 0x175   :  { %v811_v35 = vsel %vm777_vm3, %v810_v36, %v800_v32 }
 0x176   :  { %v812_v63 = vsel %vm779_vm4, %v811_v35, %v1770_v34 }
 0x177   :  { %v813_v0 = vpack.c.bf16 %v812_v63, %v812_v63 }
 0x179   :  { %v851_v41 = vsel %vm846_vm5, %v813_v0, 0 }
 0x17a   :  { %860 = vmatpush.bf16.xpose.msrb.mxu2 %v851_v41 }
 0x17d   :  { %v2496_v23 = vpop.f32.mrf.mxu1 }
 0x17e   :  { %v606_v49 = vsel %vm251_vm0, %v2496_v23, 0.0  ;;  %v620_v50 = vmul.f32 %v2496_v23, %v2496_v23 }
 0x17f   :  { %v2493_v20 = vpop.f32.mrf.mxu0  ;;  %v607_v53 = vrot.slane %v606_v49, 4 }
 0x180   :  { %v599_v46 = vsel %vm251_vm0, %v2493_v20, 0.0  ;;  %v619_v47 = vmul.f32 %v2493_v20, %v2493_v20  ;;  %v642_v55 = vsel %vm251_vm0, %v620_v50, 0.0  ;;  %v721_v50 = vperm.slane %v2360_v61, 3 }
 0x181   :  { %1544 = vmatmul.msk.bf16.vlgmr.msrb.gmra.mxu2 %vm846_vm5, %v781_v44  ;;  %v600_v51 = vrot.slane %v599_v46, 4  ;;  %v608_v59 = vadd.f32 %v607_v53, %v606_v49  ;;  %v643_v60 = vrot.slane %v642_v55, 4 }
 0x182   :  { %v635_v52 = vsel %vm251_vm0, %v619_v47, 0.0  ;;  %v720_v47 = vperm.slane %v2360_v61, 2 }
 0x183   :  { %v601_v56 = vadd.f32 %v600_v51, %v599_v46  ;;  %v636_v57 = vrot.slane %v635_v52, 4  ;;  %v609_v3 = vrot.slane %v608_v59, 2  ;;  %v644_v4 = vadd.f32 %v643_v60, %v642_v55  ;;  %v743_v60 = vld [vmem:[%s2665_s7] sm:$0xff] }
 0x185   :  { %v581_v54 = vpop.f32.mrf.mxu1  ;;  %v602_v62 = vrot.slane %v601_v56, 2  ;;  %v637_v2 = vadd.f32 %v636_v57, %v635_v52  ;;  %v610_v7 = vadd.f32 %v609_v3, %v608_v59  ;;  %v645_v8 = vrot.slane %v644_v4, 2 }
 0x186   :  { %v733_v52 = vperm.slane %v2387_v13, 2  ;;  %v734_v54 = vperm.slane %v2387_v13, 3 }
 0x187   :  { %v568_v42 = vpop.f32.mrf.mxu0  ;;  %v603_v5 = vadd.f32 %v602_v62, %v601_v56  ;;  %v638_v6 = vrot.slane %v637_v2, 2  ;;  %v611_v11 = vrot.slane %v610_v7, 1  ;;  %v646_v58 = vadd.f32 %v645_v8, %v644_v4 }
 0x189   :  { %v604_v9 = vrot.slane %v603_v5, 1  ;;  %v639_v10 = vadd.f32 %v638_v6, %v637_v2  ;;  %v612_v14 = vadd.f32 %v611_v11, %v610_v7  ;;  %v647_v15 = vrot.slane %v646_v58, 1 }
 0x18b   :  { %v605_v48 = vadd.f32 %v604_v9, %v603_v5  ;;  %v640_v12 = vrot.slane %v639_v10, 1  ;;  %v616_v18 = vmul.f32 %v612_v14, %v2281_v1  ;;  %v648_v19 = vadd.f32 %v647_v15, %v646_v58 }
 0x18d   :  { %v615_v16 = vmul.f32 %v605_v48, %v2281_v1  ;;  %v641_v17 = vadd.f32 %v640_v12, %v639_v10  ;;  %v652_v22 = vmul.f32 %v648_v19, %v2281_v1  ;;  %v656_v24 = vmul.f32 %v616_v18, %v616_v18 }
 0x18e   :  { %v668_v38 = vsub.f32 %v2496_v23, %v616_v18 }
 0x18f   :  { %v651_v33 = vmul.f32 %v641_v17, %v2281_v1  ;;  %v655_v21 = vmul.f32 %v615_v16, %v615_v16  ;;  %v660_v26 = vsub.f32 %v652_v22, %v656_v24  ;;  %v667_v43 = vsub.f32 %v2493_v20, %v615_v16 }
 0x191   :  { %v659_v25 = vsub.f32 %v651_v33, %v655_v21  ;;  %v664_v28 = vmax.f32 %v660_v26, 0.0 }
 0x193   :  { %v663_v27 = vmax.f32 %v659_v25, 0.0  ;;  %v672_v30 = vadd.f32 1e-05, %v664_v28 }
 0x195   :  { %v671_v29 = vadd.f32 1e-05, %v663_v27  ;;  %vm709_vm8 = vweird.f32 %v672_v30 }
 0x197   :  { %1807 = vrsqrt.f32 %v671_v29  ;;  %vm699_vm6 = vweird.f32 %v671_v29 }
 0x198   :  { %1809 = vrsqrt.f32 %v672_v30 }
 0x19d   :  { %v1808_v31 = vpop.eup %1807 }
 0x19e   :  { %v1810_v32 = vpop.eup %1809  ;;  %v694_v34 = vmul.f32 %v1808_v31, %v671_v29  ;;  %vm700_vm7 = vweird.f32 %v1808_v31 }
 0x19f   :  { %v704_v36 = vmul.f32 %v1810_v32, %v672_v30  ;;  %vm710_vm9 = vweird.f32 %v1810_v32  ;;  %vm701_vm10 = vmor %vm699_vm6, %vm700_vm7 }
 0x1a0   :  { %v695_v37 = vmul.f32 %v1808_v31, %v694_v34  ;;  %vm711_vm11 = vmor %vm709_vm8, %vm710_vm9  ;;  %v1729_v34 = vld [vmem:[%s2666_s8 + $0x38] sm:$0xff] }
 0x1a1   :  { %v705_v35 = vmul.f32 %v1810_v32, %v704_v36  ;;  %v1737_v36 = vld [vmem:[%s2666_s8 + $0x78] sm:$0xff]  ;;  %1065 = vmatpush.bf16.msra.mxu2 %v1729_v34 }
 0x1a2   :  { %v696_v39 = vmul.f32 0.5, %v695_v37  ;;  %v1728_v37 = vld [vmem:[%s2666_s8 + $0x30] sm:$0xff] }
 0x1a3   :  { %v706_v63 = vmul.f32 0.5, %v705_v35  ;;  %v1736_v35 = vld [vmem:[%s2666_s8 + $0x70] sm:$0xff] }
 0x1a4   :  { %v697_v45 = vsub.f32 1.5, %v696_v39  ;;  %v1727_v39 = vld [vmem:[%s2666_s8 + $0x28] sm:$0xff] }
 0x1a5   :  { %v707_v0 = vsub.f32 1.5, %v706_v63  ;;  %1066 = vmatpush.bf16.msra.mxu2 %v1728_v37  ;;  %v1726_v63 = vld [vmem:[%s2666_s8 + $0x20] sm:$0xff] }
 0x1a6   :  { %v698_v40 = vmul.f32 %v1808_v31, %v697_v45 }
 0x1a7   :  { %v708_v41 = vmul.f32 %v1810_v32, %v707_v0 }
 0x1a8   :  { %v702_v44 = vsel %vm701_vm10, %v1808_v31, %v698_v40 }
 0x1a9   :  { %v712_v42 = vsel %vm711_vm11, %v1810_v32, %v708_v41  ;;  %v715_v46 = vmul.f32 %v702_v44, %v667_v43  ;;  %1067 = vmatpush.bf16.msra.mxu2 %v1727_v39  ;;  %v1725_v43 = vld [vmem:[%s2666_s8 + $0x18] sm:$0xff]  ;;  %v1724_v44 = vld [vmem:[%s2666_s8 + $0x10] sm:$0xff] }
 0x1aa   :  { %v716_v49 = vmul.f32 %v712_v42, %v668_v38  ;;  %v1735_v38 = vld [vmem:[%s2666_s8 + $0x68] sm:$0xff]  ;;  %v1734_v42 = vld [vmem:[%s2666_s8 + $0x60] sm:$0xff] }
 0x1ab   :  { %v728_v51 = vmul.f32 %v720_v47, %v715_v46  ;;  %v1723_v46 = vld [vmem:[%s2666_s8 + $0x8] sm:$0xff]  ;;  %v1733_v47 = vld [vmem:[%s2666_s8 + $0x58] sm:$0xff] }
 0x1ac   :  { %v729_v53 = vmul.f32 %v721_v50, %v716_v49  ;;  %v1722_v49 = vld [vmem:[%s2666_s8] sm:$0xff]  ;;  %v1732_v50 = vld [vmem:[%s2666_s8 + $0x50] sm:$0xff] }
 0x1ad   :  { %v741_v55 = vadd.f32 %v733_v52, %v728_v51  ;;  %1068 = vmatpush.bf16.msra.mxu2 %v1726_v63  ;;  %v1731_v51 = vld [vmem:[%s2666_s8 + $0x48] sm:$0xff]  ;;  %v1730_v52 = vld [vmem:[%s2666_s8 + $0x40] sm:$0xff] }
 0x1ae   :  { %v742_v56 = vadd.f32 %v734_v54, %v729_v53 }
 0x1af   :  { %v828_v57 = vrot.slane %v741_v55, 4  ;;  %v815_v13 = vrot.slane %v741_v55, 7  ;;  %v826_v16 = vrot.slane %v741_v55, 5 }
 0x1b0   :  { %v834_v20 = vrot.slane %v742_v56, 2  ;;  %v822_v4 = vrot.slane %v742_v56, 5  ;;  %v820_v48 = vrot.slane %v742_v56, 6  ;;  %v832_v22 = vrot.slane %v742_v56, 3 }
 0x1b1   :  { %1069 = vmatpush.bf16.msra.mxu2 %v1725_v43 }
 0x1b2   :  { %v1786_v59 = vpack.i.bf16 %v834_v20, %v828_v57  ;;  %v1781_v5 = vpack.i.bf16 %v822_v4, %v815_v13 }
 0x1b4   :  { %1787 = vrot.lane.b32.xlu1 %v1786_v59, %s1952_s1 }
 0x1b5   :  { %1070 = vmatpush.bf16.msra.mxu2 %v1724_v44 }
 0x1b9   :  { %1071 = vmatpush.bf16.msra.mxu2 %v1723_v46 }
 0x1bd   :  { %1072 = vmatpush.bf16.msra.mxu2 %v1722_v49 }
 0x204   :  { %v862_v23 = vpop.f32.mrf.mxu2 }
 0x205   :  { %v866_v62 = vmul.f32 0.125, %v862_v23 }
 0x207   :  { %v867_v61 = vadd.f32 %v866_v62, %v743_v60 }
 0x209   :  { %v869_v2 = vsel %vm868_vm12, %v867_v61, -inf }
 0x20a   :  { %870 = vmax.xlane.f32.xlu2 %v869_v2 }
 0x20c   :  { %v864_v3 = vpop.f32.mrf.mxu2 }
 0x222   :  { %1782 = vrot.lane.b32.xlu2 %v1781_v5, %s1952_s1 }
 0x226   :  { %v1788_v10 = vpop.permute.xlu1 %1787 }
 0x227   :  { %v1789_v15 = vunpack.i.l.bf16 %v1788_v10  ;;  %v1790_v33 = vunpack.i.h.bf16 %v1788_v10 }
 0x27d   :  { %v871_v6 = vpop.xlane.xlu2 %870 }
 0x27e   :  { %v872_v7 = vsub.f32 %v867_v61, %v871_v6 }
 0x280   :  { %v873_v8 = vmul.f32 1.442695, %v872_v7 }
 0x282   :  { %1811 = vpow2.f32 %v873_v8 }
 0x285   :  { %v1783_v9 = vpop.permute.xlu2 %1782 }
 0x286   :  { %v1785_v11 = vunpack.i.h.bf16 %v1783_v9  ;;  %v1784_v58 = vunpack.i.l.bf16 %v1783_v9 }
 0x288   :  { %v1812_v12 = vpop.eup %1811  ;;  %v838_v14 = vsel %vm768_vm14, %v741_v55, %v1784_v58 }
 0x289   :  { %v839_v17 = vsel %vm251_vm0, %v838_v14, %v820_v48  ;;  %v875_v18 = vsel %vm868_vm12, %v1812_v12, 0.0  ;;  %v1744_v48 = vld [vmem:[%s2670_s12 + $0x30] sm:$0xff]  ;;  %v1743_v14 = vld [vmem:[%s2670_s12 + $0x28] sm:$0xff] }
 0x28a   :  { %v840_v19 = vsel %vm771_vm15, %v839_v17, %v1785_v11  ;;  %876 = vadd.xlane.f32.xlu0 %v875_v18  ;;  %v1745_v11 = vld [vmem:[%s2670_s12 + $0x38] sm:$0xff] }
 0x28b   :  { %v841_v21 = vsel %vm773_vm1, %v840_v19, %v826_v16  ;;  %1200 = vmatpush.bf16.msra.mxu0 %v1745_v11  ;;  %v1742_v19 = vld [vmem:[%s2670_s12 + $0x20] sm:$0xff] }
 0x28c   :  { %v842_v24 = vsel %vm775_vm2, %v841_v21, %v1789_v15 }
 0x28d   :  { %v843_v25 = vsel %vm777_vm3, %v842_v24, %v832_v22 }
 0x28e   :  { %v844_v26 = vsel %vm779_vm4, %v843_v25, %v1790_v33  ;;  %v1741_v25 = vld [vmem:[%s2670_s12 + $0x18] sm:$0xff] }
 0x28f   :  { %v845_v27 = vpack.c.bf16 %v844_v26, %v844_v26  ;;  %1201 = vmatpush.bf16.msra.mxu0 %v1744_v48 }
 0x291   :  { %v885_v28 = vsel %vm773_vm1, %v845_v27, 0 }
 0x292   :  { %894 = vmatpush.bf16.msrb.mxu3 %v885_v28 }
 0x293   :  { %1202 = vmatpush.bf16.msra.mxu0 %v1743_v14 }
 0x296   :  { %1078 = vmatpush.bf16.msra.mxu3 %v1737_v36 }
 0x297   :  { %1203 = vmatpush.bf16.msra.mxu0 %v1742_v19 }
 0x29a   :  { %1079 = vmatpush.bf16.msra.mxu3 %v1736_v35  ;;  %v1739_v35 = vld [vmem:[%s2670_s12 + $0x8] sm:$0xff] }
 0x29b   :  { %1204 = vmatpush.bf16.msra.mxu0 %v1741_v25 }
 0x29e   :  { %1080 = vmatpush.bf16.msra.mxu3 %v1735_v38 }
 0x2a2   :  { %1081 = vmatpush.bf16.msra.mxu3 %v1734_v42 }
 0x2a6   :  { %1082 = vmatpush.bf16.msra.mxu3 %v1733_v47 }
 0x2aa   :  { %1083 = vmatpush.bf16.msra.mxu3 %v1732_v50 }
 0x2ae   :  { %1084 = vmatpush.bf16.msra.mxu3 %v1731_v51 }
 0x2b2   :  { %1085 = vmatpush.bf16.msra.mxu3 %v1730_v52 }
 0x2fd   :  { %v877_v29 = vpop.xlane.xlu0 %876 }
 0x2fe   :  { %1813 = vrcp.f32 %v877_v29 }
 0x304   :  { %v1814_v30 = vpop.eup %1813 }
 0x305   :  { %v879_v31 = vmul.f32 %v1814_v30, %v1812_v12  ;;  %v1791_v12 = vld [vmem:[%s2667_s9] ss:$0 sm:$0xff] }
 0x307   :  { %v880_v32 = vpack.c.bf16 %v879_v31, %v879_v31  ;;  %v1740_v31 = vld [vmem:[%s2670_s12 + $0x10] sm:$0xff] }
 0x308   :  { %1205 = vmatpush.bf16.msra.mxu0 %v1740_v31 }
 0x309   :  { %1545 = vmatmul.msk.bf16.vlgmr.msrb.gmra.mxu3 %vm868_vm12, %v880_v32 }
 0x30c   :  { %1206 = vmatpush.bf16.msra.mxu0 %v1739_v35 }
 0x38c   :  { %v896_v45 = vpop.f32.mrf.mxu3 }
 0x38d   :  { %v901_v0 = vrot.slane %v896_v45, 1  ;;  %v907_v41 = vrot.slane %v896_v45, 3  ;;  %v905_v20 = vrot.slane %v896_v45, 2 }
 0x38f   :  { %902 = vrot.lane.b32.xlu1 %v901_v0, %s1952_s1 }
 0x394   :  { %v898_v40 = vpop.f32.mrf.mxu3 }
 0x395   :  { %v1738_v40 = vld [vmem:[%s2670_s12] sm:$0xff] }
 0x396   :  { %1207 = vmatpush.bf16.msra.mxu0 %v1738_v40 }
 0x397   :  { %908 = vrot.lane.b32.xlu1 %v907_v41, %s1952_s1 }
 0x401   :  { %v903_v53 = vpop.permute.xlu1 %902 }
 0x402   :  { %v911_v54 = vsel %vm846_vm5, %v896_v45, %v903_v53 }
 0x403   :  { %v915_v55 = vrot.slane %v911_v54, 3 }
 0x405   :  { %v919_v56 = vsel %vm768_vm14, %v911_v54, %v915_v55  ;;  %v1792_v54 = vld [vmem:[#allocation2] ss:$0 sm:$0xff] }
 0x406   :  { %v921_v57 = vadd.f32 3.0, %v919_v56 }
 0x408   :  { %v923_v59 = vmax.f32 %v921_v57, 0.0  ;;  %v1793_v57 = vld [vmem:[#allocation4] ss:$0 sm:$0xff] }
 0x409   :  { %v909_v23 = vpop.permute.xlu1 %908 }
 0x40a   :  { %v925_v60 = vmin.f32 %v923_v59, 6.0  ;;  %v912_v62 = vsel %vm846_vm5, %v905_v20, %v909_v23  ;;  %v1819_v23 = vld [vmem:[%s2681_s28] sm:$0x3] }
 0x40b   :  { %v916_v61 = vrot.slane %v912_v62, 3 }
 0x40c   :  { %v927_v2 = vmul.f32 %v925_v60, %v919_v56 }
 0x40d   :  { %v920_v3 = vsel %vm768_vm14, %v912_v62, %v916_v61  ;;  %v1753_v61 = vld [vmem:[%s2673_s15 + $0x38] sm:$0xff] }
 0x40e   :  { %v929_v13 = vmul.f32 0.16666667, %v927_v2  ;;  %v922_v4 = vadd.f32 3.0, %v920_v3  ;;  %1330 = vmatpush.bf16.msra.mxu1 %v1753_v61  ;;  %v1752_v2 = vld [vmem:[%s2673_s15 + $0x30] sm:$0xff] }
 0x410   :  { %v931_v5 = vpack.c.bf16 %v929_v13, %v929_v13  ;;  %v924_v6 = vmax.f32 %v922_v4, 0.0 }
 0x412   :  { %v926_v7 = vmin.f32 %v924_v6, 6.0  ;;  %1073 = vmatmul.bf16.vlgmr.msra.gmra.mxu2 %v931_v5  ;;  %1331 = vmatpush.bf16.msra.mxu1 %v1752_v2 }
 0x414   :  { %v928_v8 = vmul.f32 %v926_v7, %v920_v3  ;;  %v1751_v7 = vld [vmem:[%s2673_s15 + $0x28] sm:$0xff] }
 0x416   :  { %v930_v9 = vmul.f32 0.16666667, %v928_v8  ;;  %1332 = vmatpush.bf16.msra.mxu1 %v1751_v7 }
 0x418   :  { %v932_v10 = vpack.c.bf16 %v930_v9, %v930_v9 }
 0x41a   :  { %1086 = vmatmul.bf16.vlgmr.msra.gmra.mxu3 %v932_v10 }
 0x495   :  { %v1074_v58 = vpop.f32.mrf.mxu2 }
 0x496   :  { %v1075_v15 = vadd.f32 %v1791_v12, %v1074_v58  ;;  %v1750_v58 = vld [vmem:[%s2673_s15 + $0x20] sm:$0xff] }
 0x497   :  { %1333 = vmatpush.bf16.msra.mxu1 %v1750_v58 }
 0x49d   :  { %v1076_v16 = vpop.f32.mrf.mxu2  ;;  %v1087_v17 = vpop.f32.mrf.mxu3 }
 0x49e   :  { %v1088_v18 = vadd.f32 %v1087_v17, %v1075_v15  ;;  %v1749_v17 = vld [vmem:[%s2673_s15 + $0x18] sm:$0xff] }
 0x49f   :  { %1334 = vmatpush.bf16.msra.mxu1 %v1749_v17 }
 0x4a0   :  { %v1093_v33 = vsel %vm251_vm0, %v1088_v18, 0.0  ;;  %v1101_v21 = vmul.f32 %v1088_v18, %v1088_v18 }
 0x4a1   :  { %v1094_v22 = vrot.slane %v1093_v33, 4 }
 0x4a2   :  { %v1102_v24 = vsel %vm251_vm0, %v1101_v21, 0.0 }
 0x4a3   :  { %v1095_v26 = vadd.f32 %v1094_v22, %v1093_v33  ;;  %v1103_v27 = vrot.slane %v1102_v24, 4  ;;  %v1748_v22 = vld [vmem:[%s2673_s15 + $0x10] sm:$0xff] }
 0x4a4   :  { %1335 = vmatpush.bf16.msra.mxu1 %v1748_v22 }
 0x4a5   :  { %v1096_v28 = vrot.slane %v1095_v26, 2  ;;  %v1104_v29 = vadd.f32 %v1103_v27, %v1102_v24  ;;  %v1089_v30 = vpop.f32.mrf.mxu3 }
 0x4a7   :  { %v1097_v32 = vadd.f32 %v1096_v28, %v1095_v26  ;;  %v1105_v34 = vrot.slane %v1104_v29, 2  ;;  %v1747_v26 = vld [vmem:[%s2673_s15 + $0x8] sm:$0xff] }
 0x4a8   :  { %1336 = vmatpush.bf16.msra.mxu1 %v1747_v26 }
 0x4a9   :  { %v1098_v36 = vrot.slane %v1097_v32, 1  ;;  %v1106_v37 = vadd.f32 %v1105_v34, %v1104_v29  ;;  %v1746_v29 = vld [vmem:[%s2673_s15] sm:$0xff] }
 0x4ab   :  { %v1099_v39 = vadd.f32 %v1098_v36, %v1097_v32  ;;  %v1107_v63 = vrot.slane %v1106_v37, 1 }
 0x4ac   :  { %1337 = vmatpush.bf16.msra.mxu1 %v1746_v29 }
 0x4ad   :  { %v1100_v45 = vmul.f32 %v1099_v39, %v2281_v1  ;;  %v1108_v0 = vadd.f32 %v1107_v63, %v1106_v37  ;;  %v1794_v39 = vld [vmem:[#allocation6] ss:$0 sm:$0xff] }
 0x4af   :  { %v1109_v41 = vmul.f32 %v1108_v0, %v2281_v1  ;;  %v1110_v43 = vmul.f32 %v1100_v45, %v1100_v45  ;;  %v1113_v53 = vsub.f32 %v1088_v18, %v1100_v45  ;;  %v1795_v0 = vld [vmem:[#allocation7] ss:$0 sm:$0xff] }
 0x4b1   :  { %v1111_v38 = vsub.f32 %v1109_v41, %v1110_v43 }
 0x4b3   :  { %v1112_v44 = vmax.f32 %v1111_v38, 0.0 }
 0x4b5   :  { %v1114_v42 = vadd.f32 1e-05, %v1112_v44 }
 0x4b7   :  { %1815 = vrsqrt.f32 %v1114_v42  ;;  %vm1121_vm14 = vweird.f32 %v1114_v42 }
 0x4bd   :  { %v1816_v46 = vpop.eup %1815 }
 0x4be   :  { %v1116_v47 = vmul.f32 %v1816_v46, %v1114_v42  ;;  %vm1122_vm13 = vweird.f32 %v1816_v46 }
 0x4bf   :  { %vm1123_vm15 = vmor %vm1121_vm14, %vm1122_vm13 }
 0x4c0   :  { %v1117_v49 = vmul.f32 %v1816_v46, %v1116_v47 }
 0x4c2   :  { %v1118_v50 = vmul.f32 0.5, %v1117_v49  ;;  %v1796_v49 = vld [vmem:[#allocation9] ss:$0 sm:$0xff] }
 0x4c4   :  { %v1119_v51 = vsub.f32 1.5, %v1118_v50 }
 0x4c6   :  { %v1120_v52 = vmul.f32 %v1816_v46, %v1119_v51 }
 0x4c8   :  { %v1124_v55 = vsel %vm1123_vm15, %v1816_v46, %v1120_v52 }
 0x4c9   :  { %v1125_v56 = vmul.f32 %v1124_v55, %v1113_v53 }
 0x4cb   :  { %v1129_v20 = vmul.f32 %v1792_v54, %v1125_v56 }
 0x4cd   :  { %v1133_v59 = vadd.f32 %v1793_v57, %v1129_v20 }
 0x4cf   :  { %v2622_v60 = vadd.f32 %v1819_v23, %v1133_v59 }
 0x4d1   :  { %v1135_v62 = vpack.c.bf16 %v2622_v60, %v2622_v60 }
 0x4d3   :  { %1208 = vmatmul.bf16.vlgmr.msra.gmra.mxu0 %v1135_v62 }
 0x550   :  { %v1209_v3 = vpop.f32.mrf.mxu0 }
 0x551   :  { %v1215_v13 = vsel %vm251_vm0, %v1209_v3, 0.0  ;;  %v1223_v4 = vmul.f32 %v1209_v3, %v1209_v3 }
 0x552   :  { %v1216_v5 = vrot.slane %v1215_v13, 4 }
 0x553   :  { %v1224_v6 = vsel %vm251_vm0, %v1223_v4, 0.0 }
 0x554   :  { %v1217_v8 = vadd.f32 %v1216_v5, %v1215_v13  ;;  %v1225_v9 = vrot.slane %v1224_v6, 4 }
 0x556   :  { %v1218_v10 = vrot.slane %v1217_v8, 2  ;;  %v1226_v11 = vadd.f32 %v1225_v9, %v1224_v6 }
 0x558   :  { %v1219_v48 = vadd.f32 %v1218_v10, %v1217_v8  ;;  %v1227_v12 = vrot.slane %v1226_v11, 2  ;;  %v1211_v14 = vpop.f32.mrf.mxu0 }
 0x55a   :  { %v1220_v15 = vrot.slane %v1219_v48, 1  ;;  %v1228_v16 = vadd.f32 %v1227_v12, %v1226_v11 }
 0x55c   :  { %v1221_v18 = vadd.f32 %v1220_v15, %v1219_v48  ;;  %v1229_v19 = vrot.slane %v1228_v16, 1 }
 0x55e   :  { %v1222_v33 = vmul.f32 %v1221_v18, %v2281_v1  ;;  %v1230_v21 = vadd.f32 %v1229_v19, %v1228_v16 }
 0x560   :  { %v1231_v24 = vmul.f32 %v1230_v21, %v2281_v1  ;;  %v1232_v25 = vmul.f32 %v1222_v33, %v1222_v33  ;;  %v1235_v35 = vsub.f32 %v1209_v3, %v1222_v33 }
 0x562   :  { %v1233_v27 = vsub.f32 %v1231_v24, %v1232_v25 }
 0x564   :  { %v1234_v28 = vmax.f32 %v1233_v27, 0.0 }
 0x566   :  { %v1236_v30 = vadd.f32 1e-05, %v1234_v28 }
 0x568   :  { %1817 = vrsqrt.f32 %v1236_v30  ;;  %vm1243_vm1 = vweird.f32 %v1236_v30 }
 0x56e   :  { %v1818_v31 = vpop.eup %1817 }
 0x56f   :  { %v1238_v32 = vmul.f32 %v1818_v31, %v1236_v30  ;;  %vm1244_vm0 = vweird.f32 %v1818_v31 }
 0x570   :  { %vm1245_vm2 = vmor %vm1243_vm1, %vm1244_vm0 }
 0x571   :  { %v1239_v34 = vmul.f32 %v1818_v31, %v1238_v32 }
 0x573   :  { %v1240_v1 = vmul.f32 0.5, %v1239_v34 }
 0x575   :  { %v1241_v36 = vsub.f32 1.5, %v1240_v1 }
 0x577   :  { %v1242_v37 = vmul.f32 %v1818_v31, %v1241_v36 }
 0x579   :  { %v1246_v63 = vsel %vm1245_vm2, %v1818_v31, %v1242_v37 }
 0x57a   :  { %v1247_v45 = vmul.f32 %v1246_v63, %v1235_v35 }
 0x57c   :  { %v1251_v40 = vmul.f32 %v1794_v39, %v1247_v45 }
 0x57e   :  { %v1255_v41 = vadd.f32 %v1795_v0, %v1251_v40 }
 0x580   :  { %v1256_v43 = vadd.f32 3.0, %v1255_v41 }
 0x582   :  { %v1257_v38 = vmax.f32 %v1256_v43, 0.0 }
 0x584   :  { %v1258_v44 = vmin.f32 %v1257_v38, 6.0 }
 0x586   :  { %v1259_v42 = vmul.f32 %v1258_v44, %v1255_v41 }
 0x588   :  { %v1260_v46 = vmul.f32 0.16666667, %v1259_v42 }
 0x58a   :  { %v1261_v47 = vpack.c.bf16 %v1260_v46, %v1260_v46 }
 0x58c   :  { %1338 = vmatmul.bf16.vlgmr.msra.gmra.mxu1 %v1261_v47 }
 0x609   :  { %v1339_v50 = vpop.f32.mrf.mxu1 }
 0x60a   :  { %v1340_v51 = vadd.f32 %v1796_v49, %v1339_v50 }
 0x60c   :  { %v1343_v52 = vadd.f32 %v1340_v51, %v2622_v60 }
 0x60e   :  { %1344 = vst [vmem:[%s2675_s17] sm:$0x3] %v1343_v52 }
 0x611   :  { %v1341_v53 = vpop.f32.mrf.mxu1 }
 0x612   :  { %1349 = vsyncpa [#allocation3], 1 }
 0x613   :  { %1350 = vsyncpa [#allocation5], 1 }
 0x614   :  { %1351 = vsyncpa [#allocation8], 1 }

// kernel: _lambda_.15
= control target key start
LH: loop header
LB: loop body
LE: loop exit
PB: predicated region body
PF: predicated region fallthrough
CT: control target
= control target key end

     0   :  { %s2631_s0 = inlined_call_operand.vmem [shape: f32[8,128], index: 0, kind: input, shape index: {}]   ;;  %s2632_s1 = inlined_call_operand.vmem [shape: bf16[128,256], index: 1, kind: input, shape index: {}]   ;;  %s2633_s2 = inlined_call_operand.vmem [shape: f32[1,256], index: 2, kind: input, shape index: {}]   ;;  %s2634_s3 = inlined_call_operand.vmem [shape: f32[1,256], index: 3, kind: input, shape index: {}]   ;;  %s2635_s4 = inlined_call_operand.vmem [shape: bf16[128,512], index: 4, kind: input, shape index: {}]   ;;  %s2636_s5 = inlined_call_operand.vmem [shape: f32[1,512], index: 5, kind: input, shape index: {}]   ;;  %s2637_s6 = inlined_call_operand.vmem [shape: f32[1,512], index: 6, kind: input, shape index: {}]   ;;  %s2638_s7 = inlined_call_operand.vmem [shape: f32[32,32], index: 7, kind: input, shape index: {}]   ;;  %s2639_s8 = inlined_call_operand.vmem [shape: bf16[256,128], index: 8, kind: input, shape index: {}]   ;;  %s2640_s9 = inlined_call_operand.vmem [shape: f32[1,128], index: 9, kind: input, shape index: {}]   ;;  %s2641_s10 = inlined_call_operand.vmem [shape: f32[1,128], index: 10, kind: input, shape index: {}]   ;;  %s2642_s11 = inlined_call_operand.vmem [shape: f32[1,128], index: 11, kind: input, shape index: {}]   ;;  %s2643_s12 = inlined_call_operand.vmem [shape: bf16[128,128], index: 12, kind: input, shape index: {}]   ;;  %s2644_s13 = inlined_call_operand.hbm [shape: f32[1,128], index: 13, kind: input, shape index: {}]   ;;  %s2645_s14 = inlined_call_operand.hbm [shape: f32[1,128], index: 14, kind: input, shape index: {}]   ;;  %s2646_s15 = inlined_call_operand.vmem [shape: bf16[128,128], index: 15, kind: input, shape index: {}]   ;;  %s2647_s16 = inlined_call_operand.hbm [shape: f32[1,128], index: 16, kind: input, shape index: {}]   ;;  %s2648_s17 = inlined_call_operand.vmem [shape: f32[8,128], index: 17, kind: output, shape index: {}]  }
   0x1   :  { %2651 = sst [smem:[#allocation9_spill]] %s2631_s0 }
   0x2   :  { %2652 = sst [smem:[#allocation10_spill]] %s2632_s1 }
   0x3   :  { %22 = vsyncpa [#allocation3], 0 }
   0x4   :  { %23 = vsyncpa [#allocation5], 0  ;;  %s66_s26 = sshll.u32 %s2645_s14, 4  ;;  %s1906_s27 = smov [#allocation4]   ;;  %s67_s26 = int_to_ptr.hbm [resolvable:$true] %s66_s26 }
   0x5   :  { %s68_s28 = sshll.u32 %s1906_s27, 4  ;;  %s55_s30 = sshll.u32 %s2644_s13, 4  ;;  %s69_s28 = int_to_ptr.vmem [resolvable:$true] %s68_s28  ;;  %s56_s30 = int_to_ptr.hbm [resolvable:$true] %s55_s30 }
   0x6   :  { %71 = dma.hbm_to_vmem [thread:$0]  %s67_s26, 16, %s69_s28, [#allocation5]  }
   0x7   :  { %s1907_s18 = smov [#allocation2]   ;;  %s79_s21 = sshll.u32 %s2647_s16, 4  ;;  %s80_s21 = int_to_ptr.hbm [resolvable:$true] %s79_s21 }
   0x8   :  { %s57_s19 = sshll.u32 %s1907_s18, 4  ;;  %s1908_s14 = smov [#allocation6]   ;;  %s58_s19 = int_to_ptr.vmem [resolvable:$true] %s57_s19 }
   0x9   :  { %60 = dma.hbm_to_vmem [thread:$0]  %s56_s30, 16, %s58_s19, [#allocation3]  }
   0xa   :  { %s81_s22 = sshll.u32 %s1908_s14, 4  ;;  %s82_s22 = int_to_ptr.vmem [resolvable:$true] %s81_s22 }
   0xb   :  { %84 = dma.hbm_to_vmem [thread:$0]  %s80_s21, 16, %s82_s22, [#allocation5]  }
   0xc   :  { %1902 = dma.done.wait [#allocation3], 16  }
   0xd   :  { %1903 = vsyncadd [#allocation3], 4294967280 }
   0xe   :  { %1904 = dma.done.wait [#allocation5], 32  }
   0xf   :  { %1905 = vsyncadd [#allocation5], 4294967264  ;;  %s2653_s24 = sld [smem:[#allocation10_spill]]  ;;  %v1528_v5 = vld [vmem:[%s2635_s4 + $0xe0] sm:$0xf]  ;;  %s1910_s29 = smov 64  }
  0x10   :  { %v1720_v6 = vld [vmem:[%s2635_s4 + $0xec] sm:$0xf0]  ;;  %v1718_v9 = vld [vmem:[%s2635_s4 + $0xe4] sm:$0xf]  ;;  %v1530_v10 = vld [vmem:[%s2635_s4 + $0xf0] sm:$0xf0] }
  0x11   :  { %v1529_v8 = vor.u32 %v1720_v6, %v1528_v5  ;;  %v1533_v12 = vor.u32 %v1718_v9, %v1530_v10  ;;  %v1512_v18 = vld [vmem:[%s2635_s4 + $0xc0] sm:$0xf]  ;;  %v1716_v19 = vld [vmem:[%s2635_s4 + $0xcc] sm:$0xf0]  ;;  %v1714_v20 = vld [vmem:[%s2635_s4 + $0xc4] sm:$0xf] }
  0x12   :  { %v1513_v21 = vor.u32 %v1716_v19, %v1512_v18  ;;  %v1514_v22 = vld [vmem:[%s2635_s4 + $0xd0] sm:$0xf0]  ;;  %v1496_v28 = vld [vmem:[%s2635_s4 + $0xa0] sm:$0xf]  ;;  %v1712_v30 = vld [vmem:[%s2635_s4 + $0xac] sm:$0xf0] }
  0x13   :  { %499 = vmatpush.bf16.msra.mxu2 %v1529_v8  ;;  %512 = vmatpush.bf16.msra.mxu3 %v1533_v12  ;;  %v1517_v25 = vor.u32 %v1714_v20, %v1514_v22  ;;  %v1710_v31 = vld [vmem:[%s2635_s4 + $0xa4] sm:$0xf]  ;;  %v1498_v32 = vld [vmem:[%s2635_s4 + $0xb0] sm:$0xf0]  ;;  %v1497_v34 = vor.u32 %v1712_v30, %v1496_v28  ;;  %v1480_v40 = vld [vmem:[%s2635_s4 + $0x80] sm:$0xf] }
  0x14   :  { %v1501_v38 = vor.u32 %v1710_v31, %v1498_v32  ;;  %v1708_v41 = vld [vmem:[%s2635_s4 + $0x8c] sm:$0xf0]  ;;  %v1706_v42 = vld [vmem:[%s2635_s4 + $0x84] sm:$0xf]  ;;  %v1482_v43 = vld [vmem:[%s2635_s4 + $0x90] sm:$0xf0] }
  0x15   :  { %v1408_v0 = vld [vmem:[%s2653_s24 + $0x70] sm:$0xf]  ;;  %v1689_v1 = vld [vmem:[%s2653_s24 + $0x74] sm:$0xf0]  ;;  %v1688_v2 = vld [vmem:[%s2653_s24 + $0x74] sm:$0xf]  ;;  %v1481_v46 = vor.u32 %v1708_v41, %v1480_v40  ;;  %v1485_v50 = vor.u32 %v1706_v42, %v1482_v43 }
  0x16   :  { %v1409_v3 = vor.u32 %v1689_v1, %v1408_v0  ;;  %v1410_v4 = vld [vmem:[%s2653_s24 + $0x78] sm:$0xf0]  ;;  %v1400_v11 = vld [vmem:[%s2653_s24 + $0x60] sm:$0xf]  ;;  %v1687_v13 = vld [vmem:[%s2653_s24 + $0x64] sm:$0xf0] }
  0x17   :  { %v1413_v7 = vor.u32 %v1688_v2, %v1410_v4  ;;  %v1686_v14 = vld [vmem:[%s2653_s24 + $0x64] sm:$0xf]  ;;  %v1402_v15 = vld [vmem:[%s2653_s24 + $0x68] sm:$0xf0]  ;;  %v1401_v16 = vor.u32 %v1687_v13, %v1400_v11  ;;  %v1392_v23 = vld [vmem:[%s2653_s24 + $0x50] sm:$0xf]  ;;  %500 = vmatpush.bf16.msra.mxu2 %v1513_v21  ;;  %513 = vmatpush.bf16.msra.mxu3 %v1517_v25 }
  0x18   :  { %196 = vmatpush.bf16.msra.mxu0 %v1409_v3  ;;  %v1405_v17 = vor.u32 %v1686_v14, %v1402_v15  ;;  %v1685_v24 = vld [vmem:[%s2653_s24 + $0x54] sm:$0xf0]  ;;  %v1684_v26 = vld [vmem:[%s2653_s24 + $0x54] sm:$0xf]  ;;  %v1394_v27 = vld [vmem:[%s2653_s24 + $0x58] sm:$0xf0] }
  0x19   :  { %209 = vmatpush.bf16.msra.mxu1 %v1413_v7  ;;  %v1393_v29 = vor.u32 %v1685_v24, %v1392_v23  ;;  %v1397_v33 = vor.u32 %v1684_v26, %v1394_v27  ;;  %v1384_v35 = vld [vmem:[%s2653_s24 + $0x40] sm:$0xf]  ;;  %v1683_v36 = vld [vmem:[%s2653_s24 + $0x44] sm:$0xf0]  ;;  %v1682_v37 = vld [vmem:[%s2653_s24 + $0x44] sm:$0xf] }
  0x1a   :  { %v1386_v39 = vld [vmem:[%s2653_s24 + $0x48] sm:$0xf0]  ;;  %v1385_v44 = vor.u32 %v1683_v36, %v1384_v35  ;;  %v1376_v47 = vld [vmem:[%s2653_s24 + $0x30] sm:$0xf]  ;;  %v1681_v48 = vld [vmem:[%s2653_s24 + $0x34] sm:$0xf0] }
  0x1b   :  { %501 = vmatpush.bf16.msra.mxu2 %v1497_v34  ;;  %v1389_v45 = vor.u32 %v1682_v37, %v1386_v39  ;;  %v1680_v49 = vld [vmem:[%s2653_s24 + $0x34] sm:$0xf]  ;;  %514 = vmatpush.bf16.msra.mxu3 %v1501_v38  ;;  %v1378_v51 = vld [vmem:[%s2653_s24 + $0x38] sm:$0xf0]  ;;  %v1464_v52 = vld [vmem:[%s2635_s4 + $0x60] sm:$0xf]  ;;  %v1377_v56 = vor.u32 %v1681_v48, %v1376_v47 }
  0x1c   :  { %197 = vmatpush.bf16.msra.mxu0 %v1401_v16  ;;  %v1704_v53 = vld [vmem:[%s2635_s4 + $0x6c] sm:$0xf0]  ;;  %v1702_v54 = vld [vmem:[%s2635_s4 + $0x64] sm:$0xf]  ;;  %v1466_v55 = vld [vmem:[%s2635_s4 + $0x70] sm:$0xf0]  ;;  %v1381_v57 = vor.u32 %v1680_v49, %v1378_v51 }
  0x1d   :  { %210 = vmatpush.bf16.msra.mxu1 %v1405_v17  ;;  %v1465_v58 = vor.u32 %v1704_v53, %v1464_v52  ;;  %v1368_v59 = vld [vmem:[%s2653_s24 + $0x20] sm:$0xf]  ;;  %v1679_v60 = vld [vmem:[%s2653_s24 + $0x24] sm:$0xf0]  ;;  %v1678_v61 = vld [vmem:[%s2653_s24 + $0x24] sm:$0xf]  ;;  %v1469_v62 = vor.u32 %v1702_v54, %v1466_v55 }
  0x1e   :  { %v1370_v63 = vld [vmem:[%s2653_s24 + $0x28] sm:$0xf0]  ;;  %v1448_v0 = vld [vmem:[%s2635_s4 + $0x40] sm:$0xf]  ;;  %v1700_v1 = vld [vmem:[%s2635_s4 + $0x4c] sm:$0xf0]  ;;  %v1369_v4 = vor.u32 %v1679_v60, %v1368_v59 }
  0x1f   :  { %502 = vmatpush.bf16.msra.mxu2 %v1481_v46  ;;  %515 = vmatpush.bf16.msra.mxu3 %v1485_v50  ;;  %v1698_v2 = vld [vmem:[%s2635_s4 + $0x44] sm:$0xf]  ;;  %v1450_v3 = vld [vmem:[%s2635_s4 + $0x50] sm:$0xf0]  ;;  %v1360_v5 = vld [vmem:[%s2653_s24 + $0x10] sm:$0xf]  ;;  %v1373_v8 = vor.u32 %v1678_v61, %v1370_v63  ;;  %v1449_v9 = vor.u32 %v1700_v1, %v1448_v0 }
  0x20   :  { %198 = vmatpush.bf16.msra.mxu0 %v1393_v29  ;;  %v1677_v6 = vld [vmem:[%s2653_s24 + $0x14] sm:$0xf0]  ;;  %v1676_v7 = vld [vmem:[%s2653_s24 + $0x14] sm:$0xf]  ;;  %v1362_v10 = vld [vmem:[%s2653_s24 + $0x18] sm:$0xf0]  ;;  %v1453_v13 = vor.u32 %v1698_v2, %v1450_v3 }
  0x21   :  { %211 = vmatpush.bf16.msra.mxu1 %v1397_v33  ;;  %v1432_v11 = vld [vmem:[%s2635_s4 + $0x20] sm:$0xf]  ;;  %v1696_v12 = vld [vmem:[%s2635_s4 + $0x2c] sm:$0xf0]  ;;  %v1694_v14 = vld [vmem:[%s2635_s4 + $0x24] sm:$0xf]  ;;  %v1361_v16 = vor.u32 %v1677_v6, %v1360_v5  ;;  %v1365_v17 = vor.u32 %v1676_v7, %v1362_v10 }
  0x22   :  { %v1434_v15 = vld [vmem:[%s2635_s4 + $0x30] sm:$0xf0]  ;;  %v1433_v18 = vor.u32 %v1696_v12, %v1432_v11  ;;  %v1352_v19 = vld [vmem:[%s2653_s24] sm:$0xf]  ;;  %v1675_v20 = vld [vmem:[%s2653_s24 + $0x4] sm:$0xf0] }
  0x23   :  { %503 = vmatpush.bf16.msra.mxu2 %v1465_v58  ;;  %516 = vmatpush.bf16.msra.mxu3 %v1469_v62  ;;  %v1674_v21 = vld [vmem:[%s2653_s24 + $0x4] sm:$0xf]  ;;  %v1437_v22 = vor.u32 %v1694_v14, %v1434_v15  ;;  %v1354_v23 = vld [vmem:[%s2653_s24 + $0x8] sm:$0xf0]  ;;  %v1416_v24 = vld [vmem:[%s2635_s4] sm:$0xf]  ;;  %v1353_v28 = vor.u32 %v1675_v20, %v1352_v19 }
  0x24   :  { %199 = vmatpush.bf16.msra.mxu0 %v1385_v44  ;;  %v1692_v25 = vld [vmem:[%s2635_s4 + $0xc] sm:$0xf0]  ;;  %v1690_v26 = vld [vmem:[%s2635_s4 + $0x4] sm:$0xf]  ;;  %v1418_v27 = vld [vmem:[%s2635_s4 + $0x10] sm:$0xf0]  ;;  %v1357_v30 = vor.u32 %v1674_v21, %v1354_v23 }
  0x25   :  { %212 = vmatpush.bf16.msra.mxu1 %v1389_v45  ;;  %s2654_s18 = sld [smem:[#allocation9_spill]]  ;;  %v1417_v31 = vor.u32 %v1692_v25, %v1416_v24  ;;  %v1421_v32 = vor.u32 %v1690_v26, %v1418_v27  ;;  %v1909_v34 = vmov 8.0   ;;  %vm725_vm13 = vcmask 1043456  }
  0x26   :  { %1795 = vrcp.f32 %v1909_v34  ;;  %vm780_vm14 = vcmask 523264   ;;  %vm820_vm15 = vcmask 261120  }
  0x27   :  { %504 = vmatpush.bf16.msra.mxu2 %v1449_v9  ;;  %517 = vmatpush.bf16.msra.mxu3 %v1453_v13 }
  0x28   :  { %200 = vmatpush.bf16.msra.mxu0 %v1377_v56 }
  0x29   :  { %213 = vmatpush.bf16.msra.mxu1 %v1381_v57 }
  0x2b   :  { %v98_v29 = vld [vmem:[%s2654_s18] sm:$0xff]  ;;  %505 = vmatpush.bf16.msra.mxu2 %v1433_v18  ;;  %518 = vmatpush.bf16.msra.mxu3 %v1437_v22 }
  0x2c   :  { %201 = vmatpush.bf16.msra.mxu0 %v1369_v4  ;;  %v2205_v33 = vpack.c.bf16 %v98_v29, %v98_v29  ;;  %v1796_v35 = vpop.eup %1795 }
  0x2d   :  { %214 = vmatpush.bf16.msra.mxu1 %v1373_v8  ;;  %v237_v36 = vmul.f32 8.0, %v1796_v35  ;;  %vm241_vm0 = vweird.f32 %v1796_v35 }
  0x2f   :  { %506 = vmatpush.bf16.msra.mxu2 %v1417_v31  ;;  %519 = vmatpush.bf16.msra.mxu3 %v1421_v32  ;;  %v238_v37 = vsub.f32 1.0, %v237_v36 }
  0x30   :  { %202 = vmatpush.bf16.msra.mxu0 %v1361_v16 }
  0x31   :  { %215 = vmatpush.bf16.msra.mxu1 %v1365_v17  ;;  %v239_v40 = vmul.f32 %v1796_v35, %v238_v37 }
  0x32   :  { %507 = vmatmul.bf16.vlgmr.msra.gmra.mxu2 %v2205_v33  ;;  %520 = vmatmul.bf16.vlgmr.msra.gmra.mxu3 %v2205_v33 }
  0x33   :  { %v240_v50 = vadd.f32 %v1796_v35, %v239_v40 }
  0x34   :  { %203 = vmatpush.bf16.msra.mxu0 %v1353_v28 }
  0x35   :  { %216 = vmatpush.bf16.msra.mxu1 %v1357_v30  ;;  %v2230_v0 = vsel %vm241_vm0, %v1796_v35, %v240_v50 }
  0x37   :  { %204 = vmatmul.bf16.vlgmr.msra.gmra.mxu0 %v2205_v33 }
  0x38   :  { %217 = vmatmul.bf16.vlgmr.msra.gmra.mxu1 %v2205_v33 }
  0xb4   :  { %v2211_v38 = vpop.f32.mrf.mxu0 }
  0xb5   :  { %v224_v39 = vrot.slane %v2211_v38, 4  ;;  %v245_v41 = vmul.f32 %v2211_v38, %v2211_v38  ;;  %v2216_v42 = vpop.f32.mrf.mxu1  ;;  %v2223_v56 = vpop.f32.mrf.mxu2 }
  0xb6   :  { %v230_v43 = vrot.slane %v2216_v42, 4  ;;  %v246_v44 = vmul.f32 %v2216_v42, %v2216_v42  ;;  %v553_v59 = vrot.slane %v2223_v56, 4  ;;  %v581_v60 = vmul.f32 %v2223_v56, %v2223_v56  ;;  %v2228_v61 = vpop.f32.mrf.mxu3 }
  0xb7   :  { %v225_v45 = vadd.f32 %v224_v39, %v2211_v38  ;;  %v247_v46 = vrot.slane %v245_v41, 4  ;;  %v559_v2 = vrot.slane %v2228_v61, 4  ;;  %v582_v18 = vmul.f32 %v2228_v61, %v2228_v61 }
  0xb8   :  { %v231_v47 = vadd.f32 %v230_v43, %v2216_v42  ;;  %v253_v48 = vrot.slane %v246_v44, 4  ;;  %v554_v6 = vadd.f32 %v553_v59, %v2223_v56  ;;  %v585_v7 = vrot.slane %v581_v60, 4 }
  0xb9   :  { %v226_v49 = vrot.slane %v225_v45, 2  ;;  %v248_v51 = vadd.f32 %v247_v46, %v245_v41  ;;  %v560_v10 = vadd.f32 %v559_v2, %v2228_v61  ;;  %v591_v35 = vrot.slane %v582_v18, 4 }
  0xba   :  { %v232_v52 = vrot.slane %v231_v47, 2  ;;  %v254_v53 = vadd.f32 %v253_v48, %v246_v44  ;;  %v555_v13 = vrot.slane %v554_v6, 2  ;;  %v586_v14 = vadd.f32 %v585_v7, %v581_v60 }
  0xbb   :  { %v227_v54 = vadd.f32 %v226_v49, %v225_v45  ;;  %v249_v55 = vrot.slane %v248_v51, 2  ;;  %v561_v17 = vrot.slane %v560_v10, 2  ;;  %v592_v41 = vadd.f32 %v591_v35, %v582_v18  ;;  %v1522_v18 = vld [vmem:[%s2635_s4 + $0xd8] sm:$0xf0] }
  0xbc   :  { %v233_v57 = vadd.f32 %v232_v52, %v231_v47  ;;  %v255_v58 = vrot.slane %v254_v53, 2  ;;  %v207_v62 = vpop.f32.mrf.mxu0  ;;  %v556_v21 = vadd.f32 %v555_v13, %v554_v6  ;;  %v587_v22 = vrot.slane %v586_v14, 2 }
  0xbd   :  { %v228_v63 = vrot.slane %v227_v54, 1  ;;  %v250_v1 = vadd.f32 %v249_v55, %v248_v51  ;;  %v220_v3 = vpop.f32.mrf.mxu1  ;;  %v562_v25 = vadd.f32 %v561_v17, %v560_v10  ;;  %v510_v26 = vpop.f32.mrf.mxu2  ;;  %v593_v48 = vrot.slane %v592_v41, 2  ;;  %v222_v10 = vld [vmem:[%s2633_s2] sm:$0x3] }
  0xbe   :  { %v234_v4 = vrot.slane %v233_v57, 1  ;;  %v256_v5 = vadd.f32 %v255_v58, %v254_v53  ;;  %v557_v29 = vrot.slane %v556_v21, 1  ;;  %v523_v30 = vpop.f32.mrf.mxu3  ;;  %v588_v32 = vadd.f32 %v587_v22, %v586_v14  ;;  %v1717_v14 = vld [vmem:[%s2635_s4 + $0xd4] sm:$0xf0] }
  0xbf   :  { %v229_v8 = vadd.f32 %v228_v63, %v227_v54  ;;  %v251_v9 = vrot.slane %v250_v1, 1  ;;  %v563_v34 = vrot.slane %v562_v25, 1  ;;  %v594_v52 = vadd.f32 %v593_v48, %v592_v41  ;;  %v1721_v30 = vld [vmem:[%s2635_s4 + $0xf4] sm:$0xf0] }
  0xc0   :  { %v235_v11 = vadd.f32 %v234_v4, %v233_v57  ;;  %v257_v12 = vrot.slane %v256_v5, 1  ;;  %v558_v37 = vadd.f32 %v557_v29, %v556_v21  ;;  %v589_v40 = vrot.slane %v588_v32, 1  ;;  %v223_v21 = vld [vmem:[%s2634_s3] sm:$0x3]  ;;  %v1536_v29 = vld [vmem:[%s2635_s4 + $0xe8] sm:$0xf] }
  0xc1   :  { %v2236_v15 = vmul.f32 %v2230_v0, %v229_v8  ;;  %v252_v16 = vadd.f32 %v251_v9, %v250_v1  ;;  %v564_v45 = vadd.f32 %v563_v34, %v562_v25  ;;  %v595_v55 = vrot.slane %v594_v52, 1 }
  0xc2   :  { %v2241_v19 = vmul.f32 %v2230_v0, %v235_v11  ;;  %v258_v20 = vadd.f32 %v257_v12, %v256_v5  ;;  %v2250_v44 = vmul.f32 %v558_v37, %v2230_v0  ;;  %v590_v47 = vadd.f32 %v589_v40, %v588_v32 }
  0xc3   :  { %v259_v23 = vmul.f32 %v252_v16, %v2230_v0  ;;  %v261_v24 = vmul.f32 %v2236_v15, %v2236_v15  ;;  %v2256_v53 = vmul.f32 %v564_v45, %v2230_v0  ;;  %v596_v58 = vadd.f32 %v595_v55, %v594_v52 }
  0xc4   :  { %v260_v27 = vmul.f32 %v258_v20, %v2230_v0  ;;  %v262_v28 = vmul.f32 %v2241_v19, %v2241_v19  ;;  %v613_v50 = vmul.f32 %v2250_v44, %v2250_v44  ;;  %v609_v51 = vmul.f32 %v590_v47, %v2230_v0 }
  0xc5   :  { %v263_v31 = vsub.f32 %v259_v23, %v261_v24  ;;  %v614_v59 = vmul.f32 %v2256_v53, %v2256_v53  ;;  %v610_v63 = vmul.f32 %v596_v58, %v2230_v0  ;;  %v267_v22 = vsub.f32 %v2211_v38, %v2236_v15  ;;  %v1719_v38 = vld [vmem:[%s2635_s4 + $0xec] sm:$0xf] }
  0xc6   :  { %v264_v36 = vsub.f32 %v260_v27, %v262_v28  ;;  %v617_v54 = vsub.f32 %v609_v51, %v613_v50  ;;  %v294_v23 = vperm.slane %v222_v10, 0  ;;  %v295_v25 = vperm.slane %v222_v10, 1  ;;  %v2303_v51 = vld [vmem:[%s2636_s5] sm:$0xf] }
  0xc7   :  { %v265_v39 = vmax.f32 %v263_v31, 0.0  ;;  %v618_v5 = vsub.f32 %v610_v63, %v614_v59  ;;  %v268_v27 = vsub.f32 %v2216_v42, %v2241_v19  ;;  %v301_v32 = vperm.slane %v223_v21, 0  ;;  %v1538_v42 = vld [vmem:[%s2635_s4 + $0xf8] sm:$0xf0]  ;;  %v2316_v63 = vld [vmem:[%s2637_s6] sm:$0xf] }
  0xc8   :  { %v266_v43 = vmax.f32 %v264_v36, 0.0  ;;  %v621_v57 = vmax.f32 %v617_v54, 0.0  ;;  %v1537_v34 = vor.u32 %v1721_v30, %v1536_v29  ;;  %v302_v36 = vperm.slane %v223_v21, 1  ;;  %v1504_v21 = vld [vmem:[%s2635_s4 + $0xa8] sm:$0xf] }
  0xc9   :  { %v269_v46 = vadd.f32 1e-05, %v265_v39  ;;  %v622_v8 = vmax.f32 %v618_v5, 0.0  ;;  %v1541_v37 = vor.u32 %v1719_v38, %v1538_v42  ;;  %v625_v52 = vsub.f32 %v2223_v56, %v2250_v44  ;;  %v1707_v29 = vld [vmem:[%s2635_s4 + $0x8c] sm:$0xf] }
  0xca   :  { %v270_v49 = vadd.f32 1e-05, %v266_v43  ;;  %v629_v62 = vadd.f32 1e-05, %v621_v57  ;;  %525 = vmatpush.bf16.msrb.mxu0 %v1537_v34  ;;  %v626_v44 = vsub.f32 %v2228_v61, %v2256_v53  ;;  %v1490_v30 = vld [vmem:[%s2635_s4 + $0x98] sm:$0xf0] }
  0xcb   :  { %1797 = vrsqrt.f32 %v269_v46  ;;  %vm277_vm1 = vweird.f32 %v269_v46  ;;  %v630_v12 = vadd.f32 1e-05, %v622_v8  ;;  %538 = vmatpush.bf16.msrb.mxu1 %v1541_v37  ;;  %v1703_v34 = vld [vmem:[%s2635_s4 + $0x6c] sm:$0xf] }
  0xcc   :  { %1799 = vrsqrt.f32 %v270_v49  ;;  %vm287_vm3 = vweird.f32 %v270_v49  ;;  %vm639_vm8 = vweird.f32 %v629_v62 }
  0xcd   :  { %1801 = vrsqrt.f32 %v629_v62  ;;  %vm649_vm11 = vweird.f32 %v630_v12 }
  0xce   :  { %1803 = vrsqrt.f32 %v630_v12 }
  0xd1   :  { %v1798_v60 = vpop.eup %1797 }
  0xd2   :  { %v1800_v1 = vpop.eup %1799  ;;  %v272_v2 = vmul.f32 %v1798_v60, %v269_v46  ;;  %vm278_vm2 = vweird.f32 %v1798_v60 }
  0xd3   :  { %v282_v3 = vmul.f32 %v1800_v1, %v270_v49  ;;  %vm288_vm4 = vweird.f32 %v1800_v1  ;;  %v1802_v13 = vpop.eup %1801  ;;  %vm2264_vm5 = vmor %vm277_vm1, %vm278_vm2 }
  0xd4   :  { %v273_v4 = vmul.f32 %v1798_v60, %v272_v2  ;;  %vm2268_vm6 = vmor %vm287_vm3, %vm288_vm4  ;;  %v634_v20 = vmul.f32 %v1802_v13, %v629_v62  ;;  %v1804_v40 = vpop.eup %1803  ;;  %vm640_vm7 = vweird.f32 %v1802_v13 }
  0xd5   :  { %v283_v6 = vmul.f32 %v1800_v1, %v282_v3  ;;  %v644_v45 = vmul.f32 %v1804_v40, %v630_v12  ;;  %vm641_vm9 = vmor %vm639_vm8, %vm640_vm7  ;;  %vm650_vm10 = vweird.f32 %v1804_v40  ;;  %v691_v3 = vperm.slane %v2316_v63, 0 }
  0xd6   :  { %v274_v7 = vmul.f32 0.5, %v273_v4  ;;  %v635_v28 = vmul.f32 %v1802_v13, %v634_v20  ;;  %vm651_vm12 = vmor %vm649_vm11, %vm650_vm10 }
  0xd7   :  { %v284_v9 = vmul.f32 0.5, %v283_v6  ;;  %v645_v49 = vmul.f32 %v1804_v40, %v644_v45  ;;  %v692_v6 = vperm.slane %v2316_v63, 1  ;;  %v1440_v45 = vld [vmem:[%s2635_s4 + $0x28] sm:$0xf] }
  0xd8   :  { %v275_v11 = vsub.f32 1.5, %v274_v7  ;;  %v636_v35 = vmul.f32 0.5, %v635_v28 }
  0xd9   :  { %v285_v16 = vsub.f32 1.5, %v284_v9  ;;  %v646_v57 = vmul.f32 0.5, %v645_v49  ;;  %v1695_v49 = vld [vmem:[%s2635_s4 + $0x2c] sm:$0xf] }
  0xda   :  { %v276_v17 = vmul.f32 %v1798_v60, %v275_v11  ;;  %v637_v43 = vsub.f32 1.5, %v636_v35  ;;  %v1456_v35 = vld [vmem:[%s2635_s4 + $0x48] sm:$0xf] }
  0xdb   :  { %v286_v24 = vmul.f32 %v1800_v1, %v285_v16  ;;  %v647_v62 = vsub.f32 1.5, %v646_v57  ;;  %v1715_v16 = vld [vmem:[%s2635_s4 + $0xcc] sm:$0xf] }
  0xdc   :  { %v280_v26 = vsel %vm2264_vm5, %v1798_v60, %v276_v17  ;;  %v638_v47 = vmul.f32 %v1802_v13, %v637_v43  ;;  %v678_v60 = vperm.slane %v2303_v51, 0  ;;  %v1525_v20 = vor.u32 %v1715_v16, %v1522_v18 }
  0xdd   :  { %v291_v15 = vmul.f32 %v280_v26, %v267_v22  ;;  %v290_v31 = vsel %vm2268_vm6, %v1800_v1, %v286_v24  ;;  %v648_v56 = vmul.f32 %v1804_v40, %v647_v62  ;;  %v679_v1 = vperm.slane %v2303_v51, 1  ;;  %v1713_v22 = vld [vmem:[%s2635_s4 + $0xb4] sm:$0xf0]  ;;  %v1488_v26 = vld [vmem:[%s2635_s4 + $0x88] sm:$0xf] }
  0xde   :  { %v292_v19 = vmul.f32 %v290_v31, %v268_v27  ;;  %v642_v54 = vsel %vm641_vm9, %v1802_v13, %v638_v47  ;;  %v1520_v13 = vld [vmem:[%s2635_s4 + $0xc8] sm:$0xf]  ;;  %539 = vmatpush.bf16.msrb.mxu1 %v1525_v20  ;;  %v1505_v24 = vor.u32 %v1713_v22, %v1504_v21  ;;  %v1709_v27 = vld [vmem:[%s2635_s4 + $0x94] sm:$0xf0] }
  0xdf   :  { %v298_v39 = vmul.f32 %v294_v23, %v291_v15  ;;  %v673_v58 = vmul.f32 %v642_v54, %v625_v52  ;;  %v652_v4 = vsel %vm651_vm12, %v1804_v40, %v648_v56  ;;  %v1521_v17 = vor.u32 %v1717_v14, %v1520_v13  ;;  %v1711_v23 = vld [vmem:[%s2635_s4 + $0xac] sm:$0xf]  ;;  %v1472_v31 = vld [vmem:[%s2635_s4 + $0x68] sm:$0xf]  ;;  %v1458_v40 = vld [vmem:[%s2635_s4 + $0x58] sm:$0xf0] }
  0xe0   :  { %v299_v41 = vmul.f32 %v295_v25, %v292_v19  ;;  %v674_v5 = vmul.f32 %v652_v4, %v626_v44  ;;  %v1506_v25 = vld [vmem:[%s2635_s4 + $0xb8] sm:$0xf0]  ;;  %v1489_v38 = vor.u32 %v1709_v27, %v1488_v26  ;;  %v1493_v15 = vor.u32 %v1707_v29, %v1490_v30  ;;  %v1697_v47 = vld [vmem:[%s2635_s4 + $0x34] sm:$0xf0] }
  0xe1   :  { %v2295_v46 = vadd.f32 %v301_v32, %v298_v39  ;;  %v686_v2 = vmul.f32 %v678_v60, %v673_v58  ;;  %526 = vmatpush.bf16.msrb.mxu0 %v1521_v17  ;;  %v1509_v28 = vor.u32 %v1711_v23, %v1506_v25  ;;  %v1705_v32 = vld [vmem:[%s2635_s4 + $0x74] sm:$0xf0]  ;;  %v1474_v19 = vld [vmem:[%s2635_s4 + $0x78] sm:$0xf0]  ;;  %v1699_v39 = vld [vmem:[%s2635_s4 + $0x4c] sm:$0xf]  ;;  %v1441_v52 = vor.u32 %v1697_v47, %v1440_v45 }
  0xe2   :  { %v2297_v48 = vadd.f32 %v302_v36, %v299_v41  ;;  %v687_v7 = vmul.f32 %v679_v1, %v674_v5  ;;  %v1473_v42 = vor.u32 %v1705_v32, %v1472_v31  ;;  %v1701_v36 = vld [vmem:[%s2635_s4 + $0x54] sm:$0xf0]  ;;  %v1477_v37 = vor.u32 %v1703_v34, %v1474_v19  ;;  %v1442_v54 = vld [vmem:[%s2635_s4 + $0x38] sm:$0xf0]  ;;  %v1424_v58 = vld [vmem:[%s2635_s4 + $0x8] sm:$0xf] }
  0xe3   :  { %v708_v50 = vrot.slane %v2295_v46, 4  ;;  %v2324_v8 = vadd.f32 %v691_v3, %v686_v2  ;;  %540 = vmatpush.bf16.msrb.mxu1 %v1509_v28  ;;  %v1457_v41 = vor.u32 %v1701_v36, %v1456_v35  ;;  %v1461_v43 = vor.u32 %v1699_v39, %v1458_v40  ;;  %v1691_v60 = vld [vmem:[%s2635_s4 + $0xc] sm:$0xf]  ;;  %v1426_v56 = vld [vmem:[%s2635_s4 + $0x18] sm:$0xf0] }
  0xe4   :  { %v713_v55 = vrot.slane %v2297_v48, 4  ;;  %v1774_v9 = vpack.i.bf16 %v2297_v48, %v2295_v46  ;;  %v2328_v10 = vadd.f32 %v692_v6, %v687_v7  ;;  %v1445_v57 = vor.u32 %v1695_v49, %v1442_v54 }
  0xe5   :  { %v733_v53 = vrot.slane %v2324_v8, 4  ;;  %527 = vmatpush.bf16.msrb.mxu0 %v1505_v24  ;;  %v1429_v44 = vor.u32 %v1691_v60, %v1426_v56 }
  0xe6   :  { %v1769_v59 = vpack.i.bf16 %v713_v55, %v708_v50  ;;  %v1759_v61 = vpack.i.bf16 %v2328_v10, %v2324_v8  ;;  %v738_v11 = vrot.slane %v2328_v10, 4 }
  0xe7   :  { %541 = vmatpush.bf16.msrb.mxu1 %v1493_v15 }
  0xe8   :  { %1770 = vrot.lane.b32.xlu1 %v1769_v59, %s1910_s29  ;;  %1760 = vrot.lane.b32.xlu0 %v1759_v61, %s1910_s29  ;;  %v1764_v12 = vpack.i.bf16 %v738_v11, %v733_v53  ;;  %v1693_v59 = vld [vmem:[%s2635_s4 + $0x14] sm:$0xf0] }
  0xe9   :  { %528 = vmatpush.bf16.msrb.mxu0 %v1489_v38  ;;  %v1425_v62 = vor.u32 %v1693_v59, %v1424_v58 }
  0xeb   :  { %542 = vmatpush.bf16.msrb.mxu1 %v1477_v37 }
  0xed   :  { %529 = vmatpush.bf16.msrb.mxu0 %v1473_v42 }
  0xef   :  { %543 = vmatpush.bf16.msrb.mxu1 %v1461_v43 }
  0xf0   :  { %1775 = vrot.lane.b32.xlu1 %v1774_v9, %s1910_s29  ;;  %1765 = vrot.lane.b32.xlu0 %v1764_v12, %s1910_s29 }
  0xf1   :  { %530 = vmatpush.bf16.msrb.mxu0 %v1457_v41 }
  0xf3   :  { %544 = vmatpush.bf16.msrb.mxu1 %v1445_v57 }
  0xf5   :  { %531 = vmatpush.bf16.msrb.mxu0 %v1441_v52 }
  0xf7   :  { %545 = vmatpush.bf16.msrb.mxu1 %v1429_v44 }
  0xf9   :  { %532 = vmatpush.bf16.msrb.mxu0 %v1425_v62 }
  0xfa   :  { %546 = vmatmul.bf16.vlgmr.msrb.gmra.mxu1 %v2205_v33 }
  0xfc   :  { %533 = vmatmul.bf16.vlgmr.msrb.gmra.mxu0 %v2205_v33 }
 0x15a   :  { %v1761_v1 = vpop.permute.xlu0 %1760  ;;  %v1771_v12 = vpop.permute.xlu1 %1770 }
 0x15b   :  { %v1763_v2 = vunpack.i.h.bf16 %v1761_v1  ;;  %v1762_v3 = vunpack.i.l.bf16 %v1761_v1  ;;  %v1773_v16 = vunpack.i.h.bf16 %v1771_v12  ;;  %v1772_v17 = vunpack.i.l.bf16 %v1771_v12 }
 0x15d   :  { %v752_v4 = vsel %vm725_vm13, %v733_v53, %v1762_v3  ;;  %v753_v5 = vsel %vm725_vm13, %v738_v11, %v1763_v2  ;;  %v727_v18 = vsel %vm725_vm13, %v2297_v48, %v1773_v16  ;;  %v726_v20 = vsel %vm725_vm13, %v2295_v46, %v1772_v17 }
 0x15e   :  { %v755_v6 = vpack.c.bf16 %v753_v5, %v752_v4  ;;  %v730_v21 = vpack.c.bf16 %v727_v18, %v726_v20 }
 0x160   :  { %v791_v7 = vsel %vm780_vm14, %v755_v6, 0 }
 0x161   :  { %799 = vmatpush.bf16.xpose.msrb.mxu2 %v791_v7 }
 0x162   :  { %v1766_v9 = vpop.permute.xlu0 %1765  ;;  %v1776_v22 = vpop.permute.xlu1 %1775 }
 0x163   :  { %v1768_v61 = vunpack.i.h.bf16 %v1766_v9  ;;  %v1767_v33 = vunpack.i.l.bf16 %v1766_v9  ;;  %v1777_v23 = vunpack.i.l.bf16 %v1776_v22 }
 0x165   :  { %v750_v13 = vsel %vm725_vm13, %v2324_v8, %v1767_v33  ;;  %v751_v14 = vsel %vm725_vm13, %v2328_v10, %v1768_v61  ;;  %v1778_v8 = vunpack.i.h.bf16 %v1776_v22  ;;  %v728_v10 = vsel %vm725_vm13, %v708_v50, %v1777_v23 }
 0x166   :  { %v754_v53 = vpack.c.bf16 %v751_v14, %v750_v13  ;;  %v703_v14 = vld [vmem:[%s2638_s7] sm:$0xff] }
 0x167   :  { %v729_v24 = vsel %vm725_vm13, %v713_v55, %v1778_v8  ;;  %v704_v8 = vld [vmem:[%s2638_s7 + $0x8] sm:$0xff] }
 0x168   :  { %v788_v11 = vsel %vm780_vm14, %v754_v53, 0  ;;  %v731_v25 = vpack.c.bf16 %v729_v24, %v728_v10 }
 0x169   :  { %800 = vmatpush.bf16.xpose.msrb.mxu2 %v788_v11 }
 0x170   :  { %1542 = vmatmul.msk.bf16.vlgmr.msrb.gmra.mxu2 %vm780_vm14, %v730_v21 }
 0x177   :  { %v2456_v29 = vpop.f32.mrf.mxu1 }
 0x178   :  { %v571_v46 = vrot.slane %v2456_v29, 4  ;;  %v584_v50 = vmul.f32 %v2456_v29, %v2456_v29 }
 0x179   :  { %v2451_v26 = vpop.f32.mrf.mxu0 }
 0x17a   :  { %v565_v27 = vrot.slane %v2451_v26, 4  ;;  %v583_v28 = vmul.f32 %v2451_v26, %v2451_v26  ;;  %v572_v30 = vadd.f32 %v571_v46, %v2456_v29  ;;  %v603_v38 = vrot.slane %v584_v50, 4 }
 0x17c   :  { %v566_v48 = vadd.f32 %v565_v27, %v2451_v26  ;;  %v597_v55 = vrot.slane %v583_v28, 4  ;;  %v573_v32 = vrot.slane %v572_v30, 2  ;;  %v604_v34 = vadd.f32 %v603_v38, %v584_v50 }
 0x17e   :  { %v567_v15 = vrot.slane %v566_v48, 2  ;;  %v598_v31 = vadd.f32 %v597_v55, %v583_v28  ;;  %v574_v35 = vadd.f32 %v573_v32, %v572_v30  ;;  %v605_v36 = vrot.slane %v604_v34, 2 }
 0x17f   :  { %v549_v41 = vpop.f32.mrf.mxu1 }
 0x180   :  { %1543 = vmatmul.msk.bf16.gmra.mxu2 %vm780_vm14, %v731_v25  ;;  %v568_v42 = vadd.f32 %v567_v15, %v566_v48  ;;  %v599_v19 = vrot.slane %v598_v31, 2  ;;  %v575_v43 = vrot.slane %v574_v35, 1  ;;  %v606_v45 = vadd.f32 %v605_v36, %v604_v34  ;;  %v705_v48 = vld [vmem:[%s2638_s7 + $0x10] sm:$0xff] }
 0x181   :  { %v536_v37 = vpop.f32.mrf.mxu0  ;;  %v681_v36 = vperm.slane %v2303_v51, 3  ;;  %v693_v41 = vperm.slane %v2316_v63, 2 }
 0x182   :  { %v569_v39 = vrot.slane %v568_v42, 1  ;;  %v600_v40 = vadd.f32 %v599_v19, %v598_v31  ;;  %v576_v52 = vadd.f32 %v575_v43, %v574_v35  ;;  %v607_v54 = vrot.slane %v606_v45, 1 }
 0x183   :  { %v680_v19 = vperm.slane %v2303_v51, 2  ;;  %v694_v43 = vperm.slane %v2316_v63, 3 }
 0x184   :  { %v570_v47 = vadd.f32 %v569_v39, %v568_v42  ;;  %v601_v49 = vrot.slane %v600_v40, 1  ;;  %v580_v59 = vmul.f32 %v576_v52, %v2230_v0  ;;  %v608_v60 = vadd.f32 %v607_v54, %v606_v45  ;;  %v706_v39 = vld [vmem:[%s2638_s7 + $0x18] sm:$0xff] }
 0x186   :  { %v579_v57 = vmul.f32 %v570_v47, %v2230_v0  ;;  %v602_v58 = vadd.f32 %v601_v49, %v600_v40  ;;  %v612_v44 = vmul.f32 %v608_v60, %v2230_v0  ;;  %v616_v1 = vmul.f32 %v580_v59, %v580_v59 }
 0x187   :  { %v628_v38 = vsub.f32 %v2456_v29, %v580_v59 }
 0x188   :  { %v611_v62 = vmul.f32 %v602_v58, %v2230_v0  ;;  %v615_v56 = vmul.f32 %v579_v57, %v579_v57  ;;  %v620_v3 = vsub.f32 %v612_v44, %v616_v1  ;;  %v627_v30 = vsub.f32 %v2451_v26, %v579_v57 }
 0x18a   :  { %v619_v2 = vsub.f32 %v611_v62, %v615_v56  ;;  %v624_v5 = vmax.f32 %v620_v3, 0.0 }
 0x18c   :  { %v623_v4 = vmax.f32 %v619_v2, 0.0  ;;  %v632_v7 = vadd.f32 1e-05, %v624_v5 }
 0x18e   :  { %v631_v6 = vadd.f32 1e-05, %v623_v4  ;;  %vm669_vm2 = vweird.f32 %v632_v7 }
 0x190   :  { %1805 = vrsqrt.f32 %v631_v6  ;;  %vm659_vm0 = vweird.f32 %v631_v6 }
 0x191   :  { %1807 = vrsqrt.f32 %v632_v7 }
 0x196   :  { %v1806_v9 = vpop.eup %1805 }
 0x197   :  { %v1808_v61 = vpop.eup %1807  ;;  %v654_v33 = vmul.f32 %v1806_v9, %v631_v6  ;;  %vm660_vm1 = vweird.f32 %v1806_v9 }
 0x198   :  { %v664_v12 = vmul.f32 %v1808_v61, %v632_v7  ;;  %vm670_vm3 = vweird.f32 %v1808_v61  ;;  %vm661_vm4 = vmor %vm659_vm0, %vm660_vm1 }
 0x199   :  { %v655_v16 = vmul.f32 %v1806_v9, %v654_v33  ;;  %vm671_vm5 = vmor %vm669_vm2, %vm670_vm3 }
 0x19a   :  { %v665_v17 = vmul.f32 %v1808_v61, %v664_v12 }
 0x19b   :  { %v656_v20 = vmul.f32 0.5, %v655_v16 }
 0x19c   :  { %v666_v21 = vmul.f32 0.5, %v665_v17 }
 0x19d   :  { %v657_v10 = vsub.f32 1.5, %v656_v20 }
 0x19e   :  { %v667_v24 = vsub.f32 1.5, %v666_v21 }
 0x19f   :  { %v658_v28 = vmul.f32 %v1806_v9, %v657_v10 }
 0x1a0   :  { %v668_v46 = vmul.f32 %v1808_v61, %v667_v24 }
 0x1a1   :  { %v662_v15 = vsel %vm661_vm4, %v1806_v9, %v658_v28 }
 0x1a2   :  { %v672_v31 = vsel %vm671_vm5, %v1808_v61, %v668_v46  ;;  %v675_v42 = vmul.f32 %v662_v15, %v627_v30 }
 0x1a3   :  { %v676_v35 = vmul.f32 %v672_v31, %v628_v38 }
 0x1a4   :  { %v688_v40 = vmul.f32 %v680_v19, %v675_v42 }
 0x1a5   :  { %v689_v29 = vmul.f32 %v681_v36, %v676_v35  ;;  %v1729_v35 = vld [vmem:[%s2639_s8 + $0x38] sm:$0xff]  ;;  %v1728_v36 = vld [vmem:[%s2639_s8 + $0x30] sm:$0xff] }
 0x1a6   :  { %v701_v49 = vadd.f32 %v693_v41, %v688_v40  ;;  %1068 = vmatpush.bf16.msra.mxu2 %v1729_v35 }
 0x1a7   :  { %v702_v52 = vadd.f32 %v694_v43, %v689_v29 }
 0x1a8   :  { %v757_v2 = vrot.slane %v701_v49, 4 }
 0x1a9   :  { %v1779_v51 = vpack.i.bf16 %v702_v52, %v701_v49  ;;  %v762_v6 = vrot.slane %v702_v52, 4 }
 0x1aa   :  { %1069 = vmatpush.bf16.msra.mxu2 %v1728_v36 }
 0x1ab   :  { %v1784_v21 = vpack.i.bf16 %v762_v6, %v757_v2 }
 0x1f3   :  { %v802_v13 = vpop.f32.mrf.mxu2 }
 0x1f4   :  { %v812_v53 = vmul.f32 0.125, %v802_v13 }
 0x1f6   :  { %v816_v11 = vadd.f32 %v812_v53, %v703_v14 }
 0x1f8   :  { %v821_v18 = vsel %vm820_vm15, %v816_v11, -inf }
 0x1f9   :  { %822 = vmax.xlane.f32.xlu2 %v821_v18 }
 0x1fb   :  { %v804_v22 = vpop.f32.mrf.mxu2 }
 0x1fc   :  { %v813_v23 = vmul.f32 0.125, %v804_v22 }
 0x1fe   :  { %v817_v25 = vadd.f32 %v813_v23, %v704_v8 }
 0x200   :  { %v824_v27 = vsel %vm820_vm15, %v817_v25, -inf }
 0x201   :  { %825 = vmax.xlane.f32.xlu2 %v824_v27 }
 0x203   :  { %v807_v50 = vpop.f32.mrf.mxu2 }
 0x204   :  { %v814_v55 = vmul.f32 0.125, %v807_v50 }
 0x206   :  { %v818_v32 = vadd.f32 %v814_v55, %v705_v48 }
 0x208   :  { %v827_v34 = vsel %vm820_vm15, %v818_v32, -inf }
 0x209   :  { %828 = vmax.xlane.f32.xlu0 %v827_v34 }
 0x20b   :  { %v809_v37 = vpop.f32.mrf.mxu2 }
 0x20c   :  { %v815_v26 = vmul.f32 0.125, %v809_v37 }
 0x20e   :  { %v819_v45 = vadd.f32 %v815_v26, %v706_v39  ;;  %v1727_v26 = vld [vmem:[%s2639_s8 + $0x28] sm:$0xff] }
 0x20f   :  { %1070 = vmatpush.bf16.msra.mxu2 %v1727_v26 }
 0x210   :  { %v830_v47 = vsel %vm820_vm15, %v819_v45, -inf }
 0x211   :  { %831 = vmax.xlane.f32.xlu1 %v830_v47 }
 0x219   :  { %1780 = vrot.lane.b32.xlu2 %v1779_v51, %s1910_s29  ;;  %v1724_v51 = vld [vmem:[%s2639_s8 + $0x10] sm:$0xff] }
 0x26c   :  { %v823_v54 = vpop.xlane.xlu2 %822 }
 0x26d   :  { %v833_v57 = vsub.f32 %v816_v11, %v823_v54  ;;  %v1723_v54 = vld [vmem:[%s2639_s8 + $0x8] sm:$0xff] }
 0x26f   :  { %v837_v58 = vmul.f32 1.442695, %v833_v57  ;;  %v1737_v57 = vld [vmem:[%s2639_s8 + $0x78] sm:$0xff] }
 0x271   :  { %1809 = vpow2.f32 %v837_v58  ;;  %v1722_v58 = vld [vmem:[%s2639_s8] sm:$0xff] }
 0x274   :  { %v826_v59 = vpop.xlane.xlu2 %825 }
 0x275   :  { %v834_v60 = vsub.f32 %v817_v25, %v826_v59  ;;  %v1736_v59 = vld [vmem:[%s2639_s8 + $0x70] sm:$0xff] }
 0x277   :  { %v1810_v62 = vpop.eup %1809  ;;  %v839_v56 = vmul.f32 1.442695, %v834_v60  ;;  %v1735_v60 = vld [vmem:[%s2639_s8 + $0x68] sm:$0xff] }
 0x278   :  { %v845_v44 = vsel %vm820_vm15, %v1810_v62, 0.0 }
 0x279   :  { %1811 = vpow2.f32 %v839_v56  ;;  %846 = vadd.xlane.f32.xlu2 %v845_v44  ;;  %v1733_v56 = vld [vmem:[%s2639_s8 + $0x58] sm:$0xff] }
 0x27c   :  { %v829_v63 = vpop.xlane.xlu0 %828  ;;  %v1781_v1 = vpop.permute.xlu2 %1780 }
 0x27d   :  { %v835_v3 = vsub.f32 %v818_v32, %v829_v63  ;;  %v1783_v4 = vunpack.i.h.bf16 %v1781_v1  ;;  %v1782_v5 = vunpack.i.l.bf16 %v1781_v1  ;;  %v1732_v1 = vld [vmem:[%s2639_s8 + $0x50] sm:$0xff] }
 0x27f   :  { %v1812_v7 = vpop.eup %1811  ;;  %v841_v9 = vmul.f32 1.442695, %v835_v3  ;;  %v776_v61 = vsel %vm725_vm13, %v757_v2, %v1782_v5  ;;  %v777_v33 = vsel %vm725_vm13, %v762_v6, %v1783_v4  ;;  %v1731_v5 = vld [vmem:[%s2639_s8 + $0x48] sm:$0xff] }
 0x280   :  { %v848_v12 = vsel %vm820_vm15, %v1812_v7, 0.0  ;;  %v779_v13 = vpack.c.bf16 %v777_v33, %v776_v61 }
 0x281   :  { %1813 = vpow2.f32 %v841_v9  ;;  %849 = vadd.xlane.f32.xlu2 %v848_v12  ;;  %v1730_v9 = vld [vmem:[%s2639_s8 + $0x40] sm:$0xff] }
 0x282   :  { %879 = vmatpush.bf16.msrb.mxu3 %v779_v13 }
 0x284   :  { %v832_v14 = vpop.xlane.xlu1 %831 }
 0x285   :  { %v836_v53 = vsub.f32 %v819_v45, %v832_v14 }
 0x287   :  { %v1814_v16 = vpop.eup %1813  ;;  %v843_v17 = vmul.f32 1.442695, %v836_v53 }
 0x288   :  { %v851_v11 = vsel %vm820_vm15, %v1814_v16, 0.0 }
 0x289   :  { %1815 = vpow2.f32 %v843_v17  ;;  %852 = vadd.xlane.f32.xlu0 %v851_v11 }
 0x28f   :  { %v1816_v18 = vpop.eup %1815 }
 0x290   :  { %v854_v20 = vsel %vm820_vm15, %v1816_v18, 0.0 }
 0x291   :  { %855 = vadd.xlane.f32.xlu1 %v854_v20 }
 0x299   :  { %1785 = vrot.lane.b32.xlu2 %v1784_v21, %s1910_s29 }
 0x2ec   :  { %v847_v22 = vpop.xlane.xlu2 %846 }
 0x2f4   :  { %v850_v8 = vpop.xlane.xlu2 %849 }
 0x2f5   :  { %1817 = vrcp.f32 %v850_v8 }
 0x2f6   :  { %1819 = vrcp.f32 %v847_v22 }
 0x2fb   :  { %v1818_v23 = vpop.eup %1817 }
 0x2fc   :  { %v1786_v10 = vpop.permute.xlu2 %1785  ;;  %v1820_v27 = vpop.eup %1819  ;;  %v862_v28 = vmul.f32 %v1818_v23, %v1812_v7 }
 0x2fd   :  { %v1788_v24 = vunpack.i.h.bf16 %v1786_v10  ;;  %v1787_v25 = vunpack.i.l.bf16 %v1786_v10  ;;  %v861_v55 = vmul.f32 %v1820_v27, %v1810_v62  ;;  %v853_v15 = vpop.xlane.xlu0 %852  ;;  %v1734_v62 = vld [vmem:[%s2639_s8 + $0x60] sm:$0xff] }
 0x2ff   :  { %v774_v46 = vsel %vm725_vm13, %v701_v49, %v1787_v25  ;;  %v775_v50 = vsel %vm725_vm13, %v702_v52, %v1788_v24  ;;  %v865_v30 = vpack.c.bf16 %v862_v28, %v861_v55  ;;  %v1726_v49 = vld [vmem:[%s2639_s8 + $0x20] sm:$0xff]  ;;  %v1725_v52 = vld [vmem:[%s2639_s8 + $0x18] sm:$0xff] }
 0x300   :  { %v778_v48 = vpack.c.bf16 %v775_v50, %v774_v46  ;;  %1071 = vmatpush.bf16.msra.mxu2 %v1726_v49  ;;  %v1745_v28 = vld [vmem:[%s2643_s12 + $0x38] sm:$0xff]  ;;  %v1744_v46 = vld [vmem:[%s2643_s12 + $0x30] sm:$0xff]  ;;  %v1789_v50 = vld [vmem:[%s2640_s9] ss:$0 sm:$0xff] }
 0x301   :  { %1201 = vmatpush.bf16.msra.mxu0 %v1745_v28 }
 0x302   :  { %880 = vmatpush.bf16.msrb.mxu3 %v778_v48  ;;  %v1743_v48 = vld [vmem:[%s2643_s12 + $0x28] sm:$0xff] }
 0x304   :  { %v856_v38 = vpop.xlane.xlu1 %855  ;;  %1072 = vmatpush.bf16.msra.mxu2 %v1725_v52 }
 0x305   :  { %1544 = vmatmul.msk.bf16.vlgmr.msrb.gmra.mxu3 %vm820_vm15, %v865_v30  ;;  %1821 = vrcp.f32 %v856_v38  ;;  %1202 = vmatpush.bf16.msra.mxu0 %v1744_v46 }
 0x306   :  { %1823 = vrcp.f32 %v853_v15  ;;  %1081 = vmatpush.bf16.msra.mxu3 %v1737_v57  ;;  %v1742_v15 = vld [vmem:[%s2643_s12 + $0x20] sm:$0xff] }
 0x308   :  { %1073 = vmatpush.bf16.msra.mxu2 %v1724_v51  ;;  %v1738_v51 = vld [vmem:[%s2643_s12] sm:$0xff] }
 0x309   :  { %1203 = vmatpush.bf16.msra.mxu0 %v1743_v48  ;;  %v1749_v48 = vld [vmem:[%s2646_s15 + $0x18] sm:$0xff] }
 0x30a   :  { %1082 = vmatpush.bf16.msra.mxu3 %v1736_v59 }
 0x30b   :  { %v1822_v31 = vpop.eup %1821 }
 0x30c   :  { %v1824_v32 = vpop.eup %1823  ;;  %v864_v34 = vmul.f32 %v1822_v31, %v1816_v18  ;;  %1074 = vmatpush.bf16.msra.mxu2 %v1723_v54 }
 0x30d   :  { %v863_v42 = vmul.f32 %v1824_v32, %v1814_v16  ;;  %1204 = vmatpush.bf16.msra.mxu0 %v1742_v15 }
 0x30e   :  { %1083 = vmatpush.bf16.msra.mxu3 %v1735_v60 }
 0x30f   :  { %v866_v19 = vpack.c.bf16 %v864_v34, %v863_v42 }
 0x310   :  { %1075 = vmatpush.bf16.msra.mxu2 %v1722_v58 }
 0x312   :  { %1084 = vmatpush.bf16.msra.mxu3 %v1734_v62 }
 0x315   :  { %1545 = vmatmul.msk.bf16.gmra.mxu3 %vm820_vm15, %v866_v19  ;;  %v1741_v19 = vld [vmem:[%s2643_s12 + $0x18] sm:$0xff] }
 0x316   :  { %1085 = vmatpush.bf16.msra.mxu3 %v1733_v56  ;;  %1205 = vmatpush.bf16.msra.mxu0 %v1741_v19 }
 0x31a   :  { %1086 = vmatpush.bf16.msra.mxu3 %v1732_v1 }
 0x31e   :  { %1087 = vmatpush.bf16.msra.mxu3 %v1731_v5 }
 0x322   :  { %1088 = vmatpush.bf16.msra.mxu3 %v1730_v9 }
 0x388   :  { %v882_v37 = vpop.f32.mrf.mxu3 }
 0x389   :  { %v893_v39 = vrot.slane %v882_v37, 4 }
 0x38b   :  { %894 = vrot.lane.b32.xlu0 %v893_v39, %s1910_s29 }
 0x390   :  { %v884_v40 = vpop.f32.mrf.mxu3 }
 0x391   :  { %v898_v45 = vrot.slane %v884_v40, 4 }
 0x398   :  { %v887_v29 = vpop.f32.mrf.mxu3 }
 0x399   :  { %v905_v41 = vrot.slane %v887_v29, 4 }
 0x39b   :  { %906 = vrot.lane.b32.xlu2 %v905_v41, %s1910_s29 }
 0x3a0   :  { %v889_v43 = vpop.f32.mrf.mxu3 }
 0x3a1   :  { %v910_v47 = vrot.slane %v889_v43, 4 }
 0x3a3   :  { %899 = vrot.lane.b32.xlu2 %v898_v45, %s1910_s29  ;;  %911 = vrot.lane.b32.xlu1 %v910_v47, %s1910_s29  ;;  %v1739_v47 = vld [vmem:[%s2643_s12 + $0x8] sm:$0xff] }
 0x3f5   :  { %v907_v44 = vpop.permute.xlu2 %906 }
 0x3f6   :  { %v914_v63 = vsel %vm780_vm14, %v887_v29, %v907_v44 }
 0x3f7   :  { %v918_v2 = vrot.slane %v914_v63, 4 }
 0x3fd   :  { %v895_v3 = vpop.permute.xlu0 %894  ;;  %v900_v53 = vpop.permute.xlu2 %899 }
 0x3fe   :  { %v902_v4 = vsel %vm780_vm14, %v882_v37, %v895_v3  ;;  %v903_v18 = vsel %vm780_vm14, %v884_v40, %v900_v53  ;;  %v1740_v40 = vld [vmem:[%s2643_s12 + $0x10] sm:$0xff] }
 0x3ff   :  { %v922_v6 = vsel %vm725_vm13, %v902_v4, %v918_v2  ;;  %1206 = vmatpush.bf16.msra.mxu0 %v1740_v40  ;;  %v1790_v4 = vld [vmem:[%s2641_s10] ss:$0 sm:$0xff]  ;;  %v1752_v53 = vld [vmem:[%s2646_s15 + $0x30] sm:$0xff] }
 0x400   :  { %v924_v7 = vadd.f32 3.0, %v922_v6 }
 0x402   :  { %v926_v61 = vmax.f32 %v924_v7, 0.0  ;;  %v1791_v7 = vld [vmem:[%s2642_s11] ss:$0 sm:$0xff] }
 0x403   :  { %1207 = vmatpush.bf16.msra.mxu0 %v1739_v47  ;;  %v1793_v47 = vld [vmem:[#allocation4] ss:$0 sm:$0xff] }
 0x404   :  { %v928_v33 = vmin.f32 %v926_v61, 6.0 }
 0x406   :  { %v930_v12 = vmul.f32 %v928_v33, %v922_v6  ;;  %v1829_v33 = vld [vmem:[%s2654_s18] sm:$0xff] }
 0x407   :  { %1208 = vmatpush.bf16.msra.mxu0 %v1738_v51 }
 0x408   :  { %v932_v13 = vmul.f32 0.16666667, %v930_v12 }
 0x40a   :  { %v934_v14 = vpack.c.bf16 %v932_v13, %v932_v13 }
 0x40c   :  { %1076 = vmatmul.bf16.vlgmr.msra.gmra.mxu2 %v934_v14  ;;  %v1753_v14 = vld [vmem:[%s2646_s15 + $0x38] sm:$0xff] }
 0x40d   :  { %1329 = vmatpush.bf16.msra.mxu1 %v1753_v14 }
 0x411   :  { %1330 = vmatpush.bf16.msra.mxu1 %v1752_v53 }
 0x415   :  { %v912_v16 = vpop.permute.xlu1 %911 }
 0x416   :  { %v915_v17 = vsel %vm780_vm14, %v889_v43, %v912_v16 }
 0x417   :  { %v919_v11 = vrot.slane %v915_v17, 4 }
 0x419   :  { %v923_v20 = vsel %vm725_vm13, %v903_v18, %v919_v11 }
 0x41a   :  { %v925_v21 = vadd.f32 3.0, %v923_v20 }
 0x41c   :  { %v927_v22 = vmax.f32 %v925_v21, 0.0  ;;  %v1751_v21 = vld [vmem:[%s2646_s15 + $0x28] sm:$0xff] }
 0x41d   :  { %1331 = vmatpush.bf16.msra.mxu1 %v1751_v21 }
 0x41e   :  { %v929_v8 = vmin.f32 %v927_v22, 6.0 }
 0x420   :  { %v931_v23 = vmul.f32 %v929_v8, %v923_v20 }
 0x422   :  { %v933_v10 = vmul.f32 0.16666667, %v931_v23 }
 0x424   :  { %v935_v24 = vpack.c.bf16 %v933_v10, %v933_v10 }
 0x426   :  { %1089 = vmatmul.bf16.vlgmr.msra.gmra.mxu3 %v935_v24  ;;  %v1750_v24 = vld [vmem:[%s2646_s15 + $0x20] sm:$0xff] }
 0x427   :  { %1332 = vmatpush.bf16.msra.mxu1 %v1750_v24 }
 0x42b   :  { %1333 = vmatpush.bf16.msra.mxu1 %v1749_v48 }
 0x48f   :  { %v1077_v25 = vpop.f32.mrf.mxu2 }
 0x490   :  { %v1078_v55 = vadd.f32 %v1789_v50, %v1077_v25 }
 0x497   :  { %v1079_v27 = vpop.f32.mrf.mxu2 }
 0x4a9   :  { %v1090_v30 = vpop.f32.mrf.mxu3 }
 0x4aa   :  { %v1091_v38 = vadd.f32 %v1090_v30, %v1078_v55 }
 0x4ac   :  { %v1096_v31 = vrot.slane %v1091_v38, 4  ;;  %v1103_v32 = vmul.f32 %v1091_v38, %v1091_v38 }
 0x4ae   :  { %v1097_v34 = vadd.f32 %v1096_v31, %v1091_v38  ;;  %v1104_v42 = vrot.slane %v1103_v32, 4 }
 0x4b0   :  { %v1098_v35 = vrot.slane %v1097_v34, 2  ;;  %v1105_v36 = vadd.f32 %v1104_v42, %v1103_v32 }
 0x4b1   :  { %v1092_v37 = vpop.f32.mrf.mxu3 }
 0x4b2   :  { %v1099_v39 = vadd.f32 %v1098_v35, %v1097_v34  ;;  %v1106_v26 = vrot.slane %v1105_v36, 2  ;;  %v1747_v34 = vld [vmem:[%s2646_s15 + $0x8] sm:$0xff]  ;;  %v1746_v35 = vld [vmem:[%s2646_s15] sm:$0xff] }
 0x4b4   :  { %v1100_v29 = vrot.slane %v1099_v39, 1  ;;  %v1107_v41 = vadd.f32 %v1106_v26, %v1105_v36 }
 0x4b6   :  { %v1101_v43 = vadd.f32 %v1100_v29, %v1099_v39  ;;  %v1108_v45 = vrot.slane %v1107_v41, 1 }
 0x4b8   :  { %v1102_v49 = vmul.f32 %v1101_v43, %v2230_v0  ;;  %v1109_v52 = vadd.f32 %v1108_v45, %v1107_v41  ;;  %v1792_v41 = vld [vmem:[#allocation2] ss:$0 sm:$0xff] }
 0x4ba   :  { %v1110_v54 = vmul.f32 %v1109_v52, %v2230_v0  ;;  %v1111_v57 = vmul.f32 %v1102_v49, %v1102_v49  ;;  %v1114_v3 = vsub.f32 %v1091_v38, %v1102_v49  ;;  %v1748_v38 = vld [vmem:[%s2646_s15 + $0x10] sm:$0xff] }
 0x4bb   :  { %1334 = vmatpush.bf16.msra.mxu1 %v1748_v38 }
 0x4bc   :  { %v1112_v58 = vsub.f32 %v1110_v54, %v1111_v57 }
 0x4be   :  { %v1113_v59 = vmax.f32 %v1112_v58, 0.0 }
 0x4bf   :  { %1335 = vmatpush.bf16.msra.mxu1 %v1747_v34 }
 0x4c0   :  { %v1115_v60 = vadd.f32 1e-05, %v1113_v59 }
 0x4c2   :  { %1825 = vrsqrt.f32 %v1115_v60  ;;  %vm1122_vm7 = vweird.f32 %v1115_v60 }
 0x4c3   :  { %1336 = vmatpush.bf16.msra.mxu1 %v1746_v35 }
 0x4c8   :  { %v1826_v62 = vpop.eup %1825 }
 0x4c9   :  { %v1117_v56 = vmul.f32 %v1826_v62, %v1115_v60  ;;  %vm1123_vm6 = vweird.f32 %v1826_v62 }
 0x4ca   :  { %vm1124_vm8 = vmor %vm1122_vm7, %vm1123_vm6 }
 0x4cb   :  { %v1118_v44 = vmul.f32 %v1826_v62, %v1117_v56 }
 0x4cd   :  { %v1119_v63 = vmul.f32 0.5, %v1118_v44 }
 0x4cf   :  { %v1120_v1 = vsub.f32 1.5, %v1119_v63 }
 0x4d1   :  { %v1121_v2 = vmul.f32 %v1826_v62, %v1120_v1 }
 0x4d3   :  { %v1125_v5 = vsel %vm1124_vm8, %v1826_v62, %v1121_v2  ;;  %v1794_v62 = vld [vmem:[#allocation6] ss:$0 sm:$0xff] }
 0x4d4   :  { %v1126_v6 = vmul.f32 %v1125_v5, %v1114_v3 }
 0x4d6   :  { %v1130_v9 = vmul.f32 %v1790_v4, %v1126_v6 }
 0x4d8   :  { %v1134_v61 = vadd.f32 %v1791_v7, %v1130_v9 }
 0x4da   :  { %v2597_v12 = vadd.f32 %v1829_v33, %v1134_v61 }
 0x4dc   :  { %v1136_v13 = vpack.c.bf16 %v2597_v12, %v2597_v12 }
 0x4de   :  { %1209 = vmatmul.bf16.vlgmr.msra.gmra.mxu0 %v1136_v13 }
 0x55b   :  { %v1210_v16 = vpop.f32.mrf.mxu0 }
 0x55c   :  { %v1216_v17 = vrot.slane %v1210_v16, 4  ;;  %v1223_v11 = vmul.f32 %v1210_v16, %v1210_v16 }
 0x55e   :  { %v1217_v18 = vadd.f32 %v1216_v17, %v1210_v16  ;;  %v1224_v20 = vrot.slane %v1223_v11, 4 }
 0x560   :  { %v1218_v22 = vrot.slane %v1217_v18, 2  ;;  %v1225_v8 = vadd.f32 %v1224_v20, %v1223_v11 }
 0x562   :  { %v1219_v23 = vadd.f32 %v1218_v22, %v1217_v18  ;;  %v1226_v10 = vrot.slane %v1225_v8, 2 }
 0x563   :  { %v1212_v25 = vpop.f32.mrf.mxu0 }
 0x564   :  { %v1220_v27 = vrot.slane %v1219_v23, 1  ;;  %v1227_v28 = vadd.f32 %v1226_v10, %v1225_v8 }
 0x566   :  { %v1221_v46 = vadd.f32 %v1220_v27, %v1219_v23  ;;  %v1228_v50 = vrot.slane %v1227_v28, 1 }
 0x568   :  { %v1222_v55 = vmul.f32 %v1221_v46, %v2230_v0  ;;  %v1229_v30 = vadd.f32 %v1228_v50, %v1227_v28 }
 0x56a   :  { %v1230_v15 = vmul.f32 %v1229_v30, %v2230_v0  ;;  %v1231_v31 = vmul.f32 %v1222_v55, %v1222_v55  ;;  %v1234_v29 = vsub.f32 %v1210_v16, %v1222_v55 }
 0x56c   :  { %v1232_v32 = vsub.f32 %v1230_v15, %v1231_v31 }
 0x56e   :  { %v1233_v42 = vmax.f32 %v1232_v32, 0.0 }
 0x570   :  { %v1235_v19 = vadd.f32 1e-05, %v1233_v42 }
 0x572   :  { %1827 = vrsqrt.f32 %v1235_v19  ;;  %vm1242_vm10 = vweird.f32 %v1235_v19 }
 0x578   :  { %v1828_v36 = vpop.eup %1827 }
 0x579   :  { %v1237_v37 = vmul.f32 %v1828_v36, %v1235_v19  ;;  %vm1243_vm9 = vweird.f32 %v1828_v36 }
 0x57a   :  { %vm1244_vm11 = vmor %vm1242_vm10, %vm1243_vm9 }
 0x57b   :  { %v1238_v39 = vmul.f32 %v1828_v36, %v1237_v37 }
 0x57d   :  { %v1239_v0 = vmul.f32 0.5, %v1238_v39 }
 0x57f   :  { %v1240_v26 = vsub.f32 1.5, %v1239_v0 }
 0x581   :  { %v1241_v40 = vmul.f32 %v1828_v36, %v1240_v26 }
 0x583   :  { %v1245_v43 = vsel %vm1244_vm11, %v1828_v36, %v1241_v40 }
 0x584   :  { %v1246_v45 = vmul.f32 %v1245_v43, %v1234_v29 }
 0x586   :  { %v1250_v49 = vmul.f32 %v1792_v41, %v1246_v45 }
 0x588   :  { %v1254_v52 = vadd.f32 %v1793_v47, %v1250_v49 }
 0x58a   :  { %v1255_v51 = vadd.f32 3.0, %v1254_v52 }
 0x58c   :  { %v1256_v54 = vmax.f32 %v1255_v51, 0.0 }
 0x58e   :  { %v1257_v57 = vmin.f32 %v1256_v54, 6.0 }
 0x590   :  { %v1258_v58 = vmul.f32 %v1257_v57, %v1254_v52 }
 0x592   :  { %v1259_v59 = vmul.f32 0.16666667, %v1258_v58 }
 0x594   :  { %v1260_v60 = vpack.c.bf16 %v1259_v59, %v1259_v59 }
 0x596   :  { %1337 = vmatmul.bf16.vlgmr.msra.gmra.mxu1 %v1260_v60 }
 0x613   :  { %v1338_v56 = vpop.f32.mrf.mxu1 }
 0x614   :  { %v1339_v44 = vadd.f32 %v1794_v62, %v1338_v56 }
 0x616   :  { %v1342_v63 = vadd.f32 %v1339_v44, %v2597_v12 }
 0x618   :  { %1343 = vst [vmem:[%s2648_s17] sm:$0xff] %v1342_v63 }
 0x61b   :  { %v1340_v1 = vpop.f32.mrf.mxu1 }
 0x61c   :  { %1348 = vsyncpa [#allocation3], 1 }
 0x61d   :  { %1349 = vsyncpa [#allocation5], 1 }

// kernel: _lambda_.18
= control target key start
LH: loop header
LB: loop body
LE: loop exit
PB: predicated region body
PF: predicated region fallthrough
CT: control target
= control target key end

     0   :  { %10 = vsyncpa [#allocation3], 0  ;;  %s397_s0 = inlined_call_operand.vmem [shape: f32[2,128], index: 0, kind: input, shape index: {}]   ;;  %s398_s1 = inlined_call_operand.vmem [shape: bf16[128,128], index: 1, kind: input, shape index: {}]   ;;  %s399_s2 = inlined_call_operand.hbm [shape: f32[1,128], index: 2, kind: input, shape index: {}]   ;;  %s400_s3 = inlined_call_operand.hbm [shape: f32[1,128], index: 3, kind: input, shape index: {}]   ;;  %s401_s4 = inlined_call_operand.hbm [shape: f32[1,128], index: 4, kind: input, shape index: {}]   ;;  %s402_s5 = inlined_call_operand.vmem [shape: f32[2,128], index: 5, kind: output, shape index: {}]  }
   0x1   :  { %11 = vsyncpa [#allocation5], 0  ;;  %s32_s20 = sshll.u32 %s400_s3, 4  ;;  %s324_s21 = smov [#allocation4]   ;;  %s33_s20 = int_to_ptr.hbm [resolvable:$true] %s32_s20 }
   0x2   :  { %s34_s22 = sshll.u32 %s324_s21, 4  ;;  %s21_s25 = sshll.u32 %s399_s2, 4  ;;  %s35_s22 = int_to_ptr.vmem [resolvable:$true] %s34_s22  ;;  %s22_s25 = int_to_ptr.hbm [resolvable:$true] %s21_s25 }
   0x3   :  { %37 = dma.hbm_to_vmem [thread:$0]  %s33_s20, 16, %s35_s22, [#allocation5]  }
   0x4   :  { %s325_s26 = smov [#allocation2]   ;;  %s43_s30 = sshll.u32 %s401_s4, 4  ;;  %s44_s30 = int_to_ptr.hbm [resolvable:$true] %s43_s30 }
   0x5   :  { %s23_s27 = sshll.u32 %s325_s26, 4  ;;  %s326_s3 = smov [#allocation6]   ;;  %s24_s27 = int_to_ptr.vmem [resolvable:$true] %s23_s27 }
   0x6   :  { %26 = dma.hbm_to_vmem [thread:$0]  %s22_s25, 16, %s24_s27, [#allocation3]  }
   0x7   :  { %s45_s6 = sshll.u32 %s326_s3, 4  ;;  %s46_s6 = int_to_ptr.vmem [resolvable:$true] %s45_s6 }
   0x8   :  { %48 = dma.hbm_to_vmem [thread:$0]  %s44_s30, 16, %s46_s6, [#allocation5]  }
   0x9   :  { %320 = dma.done.wait [#allocation3], 16  }
   0xa   :  { %321 = vsyncadd [#allocation3], 4294967280 }
   0xb   :  { %322 = dma.done.wait [#allocation5], 32  }
   0xc   :  { %323 = vsyncadd [#allocation5], 4294967264  ;;  %v236_v0 = vld [vmem:[%s398_s1 + $0x38] sm:$0xff]  ;;  %v235_v1 = vld [vmem:[%s398_s1 + $0x30] sm:$0xff]  ;;  %vm149_vm1 = vcmask 1041408   ;;  %v327_v19 = vmov 32.0  }
   0xd   :  { %131 = vmatpush.bf16.msra.mxu0 %v236_v0  ;;  %v234_v2 = vld [vmem:[%s398_s1 + $0x28] sm:$0xff]  ;;  %v233_v3 = vld [vmem:[%s398_s1 + $0x20] sm:$0xff]  ;;  %v232_v4 = vld [vmem:[%s398_s1 + $0x18] sm:$0xff]  ;;  %244 = vrcp.f32 %v327_v19 }
   0xe   :  { %v231_v5 = vld [vmem:[%s398_s1 + $0x10] sm:$0xff]  ;;  %v230_v6 = vld [vmem:[%s398_s1 + $0x8] sm:$0xff]  ;;  %v229_v7 = vld [vmem:[%s398_s1] sm:$0xff] }
   0xf   :  { %v61_v8 = vld [vmem:[%s397_s0] sm:$0x3]  ;;  %v242_v41 = vld [vmem:[#allocation4] ss:$0 sm:$0xff]  ;;  %v243_v43 = vld [vmem:[#allocation6] ss:$0 sm:$0xff] }
  0x10   :  { %v62_v9 = vpack.c.bf16 %v61_v8, %v61_v8  ;;  %v241_v10 = vld [vmem:[#allocation2] ss:$0 sm:$0xff] }
  0x11   :  { %132 = vmatpush.bf16.msra.mxu0 %v235_v1 }
  0x13   :  { %v245_v20 = vpop.eup %244 }
  0x14   :  { %v154_v21 = vmul.f32 32.0, %v245_v20  ;;  %vm158_vm2 = vweird.f32 %v245_v20 }
  0x15   :  { %133 = vmatpush.bf16.msra.mxu0 %v234_v2 }
  0x16   :  { %v155_v22 = vsub.f32 1.0, %v154_v21 }
  0x18   :  { %v156_v23 = vmul.f32 %v245_v20, %v155_v22 }
  0x19   :  { %134 = vmatpush.bf16.msra.mxu0 %v233_v3 }
  0x1a   :  { %v157_v24 = vadd.f32 %v245_v20, %v156_v23 }
  0x1c   :  { %v159_v26 = vsel %vm158_vm2, %v245_v20, %v157_v24 }
  0x1d   :  { %135 = vmatpush.bf16.msra.mxu0 %v232_v4 }
  0x21   :  { %136 = vmatpush.bf16.msra.mxu0 %v231_v5 }
  0x25   :  { %137 = vmatpush.bf16.msra.mxu0 %v230_v6 }
  0x29   :  { %138 = vmatpush.bf16.msra.mxu0 %v229_v7 }
  0x2c   :  { %139 = vmatmul.bf16.vlgmr.msra.gmra.mxu0 %v62_v9 }
  0xa9   :  { %v140_v11 = vpop.f32.mrf.mxu0 }
  0xaa   :  { %v141_v12 = vadd.f32 %v241_v10, %v140_v11 }
  0xac   :  { %v145_v13 = vmul.f32 0.05, %v141_v12  ;;  %vm144_vm0 = vcmp.ge.f32.partialorder %v141_v12, 0.0 }
  0xae   :  { %v146_v14 = vsel %vm144_vm0, %v141_v12, %v145_v13 }
  0xaf   :  { %v150_v15 = vsel %vm149_vm1, %v146_v14, 0.0  ;;  %v161_v17 = vmul.f32 %v146_v14, %v146_v14 }
  0xb0   :  { %151 = vadd.xlane.f32.xlu0 %v150_v15 }
  0xb1   :  { %v142_v16 = vpop.f32.mrf.mxu0  ;;  %v162_v18 = vsel %vm149_vm1, %v161_v17, 0.0 }
  0xb8   :  { %163 = vadd.xlane.f32.xlu0 %v162_v18 }
 0x123   :  { %v152_v25 = vpop.xlane.xlu0 %151 }
 0x124   :  { %v160_v27 = vmul.f32 %v159_v26, %v152_v25 }
 0x126   :  { %v166_v29 = vmul.f32 %v160_v27, %v160_v27  ;;  %v169_v40 = vsub.f32 %v146_v14, %v160_v27 }
 0x12b   :  { %v164_v28 = vpop.xlane.xlu0 %163 }
 0x12c   :  { %v165_v30 = vmul.f32 %v164_v28, %v159_v26 }
 0x12e   :  { %v167_v31 = vsub.f32 %v165_v30, %v166_v29 }
 0x130   :  { %v168_v32 = vmax.f32 %v167_v31, 0.0 }
 0x132   :  { %v170_v33 = vadd.f32 1e-05, %v168_v32 }
 0x134   :  { %246 = vrsqrt.f32 %v170_v33  ;;  %vm177_vm4 = vweird.f32 %v170_v33 }
 0x13a   :  { %v247_v34 = vpop.eup %246 }
 0x13b   :  { %v172_v35 = vmul.f32 %v247_v34, %v170_v33  ;;  %vm178_vm3 = vweird.f32 %v247_v34 }
 0x13c   :  { %vm179_vm5 = vmor %vm177_vm4, %vm178_vm3 }
 0x13d   :  { %v173_v36 = vmul.f32 %v247_v34, %v172_v35 }
 0x13f   :  { %v174_v37 = vmul.f32 0.5, %v173_v36 }
 0x141   :  { %v175_v38 = vsub.f32 1.5, %v174_v37 }
 0x143   :  { %v176_v39 = vmul.f32 %v247_v34, %v175_v38 }
 0x145   :  { %v180_v42 = vsel %vm179_vm5, %v247_v34, %v176_v39 }
 0x146   :  { %v181_v44 = vmul.f32 %v180_v42, %v169_v40 }
 0x148   :  { %v185_v45 = vmul.f32 %v242_v41, %v181_v44 }
 0x14a   :  { %v189_v46 = vadd.f32 %v243_v43, %v185_v45 }
 0x14c   :  { %190 = vst [vmem:[%s402_s5] sm:$0x3] %v189_v46 }
 0x14d   :  { %195 = vsyncpa [#allocation3], 1 }
 0x14e   :  { %196 = vsyncpa [#allocation5], 1 }

// kernel: _lambda_.21
= control target key start
LH: loop header
LB: loop body
LE: loop exit
PB: predicated region body
PF: predicated region fallthrough
CT: control target
= control target key end

     0   :  { %s205_s1 = inlined_call_operand.vmem [shape: bf16[128,128], index: 1, kind: input, shape index: {}]   ;;  %s206_s2 = inlined_call_operand.vmem [shape: f32[1,128], index: 2, kind: input, shape index: {}]   ;;  %s207_s0 = inlined_call_operand.vmem [shape: f32[12,128], index: 0, kind: input, shape index: {}]   ;;  %s208_s3 = inlined_call_operand.vmem [shape: f32[12,128], index: 3, kind: output, shape index: {}]  }
   0x1   :  { %v144_v0 = vld [vmem:[%s205_s1 + $0x38] sm:$0xff]  ;;  %v143_v1 = vld [vmem:[%s205_s1 + $0x30] sm:$0xff]  ;;  %v142_v2 = vld [vmem:[%s205_s1 + $0x28] sm:$0xff] }
   0x2   :  { %85 = vmatpush.bf16.msra.mxu0 %v144_v0  ;;  %v141_v3 = vld [vmem:[%s205_s1 + $0x20] sm:$0xff]  ;;  %v140_v4 = vld [vmem:[%s205_s1 + $0x18] sm:$0xff]  ;;  %v139_v5 = vld [vmem:[%s205_s1 + $0x10] sm:$0xff] }
   0x3   :  { %v138_v6 = vld [vmem:[%s205_s1 + $0x8] sm:$0xff]  ;;  %v137_v7 = vld [vmem:[%s205_s1] sm:$0xff] }
   0x4   :  { %v14_v8 = vld [vmem:[%s207_s0] sm:$0xff]  ;;  %v15_v9 = vld [vmem:[%s207_s0 + $0x8] sm:$0xf] }
   0x5   :  { %v16_v10 = vpack.c.bf16 %v15_v9, %v14_v8  ;;  %v145_v11 = vld [vmem:[%s206_s2] ss:$0 sm:$0xff] }
   0x6   :  { %86 = vmatpush.bf16.msra.mxu0 %v143_v1 }
   0xa   :  { %87 = vmatpush.bf16.msra.mxu0 %v142_v2 }
   0xe   :  { %88 = vmatpush.bf16.msra.mxu0 %v141_v3 }
  0x12   :  { %89 = vmatpush.bf16.msra.mxu0 %v140_v4 }
  0x16   :  { %90 = vmatpush.bf16.msra.mxu0 %v139_v5 }
  0x1a   :  { %91 = vmatpush.bf16.msra.mxu0 %v138_v6 }
  0x1e   :  { %92 = vmatpush.bf16.msra.mxu0 %v137_v7 }
  0x21   :  { %93 = vmatmul.bf16.vlgmr.msra.gmra.mxu0 %v16_v10 }
  0x9e   :  { %v94_v12 = vpop.f32.mrf.mxu0 }
  0x9f   :  { %v95_v13 = vadd.f32 %v145_v11, %v94_v12 }
  0xa1   :  { %99 = vst [vmem:[%s208_s3] sm:$0xff] %v95_v13 }
  0xa6   :  { %v96_v14 = vpop.f32.mrf.mxu0 }
  0xa7   :  { %v97_v15 = vadd.f32 %v145_v11, %v96_v14 }
  0xa9   :  { %100 = vst [vmem:[%s208_s3 + $0x8] sm:$0xf] %v97_v15 }

// kernel: _lambda_.20
= control target key start
LH: loop header
LB: loop body
LE: loop exit
PB: predicated region body
PF: predicated region fallthrough
CT: control target
= control target key end

     0   :  { %vm116_vm0 = vcmask 1043456   ;;  %v236_v24 = vmov 32.0   ;;  %s329_s1 = inlined_call_operand.vmem [shape: bf16[128,128], index: 1, kind: input, shape index: {}]   ;;  %s330_s2 = inlined_call_operand.vmem [shape: f32[1,128], index: 2, kind: input, shape index: {}]   ;;  %s331_s0 = inlined_call_operand.vmem [shape: f32[12,128], index: 0, kind: input, shape index: {}]   ;;  %s332_s4 = inlined_call_operand.vmem [shape: f32[1,128], index: 4, kind: input, shape index: {}]   ;;  %s333_s5 = inlined_call_operand.vmem [shape: f32[1,128], index: 5, kind: input, shape index: {}]   ;;  %s334_s3 = inlined_call_operand.vmem [shape: f32[12,128], index: 3, kind: input, shape index: {}]   ;;  %s335_s6 = inlined_call_operand.vmem [shape: f32[12,128], index: 6, kind: output, shape index: {}]  }
   0x1   :  { %v225_v0 = vld [vmem:[%s329_s1 + $0x38] sm:$0xff]  ;;  %v224_v1 = vld [vmem:[%s329_s1 + $0x30] sm:$0xff]  ;;  %v223_v2 = vld [vmem:[%s329_s1 + $0x28] sm:$0xff]  ;;  %230 = vrcp.f32 %v236_v24 }
   0x2   :  { %94 = vmatpush.bf16.msra.mxu0 %v225_v0  ;;  %v222_v3 = vld [vmem:[%s329_s1 + $0x20] sm:$0xff]  ;;  %v221_v4 = vld [vmem:[%s329_s1 + $0x18] sm:$0xff]  ;;  %v220_v5 = vld [vmem:[%s329_s1 + $0x10] sm:$0xff] }
   0x3   :  { %v219_v6 = vld [vmem:[%s329_s1 + $0x8] sm:$0xff]  ;;  %v218_v7 = vld [vmem:[%s329_s1] sm:$0xff] }
   0x4   :  { %v23_v8 = vld [vmem:[%s331_s0] sm:$0xff]  ;;  %v24_v9 = vld [vmem:[%s331_s0 + $0x8] sm:$0xf] }
   0x5   :  { %v25_v10 = vpack.c.bf16 %v24_v9, %v23_v8  ;;  %v227_v11 = vld [vmem:[%s330_s2] ss:$0 sm:$0xff]  ;;  %v109_v18 = vld [vmem:[%s334_s3 + $0x8] sm:$0xf] }
   0x6   :  { %95 = vmatpush.bf16.msra.mxu0 %v224_v1  ;;  %v108_v13 = vld [vmem:[%s334_s3] sm:$0xff] }
   0x7   :  { %v231_v25 = vpop.eup %230  ;;  %v228_v55 = vld [vmem:[%s332_s4] ss:$0 sm:$0xff] }
   0x8   :  { %v121_v26 = vmul.f32 32.0, %v231_v25  ;;  %vm125_vm1 = vweird.f32 %v231_v25  ;;  %v229_v58 = vld [vmem:[%s333_s5] ss:$0 sm:$0xff] }
   0xa   :  { %96 = vmatpush.bf16.msra.mxu0 %v223_v2  ;;  %v122_v27 = vsub.f32 1.0, %v121_v26 }
   0xc   :  { %v123_v28 = vmul.f32 %v231_v25, %v122_v27 }
   0xe   :  { %97 = vmatpush.bf16.msra.mxu0 %v222_v3  ;;  %v124_v29 = vadd.f32 %v231_v25, %v123_v28 }
  0x10   :  { %v126_v30 = vsel %vm125_vm1, %v231_v25, %v124_v29 }
  0x12   :  { %98 = vmatpush.bf16.msra.mxu0 %v221_v4 }
  0x16   :  { %99 = vmatpush.bf16.msra.mxu0 %v220_v5 }
  0x1a   :  { %100 = vmatpush.bf16.msra.mxu0 %v219_v6 }
  0x1e   :  { %101 = vmatpush.bf16.msra.mxu0 %v218_v7 }
  0x21   :  { %102 = vmatmul.bf16.vlgmr.msra.gmra.mxu0 %v25_v10 }
  0x9e   :  { %v103_v12 = vpop.f32.mrf.mxu0 }
  0x9f   :  { %v104_v14 = vadd.f32 %v227_v11, %v103_v12 }
  0xa1   :  { %v110_v15 = vadd.f32 %v108_v13, %v104_v14 }
  0xa3   :  { %114 = vadd.xlane.f32.xlu0 %v110_v15  ;;  %v129_v16 = vmul.f32 %v110_v15, %v110_v15 }
  0xa5   :  { %131 = vadd.xlane.f32.xlu1 %v129_v16 }
  0xa6   :  { %v105_v17 = vpop.f32.mrf.mxu0 }
  0xa7   :  { %v106_v19 = vadd.f32 %v227_v11, %v105_v17 }
  0xa9   :  { %v311_v20 = vadd.f32 %v109_v18, %v106_v19 }
  0xab   :  { %v117_v21 = vsel %vm116_vm0, %v311_v20, 0.0  ;;  %v130_v22 = vmul.f32 %v311_v20, %v311_v20 }
  0xac   :  { %118 = vadd.xlane.f32.xlu0 %v117_v21 }
  0xad   :  { %v133_v23 = vsel %vm116_vm0, %v130_v22, 0.0 }
  0xae   :  { %134 = vadd.xlane.f32.xlu1 %v133_v23 }
 0x116   :  { %v115_v31 = vpop.xlane.xlu0 %114 }
 0x117   :  { %v127_v32 = vmul.f32 %v126_v30, %v115_v31 }
 0x118   :  { %v132_v33 = vpop.xlane.xlu1 %131 }
 0x119   :  { %v138_v34 = vmul.f32 %v127_v32, %v127_v32  ;;  %v136_v35 = vmul.f32 %v132_v33, %v126_v30  ;;  %v144_v54 = vsub.f32 %v110_v15, %v127_v32 }
 0x11b   :  { %v140_v36 = vsub.f32 %v136_v35, %v138_v34 }
 0x11d   :  { %v142_v37 = vmax.f32 %v140_v36, 0.0 }
 0x11f   :  { %v146_v38 = vadd.f32 1e-05, %v142_v37  ;;  %v119_v39 = vpop.xlane.xlu0 %118 }
 0x120   :  { %v128_v40 = vmul.f32 %v126_v30, %v119_v39 }
 0x121   :  { %232 = vrsqrt.f32 %v146_v38  ;;  %v135_v41 = vpop.xlane.xlu1 %134  ;;  %vm154_vm3 = vweird.f32 %v146_v38 }
 0x122   :  { %v139_v42 = vmul.f32 %v128_v40, %v128_v40  ;;  %v137_v43 = vmul.f32 %v135_v41, %v126_v30  ;;  %v145_v2 = vsub.f32 %v311_v20, %v128_v40 }
 0x124   :  { %v141_v44 = vsub.f32 %v137_v43, %v139_v42 }
 0x126   :  { %v143_v45 = vmax.f32 %v141_v44, 0.0 }
 0x127   :  { %v233_v46 = vpop.eup %232 }
 0x128   :  { %v149_v47 = vmul.f32 %v233_v46, %v146_v38  ;;  %v147_v48 = vadd.f32 1e-05, %v143_v45  ;;  %vm155_vm2 = vweird.f32 %v233_v46 }
 0x129   :  { %vm156_vm4 = vmor %vm154_vm3, %vm155_vm2 }
 0x12a   :  { %v150_v49 = vmul.f32 %v233_v46, %v149_v47  ;;  %234 = vrsqrt.f32 %v147_v48  ;;  %vm164_vm6 = vweird.f32 %v147_v48 }
 0x12c   :  { %v151_v50 = vmul.f32 0.5, %v150_v49 }
 0x12e   :  { %v152_v51 = vsub.f32 1.5, %v151_v50 }
 0x130   :  { %v235_v52 = vpop.eup %234  ;;  %v153_v53 = vmul.f32 %v233_v46, %v152_v51 }
 0x131   :  { %v159_v56 = vmul.f32 %v235_v52, %v147_v48  ;;  %vm165_vm5 = vweird.f32 %v235_v52 }
 0x132   :  { %v157_v57 = vsel %vm156_vm4, %v233_v46, %v153_v53  ;;  %vm166_vm7 = vmor %vm164_vm6, %vm165_vm5 }
 0x133   :  { %v168_v59 = vmul.f32 %v157_v57, %v144_v54  ;;  %v160_v60 = vmul.f32 %v235_v52, %v159_v56 }
 0x135   :  { %v173_v61 = vmul.f32 %v228_v55, %v168_v59  ;;  %v161_v62 = vmul.f32 0.5, %v160_v60 }
 0x137   :  { %v178_v63 = vadd.f32 %v229_v58, %v173_v61  ;;  %v162_v0 = vsub.f32 1.5, %v161_v62 }
 0x139   :  { %180 = vst [vmem:[%s335_s6] sm:$0xff] %v178_v63  ;;  %v163_v1 = vmul.f32 %v235_v52, %v162_v0 }
 0x13b   :  { %v167_v3 = vsel %vm166_vm7, %v235_v52, %v163_v1 }
 0x13c   :  { %v169_v4 = vmul.f32 %v167_v3, %v145_v2 }
 0x13e   :  { %v174_v5 = vmul.f32 %v228_v55, %v169_v4 }
 0x140   :  { %v179_v6 = vadd.f32 %v229_v58, %v174_v5 }
 0x142   :  { %181 = vst [vmem:[%s335_s6 + $0x8] sm:$0xf] %v179_v6 }

// kernel: _lambda_.19
= control target key start
LH: loop header
LB: loop body
LE: loop exit
PB: predicated region body
PF: predicated region fallthrough
CT: control target
= control target key end

     0   :  { %vm167_vm0 = vcmask 1043456   ;;  %vm162_vm1 = vcmask 1045504   ;;  %vm176_vm2 = vcmask 1041408   ;;  %s1202_s22 = smov 96   ;;  %vm186_vm3 = vcmask 130048   ;;  %s1204_s29 = smov 16   ;;  %s1620_s2 = inlined_call_operand.vmem [shape: bf16[128,96], index: 2, kind: input, shape index: {}]   ;;  %s1621_s3 = inlined_call_operand.vmem [shape: f32[1,96], index: 3, kind: input, shape index: {}]   ;;  %s1622_s0 = inlined_call_operand.vmem [shape: f32[12,128], index: 0, kind: input, shape index: {}]   ;;  %s1623_s8 = inlined_call_operand.vmem [shape: f32[24,24], index: 8, kind: input, shape index: {}]   ;;  %s1624_s5 = inlined_call_operand.vmem [shape: f32[1,128], index: 5, kind: input, shape index: {}]   ;;  %s1625_s4 = inlined_call_operand.vmem [shape: bf16[32,128], index: 4, kind: input, shape index: {}]   ;;  %s1626_s11 = inlined_call_operand.vmem [shape: bf16[128,64], index: 11, kind: input, shape index: {}]   ;;  %s1627_s1 = inlined_call_operand.vmem [shape: f32[2,128], index: 1, kind: input, shape index: {}]   ;;  %s1628_s12 = inlined_call_operand.vmem [shape: f32[1,64], index: 12, kind: input, shape index: {}]   ;;  %s1629_s6 = inlined_call_operand.vmem [shape: f32[1,128], index: 6, kind: input, shape index: {}]   ;;  %s1630_s7 = inlined_call_operand.vmem [shape: f32[1,128], index: 7, kind: input, shape index: {}]   ;;  %s1631_s9 = inlined_call_operand.vmem [shape: bf16[128,32], index: 9, kind: input, shape index: {}]   ;;  %s1632_s10 = inlined_call_operand.vmem [shape: f32[1,32], index: 10, kind: input, shape index: {}]   ;;  %s1633_s17 = inlined_call_operand.vmem [shape: f32[24,4], index: 17, kind: input, shape index: {}]   ;;  %s1634_s14 = inlined_call_operand.vmem [shape: f32[1,128], index: 14, kind: input, shape index: {}]   ;;  %s1635_s13 = inlined_call_operand.vmem [shape: bf16[32,128], index: 13, kind: input, shape index: {}]   ;;  %s1636_s15 = inlined_call_operand.vmem [shape: f32[1,128], index: 15, kind: input, shape index: {}]   ;;  %s1637_s16 = inlined_call_operand.vmem [shape: f32[1,128], index: 16, kind: input, shape index: {}]   ;;  %s1638_s19 = inlined_call_operand.vmem [shape: f32[1,128], index: 19, kind: input, shape index: {}]   ;;  %s1639_s18 = inlined_call_operand.vmem [shape: bf16[128,128], index: 18, kind: input, shape index: {}]   ;;  %s1640_s20 = inlined_call_operand.vmem [shape: f32[12,128], index: 20, kind: output, shape index: {0}]   ;;  %s1641_s21 = inlined_call_operand.vmem [shape: f32[12,128], index: 21, kind: output, shape index: {1}]  }
   0x1   :  { %1646 = sst [smem:[#allocation2_spill]] %s1620_s2  ;;  %vm223_vm4 = vcmask 195584   ;;  %vm336_vm5 = vcmask 261120   ;;  %vm623_vm13 = vcmask 1040384   ;;  %vm626_vm14 = vcmask 1042432  }
   0x2   :  { %1647 = sst [smem:[#allocation3_spill]] %s1621_s3  ;;  %vm662_vm15 = vcmask 31744  }
   0x3   :  { %1648 = sst [smem:[#allocation4_spill]] %s1622_s0 }
   0x4   :  { %1649 = sst [smem:[#allocation5_spill]] %s1623_s8 }
   0x5   :  { %1650 = sst [smem:[#allocation6_spill]] %s1624_s5 }
   0x6   :  { %1651 = sst [smem:[#allocation7_spill]] %s1625_s4 }
   0x7   :  { %s1652_s26 = sld [smem:[#allocation2_spill]] }
   0x8   :  { %s1653_s28 = sld [smem:[#allocation4_spill]] }
   0x9   :  { %s1654_s4 = sld [smem:[#allocation3_spill]] }
   0xa   :  { %s1655_s24 = sld [smem:[#allocation5_spill]] }
   0xb   :  { %s1656_s30 = sld [smem:[#allocation7_spill]] }
   0xc   :  { %s1657_s5 = sld [smem:[#allocation6_spill]] }
   0xd   :  { %v1108_v0 = vld [vmem:[%s1652_s26 + $0x38] sm:$0xff]  ;;  %v1107_v1 = vld [vmem:[%s1652_s26 + $0x30] sm:$0xff]  ;;  %v1106_v2 = vld [vmem:[%s1652_s26 + $0x28] sm:$0xff] }
   0xe   :  { %139 = vmatpush.bf16.msra.mxu0 %v1108_v0  ;;  %v1105_v3 = vld [vmem:[%s1652_s26 + $0x20] sm:$0xff]  ;;  %v1104_v4 = vld [vmem:[%s1652_s26 + $0x18] sm:$0xff]  ;;  %v1103_v5 = vld [vmem:[%s1652_s26 + $0x10] sm:$0xff] }
   0xf   :  { %v1102_v6 = vld [vmem:[%s1652_s26 + $0x8] sm:$0xff]  ;;  %v1101_v7 = vld [vmem:[%s1652_s26] sm:$0xff]  ;;  %s1201_s26 = smov 112  }
  0x10   :  { %v1343_v8 = vld [vmem:[%s1653_s28] sm:$0xff]  ;;  %v1348_v9 = vld [vmem:[%s1653_s28 + $0x8] sm:$0xf]  ;;  %v155_v44 = vld [vmem:[%s1655_s24 + $0x10] sm:$0xff]  ;;  %s1203_s28 = smov 64  }
  0x11   :  { %v70_v10 = vpack.c.bf16 %v1348_v9, %v1343_v8  ;;  %v1157_v12 = vld [vmem:[%s1654_s4] ss:$0 sm:$0xff]  ;;  %v154_v39 = vld [vmem:[%s1655_s24 + $0x8] sm:$0xff] }
  0x12   :  { %140 = vmatpush.bf16.msra.mxu0 %v1107_v1  ;;  %v153_v34 = vld [vmem:[%s1655_s24] sm:$0xff] }
  0x16   :  { %141 = vmatpush.bf16.msra.mxu0 %v1106_v2 }
  0x1a   :  { %142 = vmatpush.bf16.msra.mxu0 %v1105_v3 }
  0x1e   :  { %143 = vmatpush.bf16.msra.mxu0 %v1104_v4 }
  0x22   :  { %144 = vmatpush.bf16.msra.mxu0 %v1103_v5 }
  0x26   :  { %145 = vmatpush.bf16.msra.mxu0 %v1102_v6 }
  0x2a   :  { %146 = vmatpush.bf16.msra.mxu0 %v1101_v7 }
  0x2d   :  { %147 = vmatmul.bf16.vlgmr.msra.gmra.mxu0 %v70_v10 }
  0xaa   :  { %v148_v11 = vpop.f32.mrf.mxu0 }
  0xab   :  { %v149_v13 = vadd.f32 %v1157_v12, %v148_v11 }
  0xad   :  { %v168_v18 = vrot.slane %v149_v13, 4  ;;  %v157_v19 = vrot.slane %v149_v13, 2 }
  0xb2   :  { %v150_v14 = vpop.f32.mrf.mxu0 }
  0xb3   :  { %v151_v15 = vadd.f32 %v1157_v12, %v150_v14 }
  0xb5   :  { %v163_v16 = vrot.slane %v151_v15, 2  ;;  %v169_v17 = vrot.slane %v151_v15, 4 }
  0xb7   :  { %v170_v20 = vsel %vm167_vm0, %v168_v18, %v169_v17  ;;  %v164_v21 = vsel %vm162_vm1, %v157_v19, %v163_v16 }
  0xb8   :  { %171 = vrot.lane.b32.xlu0 %v170_v20, %s1201_s26 }
  0xc0   :  { %158 = vrot.lane.b32.xlu0 %v157_v19, %s1201_s26 }
 0x12a   :  { %v172_v22 = vpop.permute.xlu0 %171 }
 0x12b   :  { %v177_v23 = vsel %vm176_vm2, %v163_v16, %v172_v22 }
 0x12c   :  { %v179_v24 = vpack.c.bf16 %v177_v23, %v177_v23 }
 0x12e   :  { %184 = vrot.lane.b32.xlu1 %v179_v24, %s1202_s22 }
 0x132   :  { %v159_v25 = vpop.permute.xlu0 %158 }
 0x133   :  { %v174_v26 = vsel %vm162_vm1, %v149_v13, %v159_v25  ;;  %v175_v27 = vsel %vm167_vm0, %v159_v25, %v164_v21  ;;  %v1110_v25 = vld [vmem:[%s1656_s30 + $0x8] sm:$0xff] }
 0x134   :  { %v178_v28 = vpack.c.bf16 %v175_v27, %v174_v26  ;;  %346 = vmatpush.bf16.msra.mxu3 %v1110_v25  ;;  %v1109_v26 = vld [vmem:[%s1656_s30] sm:$0xff]  ;;  %v1126_v27 = vld [vmem:[%s1626_s11 + $0x38] sm:$0xff] }
 0x136   :  { %182 = vrot.lane.b32.xlu1 %v178_v28, %s1202_s22 }
 0x138   :  { %347 = vmatpush.bf16.msra.mxu3 %v1109_v26 }
 0x13c   :  { %576 = vmatpush.bf16.msrb.mxu3 %v1126_v27 }
 0x1a0   :  { %v185_v29 = vpop.permute.xlu1 %184 }
 0x1a1   :  { %v197_v30 = vsel %vm186_vm3, %v185_v29, 0  ;;  %v1124_v29 = vld [vmem:[%s1626_s11 + $0x28] sm:$0xff] }
 0x1a2   :  { %205 = vmatpush.bf16.xpose.msra.mxu1 %v197_v30  ;;  %v1123_v30 = vld [vmem:[%s1626_s11 + $0x20] sm:$0xff] }
 0x1a8   :  { %v183_v31 = vpop.permute.xlu1 %182 }
 0x1a9   :  { %v194_v32 = vsel %vm186_vm3, %v183_v31, 0  ;;  %v1122_v31 = vld [vmem:[%s1626_s11 + $0x18] sm:$0xff] }
 0x1aa   :  { %206 = vmatpush.bf16.xpose.msra.mxu1 %v194_v32 }
 0x1b1   :  { %979 = vmatmul.msk.bf16.vlgmr.msra.gmra.mxu1 %vm186_vm3, %v178_v28 }
 0x1c1   :  { %980 = vmatmul.msk.bf16.gmra.mxu1 %vm186_vm3, %v179_v24 }
 0x22e   :  { %v208_v33 = vpop.f32.mrf.mxu1 }
 0x22f   :  { %v217_v35 = vmul.f32 0.25, %v208_v33 }
 0x231   :  { %v220_v36 = vadd.f32 %v217_v35, %v153_v34 }
 0x233   :  { %v224_v37 = vsel %vm223_vm4, %v220_v36, -inf }
 0x234   :  { %225 = vmax.xlane.f32.xlu2 %v224_v37 }
 0x236   :  { %v210_v38 = vpop.f32.mrf.mxu1 }
 0x237   :  { %v218_v40 = vmul.f32 0.25, %v210_v38 }
 0x239   :  { %v221_v41 = vadd.f32 %v218_v40, %v154_v39 }
 0x23b   :  { %v227_v42 = vsel %vm223_vm4, %v221_v41, -inf }
 0x23c   :  { %228 = vmax.xlane.f32.xlu2 %v227_v42 }
 0x23e   :  { %v213_v43 = vpop.f32.mrf.mxu1 }
 0x23f   :  { %v219_v45 = vmul.f32 0.25, %v213_v43  ;;  %v1121_v43 = vld [vmem:[%s1626_s11 + $0x10] sm:$0xff] }
 0x241   :  { %v222_v46 = vadd.f32 %v219_v45, %v155_v44  ;;  %v1120_v44 = vld [vmem:[%s1626_s11 + $0x8] sm:$0xff]  ;;  %v1119_v45 = vld [vmem:[%s1626_s11] sm:$0xff] }
 0x243   :  { %v230_v47 = vsel %vm223_vm4, %v222_v46, -inf }
 0x244   :  { %231 = vmax.xlane.f32.xlu0 %v230_v47 }
 0x246   :  { %v215_v48 = vpop.f32.mrf.mxu1 }
 0x247   :  { %v1158_v48 = vld [vmem:[%s1657_s5] ss:$0 sm:$0xff] }
 0x254   :  { %261 = vrot.lane.b32.xlu2 %v179_v24, %s1203_s28 }
 0x2a7   :  { %v226_v49 = vpop.xlane.xlu2 %225 }
 0x2a8   :  { %v233_v50 = vsub.f32 %v220_v36, %v226_v49 }
 0x2aa   :  { %v236_v51 = vmul.f32 1.442695, %v233_v50 }
 0x2ac   :  { %1167 = vpow2.f32 %v236_v51 }
 0x2af   :  { %v229_v52 = vpop.xlane.xlu2 %228 }
 0x2b0   :  { %v234_v53 = vsub.f32 %v221_v41, %v229_v52 }
 0x2b2   :  { %v1168_v54 = vpop.eup %1167  ;;  %v238_v55 = vmul.f32 1.442695, %v234_v53 }
 0x2b3   :  { %v242_v56 = vsel %vm223_vm4, %v1168_v54, 0.0 }
 0x2b4   :  { %1169 = vpow2.f32 %v238_v55  ;;  %243 = vadd.xlane.f32.xlu1 %v242_v56 }
 0x2b7   :  { %v262_v57 = vpop.permute.xlu2 %261  ;;  %v232_v61 = vpop.xlane.xlu0 %231 }
 0x2b8   :  { %v271_v58 = vsel %vm167_vm0, %v262_v57, 0  ;;  %v235_v62 = vsub.f32 %v222_v46, %v232_v61  ;;  %v423_v46 = vld [vmem:[%s1627_s1] sm:$0x3]  ;;  %v1117_v61 = vld [vmem:[%s1631_s9 + $0x30] sm:$0xff] }
 0x2b9   :  { %279 = vmatpush.bf16.msra.mxu2 %v271_v58  ;;  %v507_v47 = vpack.c.bf16 %v423_v46, %v423_v46  ;;  %v1205_v58 = vmov 32.0  }
 0x2ba   :  { %v1170_v59 = vpop.eup %1169  ;;  %v240_v63 = vmul.f32 1.442695, %v235_v62 }
 0x2bb   :  { %v245_v60 = vsel %vm223_vm4, %v1170_v59, 0.0 }
 0x2bc   :  { %246 = vadd.xlane.f32.xlu2 %v245_v60  ;;  %1171 = vpow2.f32 %v240_v63  ;;  %v1159_v60 = vld [vmem:[%s1628_s12] ss:$0 sm:$0xff] }
 0x2c2   :  { %v1172_v0 = vpop.eup %1171 }
 0x2c3   :  { %v248_v1 = vsel %vm223_vm4, %v1172_v0, 0.0 }
 0x2d4   :  { %259 = vrot.lane.b32.xlu2 %v178_v28, %s1203_s28  ;;  %v1125_v28 = vld [vmem:[%s1626_s11 + $0x30] sm:$0xff] }
 0x2d5   :  { %577 = vmatpush.bf16.msrb.mxu3 %v1125_v28 }
 0x2d9   :  { %578 = vmatpush.bf16.msrb.mxu3 %v1124_v29 }
 0x2dd   :  { %579 = vmatpush.bf16.msrb.mxu3 %v1123_v30 }
 0x2e1   :  { %580 = vmatpush.bf16.msrb.mxu3 %v1122_v31 }
 0x2e5   :  { %581 = vmatpush.bf16.msrb.mxu3 %v1121_v43 }
 0x2e9   :  { %582 = vmatpush.bf16.msrb.mxu3 %v1120_v44 }
 0x2ed   :  { %583 = vmatpush.bf16.msrb.mxu3 %v1119_v45 }
 0x2fd   :  { %249 = vadd.xlane.f32.xlu2 %v248_v1 }
 0x327   :  { %v244_v2 = vpop.xlane.xlu1 %243 }
 0x328   :  { %1173 = vrcp.f32 %v244_v2 }
 0x32e   :  { %v1174_v4 = vpop.eup %1173 }
 0x32f   :  { %v247_v3 = vpop.xlane.xlu2 %246  ;;  %v254_v7 = vmul.f32 %v1174_v4, %v1168_v54 }
 0x330   :  { %1175 = vrcp.f32 %v247_v3  ;;  %v1116_v3 = vld [vmem:[%s1631_s9 + $0x28] sm:$0xff] }
 0x336   :  { %v1176_v5 = vpop.eup %1175 }
 0x337   :  { %v260_v6 = vpop.permute.xlu2 %259  ;;  %v255_v10 = vmul.f32 %v1176_v5, %v1170_v59 }
 0x338   :  { %280 = vmatpush.bf16.msra.mxu2 %v260_v6  ;;  %v1115_v6 = vld [vmem:[%s1631_s9 + $0x20] sm:$0xff] }
 0x339   :  { %v257_v11 = vpack.c.bf16 %v255_v10, %v254_v7 }
 0x33b   :  { %981 = vmatmul.msk.bf16.vlgmr.msra.gmra.mxu2 %vm223_vm4, %v257_v11 }
 0x370   :  { %v250_v12 = vpop.xlane.xlu2 %249 }
 0x371   :  { %1177 = vrcp.f32 %v250_v12  ;;  %v1114_v12 = vld [vmem:[%s1631_s9 + $0x18] sm:$0xff] }
 0x372   :  { %1179 = vrcp.f32 %v1205_v58 }
 0x377   :  { %v1178_v13 = vpop.eup %1177 }
 0x378   :  { %v256_v14 = vmul.f32 %v1178_v13, %v1172_v0  ;;  %v1180_v59 = vpop.eup %1179 }
 0x379   :  { %v364_v63 = vmul.f32 32.0, %v1180_v59  ;;  %vm368_vm6 = vweird.f32 %v1180_v59 }
 0x37a   :  { %v258_v15 = vpack.c.bf16 %v256_v14, %v256_v14  ;;  %v1113_v14 = vld [vmem:[%s1631_s9 + $0x10] sm:$0xff] }
 0x37b   :  { %v365_v4 = vsub.f32 1.0, %v364_v63 }
 0x37c   :  { %982 = vmatmul.msk.bf16.gmra.mxu2 %vm223_vm4, %v258_v15 }
 0x37d   :  { %v366_v11 = vmul.f32 %v1180_v59, %v365_v4 }
 0x37f   :  { %v367_v13 = vadd.f32 %v1180_v59, %v366_v11 }
 0x381   :  { %v1472_v15 = vsel %vm368_vm6, %v1180_v59, %v367_v13 }
 0x3be   :  { %v282_v16 = vpop.f32.mrf.mxu2 }
 0x3bf   :  { %v293_v19 = vrot.slane %v282_v16, 6 }
 0x3c6   :  { %v284_v17 = vpop.f32.mrf.mxu2 }
 0x3c7   :  { %v294_v18 = vrot.slane %v284_v17, 6 }
 0x3c9   :  { %v295_v22 = vsel %vm176_vm2, %v293_v19, %v294_v18 }
 0x3ff   :  { %v287_v20 = vpop.f32.mrf.mxu2 }
 0x400   :  { %v301_v21 = vrot.slane %v287_v20, 6 }
 0x402   :  { %v1142_v23 = vpack.i.bf16 %v295_v22, %v301_v21  ;;  %v1111_v22 = vld [vmem:[%s1631_s9] sm:$0xff] }
 0x404   :  { %1143 = vrot.lane.b32.xlu0 %v1142_v23, %s1204_s29 }
 0x407   :  { %v289_v24 = vpop.f32.mrf.mxu2 }
 0x476   :  { %v1144_v32 = vpop.permute.xlu0 %1143 }
 0x477   :  { %v1146_v33 = vunpack.i.h.bf16 %v1144_v32  ;;  %v1145_v34 = vunpack.i.l.bf16 %v1144_v32 }
 0x479   :  { %v305_v35 = vsel %vm186_vm3, %v284_v17, %v1145_v34  ;;  %v306_v36 = vsel %vm186_vm3, %v287_v20, %v1145_v34  ;;  %v299_v39 = vsel %vm186_vm3, %v282_v16, %v1146_v33  ;;  %v1112_v17 = vld [vmem:[%s1631_s9 + $0x8] sm:$0xff] }
 0x47a   :  { %v309_v37 = vrot.slane %v305_v35, 6  ;;  %v310_v38 = vrot.slane %v306_v36, 6 }
 0x47c   :  { %v311_v40 = vsel %vm176_vm2, %v309_v37, %v310_v38  ;;  %v314_v41 = vsel %vm162_vm1, %v299_v39, %v309_v37 }
 0x47d   :  { %v315_v42 = vpack.c.bf16 %v311_v40, %v314_v41 }
 0x47f   :  { %991 = vmatmul.msk.bf16.vlgmr.msra.gmra.mxu3 %vm336_vm5, %v315_v42 }
 0x48f   :  { %584 = vmatmul.bf16.vlgmr.msrb.gmra.mxu3 %v507_v47  ;;  %v1160_v47 = vld [vmem:[%s1629_s6] ss:$0 sm:$0xff] }
 0x502   :  { %v349_v49 = vpop.f32.mrf.mxu3 }
 0x503   :  { %v350_v50 = vadd.f32 %v1158_v48, %v349_v49 }
 0x505   :  { %v1431_v51 = vadd.f32 %v350_v50, %v1343_v8 }
 0x507   :  { %358 = vadd.xlane.f32.xlu1 %v1431_v51  ;;  %v372_v8 = vmul.f32 %v1431_v51, %v1431_v51 }
 0x50a   :  { %v351_v52 = vpop.f32.mrf.mxu3 }
 0x50b   :  { %v352_v53 = vadd.f32 %v1158_v48, %v351_v52 }
 0x50d   :  { %v1435_v54 = vadd.f32 %v352_v53, %v1348_v9  ;;  %v1118_v9 = vld [vmem:[%s1631_s9 + $0x38] sm:$0xff] }
 0x50e   :  { %493 = vmatpush.bf16.msrb.mxu2 %v1118_v9 }
 0x50f   :  { %v360_v55 = vsel %vm167_vm0, %v1435_v54, 0.0  ;;  %v373_v56 = vmul.f32 %v1435_v54, %v1435_v54 }
 0x510   :  { %361 = vadd.xlane.f32.xlu1 %v360_v55  ;;  %v1161_v55 = vld [vmem:[%s1630_s7] ss:$0 sm:$0xff] }
 0x511   :  { %v376_v57 = vsel %vm167_vm0, %v373_v56, 0.0 }
 0x512   :  { %377 = vadd.xlane.f32.xlu0 %v376_v57  ;;  %v585_v62 = vpop.f32.mrf.mxu3  ;;  %494 = vmatpush.bf16.msrb.mxu2 %v1117_v61 }
 0x513   :  { %v1453_v0 = vadd.f32 %v1159_v60, %v585_v62 }
 0x515   :  { %v614_v1 = vrot.slane %v1453_v0, 7  ;;  %v619_v2 = vrot.slane %v1453_v0, 6 }
 0x516   :  { %495 = vmatpush.bf16.msrb.mxu2 %v1116_v3 }
 0x517   :  { %v1147_v5 = vpack.i.bf16 %v619_v2, %v614_v1  ;;  %v1162_v2 = vld [vmem:[%s1632_s10] ss:$0 sm:$0xff] }
 0x518   :  { %374 = vadd.xlane.f32.xlu1 %v372_v8 }
 0x51a   :  { %v587_v10 = vpop.f32.mrf.mxu3  ;;  %496 = vmatpush.bf16.msrb.mxu2 %v1115_v6 }
 0x51e   :  { %497 = vmatpush.bf16.msrb.mxu2 %v1114_v12 }
 0x522   :  { %498 = vmatpush.bf16.msrb.mxu2 %v1113_v14 }
 0x526   :  { %499 = vmatpush.bf16.msrb.mxu2 %v1112_v17 }
 0x52a   :  { %500 = vmatpush.bf16.msrb.mxu2 %v1111_v22  ;;  %v589_v22 = vld [vmem:[%s1633_s17] sm:$0xff] }
 0x531   :  { %1148 = vrot.lane.b32.xlu1 %v1147_v5, %s1201_s26 }
 0x57a   :  { %v359_v7 = vpop.xlane.xlu1 %358 }
 0x57b   :  { %v370_v23 = vmul.f32 %v1472_v15, %v359_v7 }
 0x57d   :  { %v381_v27 = vmul.f32 %v370_v23, %v370_v23  ;;  %v387_v49 = vsub.f32 %v1431_v51, %v370_v23 }
 0x583   :  { %v362_v16 = vpop.xlane.xlu1 %361 }
 0x584   :  { %v371_v18 = vmul.f32 %v1472_v15, %v362_v16 }
 0x585   :  { %v378_v19 = vpop.xlane.xlu0 %377 }
 0x586   :  { %v382_v20 = vmul.f32 %v371_v18, %v371_v18  ;;  %v380_v21 = vmul.f32 %v378_v19, %v1472_v15  ;;  %v388_v44 = vsub.f32 %v1435_v54, %v371_v18 }
 0x588   :  { %v384_v24 = vsub.f32 %v380_v21, %v382_v20 }
 0x58a   :  { %v386_v25 = vmax.f32 %v384_v24, 0.0 }
 0x58b   :  { %v375_v26 = vpop.xlane.xlu1 %374 }
 0x58c   :  { %v390_v28 = vadd.f32 1e-05, %v386_v25  ;;  %v379_v29 = vmul.f32 %v375_v26, %v1472_v15 }
 0x58e   :  { %1181 = vrsqrt.f32 %v390_v28  ;;  %v383_v30 = vsub.f32 %v379_v29, %v381_v27  ;;  %vm407_vm8 = vweird.f32 %v390_v28  ;;  %v590_v27 = vld [vmem:[%s1633_s17 + $0x8] sm:$0xff] }
 0x590   :  { %v385_v31 = vmax.f32 %v383_v30, 0.0 }
 0x592   :  { %v389_v32 = vadd.f32 1e-05, %v385_v31 }
 0x594   :  { %v1182_v33 = vpop.eup %1181  ;;  %1183 = vrsqrt.f32 %v389_v32  ;;  %vm397_vm11 = vweird.f32 %v389_v32 }
 0x595   :  { %v402_v34 = vmul.f32 %v1182_v33, %v390_v28  ;;  %vm408_vm7 = vweird.f32 %v1182_v33 }
 0x596   :  { %vm409_vm9 = vmor %vm407_vm8, %vm408_vm7 }
 0x597   :  { %v403_v35 = vmul.f32 %v1182_v33, %v402_v34 }
 0x599   :  { %v404_v36 = vmul.f32 0.5, %v403_v35 }
 0x59a   :  { %v1184_v37 = vpop.eup %1183 }
 0x59b   :  { %v405_v38 = vsub.f32 1.5, %v404_v36  ;;  %v392_v39 = vmul.f32 %v1184_v37, %v389_v32  ;;  %vm398_vm10 = vweird.f32 %v1184_v37  ;;  %v591_v32 = vld [vmem:[%s1633_s17 + $0x10] sm:$0xff] }
 0x59c   :  { %vm399_vm12 = vmor %vm397_vm11, %vm398_vm10 }
 0x59d   :  { %v406_v40 = vmul.f32 %v1182_v33, %v405_v38  ;;  %v393_v41 = vmul.f32 %v1184_v37, %v392_v39 }
 0x59f   :  { %v394_v42 = vmul.f32 0.5, %v393_v41  ;;  %v410_v43 = vsel %vm409_vm9, %v1182_v33, %v406_v40 }
 0x5a0   :  { %v412_v46 = vmul.f32 %v410_v43, %v388_v44 }
 0x5a1   :  { %v395_v45 = vsub.f32 1.5, %v394_v42 }
 0x5a2   :  { %v417_v53 = vmul.f32 %v1160_v47, %v412_v46 }
 0x5a3   :  { %v396_v48 = vmul.f32 %v1184_v37, %v395_v45  ;;  %v1149_v58 = vpop.permute.xlu1 %1148 }
 0x5a4   :  { %v1494_v57 = vadd.f32 %v1161_v55, %v417_v53  ;;  %v1151_v51 = vunpack.i.h.bf16 %v1149_v58  ;;  %v1150_v9 = vunpack.i.l.bf16 %v1149_v58 }
 0x5a5   :  { %v400_v50 = vsel %vm399_vm12, %v1184_v37, %v396_v48 }
 0x5a6   :  { %v411_v52 = vmul.f32 %v400_v50, %v387_v49  ;;  %v624_v59 = vsel %vm623_vm13, %v1453_v0, %v1150_v9 }
 0x5a7   :  { %v625_v60 = vsel %vm176_vm2, %v624_v59, %v614_v1 }
 0x5a8   :  { %v416_v54 = vmul.f32 %v1160_v47, %v411_v52  ;;  %v627_v61 = vsel %vm626_vm14, %v625_v60, %v1151_v51 }
 0x5a9   :  { %v1502_v62 = vpack.c.bf16 %v627_v61, %v627_v61 }
 0x5aa   :  { %v1492_v56 = vadd.f32 %v1161_v55, %v416_v54 }
 0x5ab   :  { %v636_v63 = vsel %vm186_vm3, %v1502_v62, 0 }
 0x5ac   :  { %v424_v8 = vpack.c.bf16 %v1494_v57, %v1492_v56  ;;  %645 = vmatpush.bf16.xpose.msrb.mxu0 %v636_v63 }
 0x5ae   :  { %501 = vmatmul.bf16.vlgmr.msrb.gmra.mxu2 %v424_v8 }
 0x631   :  { %v502_v3 = vpop.f32.mrf.mxu2 }
 0x632   :  { %v503_v4 = vadd.f32 %v1162_v2, %v502_v3 }
 0x634   :  { %v593_v5 = vrot.slane %v503_v4, 2  ;;  %v602_v7 = vrot.slane %v503_v4, 4 }
 0x636   :  { %594 = vrot.lane.b32.xlu2 %v593_v5, %s1201_s26 }
 0x639   :  { %v504_v6 = vpop.f32.mrf.mxu2 }
 0x63a   :  { %v505_v0 = vadd.f32 %v1162_v2, %v504_v6 }
 0x63c   :  { %v598_v1 = vrot.slane %v505_v0, 2  ;;  %v603_v10 = vrot.slane %v505_v0, 4 }
 0x63e   :  { %v604_v11 = vsel %vm167_vm0, %v602_v7, %v603_v10  ;;  %v599_v12 = vsel %vm162_vm1, %v593_v5, %v598_v1 }
 0x63f   :  { %605 = vrot.lane.b32.xlu1 %v604_v11, %s1201_s26 }
 0x690   :  { %v595_v13 = vpop.permute.xlu2 %594 }
 0x691   :  { %v608_v14 = vsel %vm162_vm1, %v503_v4, %v595_v13  ;;  %v609_v16 = vsel %vm167_vm0, %v595_v13, %v599_v12  ;;  %v1128_v12 = vld [vmem:[%s1635_s13 + $0x8] sm:$0xff]  ;;  %v1127_v13 = vld [vmem:[%s1635_s13] sm:$0xff] }
 0x692   :  { %v611_v17 = vpack.c.bf16 %v609_v16, %v608_v14  ;;  %782 = vmatpush.bf16.msra.mxu2 %v1128_v12 }
 0x694   :  { %1056 = vmatmul.msk.bf16.vlgmr.msrb.gmra.mxu0 %vm186_vm3, %v611_v17 }
 0x696   :  { %783 = vmatpush.bf16.msra.mxu2 %v1127_v13 }
 0x6b1   :  { %v606_v18 = vpop.permute.xlu1 %605 }
 0x6b2   :  { %v610_v19 = vsel %vm176_vm2, %v598_v1, %v606_v18 }
 0x6b3   :  { %v612_v20 = vpack.c.bf16 %v610_v19, %v610_v19 }
 0x6b5   :  { %1057 = vmatmul.msk.bf16.gmra.mxu0 %vm186_vm3, %v612_v20 }
 0x711   :  { %v647_v21 = vpop.f32.mrf.mxu0 }
 0x712   :  { %v656_v23 = vmul.f32 0.25, %v647_v21 }
 0x714   :  { %v659_v24 = vadd.f32 %v656_v23, %v589_v22 }
 0x716   :  { %v663_v25 = vsel %vm662_vm15, %v659_v24, -inf }
 0x717   :  { %664 = vmax.xlane.f32.xlu1 %v663_v25 }
 0x719   :  { %v649_v26 = vpop.f32.mrf.mxu0 }
 0x71a   :  { %v657_v28 = vmul.f32 0.25, %v649_v26  ;;  %v1163_v26 = vld [vmem:[%s1634_s14] ss:$0 sm:$0xff] }
 0x71c   :  { %v660_v29 = vadd.f32 %v657_v28, %v590_v27 }
 0x71e   :  { %v666_v30 = vsel %vm662_vm15, %v660_v29, -inf }
 0x71f   :  { %667 = vmax.xlane.f32.xlu0 %v666_v30 }
 0x732   :  { %v652_v31 = vpop.f32.mrf.mxu0 }
 0x733   :  { %v658_v33 = vmul.f32 0.25, %v652_v31 }
 0x735   :  { %v661_v34 = vadd.f32 %v658_v33, %v591_v32 }
 0x737   :  { %v669_v35 = vsel %vm662_vm15, %v661_v34, -inf }
 0x738   :  { %670 = vmax.xlane.f32.xlu2 %v669_v35 }
 0x73a   :  { %v654_v36 = vpop.f32.mrf.mxu0 }
 0x73b   :  { %v1136_v36 = vld [vmem:[%s1639_s18 + $0x38] sm:$0xff] }
 0x73c   :  { %921 = vmatpush.bf16.msra.mxu3 %v1136_v36 }
 0x78a   :  { %v665_v37 = vpop.xlane.xlu1 %664 }
 0x78b   :  { %v672_v38 = vsub.f32 %v659_v24, %v665_v37  ;;  %v1134_v37 = vld [vmem:[%s1639_s18 + $0x28] sm:$0xff] }
 0x78d   :  { %v675_v39 = vmul.f32 1.442695, %v672_v38 }
 0x78f   :  { %1185 = vpow2.f32 %v675_v39  ;;  %v1133_v39 = vld [vmem:[%s1639_s18 + $0x20] sm:$0xff] }
 0x792   :  { %v668_v40 = vpop.xlane.xlu0 %667 }
 0x793   :  { %v673_v41 = vsub.f32 %v660_v29, %v668_v40 }
 0x795   :  { %v1186_v42 = vpop.eup %1185  ;;  %v677_v43 = vmul.f32 1.442695, %v673_v41 }
 0x796   :  { %v681_v44 = vsel %vm662_vm15, %v1186_v42, 0.0 }
 0x797   :  { %1187 = vpow2.f32 %v677_v43  ;;  %682 = vadd.xlane.f32.xlu0 %v681_v44  ;;  %v1132_v44 = vld [vmem:[%s1639_s18 + $0x18] sm:$0xff] }
 0x79d   :  { %v1188_v45 = vpop.eup %1187 }
 0x79e   :  { %v684_v46 = vsel %vm662_vm15, %v1188_v45, 0.0 }
 0x79f   :  { %685 = vadd.xlane.f32.xlu0 %v684_v46 }
 0x7ab   :  { %v671_v47 = vpop.xlane.xlu2 %670 }
 0x7ac   :  { %v674_v48 = vsub.f32 %v661_v34, %v671_v47  ;;  %v1131_v47 = vld [vmem:[%s1639_s18 + $0x10] sm:$0xff] }
 0x7ae   :  { %v679_v49 = vmul.f32 1.442695, %v674_v48 }
 0x7b0   :  { %1189 = vpow2.f32 %v679_v49 }
 0x7b3   :  { %699 = vrot.lane.b32.xlu0 %v1502_v62, %s1202_s22 }
 0x7b6   :  { %v1190_v50 = vpop.eup %1189 }
 0x7b7   :  { %v687_v52 = vsel %vm662_vm15, %v1190_v50, 0.0 }
 0x7b8   :  { %688 = vadd.xlane.f32.xlu1 %v687_v52  ;;  %v1129_v52 = vld [vmem:[%s1639_s18] sm:$0xff] }
 0x80a   :  { %v683_v53 = vpop.xlane.xlu0 %682 }
 0x812   :  { %v686_v55 = vpop.xlane.xlu0 %685 }
 0x813   :  { %1191 = vrcp.f32 %v686_v55 }
 0x814   :  { %1193 = vrcp.f32 %v683_v53 }
 0x819   :  { %v1192_v54 = vpop.eup %1191 }
 0x81a   :  { %v1194_v8 = vpop.eup %1193  ;;  %v694_v58 = vmul.f32 %v1192_v54, %v1188_v45 }
 0x81b   :  { %v693_v9 = vmul.f32 %v1194_v8, %v1186_v42 }
 0x81d   :  { %v696_v60 = vpack.c.bf16 %v694_v58, %v693_v9 }
 0x825   :  { %v700_v51 = vpop.permute.xlu0 %699 }
 0x826   :  { %v708_v59 = vsel %vm176_vm2, %v700_v51, 0 }
 0x827   :  { %717 = vmatpush.bf16.msrb.mxu1 %v708_v59 }
 0x82a   :  { %1058 = vmatmul.msk.bf16.vlgmr.msrb.gmra.mxu1 %vm662_vm15, %v696_v60 }
 0x82b   :  { %v689_v61 = vpop.xlane.xlu1 %688 }
 0x82c   :  { %1195 = vrcp.f32 %v689_v61 }
 0x832   :  { %v1196_v62 = vpop.eup %1195 }
 0x833   :  { %v695_v63 = vmul.f32 %v1196_v62, %v1190_v50  ;;  %v1130_v50 = vld [vmem:[%s1639_s18 + $0x8] sm:$0xff] }
 0x835   :  { %v697_v2 = vpack.c.bf16 %v695_v63, %v695_v63 }
 0x83a   :  { %1059 = vmatmul.msk.bf16.gmra.mxu1 %vm662_vm15, %v697_v2 }
 0x8a7   :  { %v719_v3 = vpop.f32.mrf.mxu1 }
 0x8a8   :  { %v730_v6 = vrot.slane %v719_v3, 6 }
 0x8af   :  { %v721_v4 = vpop.f32.mrf.mxu1 }
 0x8b0   :  { %v731_v5 = vrot.slane %v721_v4, 6 }
 0x8b2   :  { %v732_v1 = vsel %vm176_vm2, %v730_v6, %v731_v5 }
 0x8b7   :  { %v724_v0 = vpop.f32.mrf.mxu1 }
 0x8b8   :  { %v738_v7 = vrot.slane %v724_v0, 6 }
 0x8ba   :  { %v1152_v10 = vpack.i.bf16 %v732_v1, %v738_v7 }
 0x8bc   :  { %1153 = vrot.lane.b32.xlu2 %v1152_v10, %s1204_s29 }
 0x8bf   :  { %v726_v11 = vpop.f32.mrf.mxu1 }
 0x916   :  { %v1154_v14 = vpop.permute.xlu2 %1153 }
 0x917   :  { %v1156_v16 = vunpack.i.h.bf16 %v1154_v14  ;;  %v1155_v17 = vunpack.i.l.bf16 %v1154_v14 }
 0x919   :  { %v742_v18 = vsel %vm186_vm3, %v721_v4, %v1155_v17  ;;  %v743_v19 = vsel %vm186_vm3, %v724_v0, %v1155_v17  ;;  %v736_v22 = vsel %vm186_vm3, %v719_v3, %v1156_v16  ;;  %v1164_v4 = vld [vmem:[%s1636_s15] ss:$0 sm:$0xff] }
 0x91a   :  { %v746_v20 = vrot.slane %v742_v18, 6  ;;  %v747_v21 = vrot.slane %v743_v19, 6 }
 0x91c   :  { %v748_v23 = vsel %vm176_vm2, %v746_v20, %v747_v21  ;;  %v751_v24 = vsel %vm162_vm1, %v736_v22, %v746_v20  ;;  %v1166_v22 = vld [vmem:[%s1638_s19] ss:$0 sm:$0xff] }
 0x91d   :  { %v752_v25 = vpack.c.bf16 %v748_v23, %v751_v24 }
 0x91f   :  { %1068 = vmatmul.msk.bf16.vlgmr.msra.gmra.mxu2 %vm336_vm5, %v752_v25 }
 0x9a2   :  { %v785_v27 = vpop.f32.mrf.mxu2 }
 0x9a3   :  { %v786_v28 = vadd.f32 %v1163_v26, %v785_v27 }
 0x9a5   :  { %v1556_v29 = vadd.f32 %v786_v28, %v1492_v56 }
 0x9a7   :  { %794 = vadd.xlane.f32.xlu0 %v1556_v29  ;;  %v801_v30 = vmul.f32 %v1556_v29, %v1556_v29 }
 0x9a9   :  { %803 = vadd.xlane.f32.xlu1 %v801_v30 }
 0x9aa   :  { %v787_v31 = vpop.f32.mrf.mxu2 }
 0x9ab   :  { %v788_v32 = vadd.f32 %v1163_v26, %v787_v31 }
 0x9ad   :  { %v1562_v33 = vadd.f32 %v788_v32, %v1494_v57  ;;  %v1135_v57 = vld [vmem:[%s1639_s18 + $0x30] sm:$0xff] }
 0x9ae   :  { %922 = vmatpush.bf16.msra.mxu3 %v1135_v57 }
 0x9af   :  { %v796_v34 = vsel %vm167_vm0, %v1562_v33, 0.0  ;;  %v802_v35 = vmul.f32 %v1562_v33, %v1562_v33 }
 0x9b1   :  { %797 = vadd.xlane.f32.xlu1 %v796_v34  ;;  %v805_v56 = vsel %vm167_vm0, %v802_v35, 0.0 }
 0x9b2   :  { %923 = vmatpush.bf16.msra.mxu3 %v1134_v37 }
 0x9b6   :  { %924 = vmatpush.bf16.msra.mxu3 %v1133_v39 }
 0x9b9   :  { %806 = vadd.xlane.f32.xlu1 %v805_v56 }
 0x9ba   :  { %925 = vmatpush.bf16.msra.mxu3 %v1132_v44 }
 0x9be   :  { %926 = vmatpush.bf16.msra.mxu3 %v1131_v47 }
 0x9c2   :  { %927 = vmatpush.bf16.msra.mxu3 %v1130_v50 }
 0x9c6   :  { %928 = vmatpush.bf16.msra.mxu3 %v1129_v52 }
 0xa1a   :  { %v795_v38 = vpop.xlane.xlu0 %794 }
 0xa1b   :  { %v799_v40 = vmul.f32 %v795_v38, %v1472_v15 }
 0xa1c   :  { %v804_v41 = vpop.xlane.xlu1 %803 }
 0xa1d   :  { %v810_v42 = vmul.f32 %v799_v40, %v799_v40  ;;  %v808_v43 = vmul.f32 %v804_v41, %v1472_v15  ;;  %v816_v3 = vsub.f32 %v1556_v29, %v799_v40 }
 0xa1f   :  { %v812_v45 = vsub.f32 %v808_v43, %v810_v42 }
 0xa21   :  { %v814_v46 = vmax.f32 %v812_v45, 0.0 }
 0xa23   :  { %v818_v48 = vadd.f32 1e-05, %v814_v46 }
 0xa24   :  { %v798_v49 = vpop.xlane.xlu1 %797 }
 0xa25   :  { %1197 = vrsqrt.f32 %v818_v48  ;;  %v800_v53 = vmul.f32 %v798_v49, %v1472_v15  ;;  %vm826_vm1 = vweird.f32 %v818_v48 }
 0xa27   :  { %v811_v58 = vmul.f32 %v800_v53, %v800_v53  ;;  %v817_v16 = vsub.f32 %v1562_v33, %v800_v53 }
 0xa2b   :  { %v1198_v55 = vpop.eup %1197 }
 0xa2c   :  { %v821_v54 = vmul.f32 %v1198_v55, %v818_v48  ;;  %v807_v8 = vpop.xlane.xlu1 %806  ;;  %vm827_vm0 = vweird.f32 %v1198_v55 }
 0xa2d   :  { %v809_v51 = vmul.f32 %v807_v8, %v1472_v15  ;;  %vm828_vm2 = vmor %vm826_vm1, %vm827_vm0  ;;  %v1165_v15 = vld [vmem:[%s1637_s16] ss:$0 sm:$0xff] }
 0xa2e   :  { %v822_v9 = vmul.f32 %v1198_v55, %v821_v54 }
 0xa2f   :  { %v813_v59 = vsub.f32 %v809_v51, %v811_v58 }
 0xa30   :  { %v823_v60 = vmul.f32 0.5, %v822_v9 }
 0xa31   :  { %v815_v61 = vmax.f32 %v813_v59, 0.0 }
 0xa32   :  { %v824_v62 = vsub.f32 1.5, %v823_v60 }
 0xa33   :  { %v819_v63 = vadd.f32 1e-05, %v815_v61 }
 0xa34   :  { %v825_v2 = vmul.f32 %v1198_v55, %v824_v62 }
 0xa35   :  { %1199 = vrsqrt.f32 %v819_v63  ;;  %vm836_vm4 = vweird.f32 %v819_v63 }
 0xa36   :  { %v829_v5 = vsel %vm828_vm2, %v1198_v55, %v825_v2 }
 0xa37   :  { %v840_v6 = vmul.f32 %v829_v5, %v816_v3 }
 0xa39   :  { %v845_v0 = vmul.f32 %v1164_v4, %v840_v6 }
 0xa3b   :  { %v1200_v7 = vpop.eup %1199  ;;  %v850_v1 = vadd.f32 %v1165_v15, %v845_v0 }
 0xa3c   :  { %v831_v10 = vmul.f32 %v1200_v7, %v819_v63  ;;  %vm837_vm3 = vweird.f32 %v1200_v7 }
 0xa3d   :  { %935 = vst [vmem:[%s1640_s20] sm:$0xff] %v850_v1  ;;  %vm838_vm5 = vmor %vm836_vm4, %vm837_vm3 }
 0xa3e   :  { %v832_v11 = vmul.f32 %v1200_v7, %v831_v10 }
 0xa40   :  { %v833_v12 = vmul.f32 0.5, %v832_v11 }
 0xa42   :  { %v834_v13 = vsub.f32 1.5, %v833_v12 }
 0xa44   :  { %v835_v14 = vmul.f32 %v1200_v7, %v834_v13 }
 0xa46   :  { %v839_v17 = vsel %vm838_vm5, %v1200_v7, %v835_v14 }
 0xa47   :  { %v841_v18 = vmul.f32 %v839_v17, %v817_v16 }
 0xa49   :  { %v846_v19 = vmul.f32 %v1164_v4, %v841_v18 }
 0xa4b   :  { %v851_v20 = vadd.f32 %v1165_v15, %v846_v19 }
 0xa4d   :  { %v852_v21 = vpack.c.bf16 %v851_v20, %v850_v1  ;;  %936 = vst [vmem:[%s1640_s20 + $0x8] sm:$0xf] %v851_v20 }
 0xa4f   :  { %929 = vmatmul.bf16.vlgmr.msra.gmra.mxu3 %v852_v21 }
 0xad2   :  { %v930_v23 = vpop.f32.mrf.mxu3 }
 0xad3   :  { %v931_v24 = vadd.f32 %v1166_v22, %v930_v23 }
 0xad5   :  { %937 = vst [vmem:[%s1641_s21] sm:$0xff] %v931_v24 }
 0xada   :  { %v932_v25 = vpop.f32.mrf.mxu3 }
 0xadb   :  { %v933_v26 = vadd.f32 %v1166_v22, %v932_v25 }
 0xadd   :  { %938 = vst [vmem:[%s1641_s21 + $0x8] sm:$0xf] %v933_v26 }

</bundles_post_ra>
